<compile_context>
chip_gen: v7x
topology: tpu7x:2x2x1
jax: 0.10.0
libtpu: 0.0.40
codegen_flags: <defaults>
</compile_context>

<pallas_src>
import functools

import jax
import jax.numpy as jnp
from jax.experimental import pallas as pl
from jax.experimental.pallas import tpu as pltpu


_LANE = 128                     # channel (lane) padding multiple


def _rup(x, mult):
    return ((x + mult - 1) // mult) * mult


def _vmem_budgets():
    """Generation-aware scoped-VMEM budget (v5e/v6e: 128 MiB, v7x: 64 MiB)."""
    cap = 64 * 1024 * 1024
    try:
        cap = int(pltpu.get_tpu_info().vmem_capacity_bytes)
    except Exception:
        pass
    limit = min((cap * 3) // 4, 100 * 1024 * 1024)
    return limit, limit // 3


def _num_tensorcores():
    try:
        if "v7" in jax.devices()[0].device_kind.lower():
            return 2
    except Exception:
        pass
    return 1


_VMEM_LIMIT, _TILE_BUDGET = _vmem_budgets()
_MIN_GRID_STEPS = 2 if _num_tensorcores() >= 2 else 1


def _pick_tm(m, row_bytes):
    """Largest power-of-two M tile dividing m that fits the double-buffered
    VMEM budget; >=2 grid steps is only enforced on 2-TensorCore chips."""
    fallback = None
    for t in (8192, 4096, 2048, 1024, 512, 256, 128, 64, 32, 16, 8):
        if t > m or m % t or 2 * t * row_bytes > _TILE_BUDGET:
            continue
        if m // t < _MIN_GRID_STEPS:
            if fallback is None:
                fallback = t
            continue
        return t
    if fallback is not None:
        return fallback
    # TODO(synk): indivisible M falls back to a single whole-M block.
    return m


# ----------------------------------------------------------------------------
# Kernel 1 (fallback, only used when num_blocks == 0):
#   1x1 conv (+ folded BN) + LeakyReLU
# ----------------------------------------------------------------------------

def _mm_bias_act_kernel(x_ref, w_ref, b_ref, o_ref, *, alpha):
    y = jnp.dot(x_ref[...], w_ref[...], preferred_element_type=jnp.float32)
    y = y + b_ref[...]
    y = jnp.where(y > 0, y, alpha * y)
    o_ref[...] = y.astype(o_ref.dtype)


def fused_conv1x1(x, w, shift, *, alpha):
    m, k = x.shape
    nout = w.shape[1]
    tm = _pick_tm(m, 2 * (k + nout))
    cost = pl.CostEstimate(flops=2 * m * k * nout, transcendentals=0,
                           bytes_accessed=2 * m * (k + nout) + 2 * k * nout)
    return pl.pallas_call(
        functools.partial(_mm_bias_act_kernel, alpha=alpha),
        out_shape=jax.ShapeDtypeStruct((m, nout), jnp.bfloat16),
        grid=(m // tm,),
        in_specs=[pl.BlockSpec((tm, k), lambda i: (i, 0)),
                  pl.BlockSpec((k, nout), lambda i: (0, 0)),
                  pl.BlockSpec((1, nout), lambda i: (0, 0))],
        out_specs=pl.BlockSpec((tm, nout), lambda i: (i, 0)),
        compiler_params=pltpu.CompilerParams(
            dimension_semantics=("parallel",),
            vmem_limit_bytes=_VMEM_LIMIT),
        cost_estimate=cost,
    )(x, w, shift)


# ----------------------------------------------------------------------------
# Kernel 2: fully fused ResidualBlock (optional fused conv1 + layer1 1x1 +
#           layer2 3x3 + BN + LeakyReLU + residual), one image per grid step.
# ----------------------------------------------------------------------------

def _resblock_kernel(*refs, h, w, wp, lpad, span, res_mult, fuse_pre):
    if fuse_pre:
        (x_ref, wpre_ref, bpre_ref, w1_ref, b1_ref, w2_ref, b2_ref,
         o_ref, tc_ref, hbuf_ref) = refs
    else:
        (x_ref, w1_ref, b1_ref, w2_ref, b2_ref,
         o_ref, tc_ref, hbuf_ref) = refs

    # --- optional fused conv1: 1x1 conv + folded BN + LeakyReLU(0.01) -------
    if fuse_pre:
        t = jnp.dot(x_ref[0], wpre_ref[...], preferred_element_type=jnp.float32)
        t = t + bpre_ref[...]
        t = jnp.where(t > 0, t, 0.01 * t)
        tc_ref[...] = t.astype(tc_ref.dtype)
    else:
        tc_ref[...] = x_ref[0]

    # --- layer1: 1x1 conv + folded BN + LeakyReLU(0.01) (compact layout) ----
    hc = jnp.dot(tc_ref[...], w1_ref[...], preferred_element_type=jnp.float32)
    hc = hc + b1_ref[...]
    hc = jnp.where(hc > 0, hc, 0.01 * hc)

    # --- zero-pad the layer1 output spatially, entirely inside VMEM ---------
    # (8-column left pad + wp % 8 == 0 -> every scatter store is aligned)
    hbuf_ref[...] = jnp.zeros_like(hbuf_ref)
    for y in range(h):
        dst = (y + 1) * wp + lpad
        hbuf_ref[dst:dst + w, :] = hc[y * w:(y + 1) * w, :]

    # --- layer2: 3x3 conv (pad=1) as ONE im2col matmul, K = 9*ch_pad --------
    taps = []
    for dy in range(3):
        for dx in range(3):
            s = dy * wp + lpad - 1 + dx
            taps.append(hbuf_ref[s:s + span, :])
    xcat = jnp.concatenate(taps, axis=-1).astype(jnp.bfloat16)   # (span, 9*ch)
    yv = jnp.dot(xcat, w2_ref[...], preferred_element_type=jnp.float32)
    yv = yv + b2_ref[...]
    yv = jnp.where(yv > 0, yv, 0.01 * yv)

    # --- residual add (added twice when shortcut) + dense single store ------
    rows = []
    for y in range(h):
        r = yv[y * wp:y * wp + w, :]
        r = r + res_mult * tc_ref[y * w:(y + 1) * w, :].astype(jnp.float32)
        rows.append(r)
    o_ref[0] = jnp.concatenate(rows, axis=0).astype(o_ref.dtype)


def residual_block(x, blk, n, h, w, *, res_mult, pre=None):
    """x: (n, h*w, cin_pad) bf16 -> (n, h*w, c_pad) bf16."""
    hw = h * w
    cin_pad = x.shape[2]
    c_pad = blk["l2_b"].shape[1]
    ch_pad = blk["l1_b"].shape[1]
    lpad = 8                                    # left zero-pad (sublane aligned)
    wp = _rup(w + lpad + 1, 8)                  # padded row stride
    p_full = (h + 2) * wp
    span = (h - 1) * wp + w
    fuse_pre = pre is not None

    kern = functools.partial(_resblock_kernel, h=h, w=w, wp=wp, lpad=lpad,
                             span=span, res_mult=res_mult, fuse_pre=fuse_pre)

    def const_spec(arr):
        nd = arr.ndim
        return pl.BlockSpec(arr.shape, lambda i, _nd=nd: (0,) * _nd)

    in_specs = [pl.BlockSpec((1, hw, cin_pad), lambda i: (i, 0, 0))]
    args = [x]
    if fuse_pre:
        wpre, bpre = pre
        in_specs += [const_spec(wpre), const_spec(bpre)]
        args += [wpre, bpre]
    in_specs += [const_spec(blk["l1_w"]), const_spec(blk["l1_b"]),
                 const_spec(blk["l2_w"]), const_spec(blk["l2_b"])]
    args += [blk["l1_w"], blk["l1_b"], blk["l2_w"], blk["l2_b"]]

    flops = 2 * n * hw * c_pad * ch_pad + 2 * n * span * 9 * ch_pad * c_pad
    if fuse_pre:
        flops += 2 * n * hw * cin_pad * c_pad
    w_bytes = 2 * (c_pad * ch_pad + 9 * ch_pad * c_pad
                   + (cin_pad * c_pad if fuse_pre else 0))
    cost = pl.CostEstimate(flops=flops, transcendentals=0,
                           bytes_accessed=2 * n * hw * (cin_pad + c_pad) + w_bytes)

    return pl.pallas_call(
        kern,
        out_shape=jax.ShapeDtypeStruct((n, hw, c_pad), jnp.bfloat16),
        grid=(n,),
        in_specs=in_specs,
        out_specs=pl.BlockSpec((1, hw, c_pad), lambda i: (i, 0, 0)),
        scratch_shapes=[pltpu.VMEM((hw, c_pad), jnp.bfloat16),     # t (compact)
                        pltpu.VMEM((p_full, ch_pad), jnp.float32)],  # padded h
        compiler_params=pltpu.CompilerParams(
            dimension_semantics=("parallel",),
            vmem_limit_bytes=_VMEM_LIMIT),
        cost_estimate=cost,
    )(*args)


# ----------------------------------------------------------------------------
# Kernel 3: fused tail  y1=conv3(t), y2=conv2(x), BN+LeakyReLU(0.1), conv4
# ----------------------------------------------------------------------------

def _tail_kernel(t_ref, x_ref, w3_ref, b3_ref, w2_ref, b2_ref,
                 w4a_ref, w4b_ref, b4_ref, o_ref):
    # CSP-level BN(2c_) scale is folded into w3/w2; shift is b3/b2.
    z1 = jnp.dot(t_ref[...], w3_ref[...],
                 preferred_element_type=jnp.float32) + b3_ref[...]
    z1 = jnp.where(z1 > 0, z1, 0.1 * z1)
    z2 = jnp.dot(x_ref[...], w2_ref[...],
                 preferred_element_type=jnp.float32) + b2_ref[...]
    z2 = jnp.where(z2 > 0, z2, 0.1 * z2)
    # conv4 on the (virtual) concat [z1 | z2]: split weight, sum partials.
    y = (jnp.dot(z1.astype(jnp.bfloat16), w4a_ref[...],
                 preferred_element_type=jnp.float32)
         + jnp.dot(z2.astype(jnp.bfloat16), w4b_ref[...],
                   preferred_element_type=jnp.float32)
         + b4_ref[...])
    y = jnp.where(y > 0, y, 0.01 * y)
    o_ref[...] = y.astype(o_ref.dtype)


def csp_tail(t, xf, p):
    m, c_pad = t.shape
    c1_pad = xf.shape[1]
    c2_pad = p["w4a"].shape[1]
    tm = _pick_tm(m, 2 * (c_pad + c1_pad) + 4 * c2_pad)

    def const_spec(arr):
        nd = arr.ndim
        return pl.BlockSpec(arr.shape, lambda i, _nd=nd: (0,) * _nd)

    cost = pl.CostEstimate(
        flops=2 * m * (c_pad * c_pad + c1_pad * c_pad + 2 * c_pad * c2_pad),
        transcendentals=0,
        bytes_accessed=2 * m * (c_pad + c1_pad) + 4 * m * c2_pad)

    return pl.pallas_call(
        _tail_kernel,
        out_shape=jax.ShapeDtypeStruct((m, c2_pad), jnp.float32),
        grid=(m // tm,),
        in_specs=[pl.BlockSpec((tm, c_pad), lambda i: (i, 0)),
                  pl.BlockSpec((tm, c1_pad), lambda i: (i, 0)),
                  const_spec(p["w3"]), const_spec(p["b3"]),
                  const_spec(p["w2"]), const_spec(p["b2"]),
                  const_spec(p["w4a"]), const_spec(p["w4b"]),
                  const_spec(p["b4"])],
        out_specs=pl.BlockSpec((tm, c2_pad), lambda i: (i, 0)),
        compiler_params=pltpu.CompilerParams(
            dimension_semantics=("parallel",),
            vmem_limit_bytes=_VMEM_LIMIT),
        cost_estimate=cost,
    )(t, xf, p["w3"], p["b3"], p["w2"], p["b2"],
      p["w4a"], p["w4b"], p["b4"])


# ----------------------------------------------------------------------------
# Parameters (mirror the PyTorch __init__ shapes; BN running stats folded,
# channels zero-padded to 128-lane multiples, matmul weights bf16).
# ----------------------------------------------------------------------------

_BN_EPS = 1e-5


def _bn_fold(key, c):
    k1, k2, k3, k4 = jax.random.split(key, 4)
    gamma = 1.0 + 0.1 * jax.random.normal(k1, (c,), jnp.float32)
    beta = 0.1 * jax.random.normal(k2, (c,), jnp.float32)
    mean = 0.1 * jax.random.normal(k3, (c,), jnp.float32)
    var = 1.0 + 0.1 * jax.random.uniform(k4, (c,), jnp.float32)
    scale = gamma / jnp.sqrt(var + _BN_EPS)
    shift = beta - mean * scale
    return scale, shift


def _weight(key, shape):
    return 0.1 * jax.random.normal(key, shape, jnp.float32)


def init_csp_params(key, c1, c2, num_blocks=1, e=0.5):
    c_ = int(c2 * e)
    ch = c_ // 2
    c1p, cp, chp, c2p = _rup(c1, _LANE), _rup(c_, _LANE), _rup(ch, _LANE), _rup(c2, _LANE)
    keys = jax.random.split(key, 8 + num_blocks)
    p = {}

    def padw(wm, r, c):           # zero-pad 2-D weight to (r, c), cast bf16
        return jnp.pad(wm, ((0, r - wm.shape[0]), (0, c - wm.shape[1]))
                       ).astype(jnp.bfloat16)

    def padb(bv, c):              # zero-pad shift to (1, c), keep f32
        return jnp.pad(bv, (0, c - bv.shape[0])).reshape(1, c)

    # conv1 = Conv(c1, c_, 1, 1): conv1x1 (no bias) + BN(c_) + LeakyReLU(0.01)
    w1 = _weight(keys[0], (c1, c_))
    s1, b1 = _bn_fold(keys[1], c_)
    p["w1"] = padw(w1 * s1[None, :], c1p, cp)
    p["b1"] = padb(b1, cp)
    # conv2 / conv3 (plain 1x1) + CSP-level bn(2c_) -> scale folded into w2/w3
    w2 = _weight(keys[2], (c1, c_))
    w3 = _weight(keys[3], (c_, c_))
    w4 = _weight(keys[4], (2 * c_, c2))
    s4, b4 = _bn_fold(keys[5], c2)
    sbn, bbn = _bn_fold(keys[6], 2 * c_)
    p["w3"] = padw(w3 * sbn[None, :c_], cp, cp)
    p["b3"] = padb(bbn[:c_], cp)
    p["w2"] = padw(w2 * sbn[None, c_:], c1p, cp)
    p["b2"] = padb(bbn[c_:], cp)
    # conv4 = Conv(2c_, c2): BN(c2) scale folded into the split weight halves
    w4f = w4 * s4[None, :]
    p["w4a"] = padw(w4f[:c_], cp, c2p)
    p["w4b"] = padw(w4f[c_:], cp, c2p)
    p["b4"] = padb(b4, c2p)
    # m = Sequential of ResidualBlock(c_)
    blocks = []
    for b in range(num_blocks):
        kb = jax.random.split(keys[7 + b], 4)
        l1_w = _weight(kb[0], (c_, ch))
        l1_s, l1_b = _bn_fold(kb[1], ch)
        l2_w = _weight(kb[2], (3, 3, ch, c_))          # (kh, kw, cin, cout)
        l2_s, l2_b = _bn_fold(kb[3], c_)
        w2f = l2_w * l2_s[None, None, None, :]
        w2f = jnp.pad(w2f, ((0, 0), (0, 0), (0, chp - ch), (0, cp - c_)))
        blocks.append({
            "l1_w": padw(l1_w * l1_s[None, :], cp, chp),
            "l1_b": padb(l1_b, chp),
            "l2_w": w2f.reshape(9 * chp, cp).astype(jnp.bfloat16),
            "l2_b": padb(l2_b, cp),
        })
    p["blocks"] = blocks
    return p


# ----------------------------------------------------------------------------
# CSP forward pass
# ----------------------------------------------------------------------------

def _csp_forward(x_nchw, p, c2, shortcut=True):
    n, c1, h, w = x_nchw.shape
    m = n * h * w
    c1_pad = p["w2"].shape[0]
    c_pad = p["w3"].shape[0]

    # NCHW -> channels-last, zero-padded to the lane multiple, bf16 in HBM.
    xf = jnp.transpose(x_nchw, (0, 2, 3, 1))
    xf = jnp.pad(xf, ((0, 0), (0, 0), (0, 0), (0, c1_pad - c1)))
    xf = xf.astype(jnp.bfloat16).reshape(n, h * w, c1_pad)

    res_mult = 2.0 if shortcut else 1.0
    blocks = p["blocks"]
    if blocks:
        # conv1 fused into the first residual-block kernel.
        t = residual_block(xf, blocks[0], n, h, w, res_mult=res_mult,
                           pre=(p["w1"], p["b1"]))
        for blk in blocks[1:]:
            t = residual_block(t, blk, n, h, w, res_mult=res_mult)
        t = t.reshape(m, c_pad)
    else:
        t = fused_conv1x1(xf.reshape(m, c1_pad), p["w1"], p["b1"], alpha=0.01)

    # conv3 / conv2 / concat / bn / LeakyReLU(0.1) / conv4, all fused.
    out = csp_tail(t, xf.reshape(m, c1_pad), p)          # (m, c2_pad) f32
    out = out[:, :c2].reshape(n, h, w, c2)
    return jnp.transpose(out, (0, 3, 1, 2))              # NCHW


csp_forward = jax.jit(_csp_forward, static_argnames=("c2", "shortcut"))


# ----------------------------------------------------------------------------
# Main
# ----------------------------------------------------------------------------

if __name__ == "__main__":
    N, C1, H, W = 2, 4, 16, 16
    C2 = 4                                  # c_ = 2, ch = 1 (padded to 128 lanes)
    x = jax.random.normal(jax.random.PRNGKey(0), (N, C1, H, W), jnp.float32)
    params = init_csp_params(jax.random.PRNGKey(1), c1=C1, c2=C2,
                             num_blocks=1, e=0.5)

    out = csp_forward(x, params, c2=C2, shortcut=True)
    out = jax.block_until_ready(out)

    assert out.shape == (N, C2, H, W), out.shape
    assert bool(jnp.all(jnp.isfinite(out)))
    print("KERNEL_OK")
</pallas_src>

<mosaic_0001>
module attributes {stable_mosaic.version = 11 : i64} {
  func.func @_resblock_kernel(%arg0: i32, %arg1: memref<1x256x128xbf16, #tpu.memory_space<vmem>>, %arg2: memref<128x128xbf16, #tpu.memory_space<vmem>>, %arg3: memref<1x128xf32, #tpu.memory_space<vmem>>, %arg4: memref<128x128xbf16, #tpu.memory_space<vmem>>, %arg5: memref<1x128xf32, #tpu.memory_space<vmem>>, %arg6: memref<1152x128xbf16, #tpu.memory_space<vmem>>, %arg7: memref<1x128xf32, #tpu.memory_space<vmem>>, %arg8: memref<1x256x128xbf16, #tpu.memory_space<vmem>>, %arg9: memref<256x128xbf16, #tpu.memory_space<vmem>>, %arg10: memref<576x128xf32, #tpu.memory_space<vmem>>) attributes {dimension_semantics = [#tpu.dimension_semantics<parallel>], iteration_bounds = array<i64: 2>, scalar_prefetch = 0 : i64, scratch_operands = 2 : i64, tpu.core_type = #tpu.core_type<tc>, window_params = [{transform_indices = @transform_0, window_bounds = array<i64: 1, 256, 128>}, {pipeline_mode = #tpu.pipeline_mode<synchronous>, transform_indices = @transform_1, window_bounds = array<i64: 128, 128>}, {pipeline_mode = #tpu.pipeline_mode<synchronous>, transform_indices = @transform_2, window_bounds = array<i64: 1, 128>}, {pipeline_mode = #tpu.pipeline_mode<synchronous>, transform_indices = @transform_3, window_bounds = array<i64: 128, 128>}, {pipeline_mode = #tpu.pipeline_mode<synchronous>, transform_indices = @transform_4, window_bounds = array<i64: 1, 128>}, {pipeline_mode = #tpu.pipeline_mode<synchronous>, transform_indices = @transform_5, window_bounds = array<i64: 1152, 128>}, {pipeline_mode = #tpu.pipeline_mode<synchronous>, transform_indices = @transform_6, window_bounds = array<i64: 1, 128>}, {transform_indices = @transform_7, window_bounds = array<i64: 1, 256, 128>}]} {
    %c0 = arith.constant 0 : index
    %c0_0 = arith.constant 0 : index
    %c0_1 = arith.constant 0 : index
    %0 = vector.load %arg1[%c0, %c0_0, %c0_1] : memref<1x256x128xbf16, #tpu.memory_space<vmem>>, vector<1x256x128xbf16>
    %1 = vector.shape_cast %0 : vector<1x256x128xbf16> to vector<256x128xbf16>
    %c0_2 = arith.constant 0 : index
    %c0_3 = arith.constant 0 : index
    %2 = vector.load %arg2[%c0_2, %c0_3] : memref<128x128xbf16, #tpu.memory_space<vmem>>, vector<128x128xbf16>
    %cst = arith.constant dense<0.000000e+00> : vector<256x128xf32>
    %3 = tpu.matmul %1, %2, %cst {dimension_numbers = #tpu.dot_dimension_numbers<[1], [0], [0], [1], [0, 0, 1, 1], [], []>} : vector<256x128xbf16>, vector<128x128xbf16>, vector<256x128xf32> -> vector<256x128xf32>
    %c0_4 = arith.constant 0 : index
    %c0_5 = arith.constant 0 : index
    %4 = vector.load %arg3[%c0_4, %c0_5] : memref<1x128xf32, #tpu.memory_space<vmem>>, vector<1x128xf32>
    %5 = vector.broadcast %4 : vector<1x128xf32> to vector<256x128xf32>
    %6 = arith.addf %3, %5 : vector<256x128xf32>
    %cst_6 = arith.constant 0.000000e+00 : f32
    %7 = vector.broadcast %cst_6 : f32 to vector<256x128xf32>
    %8 = arith.cmpf ogt, %6, %7 : vector<256x128xf32>
    %cst_7 = arith.constant 0.00999999977 : f32
    %9 = vector.broadcast %cst_7 : f32 to vector<256x128xf32>
    %10 = arith.mulf %9, %6 : vector<256x128xf32>
    %11 = arith.select %8, %6, %10 : vector<256x128xi1>, vector<256x128xf32>
    %12 = arith.truncf %11 : vector<256x128xf32> to vector<256x128xbf16>
    %c0_8 = arith.constant 0 : index
    %c0_9 = arith.constant 0 : index
    %13 = vector.load %arg9[%c0_8, %c0_9] : memref<256x128xbf16, #tpu.memory_space<vmem>>, vector<256x128xbf16>
    tpu.vector_store %arg9[%c0_8, %c0_9], %12 {strides = array<i32>} : memref<256x128xbf16, #tpu.memory_space<vmem>>, vector<256x128xbf16>,
    %c0_10 = arith.constant 0 : index
    %c0_11 = arith.constant 0 : index
    %14 = vector.load %arg9[%c0_10, %c0_11] : memref<256x128xbf16, #tpu.memory_space<vmem>>, vector<256x128xbf16>
    %c0_12 = arith.constant 0 : index
    %c0_13 = arith.constant 0 : index
    %15 = vector.load %arg4[%c0_12, %c0_13] : memref<128x128xbf16, #tpu.memory_space<vmem>>, vector<128x128xbf16>
    %cst_14 = arith.constant dense<0.000000e+00> : vector<256x128xf32>
    %16 = tpu.matmul %14, %15, %cst_14 {dimension_numbers = #tpu.dot_dimension_numbers<[1], [0], [0], [1], [0, 0, 1, 1], [], []>} : vector<256x128xbf16>, vector<128x128xbf16>, vector<256x128xf32> -> vector<256x128xf32>
    %c0_15 = arith.constant 0 : index
    %c0_16 = arith.constant 0 : index
    %17 = vector.load %arg5[%c0_15, %c0_16] : memref<1x128xf32, #tpu.memory_space<vmem>>, vector<1x128xf32>
    %18 = vector.broadcast %17 : vector<1x128xf32> to vector<256x128xf32>
    %19 = arith.addf %16, %18 : vector<256x128xf32>
    %cst_17 = arith.constant 0.000000e+00 : f32
    %20 = vector.broadcast %cst_17 : f32 to vector<256x128xf32>
    %21 = arith.cmpf ogt, %19, %20 : vector<256x128xf32>
    %cst_18 = arith.constant 0.00999999977 : f32
    %22 = vector.broadcast %cst_18 : f32 to vector<256x128xf32>
    %23 = arith.mulf %22, %19 : vector<256x128xf32>
    %24 = arith.select %21, %19, %23 : vector<256x128xi1>, vector<256x128xf32>
    %cst_19 = arith.constant 0.000000e+00 : f32
    %25 = vector.broadcast %cst_19 : f32 to vector<576x128xf32>
    %c0_20 = arith.constant 0 : index
    %c0_21 = arith.constant 0 : index
    %26 = vector.load %arg10[%c0_20, %c0_21] : memref<576x128xf32, #tpu.memory_space<vmem>>, vector<576x128xf32>
    tpu.vector_store %arg10[%c0_20, %c0_21], %25 {strides = array<i32>} : memref<576x128xf32, #tpu.memory_space<vmem>>, vector<576x128xf32>,
    %27 = vector.extract_strided_slice %24 {offsets = [0, 0], sizes = [16, 128], strides = [1, 1]} : vector<256x128xf32> to vector<16x128xf32>
    %c40 = arith.constant 40 : index
    %c0_22 = arith.constant 0 : index
    %28 = vector.load %arg10[%c40, %c0_22] : memref<576x128xf32, #tpu.memory_space<vmem>>, vector<16x128xf32>
    tpu.vector_store %arg10[%c40, %c0_22], %27 {strides = array<i32>} : memref<576x128xf32, #tpu.memory_space<vmem>>, vector<16x128xf32>,
    %29 = vector.extract_strided_slice %24 {offsets = [16, 0], sizes = [16, 128], strides = [1, 1]} : vector<256x128xf32> to vector<16x128xf32>
    %c72 = arith.constant 72 : index
    %c0_23 = arith.constant 0 : index
    %30 = vector.load %arg10[%c72, %c0_23] : memref<576x128xf32, #tpu.memory_space<vmem>>, vector<16x128xf32>
    tpu.vector_store %arg10[%c72, %c0_23], %29 {strides = array<i32>} : memref<576x128xf32, #tpu.memory_space<vmem>>, vector<16x128xf32>,
    %31 = vector.extract_strided_slice %24 {offsets = [32, 0], sizes = [16, 128], strides = [1, 1]} : vector<256x128xf32> to vector<16x128xf32>
    %c104 = arith.constant 104 : index
    %c0_24 = arith.constant 0 : index
    %32 = vector.load %arg10[%c104, %c0_24] : memref<576x128xf32, #tpu.memory_space<vmem>>, vector<16x128xf32>
    tpu.vector_store %arg10[%c104, %c0_24], %31 {strides = array<i32>} : memref<576x128xf32, #tpu.memory_space<vmem>>, vector<16x128xf32>,
    %33 = vector.extract_strided_slice %24 {offsets = [48, 0], sizes = [16, 128], strides = [1, 1]} : vector<256x128xf32> to vector<16x128xf32>
    %c136 = arith.constant 136 : index
    %c0_25 = arith.constant 0 : index
    %34 = vector.load %arg10[%c136, %c0_25] : memref<576x128xf32, #tpu.memory_space<vmem>>, vector<16x128xf32>
    tpu.vector_store %arg10[%c136, %c0_25], %33 {strides = array<i32>} : memref<576x128xf32, #tpu.memory_space<vmem>>, vector<16x128xf32>,
    %35 = vector.extract_strided_slice %24 {offsets = [64, 0], sizes = [16, 128], strides = [1, 1]} : vector<256x128xf32> to vector<16x128xf32>
    %c168 = arith.constant 168 : index
    %c0_26 = arith.constant 0 : index
    %36 = vector.load %arg10[%c168, %c0_26] : memref<576x128xf32, #tpu.memory_space<vmem>>, vector<16x128xf32>
    tpu.vector_store %arg10[%c168, %c0_26], %35 {strides = array<i32>} : memref<576x128xf32, #tpu.memory_space<vmem>>, vector<16x128xf32>,
    %37 = vector.extract_strided_slice %24 {offsets = [80, 0], sizes = [16, 128], strides = [1, 1]} : vector<256x128xf32> to vector<16x128xf32>
    %c200 = arith.constant 200 : index
    %c0_27 = arith.constant 0 : index
    %38 = vector.load %arg10[%c200, %c0_27] : memref<576x128xf32, #tpu.memory_space<vmem>>, vector<16x128xf32>
    tpu.vector_store %arg10[%c200, %c0_27], %37 {strides = array<i32>} : memref<576x128xf32, #tpu.memory_space<vmem>>, vector<16x128xf32>,
    %39 = vector.extract_strided_slice %24 {offsets = [96, 0], sizes = [16, 128], strides = [1, 1]} : vector<256x128xf32> to vector<16x128xf32>
    %c232 = arith.constant 232 : index
    %c0_28 = arith.constant 0 : index
    %40 = vector.load %arg10[%c232, %c0_28] : memref<576x128xf32, #tpu.memory_space<vmem>>, vector<16x128xf32>
    tpu.vector_store %arg10[%c232, %c0_28], %39 {strides = array<i32>} : memref<576x128xf32, #tpu.memory_space<vmem>>, vector<16x128xf32>,
    %41 = vector.extract_strided_slice %24 {offsets = [112, 0], sizes = [16, 128], strides = [1, 1]} : vector<256x128xf32> to vector<16x128xf32>
    %c264 = arith.constant 264 : index
    %c0_29 = arith.constant 0 : index
    %42 = vector.load %arg10[%c264, %c0_29] : memref<576x128xf32, #tpu.memory_space<vmem>>, vector<16x128xf32>
    tpu.vector_store %arg10[%c264, %c0_29], %41 {strides = array<i32>} : memref<576x128xf32, #tpu.memory_space<vmem>>, vector<16x128xf32>,
    %43 = vector.extract_strided_slice %24 {offsets = [128, 0], sizes = [16, 128], strides = [1, 1]} : vector<256x128xf32> to vector<16x128xf32>
    %c296 = arith.constant 296 : index
    %c0_30 = arith.constant 0 : index
    %44 = vector.load %arg10[%c296, %c0_30] : memref<576x128xf32, #tpu.memory_space<vmem>>, vector<16x128xf32>
    tpu.vector_store %arg10[%c296, %c0_30], %43 {strides = array<i32>} : memref<576x128xf32, #tpu.memory_space<vmem>>, vector<16x128xf32>,
    %45 = vector.extract_strided_slice %24 {offsets = [144, 0], sizes = [16, 128], strides = [1, 1]} : vector<256x128xf32> to vector<16x128xf32>
    %c328 = arith.constant 328 : index
    %c0_31 = arith.constant 0 : index
    %46 = vector.load %arg10[%c328, %c0_31] : memref<576x128xf32, #tpu.memory_space<vmem>>, vector<16x128xf32>
    tpu.vector_store %arg10[%c328, %c0_31], %45 {strides = array<i32>} : memref<576x128xf32, #tpu.memory_space<vmem>>, vector<16x128xf32>,
    %47 = vector.extract_strided_slice %24 {offsets = [160, 0], sizes = [16, 128], strides = [1, 1]} : vector<256x128xf32> to vector<16x128xf32>
    %c360 = arith.constant 360 : index
    %c0_32 = arith.constant 0 : index
    %48 = vector.load %arg10[%c360, %c0_32] : memref<576x128xf32, #tpu.memory_space<vmem>>, vector<16x128xf32>
    tpu.vector_store %arg10[%c360, %c0_32], %47 {strides = array<i32>} : memref<576x128xf32, #tpu.memory_space<vmem>>, vector<16x128xf32>,
    %49 = vector.extract_strided_slice %24 {offsets = [176, 0], sizes = [16, 128], strides = [1, 1]} : vector<256x128xf32> to vector<16x128xf32>
    %c392 = arith.constant 392 : index
    %c0_33 = arith.constant 0 : index
    %50 = vector.load %arg10[%c392, %c0_33] : memref<576x128xf32, #tpu.memory_space<vmem>>, vector<16x128xf32>
    tpu.vector_store %arg10[%c392, %c0_33], %49 {strides = array<i32>} : memref<576x128xf32, #tpu.memory_space<vmem>>, vector<16x128xf32>,
    %51 = vector.extract_strided_slice %24 {offsets = [192, 0], sizes = [16, 128], strides = [1, 1]} : vector<256x128xf32> to vector<16x128xf32>
    %c424 = arith.constant 424 : index
    %c0_34 = arith.constant 0 : index
    %52 = vector.load %arg10[%c424, %c0_34] : memref<576x128xf32, #tpu.memory_space<vmem>>, vector<16x128xf32>
    tpu.vector_store %arg10[%c424, %c0_34], %51 {strides = array<i32>} : memref<576x128xf32, #tpu.memory_space<vmem>>, vector<16x128xf32>,
    %53 = vector.extract_strided_slice %24 {offsets = [208, 0], sizes = [16, 128], strides = [1, 1]} : vector<256x128xf32> to vector<16x128xf32>
    %c456 = arith.constant 456 : index
    %c0_35 = arith.constant 0 : index
    %54 = vector.load %arg10[%c456, %c0_35] : memref<576x128xf32, #tpu.memory_space<vmem>>, vector<16x128xf32>
    tpu.vector_store %arg10[%c456, %c0_35], %53 {strides = array<i32>} : memref<576x128xf32, #tpu.memory_space<vmem>>, vector<16x128xf32>,
    %55 = vector.extract_strided_slice %24 {offsets = [224, 0], sizes = [16, 128], strides = [1, 1]} : vector<256x128xf32> to vector<16x128xf32>
    %c488 = arith.constant 488 : index
    %c0_36 = arith.constant 0 : index
    %56 = vector.load %arg10[%c488, %c0_36] : memref<576x128xf32, #tpu.memory_space<vmem>>, vector<16x128xf32>
    tpu.vector_store %arg10[%c488, %c0_36], %55 {strides = array<i32>} : memref<576x128xf32, #tpu.memory_space<vmem>>, vector<16x128xf32>,
    %57 = vector.extract_strided_slice %24 {offsets = [240, 0], sizes = [16, 128], strides = [1, 1]} : vector<256x128xf32> to vector<16x128xf32>
    %c520 = arith.constant 520 : index
    %c0_37 = arith.constant 0 : index
    %58 = vector.load %arg10[%c520, %c0_37] : memref<576x128xf32, #tpu.memory_space<vmem>>, vector<16x128xf32>
    tpu.vector_store %arg10[%c520, %c0_37], %57 {strides = array<i32>} : memref<576x128xf32, #tpu.memory_space<vmem>>, vector<16x128xf32>,
    %c7 = arith.constant 7 : index
    %c0_38 = arith.constant 0 : index
    %59 = vector.load %arg10[%c7, %c0_38] : memref<576x128xf32, #tpu.memory_space<vmem>>, vector<496x128xf32>
    %c8 = arith.constant 8 : index
    %c0_39 = arith.constant 0 : index
    %60 = vector.load %arg10[%c8, %c0_39] : memref<576x128xf32, #tpu.memory_space<vmem>>, vector<496x128xf32>
    %c9 = arith.constant 9 : index
    %c0_40 = arith.constant 0 : index
    %61 = vector.load %arg10[%c9, %c0_40] : memref<576x128xf32, #tpu.memory_space<vmem>>, vector<496x128xf32>
    %c39 = arith.constant 39 : index
    %c0_41 = arith.constant 0 : index
    %62 = vector.load %arg10[%c39, %c0_41] : memref<576x128xf32, #tpu.memory_space<vmem>>, vector<496x128xf32>
    %c40_42 = arith.constant 40 : index
    %c0_43 = arith.constant 0 : index
    %63 = vector.load %arg10[%c40_42, %c0_43] : memref<576x128xf32, #tpu.memory_space<vmem>>, vector<496x128xf32>
    %c41 = arith.constant 41 : index
    %c0_44 = arith.constant 0 : index
    %64 = vector.load %arg10[%c41, %c0_44] : memref<576x128xf32, #tpu.memory_space<vmem>>, vector<496x128xf32>
    %c71 = arith.constant 71 : index
    %c0_45 = arith.constant 0 : index
    %65 = vector.load %arg10[%c71, %c0_45] : memref<576x128xf32, #tpu.memory_space<vmem>>, vector<496x128xf32>
    %c72_46 = arith.constant 72 : index
    %c0_47 = arith.constant 0 : index
    %66 = vector.load %arg10[%c72_46, %c0_47] : memref<576x128xf32, #tpu.memory_space<vmem>>, vector<496x128xf32>
    %c73 = arith.constant 73 : index
    %c0_48 = arith.constant 0 : index
    %67 = vector.load %arg10[%c73, %c0_48] : memref<576x128xf32, #tpu.memory_space<vmem>>, vector<496x128xf32>
    %68 = tpu.concatenate %59, %60, %61, %62, %63, %64, %65, %66, %67 in 1 : vector<496x128xf32>, vector<496x128xf32>, vector<496x128xf32>, vector<496x128xf32>, vector<496x128xf32>, vector<496x128xf32>, vector<496x128xf32>, vector<496x128xf32>, vector<496x128xf32> -> vector<496x1152xf32>
    %69 = arith.truncf %68 : vector<496x1152xf32> to vector<496x1152xbf16>
    %c0_49 = arith.constant 0 : index
    %c0_50 = arith.constant 0 : index
    %70 = vector.load %arg6[%c0_49, %c0_50] : memref<1152x128xbf16, #tpu.memory_space<vmem>>, vector<1152x128xbf16>
    %cst_51 = arith.constant dense<0.000000e+00> : vector<496x128xf32>
    %71 = tpu.matmul %69, %70, %cst_51 {dimension_numbers = #tpu.dot_dimension_numbers<[1], [0], [0], [1], [0, 0, 1, 1], [], []>} : vector<496x1152xbf16>, vector<1152x128xbf16>, vector<496x128xf32> -> vector<496x128xf32>
    %c0_52 = arith.constant 0 : index
    %c0_53 = arith.constant 0 : index
    %72 = vector.load %arg7[%c0_52, %c0_53] : memref<1x128xf32, #tpu.memory_space<vmem>>, vector<1x128xf32>
    %73 = vector.broadcast %72 : vector<1x128xf32> to vector<496x128xf32>
    %74 = arith.addf %71, %73 : vector<496x128xf32>
    %cst_54 = arith.constant 0.000000e+00 : f32
    %75 = vector.broadcast %cst_54 : f32 to vector<496x128xf32>
    %76 = arith.cmpf ogt, %74, %75 : vector<496x128xf32>
    %cst_55 = arith.constant 0.00999999977 : f32
    %77 = vector.broadcast %cst_55 : f32 to vector<496x128xf32>
    %78 = arith.mulf %77, %74 : vector<496x128xf32>
    %79 = arith.select %76, %74, %78 : vector<496x128xi1>, vector<496x128xf32>
    %80 = vector.extract_strided_slice %79 {offsets = [0, 0], sizes = [16, 128], strides = [1, 1]} : vector<496x128xf32> to vector<16x128xf32>
    %c0_56 = arith.constant 0 : index
    %c0_57 = arith.constant 0 : index
    %81 = vector.load %arg9[%c0_56, %c0_57] : memref<256x128xbf16, #tpu.memory_space<vmem>>, vector<16x128xbf16>
    %82 = arith.extf %81 : vector<16x128xbf16> to vector<16x128xf32>
    %cst_58 = arith.constant 2.000000e+00 : f32
    %83 = vector.broadcast %cst_58 : f32 to vector<16x128xf32>
    %84 = arith.mulf %83, %82 : vector<16x128xf32>
    %85 = arith.addf %80, %84 : vector<16x128xf32>
    %86 = vector.extract_strided_slice %79 {offsets = [32, 0], sizes = [16, 128], strides = [1, 1]} : vector<496x128xf32> to vector<16x128xf32>
    %c16 = arith.constant 16 : index
    %c0_59 = arith.constant 0 : index
    %87 = vector.load %arg9[%c16, %c0_59] : memref<256x128xbf16, #tpu.memory_space<vmem>>, vector<16x128xbf16>
    %88 = arith.extf %87 : vector<16x128xbf16> to vector<16x128xf32>
    %cst_60 = arith.constant 2.000000e+00 : f32
    %89 = vector.broadcast %cst_60 : f32 to vector<16x128xf32>
    %90 = arith.mulf %89, %88 : vector<16x128xf32>
    %91 = arith.addf %86, %90 : vector<16x128xf32>
    %92 = vector.extract_strided_slice %79 {offsets = [64, 0], sizes = [16, 128], strides = [1, 1]} : vector<496x128xf32> to vector<16x128xf32>
    %c32 = arith.constant 32 : index
    %c0_61 = arith.constant 0 : index
    %93 = vector.load %arg9[%c32, %c0_61] : memref<256x128xbf16, #tpu.memory_space<vmem>>, vector<16x128xbf16>
    %94 = arith.extf %93 : vector<16x128xbf16> to vector<16x128xf32>
    %cst_62 = arith.constant 2.000000e+00 : f32
    %95 = vector.broadcast %cst_62 : f32 to vector<16x128xf32>
    %96 = arith.mulf %95, %94 : vector<16x128xf32>
    %97 = arith.addf %92, %96 : vector<16x128xf32>
    %98 = vector.extract_strided_slice %79 {offsets = [96, 0], sizes = [16, 128], strides = [1, 1]} : vector<496x128xf32> to vector<16x128xf32>
    %c48 = arith.constant 48 : index
    %c0_63 = arith.constant 0 : index
    %99 = vector.load %arg9[%c48, %c0_63] : memref<256x128xbf16, #tpu.memory_space<vmem>>, vector<16x128xbf16>
    %100 = arith.extf %99 : vector<16x128xbf16> to vector<16x128xf32>
    %cst_64 = arith.constant 2.000000e+00 : f32
    %101 = vector.broadcast %cst_64 : f32 to vector<16x128xf32>
    %102 = arith.mulf %101, %100 : vector<16x128xf32>
    %103 = arith.addf %98, %102 : vector<16x128xf32>
    %104 = vector.extract_strided_slice %79 {offsets = [128, 0], sizes = [16, 128], strides = [1, 1]} : vector<496x128xf32> to vector<16x128xf32>
    %c64 = arith.constant 64 : index
    %c0_65 = arith.constant 0 : index
    %105 = vector.load %arg9[%c64, %c0_65] : memref<256x128xbf16, #tpu.memory_space<vmem>>, vector<16x128xbf16>
    %106 = arith.extf %105 : vector<16x128xbf16> to vector<16x128xf32>
    %cst_66 = arith.constant 2.000000e+00 : f32
    %107 = vector.broadcast %cst_66 : f32 to vector<16x128xf32>
    %108 = arith.mulf %107, %106 : vector<16x128xf32>
    %109 = arith.addf %104, %108 : vector<16x128xf32>
    %110 = vector.extract_strided_slice %79 {offsets = [160, 0], sizes = [16, 128], strides = [1, 1]} : vector<496x128xf32> to vector<16x128xf32>
    %c80 = arith.constant 80 : index
    %c0_67 = arith.constant 0 : index
    %111 = vector.load %arg9[%c80, %c0_67] : memref<256x128xbf16, #tpu.memory_space<vmem>>, vector<16x128xbf16>
    %112 = arith.extf %111 : vector<16x128xbf16> to vector<16x128xf32>
    %cst_68 = arith.constant 2.000000e+00 : f32
    %113 = vector.broadcast %cst_68 : f32 to vector<16x128xf32>
    %114 = arith.mulf %113, %112 : vector<16x128xf32>
    %115 = arith.addf %110, %114 : vector<16x128xf32>
    %116 = vector.extract_strided_slice %79 {offsets = [192, 0], sizes = [16, 128], strides = [1, 1]} : vector<496x128xf32> to vector<16x128xf32>
    %c96 = arith.constant 96 : index
    %c0_69 = arith.constant 0 : index
    %117 = vector.load %arg9[%c96, %c0_69] : memref<256x128xbf16, #tpu.memory_space<vmem>>, vector<16x128xbf16>
    %118 = arith.extf %117 : vector<16x128xbf16> to vector<16x128xf32>
    %cst_70 = arith.constant 2.000000e+00 : f32
    %119 = vector.broadcast %cst_70 : f32 to vector<16x128xf32>
    %120 = arith.mulf %119, %118 : vector<16x128xf32>
    %121 = arith.addf %116, %120 : vector<16x128xf32>
    %122 = vector.extract_strided_slice %79 {offsets = [224, 0], sizes = [16, 128], strides = [1, 1]} : vector<496x128xf32> to vector<16x128xf32>
    %c112 = arith.constant 112 : index
    %c0_71 = arith.constant 0 : index
    %123 = vector.load %arg9[%c112, %c0_71] : memref<256x128xbf16, #tpu.memory_space<vmem>>, vector<16x128xbf16>
    %124 = arith.extf %123 : vector<16x128xbf16> to vector<16x128xf32>
    %cst_72 = arith.constant 2.000000e+00 : f32
    %125 = vector.broadcast %cst_72 : f32 to vector<16x128xf32>
    %126 = arith.mulf %125, %124 : vector<16x128xf32>
    %127 = arith.addf %122, %126 : vector<16x128xf32>
    %128 = vector.extract_strided_slice %79 {offsets = [256, 0], sizes = [16, 128], strides = [1, 1]} : vector<496x128xf32> to vector<16x128xf32>
    %c128 = arith.constant 128 : index
    %c0_73 = arith.constant 0 : index
    %129 = vector.load %arg9[%c128, %c0_73] : memref<256x128xbf16, #tpu.memory_space<vmem>>, vector<16x128xbf16>
    %130 = arith.extf %129 : vector<16x128xbf16> to vector<16x128xf32>
    %cst_74 = arith.constant 2.000000e+00 : f32
    %131 = vector.broadcast %cst_74 : f32 to vector<16x128xf32>
    %132 = arith.mulf %131, %130 : vector<16x128xf32>
    %133 = arith.addf %128, %132 : vector<16x128xf32>
    %134 = vector.extract_strided_slice %79 {offsets = [288, 0], sizes = [16, 128], strides = [1, 1]} : vector<496x128xf32> to vector<16x128xf32>
    %c144 = arith.constant 144 : index
    %c0_75 = arith.constant 0 : index
    %135 = vector.load %arg9[%c144, %c0_75] : memref<256x128xbf16, #tpu.memory_space<vmem>>, vector<16x128xbf16>
    %136 = arith.extf %135 : vector<16x128xbf16> to vector<16x128xf32>
    %cst_76 = arith.constant 2.000000e+00 : f32
    %137 = vector.broadcast %cst_76 : f32 to vector<16x128xf32>
    %138 = arith.mulf %137, %136 : vector<16x128xf32>
    %139 = arith.addf %134, %138 : vector<16x128xf32>
    %140 = vector.extract_strided_slice %79 {offsets = [320, 0], sizes = [16, 128], strides = [1, 1]} : vector<496x128xf32> to vector<16x128xf32>
    %c160 = arith.constant 160 : index
    %c0_77 = arith.constant 0 : index
    %141 = vector.load %arg9[%c160, %c0_77] : memref<256x128xbf16, #tpu.memory_space<vmem>>, vector<16x128xbf16>
    %142 = arith.extf %141 : vector<16x128xbf16> to vector<16x128xf32>
    %cst_78 = arith.constant 2.000000e+00 : f32
    %143 = vector.broadcast %cst_78 : f32 to vector<16x128xf32>
    %144 = arith.mulf %143, %142 : vector<16x128xf32>
    %145 = arith.addf %140, %144 : vector<16x128xf32>
    %146 = vector.extract_strided_slice %79 {offsets = [352, 0], sizes = [16, 128], strides = [1, 1]} : vector<496x128xf32> to vector<16x128xf32>
    %c176 = arith.constant 176 : index
    %c0_79 = arith.constant 0 : index
    %147 = vector.load %arg9[%c176, %c0_79] : memref<256x128xbf16, #tpu.memory_space<vmem>>, vector<16x128xbf16>
    %148 = arith.extf %147 : vector<16x128xbf16> to vector<16x128xf32>
    %cst_80 = arith.constant 2.000000e+00 : f32
    %149 = vector.broadcast %cst_80 : f32 to vector<16x128xf32>
    %150 = arith.mulf %149, %148 : vector<16x128xf32>
    %151 = arith.addf %146, %150 : vector<16x128xf32>
    %152 = vector.extract_strided_slice %79 {offsets = [384, 0], sizes = [16, 128], strides = [1, 1]} : vector<496x128xf32> to vector<16x128xf32>
    %c192 = arith.constant 192 : index
    %c0_81 = arith.constant 0 : index
    %153 = vector.load %arg9[%c192, %c0_81] : memref<256x128xbf16, #tpu.memory_space<vmem>>, vector<16x128xbf16>
    %154 = arith.extf %153 : vector<16x128xbf16> to vector<16x128xf32>
    %cst_82 = arith.constant 2.000000e+00 : f32
    %155 = vector.broadcast %cst_82 : f32 to vector<16x128xf32>
    %156 = arith.mulf %155, %154 : vector<16x128xf32>
    %157 = arith.addf %152, %156 : vector<16x128xf32>
    %158 = vector.extract_strided_slice %79 {offsets = [416, 0], sizes = [16, 128], strides = [1, 1]} : vector<496x128xf32> to vector<16x128xf32>
    %c208 = arith.constant 208 : index
    %c0_83 = arith.constant 0 : index
    %159 = vector.load %arg9[%c208, %c0_83] : memref<256x128xbf16, #tpu.memory_space<vmem>>, vector<16x128xbf16>
    %160 = arith.extf %159 : vector<16x128xbf16> to vector<16x128xf32>
    %cst_84 = arith.constant 2.000000e+00 : f32
    %161 = vector.broadcast %cst_84 : f32 to vector<16x128xf32>
    %162 = arith.mulf %161, %160 : vector<16x128xf32>
    %163 = arith.addf %158, %162 : vector<16x128xf32>
    %164 = vector.extract_strided_slice %79 {offsets = [448, 0], sizes = [16, 128], strides = [1, 1]} : vector<496x128xf32> to vector<16x128xf32>
    %c224 = arith.constant 224 : index
    %c0_85 = arith.constant 0 : index
    %165 = vector.load %arg9[%c224, %c0_85] : memref<256x128xbf16, #tpu.memory_space<vmem>>, vector<16x128xbf16>
    %166 = arith.extf %165 : vector<16x128xbf16> to vector<16x128xf32>
    %cst_86 = arith.constant 2.000000e+00 : f32
    %167 = vector.broadcast %cst_86 : f32 to vector<16x128xf32>
    %168 = arith.mulf %167, %166 : vector<16x128xf32>
    %169 = arith.addf %164, %168 : vector<16x128xf32>
    %170 = vector.extract_strided_slice %79 {offsets = [480, 0], sizes = [16, 128], strides = [1, 1]} : vector<496x128xf32> to vector<16x128xf32>
    %c240 = arith.constant 240 : index
    %c0_87 = arith.constant 0 : index
    %171 = vector.load %arg9[%c240, %c0_87] : memref<256x128xbf16, #tpu.memory_space<vmem>>, vector<16x128xbf16>
    %172 = arith.extf %171 : vector<16x128xbf16> to vector<16x128xf32>
    %cst_88 = arith.constant 2.000000e+00 : f32
    %173 = vector.broadcast %cst_88 : f32 to vector<16x128xf32>
    %174 = arith.mulf %173, %172 : vector<16x128xf32>
    %175 = arith.addf %170, %174 : vector<16x128xf32>
    %176 = tpu.concatenate %85, %91, %97, %103, %109, %115, %121, %127, %133, %139, %145, %151, %157, %163, %169, %175 in 0 : vector<16x128xf32>, vector<16x128xf32>, vector<16x128xf32>, vector<16x128xf32>, vector<16x128xf32>, vector<16x128xf32>, vector<16x128xf32>, vector<16x128xf32>, vector<16x128xf32>, vector<16x128xf32>, vector<16x128xf32>, vector<16x128xf32>, vector<16x128xf32>, vector<16x128xf32>, vector<16x128xf32>, vector<16x128xf32> -> vector<256x128xf32>
    %177 = arith.truncf %176 : vector<256x128xf32> to vector<256x128xbf16>
    %c0_89 = arith.constant 0 : index
    %c0_90 = arith.constant 0 : index
    %c0_91 = arith.constant 0 : index
    %178 = vector.load %arg8[%c0_89, %c0_90, %c0_91] : memref<1x256x128xbf16, #tpu.memory_space<vmem>>, vector<1x256x128xbf16>
    %179 = vector.shape_cast %178 : vector<1x256x128xbf16> to vector<256x128xbf16>
    %180 = vector.shape_cast %177 : vector<256x128xbf16> to vector<1x256x128xbf16>
    tpu.vector_store %arg8[%c0_89, %c0_90, %c0_91], %180 {strides = array<i32>} : memref<1x256x128xbf16, #tpu.memory_space<vmem>>, vector<1x256x128xbf16>,
    return
  }
  func.func @transform_0(%arg0: i32) -> (i32, i32, i32) {
    %c0_i32 = arith.constant 0 : i32
    %c0_i32_0 = arith.constant 0 : i32
    %c0_i32_1 = arith.constant 0 : i32
    return %arg0, %c0_i32, %c0_i32_0 : i32, i32, i32
  }
  func.func @transform_1(%arg0: i32) -> (i32, i32) {
    %c0_i32 = arith.constant 0 : i32
    %c0_i32_0 = arith.constant 0 : i32
    %c0_i32_1 = arith.constant 0 : i32
    return %c0_i32, %c0_i32_0 : i32, i32
  }
  func.func @transform_2(%arg0: i32) -> (i32, i32) {
    %c0_i32 = arith.constant 0 : i32
    %c0_i32_0 = arith.constant 0 : i32
    %c0_i32_1 = arith.constant 0 : i32
    return %c0_i32, %c0_i32_0 : i32, i32
  }
  func.func @transform_3(%arg0: i32) -> (i32, i32) {
    %c0_i32 = arith.constant 0 : i32
    %c0_i32_0 = arith.constant 0 : i32
    %c0_i32_1 = arith.constant 0 : i32
    return %c0_i32, %c0_i32_0 : i32, i32
  }
  func.func @transform_4(%arg0: i32) -> (i32, i32) {
    %c0_i32 = arith.constant 0 : i32
    %c0_i32_0 = arith.constant 0 : i32
    %c0_i32_1 = arith.constant 0 : i32
    return %c0_i32, %c0_i32_0 : i32, i32
  }
  func.func @transform_5(%arg0: i32) -> (i32, i32) {
    %c0_i32 = arith.constant 0 : i32
    %c0_i32_0 = arith.constant 0 : i32
    %c0_i32_1 = arith.constant 0 : i32
    return %c0_i32, %c0_i32_0 : i32, i32
  }
  func.func @transform_6(%arg0: i32) -> (i32, i32) {
    %c0_i32 = arith.constant 0 : i32
    %c0_i32_0 = arith.constant 0 : i32
    %c0_i32_1 = arith.constant 0 : i32
    return %c0_i32, %c0_i32_0 : i32, i32
  }
  func.func @transform_7(%arg0: i32) -> (i32, i32, i32) {
    %c0_i32 = arith.constant 0 : i32
    %c0_i32_0 = arith.constant 0 : i32
    %c0_i32_1 = arith.constant 0 : i32
    return %arg0, %c0_i32, %c0_i32_0 : i32, i32, i32
  }
}

module attributes {stable_mosaic.version = 11 : i64} {
  func.func @_tail_kernel(%arg0: i32, %arg1: memref<512x128xbf16, #tpu.memory_space<vmem>>, %arg2: memref<512x128xbf16, #tpu.memory_space<vmem>>, %arg3: memref<128x128xbf16, #tpu.memory_space<vmem>>, %arg4: memref<1x128xf32, #tpu.memory_space<vmem>>, %arg5: memref<128x128xbf16, #tpu.memory_space<vmem>>, %arg6: memref<1x128xf32, #tpu.memory_space<vmem>>, %arg7: memref<128x128xbf16, #tpu.memory_space<vmem>>, %arg8: memref<128x128xbf16, #tpu.memory_space<vmem>>, %arg9: memref<1x128xf32, #tpu.memory_space<vmem>>, %arg10: memref<512x128xf32, #tpu.memory_space<vmem>>) attributes {dimension_semantics = [#tpu.dimension_semantics<parallel>], iteration_bounds = array<i64: 1>, scalar_prefetch = 0 : i64, scratch_operands = 0 : i64, tpu.core_type = #tpu.core_type<tc>, window_params = [{transform_indices = @transform_0, window_bounds = array<i64: 512, 128>}, {transform_indices = @transform_1, window_bounds = array<i64: 512, 128>}, {pipeline_mode = #tpu.pipeline_mode<synchronous>, transform_indices = @transform_2, window_bounds = array<i64: 128, 128>}, {pipeline_mode = #tpu.pipeline_mode<synchronous>, transform_indices = @transform_3, window_bounds = array<i64: 1, 128>}, {pipeline_mode = #tpu.pipeline_mode<synchronous>, transform_indices = @transform_4, window_bounds = array<i64: 128, 128>}, {pipeline_mode = #tpu.pipeline_mode<synchronous>, transform_indices = @transform_5, window_bounds = array<i64: 1, 128>}, {pipeline_mode = #tpu.pipeline_mode<synchronous>, transform_indices = @transform_6, window_bounds = array<i64: 128, 128>}, {pipeline_mode = #tpu.pipeline_mode<synchronous>, transform_indices = @transform_7, window_bounds = array<i64: 128, 128>}, {pipeline_mode = #tpu.pipeline_mode<synchronous>, transform_indices = @transform_8, window_bounds = array<i64: 1, 128>}, {transform_indices = @transform_9, window_bounds = array<i64: 512, 128>}]} {
    %c0 = arith.constant 0 : index
    %c0_0 = arith.constant 0 : index
    %0 = vector.load %arg1[%c0, %c0_0] : memref<512x128xbf16, #tpu.memory_space<vmem>>, vector<512x128xbf16>
    %c0_1 = arith.constant 0 : index
    %c0_2 = arith.constant 0 : index
    %1 = vector.load %arg3[%c0_1, %c0_2] : memref<128x128xbf16, #tpu.memory_space<vmem>>, vector<128x128xbf16>
    %cst = arith.constant dense<0.000000e+00> : vector<512x128xf32>
    %2 = tpu.matmul %0, %1, %cst {dimension_numbers = #tpu.dot_dimension_numbers<[1], [0], [0], [1], [0, 0, 1, 1], [], []>} : vector<512x128xbf16>, vector<128x128xbf16>, vector<512x128xf32> -> vector<512x128xf32>
    %c0_3 = arith.constant 0 : index
    %c0_4 = arith.constant 0 : index
    %3 = vector.load %arg4[%c0_3, %c0_4] : memref<1x128xf32, #tpu.memory_space<vmem>>, vector<1x128xf32>
    %4 = vector.broadcast %3 : vector<1x128xf32> to vector<512x128xf32>
    %5 = arith.addf %2, %4 : vector<512x128xf32>
    %cst_5 = arith.constant 0.000000e+00 : f32
    %6 = vector.broadcast %cst_5 : f32 to vector<512x128xf32>
    %7 = arith.cmpf ogt, %5, %6 : vector<512x128xf32>
    %cst_6 = arith.constant 1.000000e-01 : f32
    %8 = vector.broadcast %cst_6 : f32 to vector<512x128xf32>
    %9 = arith.mulf %8, %5 : vector<512x128xf32>
    %10 = arith.select %7, %5, %9 : vector<512x128xi1>, vector<512x128xf32>
    %c0_7 = arith.constant 0 : index
    %c0_8 = arith.constant 0 : index
    %11 = vector.load %arg2[%c0_7, %c0_8] : memref<512x128xbf16, #tpu.memory_space<vmem>>, vector<512x128xbf16>
    %c0_9 = arith.constant 0 : index
    %c0_10 = arith.constant 0 : index
    %12 = vector.load %arg5[%c0_9, %c0_10] : memref<128x128xbf16, #tpu.memory_space<vmem>>, vector<128x128xbf16>
    %cst_11 = arith.constant dense<0.000000e+00> : vector<512x128xf32>
    %13 = tpu.matmul %11, %12, %cst_11 {dimension_numbers = #tpu.dot_dimension_numbers<[1], [0], [0], [1], [0, 0, 1, 1], [], []>} : vector<512x128xbf16>, vector<128x128xbf16>, vector<512x128xf32> -> vector<512x128xf32>
    %c0_12 = arith.constant 0 : index
    %c0_13 = arith.constant 0 : index
    %14 = vector.load %arg6[%c0_12, %c0_13] : memref<1x128xf32, #tpu.memory_space<vmem>>, vector<1x128xf32>
    %15 = vector.broadcast %14 : vector<1x128xf32> to vector<512x128xf32>
    %16 = arith.addf %13, %15 : vector<512x128xf32>
    %cst_14 = arith.constant 0.000000e+00 : f32
    %17 = vector.broadcast %cst_14 : f32 to vector<512x128xf32>
    %18 = arith.cmpf ogt, %16, %17 : vector<512x128xf32>
    %cst_15 = arith.constant 1.000000e-01 : f32
    %19 = vector.broadcast %cst_15 : f32 to vector<512x128xf32>
    %20 = arith.mulf %19, %16 : vector<512x128xf32>
    %21 = arith.select %18, %16, %20 : vector<512x128xi1>, vector<512x128xf32>
    %22 = arith.truncf %10 : vector<512x128xf32> to vector<512x128xbf16>
    %c0_16 = arith.constant 0 : index
    %c0_17 = arith.constant 0 : index
    %23 = vector.load %arg7[%c0_16, %c0_17] : memref<128x128xbf16, #tpu.memory_space<vmem>>, vector<128x128xbf16>
    %cst_18 = arith.constant dense<0.000000e+00> : vector<512x128xf32>
    %24 = tpu.matmul %22, %23, %cst_18 {dimension_numbers = #tpu.dot_dimension_numbers<[1], [0], [0], [1], [0, 0, 1, 1], [], []>} : vector<512x128xbf16>, vector<128x128xbf16>, vector<512x128xf32> -> vector<512x128xf32>
    %25 = arith.truncf %21 : vector<512x128xf32> to vector<512x128xbf16>
    %c0_19 = arith.constant 0 : index
    %c0_20 = arith.constant 0 : index
    %26 = vector.load %arg8[%c0_19, %c0_20] : memref<128x128xbf16, #tpu.memory_space<vmem>>, vector<128x128xbf16>
    %cst_21 = arith.constant dense<0.000000e+00> : vector<512x128xf32>
    %27 = tpu.matmul %25, %26, %cst_21 {dimension_numbers = #tpu.dot_dimension_numbers<[1], [0], [0], [1], [0, 0, 1, 1], [], []>} : vector<512x128xbf16>, vector<128x128xbf16>, vector<512x128xf32> -> vector<512x128xf32>
    %28 = arith.addf %24, %27 : vector<512x128xf32>
    %c0_22 = arith.constant 0 : index
    %c0_23 = arith.constant 0 : index
    %29 = vector.load %arg9[%c0_22, %c0_23] : memref<1x128xf32, #tpu.memory_space<vmem>>, vector<1x128xf32>
    %30 = vector.broadcast %29 : vector<1x128xf32> to vector<512x128xf32>
    %31 = arith.addf %28, %30 : vector<512x128xf32>
    %cst_24 = arith.constant 0.000000e+00 : f32
    %32 = vector.broadcast %cst_24 : f32 to vector<512x128xf32>
    %33 = arith.cmpf ogt, %31, %32 : vector<512x128xf32>
    %cst_25 = arith.constant 0.00999999977 : f32
    %34 = vector.broadcast %cst_25 : f32 to vector<512x128xf32>
    %35 = arith.mulf %34, %31 : vector<512x128xf32>
    %36 = arith.select %33, %31, %35 : vector<512x128xi1>, vector<512x128xf32>
    %c0_26 = arith.constant 0 : index
    %c0_27 = arith.constant 0 : index
    %37 = vector.load %arg10[%c0_26, %c0_27] : memref<512x128xf32, #tpu.memory_space<vmem>>, vector<512x128xf32>
    tpu.vector_store %arg10[%c0_26, %c0_27], %36 {strides = array<i32>} : memref<512x128xf32, #tpu.memory_space<vmem>>, vector<512x128xf32>,
    return
  }
  func.func @transform_0(%arg0: i32) -> (i32, i32) {
    %c0_i32 = arith.constant 0 : i32
    %c0_i32_0 = arith.constant 0 : i32
    return %arg0, %c0_i32 : i32, i32
  }
  func.func @transform_1(%arg0: i32) -> (i32, i32) {
    %c0_i32 = arith.constant 0 : i32
    %c0_i32_0 = arith.constant 0 : i32
    return %arg0, %c0_i32 : i32, i32
  }
  func.func @transform_2(%arg0: i32) -> (i32, i32) {
    %c0_i32 = arith.constant 0 : i32
    %c0_i32_0 = arith.constant 0 : i32
    %c0_i32_1 = arith.constant 0 : i32
    return %c0_i32, %c0_i32_0 : i32, i32
  }
  func.func @transform_3(%arg0: i32) -> (i32, i32) {
    %c0_i32 = arith.constant 0 : i32
    %c0_i32_0 = arith.constant 0 : i32
    %c0_i32_1 = arith.constant 0 : i32
    return %c0_i32, %c0_i32_0 : i32, i32
  }
  func.func @transform_4(%arg0: i32) -> (i32, i32) {
    %c0_i32 = arith.constant 0 : i32
    %c0_i32_0 = arith.constant 0 : i32
    %c0_i32_1 = arith.constant 0 : i32
    return %c0_i32, %c0_i32_0 : i32, i32
  }
  func.func @transform_5(%arg0: i32) -> (i32, i32) {
    %c0_i32 = arith.constant 0 : i32
    %c0_i32_0 = arith.constant 0 : i32
    %c0_i32_1 = arith.constant 0 : i32
    return %c0_i32, %c0_i32_0 : i32, i32
  }
  func.func @transform_6(%arg0: i32) -> (i32, i32) {
    %c0_i32 = arith.constant 0 : i32
    %c0_i32_0 = arith.constant 0 : i32
    %c0_i32_1 = arith.constant 0 : i32
    return %c0_i32, %c0_i32_0 : i32, i32
  }
  func.func @transform_7(%arg0: i32) -> (i32, i32) {
    %c0_i32 = arith.constant 0 : i32
    %c0_i32_0 = arith.constant 0 : i32
    %c0_i32_1 = arith.constant 0 : i32
    return %c0_i32, %c0_i32_0 : i32, i32
  }
  func.func @transform_8(%arg0: i32) -> (i32, i32) {
    %c0_i32 = arith.constant 0 : i32
    %c0_i32_0 = arith.constant 0 : i32
    %c0_i32_1 = arith.constant 0 : i32
    return %c0_i32, %c0_i32_0 : i32, i32
  }
  func.func @transform_9(%arg0: i32) -> (i32, i32) {
    %c0_i32 = arith.constant 0 : i32
    %c0_i32_0 = arith.constant 0 : i32
    return %arg0, %c0_i32 : i32, i32
  }
}

</mosaic_0001>

<bundles_post_ra>
// kernel: _csp_forward.3
= control target key start
LH: loop header
LB: loop body
LE: loop exit
PB: predicated region body
PF: predicated region fallthrough
CT: control target
= control target key end

     0   :  { %s4518_s2 = inlined_call_operand.vmem [shape: bf16[128,128], index: 2, kind: input, shape index: {}]   ;;  %s4519_s0 = inlined_call_operand.vmem [shape: bf16[512,128], index: 0, kind: input, shape index: {}]   ;;  %s4520_s4 = inlined_call_operand.vmem [shape: bf16[128,128], index: 4, kind: input, shape index: {}]   ;;  %s4521_s1 = inlined_call_operand.vmem [shape: bf16[512,128], index: 1, kind: input, shape index: {}]   ;;  %s4522_s7 = inlined_call_operand.vmem [shape: bf16[128,128], index: 7, kind: input, shape index: {}]   ;;  %s4523_s3 = inlined_call_operand.vmem [shape: f32[1,128], index: 3, kind: input, shape index: {}]   ;;  %s4524_s6 = inlined_call_operand.vmem [shape: bf16[128,128], index: 6, kind: input, shape index: {}]   ;;  %s4525_s5 = inlined_call_operand.vmem [shape: f32[1,128], index: 5, kind: input, shape index: {}]   ;;  %s4526_s8 = inlined_call_operand.vmem [shape: f32[1,128], index: 8, kind: input, shape index: {}]   ;;  %s4527_s9 = inlined_call_operand.vmem [shape: f32[512,128], index: 9, kind: output, shape index: {}]  }
   0x1   :  { %v3393_v0 = vld [vmem:[%s4518_s2] sm:$0xff]   ;;  %v3394_v1 = vld [vmem:[%s4518_s2 + $0x8] sm:$0xff]   ;;  %v3395_v2 = vld [vmem:[%s4518_s2 + $0x10] sm:$0xff]  }
   0x2   :  { %3009 = vmatprep.subr.bf16.mxu1 %v3393_v0  ;;  %v3396_v3 = vld [vmem:[%s4518_s2 + $0x18] sm:$0xff]   ;;  %v3401_v4 = vld [vmem:[%s4519_s0] sm:$0xff]   ;;  %v3398_v6 = vld [vmem:[%s4518_s2 + $0x28] sm:$0xff]  }
   0x3   :  { %3010 = vmatpush3.bf16.msra.mxu1 %v3393_v0  ;;  %3025 = vmatprep.mubr.bf16.mxu1 %v3401_v4  ;;  %v3397_v5 = vld [vmem:[%s4518_s2 + $0x20] sm:$0xff]   ;;  %v3399_v7 = vld [vmem:[%s4518_s2 + $0x30] sm:$0xff]   ;;  %v3400_v8 = vld [vmem:[%s4518_s2 + $0x38] sm:$0xff]  }
   0x4   :  { %3011 = vmatprep.subr.bf16.mxu1 %v3394_v1  ;;  %v3403_v9 = vld [vmem:[%s4520_s4] sm:$0xff]   ;;  %v3402_v10 = vld [vmem:[%s4519_s0 + $0x8] sm:$0xff]   ;;  %v3404_v11 = vld [vmem:[%s4519_s0 + $0x10] sm:$0xff]  }
   0x5   :  { %v3408_v12 = vld [vmem:[%s4520_s4 + $0x8] sm:$0xff]   ;;  %v3413_v13 = vld [vmem:[%s4520_s4 + $0x10] sm:$0xff]   ;;  %v3405_v14 = vld [vmem:[%s4519_s0 + $0x18] sm:$0xff]  }
   0x6   :  { %v3406_v15 = vld [vmem:[%s4519_s0 + $0x20] sm:$0xff]   ;;  %v3418_v16 = vld [vmem:[%s4520_s4 + $0x18] sm:$0xff]   ;;  %v3407_v18 = vld [vmem:[%s4519_s0 + $0x28] sm:$0xff]  }
   0x7   :  { %3012 = vmatpush3.bf16.msra.mxu1 %v3394_v1  ;;  %v3423_v17 = vld [vmem:[%s4520_s4 + $0x20] sm:$0xff]   ;;  %v3409_v19 = vld [vmem:[%s4519_s0 + $0x30] sm:$0xff]   ;;  %v3428_v20 = vld [vmem:[%s4520_s4 + $0x28] sm:$0xff]  }
   0x8   :  { %3013 = vmatprep.subr.bf16.mxu1 %v3395_v2  ;;  %v3433_v21 = vld [vmem:[%s4520_s4 + $0x30] sm:$0xff]   ;;  %v3410_v22 = vld [vmem:[%s4519_s0 + $0x38] sm:$0xff]   ;;  %v3411_v23 = vld [vmem:[%s4519_s0 + $0x40] sm:$0xff]  }
   0x9   :  { %v3438_v24 = vld [vmem:[%s4520_s4 + $0x38] sm:$0xff]   ;;  %v3412_v25 = vld [vmem:[%s4519_s0 + $0x48] sm:$0xff]   ;;  %v3414_v26 = vld [vmem:[%s4519_s0 + $0x50] sm:$0xff]  }
   0xa   :  { %v3415_v27 = vld [vmem:[%s4519_s0 + $0x58] sm:$0xff]   ;;  %v3416_v28 = vld [vmem:[%s4519_s0 + $0x60] sm:$0xff]   ;;  %v3417_v29 = vld [vmem:[%s4519_s0 + $0x68] sm:$0xff]  }
   0xb   :  { %3014 = vmatpush3.bf16.msra.mxu1 %v3395_v2  ;;  %v3419_v30 = vld [vmem:[%s4519_s0 + $0x70] sm:$0xff]   ;;  %v3420_v31 = vld [vmem:[%s4519_s0 + $0x78] sm:$0xff]   ;;  %v3421_v32 = vld [vmem:[%s4519_s0 + $0x80] sm:$0xff]  }
   0xc   :  { %3015 = vmatprep.subr.bf16.mxu1 %v3396_v3  ;;  %v3422_v33 = vld [vmem:[%s4519_s0 + $0x88] sm:$0xff]   ;;  %v3424_v34 = vld [vmem:[%s4519_s0 + $0x90] sm:$0xff]   ;;  %v3425_v35 = vld [vmem:[%s4519_s0 + $0x98] sm:$0xff]  }
   0xd   :  { %v3426_v36 = vld [vmem:[%s4519_s0 + $0xa0] sm:$0xff]   ;;  %v3427_v37 = vld [vmem:[%s4519_s0 + $0xa8] sm:$0xff]   ;;  %v3429_v38 = vld [vmem:[%s4519_s0 + $0xb0] sm:$0xff]  }
   0xe   :  { %v3430_v39 = vld [vmem:[%s4519_s0 + $0xb8] sm:$0xff]   ;;  %v3431_v40 = vld [vmem:[%s4519_s0 + $0xc0] sm:$0xff]   ;;  %v3432_v41 = vld [vmem:[%s4519_s0 + $0xc8] sm:$0xff]  }
   0xf   :  { %3016 = vmatpush3.bf16.msra.mxu1 %v3396_v3  ;;  %v3434_v42 = vld [vmem:[%s4519_s0 + $0xd0] sm:$0xff]   ;;  %v3435_v43 = vld [vmem:[%s4519_s0 + $0xd8] sm:$0xff]   ;;  %v3436_v44 = vld [vmem:[%s4519_s0 + $0xe0] sm:$0xff]  }
  0x10   :  { %3017 = vmatprep.subr.bf16.mxu1 %v3397_v5  ;;  %v3437_v45 = vld [vmem:[%s4519_s0 + $0xe8] sm:$0xff]   ;;  %v3439_v46 = vld [vmem:[%s4519_s0 + $0xf0] sm:$0xff]   ;;  %v3440_v47 = vld [vmem:[%s4519_s0 + $0xf8] sm:$0xff]  }
  0x11   :  { %v3441_v48 = vld [vmem:[%s4521_s1] sm:$0xff]   ;;  %v3442_v49 = vld [vmem:[%s4521_s1 + $0x8] sm:$0xff]   ;;  %v3443_v50 = vld [vmem:[%s4521_s1 + $0x10] sm:$0xff]  }
  0x12   :  { %v3444_v51 = vld [vmem:[%s4521_s1 + $0x18] sm:$0xff]   ;;  %v3445_v52 = vld [vmem:[%s4521_s1 + $0x20] sm:$0xff]   ;;  %v3446_v53 = vld [vmem:[%s4521_s1 + $0x28] sm:$0xff]  }
  0x13   :  { %3018 = vmatpush3.bf16.msra.mxu1 %v3397_v5  ;;  %v3447_v54 = vld [vmem:[%s4521_s1 + $0x30] sm:$0xff]   ;;  %v3448_v55 = vld [vmem:[%s4521_s1 + $0x38] sm:$0xff]   ;;  %v3449_v56 = vld [vmem:[%s4521_s1 + $0x40] sm:$0xff]  }
  0x14   :  { %3019 = vmatprep.subr.bf16.mxu1 %v3398_v6  ;;  %v3450_v57 = vld [vmem:[%s4521_s1 + $0x48] sm:$0xff]   ;;  %v3451_v58 = vld [vmem:[%s4521_s1 + $0x50] sm:$0xff]   ;;  %v3452_v59 = vld [vmem:[%s4521_s1 + $0x58] sm:$0xff]  }
  0x15   :  { %v3453_v60 = vld [vmem:[%s4521_s1 + $0x60] sm:$0xff]   ;;  %v3454_v61 = vld [vmem:[%s4521_s1 + $0x68] sm:$0xff]   ;;  %v3455_v62 = vld [vmem:[%s4521_s1 + $0x70] sm:$0xff]  }
  0x16   :  { %v3456_v63 = vld [vmem:[%s4521_s1 + $0x78] sm:$0xff]   ;;  %v3457_v0 = vld [vmem:[%s4521_s1 + $0x80] sm:$0xff]   ;;  %v3458_v1 = vld [vmem:[%s4521_s1 + $0x88] sm:$0xff]  }
  0x17   :  { %3020 = vmatpush3.bf16.msra.mxu1 %v3398_v6  ;;  %v3459_v2 = vld [vmem:[%s4521_s1 + $0x90] sm:$0xff]   ;;  %v3473_v3 = vld [vmem:[%s4522_s7] sm:$0xff]   ;;  %v3474_v4 = vld [vmem:[%s4522_s7 + $0x8] sm:$0xff]  }
  0x18   :  { %3021 = vmatprep.subr.bf16.mxu1 %v3399_v7  ;;  %3169 = vmatprep.subr.bf16.mxu0 %v3473_v3  ;;  %v3460_v5 = vld [vmem:[%s4521_s1 + $0x98] sm:$0xff]   ;;  %v3461_v6 = vld [vmem:[%s4521_s1 + $0xa0] sm:$0xff]  }
  0x19   :  { %3170 = vmatpush3.bf16.msra.mxu0 %v3473_v3 }
  0x1a   :  { %3171 = vmatprep.subr.bf16.mxu0 %v3474_v4 }
  0x1b   :  { %3022 = vmatpush3.bf16.msra.mxu1 %v3399_v7  ;;  %v3475_v7 = vld [vmem:[%s4522_s7 + $0x10] sm:$0xff]  }
  0x1c   :  { %3023 = vmatprep.subr.bf16.mxu1 %v3400_v8 }
  0x1d   :  { %3172 = vmatpush3.bf16.msra.mxu0 %v3474_v4 }
  0x1e   :  { %3173 = vmatprep.subr.bf16.mxu0 %v3475_v7 }
  0x1f   :  { %3024 = vmatpush3.bf16.msra.mxu1 %v3400_v8  ;;  %v3476_v8 = vld [vmem:[%s4522_s7 + $0x18] sm:$0xff]  }
  0x20   :  { %3089 = vmatprep.subr.bf16.mxu1 %v3403_v9 }
  0x21   :  { %3174 = vmatpush3.bf16.msra.mxu0 %v3475_v7 }
  0x22   :  { %3026 = vmatmul.mubr.bf16.vlgmr.msra.gmra.mrb[0].mxu1 %v3402_v10  ;;  %3175 = vmatprep.subr.bf16.mxu0 %v3476_v8  ;;  %v3463_v10 = vld [vmem:[%s4521_s1 + $0xb0] sm:$0xff]  }
  0x23   :  { %3090 = vmatpush3.bf16.msra.mxu1 %v3403_v9  ;;  %3029 = vmatprep.mubr.bf16.mxu1 %v3404_v11  ;;  %v3462_v9 = vld [vmem:[%s4521_s1 + $0xa8] sm:$0xff]   ;;  %v3477_v11 = vld [vmem:[%s4522_s7 + $0x20] sm:$0xff]  }
  0x24   :  { %3091 = vmatprep.subr.bf16.mxu1 %v3408_v12 }
  0x25   :  { %3176 = vmatpush3.bf16.msra.mxu0 %v3476_v8 }
  0x26   :  { %3177 = vmatprep.subr.bf16.mxu0 %v3477_v11 }
  0x27   :  { %3092 = vmatpush3.bf16.msra.mxu1 %v3408_v12  ;;  %v3770_v12 = vld [vmem:[%s4523_s3] ss:$0 sm:$0xff] }
  0x28   :  { %3093 = vmatprep.subr.bf16.mxu1 %v3413_v13 }
  0x29   :  { %3178 = vmatpush3.bf16.msra.mxu0 %v3477_v11 }
  0x2a   :  { %3030 = vmatmul.mubr.bf16.gmra.mrb[4].mxu1 %v3405_v14 }
  0x2b   :  { %3033 = vmatprep.mubr.bf16.mxu1 %v3406_v15  ;;  %3094 = vmatpush3.bf16.msra.mxu1 %v3413_v13  ;;  %v3478_v13 = vld [vmem:[%s4522_s7 + $0x28] sm:$0xff]  }
  0x2c   :  { %3095 = vmatprep.subr.bf16.mxu1 %v3418_v16  ;;  %3179 = vmatprep.subr.bf16.mxu0 %v3478_v13 }
  0x2d   :  { %3180 = vmatpush3.bf16.msra.mxu0 %v3478_v13 }
  0x2f   :  { %3096 = vmatpush3.bf16.msra.mxu1 %v3418_v16 }
  0x30   :  { %3097 = vmatprep.subr.bf16.mxu1 %v3423_v17 }
  0x32   :  { %3034 = vmatmul.mubr.bf16.gmra.mrb[8].mxu1 %v3407_v18 }
  0x33   :  { %3037 = vmatprep.mubr.bf16.mxu1 %v3409_v19  ;;  %3098 = vmatpush3.bf16.msra.mxu1 %v3423_v17  ;;  %v3464_v17 = vld [vmem:[%s4521_s1 + $0xb8] sm:$0xff]  }
  0x34   :  { %3099 = vmatprep.subr.bf16.mxu1 %v3428_v20 }
  0x37   :  { %3100 = vmatpush3.bf16.msra.mxu1 %v3428_v20  ;;  %v3465_v20 = vld [vmem:[%s4521_s1 + $0xc0] sm:$0xff]  }
  0x38   :  { %3101 = vmatprep.subr.bf16.mxu1 %v3433_v21 }
  0x3a   :  { %3038 = vmatmul.mubr.bf16.gmra.mrb[12].mxu1 %v3410_v22 }
  0x3b   :  { %3041 = vmatprep.mubr.bf16.mxu1 %v3411_v23  ;;  %3102 = vmatpush3.bf16.msra.mxu1 %v3433_v21  ;;  %v3479_v21 = vld [vmem:[%s4522_s7 + $0x30] sm:$0xff]  }
  0x3c   :  { %3103 = vmatprep.subr.bf16.mxu1 %v3438_v24  ;;  %3181 = vmatprep.subr.bf16.mxu0 %v3479_v21 }
  0x3d   :  { %3182 = vmatpush3.bf16.msra.mxu0 %v3479_v21 }
  0x3f   :  { %3104 = vmatpush3.bf16.msra.mxu1 %v3438_v24 }
  0x42   :  { %3042 = vmatmul.mubr.bf16.gmra.mrb[16].mxu1 %v3412_v25 }
  0x43   :  { %3045 = vmatprep.mubr.bf16.mxu1 %v3414_v26 }
  0x4a   :  { %3046 = vmatmul.mubr.bf16.gmra.mrb[20].mxu1 %v3415_v27 }
  0x4b   :  { %3049 = vmatprep.mubr.bf16.mxu1 %v3416_v28 }
  0x52   :  { %3050 = vmatmul.mubr.bf16.gmra.mrb[24].mxu1 %v3417_v29  ;;  %v3480_v29 = vld [vmem:[%s4522_s7 + $0x38] sm:$0xff]  }
  0x53   :  { %3053 = vmatprep.mubr.bf16.mxu1 %v3419_v30  ;;  %3183 = vmatprep.subr.bf16.mxu0 %v3480_v29 }
  0x54   :  { %3184 = vmatpush3.bf16.msra.mxu0 %v3480_v29 }
  0x5a   :  { %3054 = vmatmul.mubr.bf16.gmra.mrb[28].mxu1 %v3420_v31 }
  0x5b   :  { %3057 = vmatprep.mubr.bf16.mxu1 %v3421_v32 }
  0x62   :  { %3058 = vmatmul.mubr.bf16.gmra.mrb[32].mxu1 %v3422_v33 }
  0x63   :  { %3061 = vmatprep.mubr.bf16.mxu1 %v3424_v34 }
  0x6a   :  { %3062 = vmatmul.mubr.bf16.gmra.mrb[36].mxu1 %v3425_v35 }
  0x6b   :  { %3065 = vmatprep.mubr.bf16.mxu1 %v3426_v36 }
  0x72   :  { %3066 = vmatmul.mubr.bf16.gmra.mrb[40].mxu1 %v3427_v37 }
  0x73   :  { %3069 = vmatprep.mubr.bf16.mxu1 %v3429_v38  ;;  %v3466_v38 = vld [vmem:[%s4521_s1 + $0xc8] sm:$0xff]  }
  0x7a   :  { %3070 = vmatmul.mubr.bf16.gmra.mrb[44].mxu1 %v3430_v39 }
  0x7b   :  { %3073 = vmatprep.mubr.bf16.mxu1 %v3431_v40 }
  0x82   :  { %3074 = vmatmul.mubr.bf16.gmra.mrb[48].mxu1 %v3432_v41 }
  0x83   :  { %3077 = vmatprep.mubr.bf16.mxu1 %v3434_v42  ;;  %v3467_v42 = vld [vmem:[%s4521_s1 + $0xd0] sm:$0xff]  }
  0x8a   :  { %3078 = vmatmul.mubr.bf16.gmra.mrb[52].mxu1 %v3435_v43 }
  0x8b   :  { %3081 = vmatprep.mubr.bf16.mxu1 %v3436_v44 }
  0x92   :  { %3082 = vmatmul.mubr.bf16.gmra.mrb[56].mxu1 %v3437_v45 }
  0x93   :  { %3085 = vmatprep.mubr.bf16.mxu1 %v3439_v46 }
  0x9a   :  { %3086 = vmatmul.mubr.bf16.gmra.mrb[60].mxu1 %v3440_v47 }
  0x9b   :  { %3105 = vmatprep.mubr.bf16.mxu1 %v3441_v48 }
  0xa2   :  { %3106 = vmatmul.mubr.bf16.vlgmr.msra.gmra.mrb[64].mxu1 %v3442_v49 }
  0xa3   :  { %3109 = vmatprep.mubr.bf16.mxu1 %v3443_v50  ;;  %v3816_v50 = vld [vmem:[%s4524_s6] sm:$0xff]  }
  0xa4   :  { %3249 = vmatprep.subr.bf16.mxu0 %v3816_v50 }
  0xaa   :  { %3110 = vmatmul.mubr.bf16.gmra.mrb[68].mxu1 %v3444_v51 }
  0xab   :  { %3113 = vmatprep.mubr.bf16.mxu1 %v3445_v52 }
  0xb2   :  { %3114 = vmatmul.mubr.bf16.gmra.mrb[72].mxu1 %v3446_v53 }
  0xb3   :  { %3117 = vmatprep.mubr.bf16.mxu1 %v3447_v54 }
  0xba   :  { %3118 = vmatmul.mubr.bf16.gmra.mrb[76].mxu1 %v3448_v55 }
  0xbb   :  { %3121 = vmatprep.mubr.bf16.mxu1 %v3449_v56 }
  0xc2   :  { %3122 = vmatmul.mubr.bf16.gmra.mrb[80].mxu1 %v3450_v57 }
  0xc3   :  { %3125 = vmatprep.mubr.bf16.mxu1 %v3451_v58 }
  0xca   :  { %3126 = vmatmul.mubr.bf16.gmra.mrb[84].mxu1 %v3452_v59  ;;  %v3468_v59 = vld [vmem:[%s4521_s1 + $0xd8] sm:$0xff]  }
  0xcb   :  { %3129 = vmatprep.mubr.bf16.mxu1 %v3453_v60 }
  0xd2   :  { %3130 = vmatmul.mubr.bf16.gmra.mrb[88].mxu1 %v3454_v61 }
  0xd3   :  { %3133 = vmatprep.mubr.bf16.mxu1 %v3455_v62 }
  0xda   :  { %3134 = vmatmul.mubr.bf16.gmra.mrb[92].mxu1 %v3456_v63  ;;  %v3469_v63 = vld [vmem:[%s4521_s1 + $0xe0] sm:$0xff]  }
  0xdb   :  { %3137 = vmatprep.mubr.bf16.mxu1 %v3457_v0 }
  0xe2   :  { %3138 = vmatmul.mubr.bf16.gmra.mrb[96].mxu1 %v3458_v1 }
  0xe3   :  { %3141 = vmatprep.mubr.bf16.mxu1 %v3459_v2 }
  0xea   :  { %3142 = vmatmul.mubr.bf16.gmra.mrb[100].mxu1 %v3460_v5 }
  0xeb   :  { %3145 = vmatprep.mubr.bf16.mxu1 %v3461_v6 }
  0xf2   :  { %3146 = vmatmul.mubr.bf16.gmra.mrb[104].mxu1 %v3462_v9 }
  0xf3   :  { %3149 = vmatprep.mubr.bf16.mxu1 %v3463_v10 }
  0xf5   :  { %v3027_v14 = vpop.f32.mrb[0].mxu1 }
  0xf6   :  { %v403_v15 = vadd.f32 %v3027_v14, %v3770_v12  ;;  %v394_v16 = vpop.f32.mrb[1].mxu1 }
  0xf7   :  { %v395_v18 = vadd.f32 %v3770_v12, %v394_v16  ;;  %v3028_v19 = vpop.f32.mrb[2].mxu1  ;;  %v3470_v16 = vld [vmem:[%s4521_s1 + $0xe8] sm:$0xff]  }
  0xf8   :  { %v715_v22 = vmul.f32 0.1, %v403_v15  ;;  %v406_v23 = vadd.f32 %v3028_v19, %v3770_v12  ;;  %v397_v24 = vpop.f32.mrb[3].mxu1  ;;  %vm651_vm0 = vcmp.gt.f32.partialorder %v403_v15, 0.0 }
  0xf9   :  { %v713_v25 = vmul.f32 0.1, %v395_v18  ;;  %v398_v26 = vadd.f32 %v3770_v12, %v397_v24  ;;  %vm649_vm1 = vcmp.gt.f32.partialorder %v395_v18, 0.0 }
  0xfa   :  { %vm652_vm2 = vcmp.gt.f32.partialorder %v406_v23, 0.0  ;;  %v716_v27 = vmul.f32 0.1, %v406_v23  ;;  %3150 = vmatmul.mubr.bf16.gmra.mrb[108].mxu1 %v3464_v17  ;;  %v3791_v30 = vsel %vm651_vm0, %v403_v15, %v715_v22 }
  0xfb   :  { %vm650_vm3 = vcmp.gt.f32.partialorder %v398_v26, 0.0  ;;  %v714_v28 = vmul.f32 0.1, %v398_v26  ;;  %3153 = vmatprep.mubr.bf16.mxu1 %v3465_v20  ;;  %v3797_v34 = vsel %vm649_vm1, %v395_v18, %v713_v25  ;;  %v3471_v20 = vld [vmem:[%s4521_s1 + $0xf0] sm:$0xff]  }
  0xfc   :  { %v3793_v31 = vsel %vm652_vm2, %v406_v23, %v716_v27 }
  0xfd   :  { %v3031_v33 = vpop.f32.mrb[4].mxu1  ;;  %v3799_v35 = vsel %vm650_vm3, %v398_v26, %v714_v28 }
  0xfe   :  { %v419_v36 = vadd.f32 %v3031_v33, %v3770_v12  ;;  %v410_v37 = vpop.f32.mrb[5].mxu1 }
  0xff   :  { %v411_v40 = vadd.f32 %v3770_v12, %v410_v37  ;;  %v3032_v41 = vpop.f32.mrb[6].mxu1 }
 0x100   :  { %v719_v43 = vmul.f32 0.1, %v419_v36  ;;  %v422_v44 = vadd.f32 %v3032_v41, %v3770_v12  ;;  %v413_v45 = vpop.f32.mrb[7].mxu1  ;;  %vm655_vm4 = vcmp.gt.f32.partialorder %v419_v36, 0.0 }
 0x101   :  { %v717_v46 = vmul.f32 0.1, %v411_v40  ;;  %v414_v47 = vadd.f32 %v3770_v12, %v413_v45  ;;  %vm653_vm5 = vcmp.gt.f32.partialorder %v411_v40, 0.0 }
 0x102   :  { %vm656_vm6 = vcmp.gt.f32.partialorder %v422_v44, 0.0  ;;  %v720_v48 = vmul.f32 0.1, %v422_v44  ;;  %3154 = vmatmul.mubr.bf16.gmra.mrb[112].mxu1 %v3466_v38  ;;  %v3818_v51 = vsel %vm655_vm4, %v419_v36, %v719_v43 }
 0x103   :  { %vm654_vm7 = vcmp.gt.f32.partialorder %v414_v47, 0.0  ;;  %v718_v49 = vmul.f32 0.1, %v414_v47  ;;  %3157 = vmatprep.mubr.bf16.mxu1 %v3467_v42  ;;  %v3822_v54 = vsel %vm653_vm5, %v411_v40, %v717_v46  ;;  %v3472_v42 = vld [vmem:[%s4521_s1 + $0xf8] sm:$0xff]  }
 0x104   :  { %v3820_v52 = vsel %vm656_vm6, %v422_v44, %v720_v48 }
 0x105   :  { %v3035_v53 = vpop.f32.mrb[8].mxu1  ;;  %v3824_v55 = vsel %vm654_vm7, %v414_v47, %v718_v49 }
 0x106   :  { %v435_v57 = vadd.f32 %v3035_v53, %v3770_v12  ;;  %v426_v58 = vpop.f32.mrb[9].mxu1 }
 0x107   :  { %v427_v61 = vadd.f32 %v3770_v12, %v426_v58  ;;  %v3036_v62 = vpop.f32.mrb[10].mxu1 }
 0x108   :  { %v723_v0 = vmul.f32 0.1, %v435_v57  ;;  %v438_v1 = vadd.f32 %v3036_v62, %v3770_v12  ;;  %v429_v2 = vpop.f32.mrb[11].mxu1  ;;  %vm659_vm8 = vcmp.gt.f32.partialorder %v435_v57, 0.0 }
 0x109   :  { %v721_v3 = vmul.f32 0.1, %v427_v61  ;;  %v430_v4 = vadd.f32 %v3770_v12, %v429_v2  ;;  %vm657_vm9 = vcmp.gt.f32.partialorder %v427_v61, 0.0 }
 0x10a   :  { %vm660_vm10 = vcmp.gt.f32.partialorder %v438_v1, 0.0  ;;  %v724_v5 = vmul.f32 0.1, %v438_v1  ;;  %3158 = vmatmul.mubr.bf16.gmra.mrb[116].mxu1 %v3468_v59  ;;  %v3841_v7 = vsel %vm659_vm8, %v435_v57, %v723_v0 }
 0x10b   :  { %vm658_vm11 = vcmp.gt.f32.partialorder %v430_v4, 0.0  ;;  %v722_v6 = vmul.f32 0.1, %v430_v4  ;;  %3161 = vmatprep.mubr.bf16.mxu1 %v3469_v63  ;;  %v3845_v10 = vsel %vm657_vm9, %v427_v61, %v721_v3 }
 0x10c   :  { %v3843_v8 = vsel %vm660_vm10, %v438_v1, %v724_v5 }
 0x10d   :  { %v3039_v9 = vpop.f32.mrb[12].mxu1  ;;  %v3847_v11 = vsel %vm658_vm11, %v430_v4, %v722_v6 }
 0x10e   :  { %v451_v14 = vadd.f32 %v3039_v9, %v3770_v12  ;;  %v442_v15 = vpop.f32.mrb[13].mxu1 }
 0x10f   :  { %v443_v18 = vadd.f32 %v3770_v12, %v442_v15  ;;  %v3040_v19 = vpop.f32.mrb[14].mxu1 }
 0x110   :  { %v727_v21 = vmul.f32 0.1, %v451_v14  ;;  %v454_v22 = vadd.f32 %v3040_v19, %v3770_v12  ;;  %v445_v23 = vpop.f32.mrb[15].mxu1  ;;  %vm663_vm12 = vcmp.gt.f32.partialorder %v451_v14, 0.0 }
 0x111   :  { %v725_v24 = vmul.f32 0.1, %v443_v18  ;;  %v446_v25 = vadd.f32 %v3770_v12, %v445_v23  ;;  %vm661_vm13 = vcmp.gt.f32.partialorder %v443_v18, 0.0 }
 0x112   :  { %vm664_vm14 = vcmp.gt.f32.partialorder %v454_v22, 0.0  ;;  %v728_v26 = vmul.f32 0.1, %v454_v22  ;;  %3162 = vmatmul.mubr.bf16.gmra.mrb[120].mxu1 %v3470_v16  ;;  %v3863_v28 = vsel %vm663_vm12, %v451_v14, %v727_v21 }
 0x113   :  { %vm662_vm15 = vcmp.gt.f32.partialorder %v446_v25, 0.0  ;;  %v726_v27 = vmul.f32 0.1, %v446_v25  ;;  %3165 = vmatprep.mubr.bf16.mxu1 %v3471_v20  ;;  %v3867_v36 = vsel %vm661_vm13, %v443_v18, %v725_v24 }
 0x114   :  { %v3865_v29 = vsel %vm664_vm14, %v454_v22, %v728_v26 }
 0x115   :  { %v3043_v33 = vpop.f32.mrb[16].mxu1  ;;  %v3869_v37 = vsel %vm662_vm15, %v446_v25, %v726_v27 }
 0x116   :  { %v467_v40 = vadd.f32 %v3043_v33, %v3770_v12  ;;  %v458_v41 = vpop.f32.mrb[17].mxu1 }
 0x117   :  { %v459_v44 = vadd.f32 %v3770_v12, %v458_v41  ;;  %v3044_v45 = vpop.f32.mrb[18].mxu1 }
 0x118   :  { %v731_v46 = vmul.f32 0.1, %v467_v40  ;;  %v470_v47 = vadd.f32 %v3044_v45, %v3770_v12  ;;  %v461_v48 = vpop.f32.mrb[19].mxu1  ;;  %vm667_vm0 = vcmp.gt.f32.partialorder %v467_v40, 0.0 }
 0x119   :  { %v729_v49 = vmul.f32 0.1, %v459_v44  ;;  %v462_v53 = vadd.f32 %v3770_v12, %v461_v48  ;;  %vm665_vm1 = vcmp.gt.f32.partialorder %v459_v44, 0.0 }
 0x11a   :  { %vm668_vm2 = vcmp.gt.f32.partialorder %v470_v47, 0.0  ;;  %v732_v57 = vmul.f32 0.1, %v470_v47  ;;  %3166 = vmatmul.mubr.bf16.gmra.mrb[124].mxu1 %v3472_v42  ;;  %v3882_v59 = vsel %vm667_vm0, %v467_v40, %v731_v46 }
 0x11b   :  { %vm666_vm3 = vcmp.gt.f32.partialorder %v462_v53, 0.0  ;;  %v730_v58 = vmul.f32 0.1, %v462_v53  ;;  %v3886_v63 = vsel %vm665_vm1, %v459_v44, %v729_v49 }
 0x11c   :  { %v3884_v61 = vsel %vm668_vm2, %v470_v47, %v732_v57 }
 0x11d   :  { %v3047_v62 = vpop.f32.mrb[20].mxu1  ;;  %v3888_v0 = vsel %vm666_vm3, %v462_v53, %v730_v58 }
 0x11e   :  { %v483_v2 = vadd.f32 %v3047_v62, %v3770_v12  ;;  %v474_v3 = vpop.f32.mrb[21].mxu1 }
 0x11f   :  { %v475_v5 = vadd.f32 %v3770_v12, %v474_v3  ;;  %v3048_v6 = vpop.f32.mrb[22].mxu1 }
 0x120   :  { %v735_v9 = vmul.f32 0.1, %v483_v2  ;;  %v486_v14 = vadd.f32 %v3048_v6, %v3770_v12  ;;  %v477_v15 = vpop.f32.mrb[23].mxu1  ;;  %vm671_vm4 = vcmp.gt.f32.partialorder %v483_v2, 0.0 }
 0x121   :  { %v733_v16 = vmul.f32 0.1, %v475_v5  ;;  %v478_v18 = vadd.f32 %v3770_v12, %v477_v15  ;;  %vm669_vm5 = vcmp.gt.f32.partialorder %v475_v5, 0.0 }
 0x122   :  { %vm672_vm6 = vcmp.gt.f32.partialorder %v486_v14, 0.0  ;;  %v736_v19 = vmul.f32 0.1, %v486_v14  ;;  %v3898_v21 = vsel %vm671_vm4, %v483_v2, %v735_v9 }
 0x123   :  { %vm670_vm7 = vcmp.gt.f32.partialorder %v478_v18, 0.0  ;;  %v734_v20 = vmul.f32 0.1, %v478_v18  ;;  %v3902_v24 = vsel %vm669_vm5, %v475_v5, %v733_v16 }
 0x124   :  { %v3900_v22 = vsel %vm672_vm6, %v486_v14, %v736_v19 }
 0x125   :  { %v3051_v23 = vpop.f32.mrb[24].mxu1  ;;  %v3904_v25 = vsel %vm670_vm7, %v478_v18, %v734_v20 }
 0x126   :  { %v499_v27 = vadd.f32 %v3051_v23, %v3770_v12  ;;  %v490_v33 = vpop.f32.mrb[25].mxu1 }
 0x127   :  { %v491_v41 = vadd.f32 %v3770_v12, %v490_v33  ;;  %v3052_v42 = vpop.f32.mrb[26].mxu1 }
 0x128   :  { %v739_v44 = vmul.f32 0.1, %v499_v27  ;;  %v502_v45 = vadd.f32 %v3052_v42, %v3770_v12  ;;  %v493_v46 = vpop.f32.mrb[27].mxu1  ;;  %vm675_vm8 = vcmp.gt.f32.partialorder %v499_v27, 0.0 }
 0x129   :  { %v737_v47 = vmul.f32 0.1, %v491_v41  ;;  %v494_v48 = vadd.f32 %v3770_v12, %v493_v46  ;;  %vm673_vm9 = vcmp.gt.f32.partialorder %v491_v41, 0.0 }
 0x12a   :  { %vm676_vm10 = vcmp.gt.f32.partialorder %v502_v45, 0.0  ;;  %v740_v49 = vmul.f32 0.1, %v502_v45  ;;  %v3914_v57 = vsel %vm675_vm8, %v499_v27, %v739_v44 }
 0x12b   :  { %vm674_vm11 = vcmp.gt.f32.partialorder %v494_v48, 0.0  ;;  %v738_v53 = vmul.f32 0.1, %v494_v48  ;;  %v3918_v2 = vsel %vm673_vm9, %v491_v41, %v737_v47 }
 0x12c   :  { %v3916_v58 = vsel %vm676_vm10, %v502_v45, %v740_v49 }
 0x12d   :  { %v3055_v62 = vpop.f32.mrb[28].mxu1  ;;  %v3920_v3 = vsel %vm674_vm11, %v494_v48, %v738_v53 }
 0x12e   :  { %v515_v6 = vadd.f32 %v3055_v62, %v3770_v12  ;;  %v506_v9 = vpop.f32.mrb[29].mxu1 }
 0x12f   :  { %v507_v15 = vadd.f32 %v3770_v12, %v506_v9  ;;  %v3056_v16 = vpop.f32.mrb[30].mxu1 }
 0x130   :  { %v743_v18 = vmul.f32 0.1, %v515_v6  ;;  %v518_v19 = vadd.f32 %v3056_v16, %v3770_v12  ;;  %v509_v20 = vpop.f32.mrb[31].mxu1  ;;  %vm679_vm12 = vcmp.gt.f32.partialorder %v515_v6, 0.0 }
 0x131   :  { %v741_v23 = vmul.f32 0.1, %v507_v15  ;;  %v510_v27 = vadd.f32 %v3770_v12, %v509_v20  ;;  %vm677_vm13 = vcmp.gt.f32.partialorder %v507_v15, 0.0 }
 0x132   :  { %vm680_vm14 = vcmp.gt.f32.partialorder %v518_v19, 0.0  ;;  %v744_v33 = vmul.f32 0.1, %v518_v19  ;;  %v3930_v42 = vsel %vm679_vm12, %v515_v6, %v743_v18 }
 0x133   :  { %vm678_vm15 = vcmp.gt.f32.partialorder %v510_v27, 0.0  ;;  %v742_v41 = vmul.f32 0.1, %v510_v27  ;;  %v3934_v46 = vsel %vm677_vm13, %v507_v15, %v741_v23 }
 0x134   :  { %v3932_v44 = vsel %vm680_vm14, %v518_v19, %v744_v33 }
 0x135   :  { %v3059_v45 = vpop.f32.mrb[32].mxu1  ;;  %v3936_v47 = vsel %vm678_vm15, %v510_v27, %v742_v41 }
 0x136   :  { %v531_v49 = vadd.f32 %v3059_v45, %v3770_v12  ;;  %v522_v53 = vpop.f32.mrb[33].mxu1 }
 0x137   :  { %v523_v9 = vadd.f32 %v3770_v12, %v522_v53  ;;  %v3060_v6 = vpop.f32.mrb[34].mxu1 }
 0x138   :  { %v747_v16 = vmul.f32 0.1, %v531_v49  ;;  %v534_v18 = vadd.f32 %v3060_v6, %v3770_v12  ;;  %v525_v19 = vpop.f32.mrb[35].mxu1  ;;  %vm683_vm0 = vcmp.gt.f32.partialorder %v531_v49, 0.0 }
 0x139   :  { %v745_v15 = vmul.f32 0.1, %v523_v9  ;;  %v526_v20 = vadd.f32 %v3770_v12, %v525_v19  ;;  %vm681_vm1 = vcmp.gt.f32.partialorder %v523_v9, 0.0 }
 0x13a   :  { %vm684_vm2 = vcmp.gt.f32.partialorder %v534_v18, 0.0  ;;  %v748_v23 = vmul.f32 0.1, %v534_v18  ;;  %v3946_v33 = vsel %vm683_vm0, %v531_v49, %v747_v16 }
 0x13b   :  { %vm682_vm3 = vcmp.gt.f32.partialorder %v526_v20, 0.0  ;;  %v746_v27 = vmul.f32 0.1, %v526_v20  ;;  %v3950_v53 = vsel %vm681_vm1, %v523_v9, %v745_v15 }
 0x13c   :  { %v3948_v41 = vsel %vm684_vm2, %v534_v18, %v748_v23 }
 0x13d   :  { %v3063_v45 = vpop.f32.mrb[36].mxu1  ;;  %v3952_v48 = vsel %vm682_vm3, %v526_v20, %v746_v27 }
 0x13e   :  { %v547_v62 = vadd.f32 %v3063_v45, %v3770_v12  ;;  %v538_v19 = vpop.f32.mrb[37].mxu1 }
 0x13f   :  { %v539_v14 = vadd.f32 %v3770_v12, %v538_v19  ;;  %v3064_v49 = vpop.f32.mrb[38].mxu1 }
 0x140   :  { %v751_v16 = vmul.f32 0.1, %v547_v62  ;;  %v550_v18 = vadd.f32 %v3064_v49, %v3770_v12  ;;  %v541_v23 = vpop.f32.mrb[39].mxu1  ;;  %vm687_vm4 = vcmp.gt.f32.partialorder %v547_v62, 0.0 }
 0x141   :  { %v749_v9 = vmul.f32 0.1, %v539_v14  ;;  %v542_v15 = vadd.f32 %v3770_v12, %v541_v23  ;;  %vm685_vm5 = vcmp.gt.f32.partialorder %v539_v14, 0.0 }
 0x142   :  { %vm688_vm6 = vcmp.gt.f32.partialorder %v550_v18, 0.0  ;;  %v752_v20 = vmul.f32 0.1, %v550_v18  ;;  %v3962_v45 = vsel %vm687_vm4, %v547_v62, %v751_v16 }
 0x143   :  { %vm686_vm7 = vcmp.gt.f32.partialorder %v542_v15, 0.0  ;;  %v750_v27 = vmul.f32 0.1, %v542_v15  ;;  %v3966_v19 = vsel %vm685_vm5, %v539_v14, %v749_v9 }
 0x144   :  { %v3964_v6 = vsel %vm688_vm6, %v550_v18, %v752_v20 }
 0x145   :  { %v3067_v5 = vpop.f32.mrb[40].mxu1  ;;  %v3968_v26 = vsel %vm686_vm7, %v542_v15, %v750_v27 }
 0x146   :  { %v563_v40 = vadd.f32 %v3067_v5, %v3770_v12  ;;  %v554_v23 = vpop.f32.mrb[41].mxu1 }
 0x147   :  { %v555_v4 = vadd.f32 %v3770_v12, %v554_v23  ;;  %v3068_v62 = vpop.f32.mrb[42].mxu1 }
 0x148   :  { %v755_v16 = vmul.f32 0.1, %v563_v40  ;;  %v566_v18 = vadd.f32 %v3068_v62, %v3770_v12  ;;  %v557_v20 = vpop.f32.mrb[43].mxu1  ;;  %vm691_vm8 = vcmp.gt.f32.partialorder %v563_v40, 0.0 }
 0x149   :  { %v753_v14 = vmul.f32 0.1, %v555_v4  ;;  %v558_v9 = vadd.f32 %v3770_v12, %v557_v20  ;;  %vm689_vm9 = vcmp.gt.f32.partialorder %v555_v4, 0.0 }
 0x14a   :  { %vm692_vm10 = vcmp.gt.f32.partialorder %v566_v18, 0.0  ;;  %v756_v15 = vmul.f32 0.1, %v566_v18  ;;  %v3978_v27 = vsel %vm691_vm8, %v563_v40, %v755_v16 }
 0x14b   :  { %vm690_vm11 = vcmp.gt.f32.partialorder %v558_v9, 0.0  ;;  %v754_v5 = vmul.f32 0.1, %v558_v9  ;;  %4552 = vst [vmem:[#allocation2_spill] sm:$0xff] %v3978_v27  ;;  %v3982_v23 = vsel %vm689_vm9, %v555_v4, %v753_v14 }
 0x14c   :  { %v3980_v49 = vsel %vm692_vm10, %v566_v18, %v756_v15  ;;  %4554 = vst [vmem:[#allocation4_spill] sm:$0xff] %v3982_v23 }
 0x14d   :  { %4553 = vst [vmem:[#allocation3_spill] sm:$0xff] %v3980_v49  ;;  %v3071_v1 = vpop.f32.mrb[44].mxu1  ;;  %v3984_v38 = vsel %vm690_vm11, %v558_v9, %v754_v5 }
 0x14e   :  { %4555 = vst [vmem:[#allocation5_spill] sm:$0xff] %v3984_v38  ;;  %v579_v43 = vadd.f32 %v3071_v1, %v3770_v12  ;;  %v570_v20 = vpop.f32.mrb[45].mxu1 }
 0x14f   :  { %v571_v17 = vadd.f32 %v3770_v12, %v570_v20  ;;  %v3072_v40 = vpop.f32.mrb[46].mxu1 }
 0x150   :  { %v759_v16 = vmul.f32 0.1, %v579_v43  ;;  %v582_v18 = vadd.f32 %v3072_v40, %v3770_v12  ;;  %v573_v15 = vpop.f32.mrb[47].mxu1  ;;  %vm695_vm12 = vcmp.gt.f32.partialorder %v579_v43, 0.0 }
 0x151   :  { %v757_v4 = vmul.f32 0.1, %v571_v17  ;;  %v574_v14 = vadd.f32 %v3770_v12, %v573_v15  ;;  %vm693_vm13 = vcmp.gt.f32.partialorder %v571_v17, 0.0 }
 0x152   :  { %vm696_vm14 = vcmp.gt.f32.partialorder %v582_v18, 0.0  ;;  %v760_v9 = vmul.f32 0.1, %v582_v18  ;;  %v3994_v5 = vsel %vm695_vm12, %v579_v43, %v759_v16 }
 0x153   :  { %vm694_vm15 = vcmp.gt.f32.partialorder %v574_v14, 0.0  ;;  %v758_v1 = vmul.f32 0.1, %v574_v14  ;;  %4556 = vst [vmem:[#allocation6_spill] sm:$0xff] %v3994_v5  ;;  %v3998_v20 = vsel %vm693_vm13, %v571_v17, %v757_v4 }
 0x154   :  { %v3996_v62 = vsel %vm696_vm14, %v582_v18, %v760_v9  ;;  %4558 = vst [vmem:[#allocation8_spill] sm:$0xff] %v3998_v20 }
 0x155   :  { %4557 = vst [vmem:[#allocation7_spill] sm:$0xff] %v3996_v62  ;;  %v3075_v13 = vpop.f32.mrb[48].mxu1  ;;  %v4000_v56 = vsel %vm694_vm15, %v574_v14, %v758_v1 }
 0x156   :  { %4559 = vst [vmem:[#allocation9_spill] sm:$0xff] %v4000_v56  ;;  %v595_v60 = vadd.f32 %v3075_v13, %v3770_v12  ;;  %v586_v15 = vpop.f32.mrb[49].mxu1 }
 0x157   :  { %v587_v39 = vadd.f32 %v3770_v12, %v586_v15  ;;  %v3076_v43 = vpop.f32.mrb[50].mxu1 }
 0x158   :  { %v763_v16 = vmul.f32 0.1, %v595_v60  ;;  %v598_v18 = vadd.f32 %v3076_v43, %v3770_v12  ;;  %v589_v9 = vpop.f32.mrb[51].mxu1  ;;  %vm699_vm0 = vcmp.gt.f32.partialorder %v595_v60, 0.0 }
 0x159   :  { %v761_v17 = vmul.f32 0.1, %v587_v39  ;;  %v590_v4 = vadd.f32 %v3770_v12, %v589_v9  ;;  %vm697_vm1 = vcmp.gt.f32.partialorder %v587_v39, 0.0 }
 0x15a   :  { %vm700_vm2 = vcmp.gt.f32.partialorder %v598_v18, 0.0  ;;  %v764_v14 = vmul.f32 0.1, %v598_v18  ;;  %v4010_v1 = vsel %vm699_vm0, %v595_v60, %v763_v16 }
 0x15b   :  { %vm698_vm3 = vcmp.gt.f32.partialorder %v590_v4, 0.0  ;;  %v762_v13 = vmul.f32 0.1, %v590_v4  ;;  %4560 = vst [vmem:[#allocation10_spill] sm:$0xff] %v4010_v1  ;;  %v4014_v15 = vsel %vm697_vm1, %v587_v39, %v761_v17 }
 0x15c   :  { %v4012_v40 = vsel %vm700_vm2, %v598_v18, %v764_v14  ;;  %4562 = vst [vmem:[#allocation12_spill] sm:$0xff] %v4014_v15 }
 0x15d   :  { %4561 = vst [vmem:[#allocation11_spill] sm:$0xff] %v4012_v40  ;;  %v3079_v32 = vpop.f32.mrb[52].mxu1  ;;  %v4016_v5 = vsel %vm698_vm3, %v590_v4, %v762_v13 }
 0x15e   :  { %4563 = vst [vmem:[#allocation13_spill] sm:$0xff] %v4016_v5  ;;  %v611_v62 = vadd.f32 %v3079_v32, %v3770_v12  ;;  %v602_v9 = vpop.f32.mrb[53].mxu1 }
 0x15f   :  { %v603_v56 = vadd.f32 %v3770_v12, %v602_v9  ;;  %v3080_v60 = vpop.f32.mrb[54].mxu1 }
 0x160   :  { %v767_v16 = vmul.f32 0.1, %v611_v62  ;;  %v614_v18 = vadd.f32 %v3080_v60, %v3770_v12  ;;  %v605_v14 = vpop.f32.mrb[55].mxu1  ;;  %vm703_vm4 = vcmp.gt.f32.partialorder %v611_v62, 0.0 }
 0x161   :  { %v765_v39 = vmul.f32 0.1, %v603_v56  ;;  %v606_v17 = vadd.f32 %v3770_v12, %v605_v14  ;;  %vm701_vm5 = vcmp.gt.f32.partialorder %v603_v56, 0.0 }
 0x162   :  { %vm704_vm6 = vcmp.gt.f32.partialorder %v614_v18, 0.0  ;;  %v768_v4 = vmul.f32 0.1, %v614_v18  ;;  %v4026_v13 = vsel %vm703_vm4, %v611_v62, %v767_v16 }
 0x163   :  { %vm702_vm7 = vcmp.gt.f32.partialorder %v606_v17, 0.0  ;;  %v766_v32 = vmul.f32 0.1, %v606_v17  ;;  %4564 = vst [vmem:[#allocation14_spill] sm:$0xff] %v4026_v13  ;;  %v4030_v9 = vsel %vm701_vm5, %v603_v56, %v765_v39 }
 0x164   :  { %v4028_v43 = vsel %vm704_vm6, %v614_v18, %v768_v4  ;;  %4566 = vst [vmem:[#allocation16_spill] sm:$0xff] %v4030_v9 }
 0x165   :  { %4565 = vst [vmem:[#allocation15_spill] sm:$0xff] %v4028_v43  ;;  %v3083_v20 = vpop.f32.mrb[56].mxu1  ;;  %v4032_v1 = vsel %vm702_vm7, %v606_v17, %v766_v32 }
 0x166   :  { %4567 = vst [vmem:[#allocation17_spill] sm:$0xff] %v4032_v1  ;;  %v627_v40 = vadd.f32 %v3083_v20, %v3770_v12  ;;  %v618_v14 = vpop.f32.mrb[57].mxu1 }
 0x167   :  { %v619_v5 = vadd.f32 %v3770_v12, %v618_v14  ;;  %v3084_v62 = vpop.f32.mrb[58].mxu1 }
 0x168   :  { %v771_v16 = vmul.f32 0.1, %v627_v40  ;;  %v630_v18 = vadd.f32 %v3084_v62, %v3770_v12  ;;  %v621_v4 = vpop.f32.mrb[59].mxu1  ;;  %vm707_vm8 = vcmp.gt.f32.partialorder %v627_v40, 0.0 }
 0x169   :  { %v769_v56 = vmul.f32 0.1, %v619_v5  ;;  %v622_v39 = vadd.f32 %v3770_v12, %v621_v4  ;;  %vm705_vm9 = vcmp.gt.f32.partialorder %v619_v5, 0.0 }
 0x16a   :  { %vm708_vm10 = vcmp.gt.f32.partialorder %v630_v18, 0.0  ;;  %v772_v17 = vmul.f32 0.1, %v630_v18  ;;  %v4042_v32 = vsel %vm707_vm8, %v627_v40, %v771_v16 }
 0x16b   :  { %vm706_vm11 = vcmp.gt.f32.partialorder %v622_v39, 0.0  ;;  %v770_v20 = vmul.f32 0.1, %v622_v39  ;;  %4568 = vst [vmem:[#allocation18_spill] sm:$0xff] %v4042_v32  ;;  %v4046_v14 = vsel %vm705_vm9, %v619_v5, %v769_v56 }
 0x16c   :  { %v4044_v60 = vsel %vm708_vm10, %v630_v18, %v772_v17  ;;  %4570 = vst [vmem:[#allocation20_spill] sm:$0xff] %v4046_v14 }
 0x16d   :  { %4569 = vst [vmem:[#allocation19_spill] sm:$0xff] %v4044_v60  ;;  %v3087_v15 = vpop.f32.mrb[60].mxu1  ;;  %v4048_v13 = vsel %vm706_vm11, %v622_v39, %v770_v20  ;;  %v4061_v20 = vld [vmem:[%s4525_s5] ss:$0 sm:$0xff] }
 0x16e   :  { %4571 = vst [vmem:[#allocation21_spill] sm:$0xff] %v4048_v13  ;;  %v643_v43 = vadd.f32 %v3087_v15, %v3770_v12  ;;  %v634_v4 = vpop.f32.mrb[61].mxu1 }
 0x16f   :  { %v635_v1 = vadd.f32 %v3770_v12, %v634_v4  ;;  %v3088_v40 = vpop.f32.mrb[62].mxu1 }
 0x170   :  { %v775_v16 = vmul.f32 0.1, %v643_v43  ;;  %v646_v18 = vadd.f32 %v3088_v40, %v3770_v12  ;;  %v637_v17 = vpop.f32.mrb[63].mxu1  ;;  %vm711_vm12 = vcmp.gt.f32.partialorder %v643_v43, 0.0 }
 0x171   :  { %v773_v5 = vmul.f32 0.1, %v635_v1  ;;  %v638_v56 = vadd.f32 %v3770_v12, %v637_v17  ;;  %vm709_vm13 = vcmp.gt.f32.partialorder %v635_v1, 0.0 }
 0x172   :  { %vm712_vm14 = vcmp.gt.f32.partialorder %v646_v18, 0.0  ;;  %v776_v39 = vmul.f32 0.1, %v646_v18  ;;  %v4063_v4 = vsel %vm711_vm12, %v643_v43, %v775_v16 }
 0x173   :  { %vm710_vm15 = vcmp.gt.f32.partialorder %v638_v56, 0.0  ;;  %v774_v15 = vmul.f32 0.1, %v638_v56  ;;  %4572 = vst [vmem:[#allocation22_spill] sm:$0xff] %v4063_v4  ;;  %v4067_v9 = vsel %vm709_vm13, %v635_v1, %v773_v5 }
 0x174   :  { %v4065_v62 = vsel %vm712_vm14, %v646_v18, %v776_v39  ;;  %4574 = vst [vmem:[#allocation24_spill] sm:$0xff] %v4067_v9 }
 0x175   :  { %4573 = vst [vmem:[#allocation23_spill] sm:$0xff] %v4065_v62  ;;  %v3107_v40 = vpop.f32.mrb[64].mxu1  ;;  %v4069_v32 = vsel %vm710_vm15, %v638_v56, %v774_v15 }
 0x176   :  { %4575 = vst [vmem:[#allocation25_spill] sm:$0xff] %v4069_v32  ;;  %v1211_v17 = vadd.f32 %v3107_v40, %v4061_v20  ;;  %v1202_v60 = vpop.f32.mrb[65].mxu1 }
 0x177   :  { %v1203_v13 = vadd.f32 %v4061_v20, %v1202_v60  ;;  %v3108_v43 = vpop.f32.mrb[66].mxu1 }
 0x178   :  { %v1523_v16 = vmul.f32 0.1, %v1211_v17  ;;  %v1214_v18 = vadd.f32 %v3108_v43, %v4061_v20  ;;  %v1205_v39 = vpop.f32.mrb[67].mxu1  ;;  %vm1459_vm0 = vcmp.gt.f32.partialorder %v1211_v17, 0.0 }
 0x179   :  { %v1521_v1 = vmul.f32 0.1, %v1203_v13  ;;  %v1206_v5 = vadd.f32 %v4061_v20, %v1205_v39  ;;  %vm1457_vm2 = vcmp.gt.f32.partialorder %v1203_v13, 0.0  ;;  %v3482_v39 = vld [vmem:[%s4524_s6 + $0x8] sm:$0xff]  }
 0x17a   :  { %vm1460_vm1 = vcmp.gt.f32.partialorder %v1214_v18, 0.0  ;;  %v1524_v56 = vmul.f32 0.1, %v1214_v18  ;;  %v1587_v40 = vsel %vm1459_vm0, %v1211_v17, %v1523_v16 }
 0x17b   :  { %v1522_v15 = vmul.f32 0.1, %v1206_v5  ;;  %vm1458_vm3 = vcmp.gt.f32.partialorder %v1206_v5, 0.0  ;;  %v1585_v14 = vsel %vm1457_vm2, %v1203_v13, %v1521_v1 }
 0x17c   :  { %v1588_v12 = vsel %vm1460_vm1, %v1214_v18, %v1524_v56 }
 0x17d   :  { %v3111_v4 = vpop.f32.mrb[68].mxu1  ;;  %v1586_v62 = vsel %vm1458_vm3, %v1206_v5, %v1522_v15  ;;  %v1698_v60 = vpack.c.bf16 %v1588_v12, %v1587_v40 }
 0x17e   :  { %v1227_v9 = vadd.f32 %v3111_v4, %v4061_v20  ;;  %v1218_v32 = vpop.f32.mrb[69].mxu1  ;;  %v1697_v43 = vpack.c.bf16 %v1586_v62, %v1585_v14  ;;  %v3483_v62 = vld [vmem:[%s4524_s6 + $0x10] sm:$0xff]  }
 0x17f   :  { %v1219_v27 = vadd.f32 %v4061_v20, %v1218_v32  ;;  %v3112_v49 = vpop.f32.mrb[70].mxu1 }
 0x180   :  { %v1527_v23 = vmul.f32 0.1, %v1227_v9  ;;  %v1230_v38 = vadd.f32 %v3112_v49, %v4061_v20  ;;  %v1221_v17 = vpop.f32.mrb[71].mxu1  ;;  %3185 = vmatprep.mubr.bf16.mxu0 %v1697_v43  ;;  %vm1463_vm4 = vcmp.gt.f32.partialorder %v1227_v9, 0.0  ;;  %v3484_v43 = vld [vmem:[%s4524_s6 + $0x18] sm:$0xff]  }
 0x181   :  { %v1525_v13 = vmul.f32 0.1, %v1219_v27  ;;  %v1222_v12 = vadd.f32 %v4061_v20, %v1221_v17  ;;  %3186 = vmatmul.mubr.bf16.vlgmr.msra.gmra.mrb[0].mxu0 %v1698_v60  ;;  %vm1461_vm5 = vcmp.gt.f32.partialorder %v1219_v27, 0.0 }
 0x182   :  { %vm1464_vm6 = vcmp.gt.f32.partialorder %v1230_v38, 0.0  ;;  %v1528_v14 = vmul.f32 0.1, %v1230_v38  ;;  %3250 = vmatpush3.bf16.msra.mxu0 %v3816_v50  ;;  %v1591_v49 = vsel %vm1463_vm4, %v1227_v9, %v1527_v23 }
 0x183   :  { %vm1462_vm7 = vcmp.gt.f32.partialorder %v1222_v12, 0.0  ;;  %v1526_v32 = vmul.f32 0.1, %v1222_v12  ;;  %3251 = vmatprep.subr.bf16.mxu0 %v3482_v39  ;;  %v1589_v18 = vsel %vm1461_vm5, %v1219_v27, %v1525_v13 }
 0x184   :  { %v1592_v4 = vsel %vm1464_vm6, %v1230_v38, %v1528_v14 }
 0x185   :  { %v3115_v16 = vpop.f32.mrb[72].mxu1  ;;  %v1590_v1 = vsel %vm1462_vm7, %v1222_v12, %v1526_v32  ;;  %v1700_v5 = vpack.c.bf16 %v1592_v4, %v1591_v49  ;;  %v3485_v12 = vld [vmem:[%s4524_s6 + $0x20] sm:$0xff]  }
 0x186   :  { %v1243_v56 = vadd.f32 %v3115_v16, %v4061_v20  ;;  %v1234_v15 = vpop.f32.mrb[73].mxu1  ;;  %v1699_v40 = vpack.c.bf16 %v1590_v1, %v1589_v18  ;;  %3252 = vmatpush3.bf16.msra.mxu0 %v3482_v39 }
 0x187   :  { %v1235_v50 = vadd.f32 %v4061_v20, %v1234_v15  ;;  %v3116_v60 = vpop.f32.mrb[74].mxu1  ;;  %3253 = vmatprep.subr.bf16.mxu0 %v3483_v62 }
 0x188   :  { %v1531_v17 = vmul.f32 0.1, %v1243_v56  ;;  %v1246_v38 = vadd.f32 %v3116_v60, %v4061_v20  ;;  %v1237_v23 = vpop.f32.mrb[75].mxu1  ;;  %3189 = vmatprep.mubr.bf16.mxu0 %v1699_v40  ;;  %vm1467_vm8 = vcmp.gt.f32.partialorder %v1243_v56, 0.0  ;;  %v3486_v60 = vld [vmem:[%s4524_s6 + $0x28] sm:$0xff]  }
 0x189   :  { %v1529_v27 = vmul.f32 0.1, %v1235_v50  ;;  %v1238_v9 = vadd.f32 %v4061_v20, %v1237_v23  ;;  %3190 = vmatmul.mubr.bf16.gmra.mrb[4].mxu0 %v1700_v5  ;;  %vm1465_vm9 = vcmp.gt.f32.partialorder %v1235_v50, 0.0 }
 0x18a   :  { %vm1468_vm10 = vcmp.gt.f32.partialorder %v1246_v38, 0.0  ;;  %v1532_v39 = vmul.f32 0.1, %v1246_v38  ;;  %3254 = vmatpush3.bf16.msra.mxu0 %v3483_v62  ;;  %v1595_v14 = vsel %vm1467_vm8, %v1243_v56, %v1531_v17 }
 0x18b   :  { %vm1466_vm11 = vcmp.gt.f32.partialorder %v1238_v9, 0.0  ;;  %v1530_v13 = vmul.f32 0.1, %v1238_v9  ;;  %3255 = vmatprep.subr.bf16.mxu0 %v3484_v43  ;;  %v1593_v4 = vsel %vm1465_vm9, %v1235_v50, %v1529_v27 }
 0x18c   :  { %v1596_v32 = vsel %vm1468_vm10, %v1246_v38, %v1532_v39 }
 0x18d   :  { %v3119_v49 = vpop.f32.mrb[76].mxu1  ;;  %v1594_v16 = vsel %vm1466_vm11, %v1238_v9, %v1530_v13  ;;  %v1702_v18 = vpack.c.bf16 %v1596_v32, %v1595_v14  ;;  %v3487_v9 = vld [vmem:[%s4524_s6 + $0x30] sm:$0xff]  }
 0x18e   :  { %v1259_v1 = vadd.f32 %v3119_v49, %v4061_v20  ;;  %v1250_v5 = vpop.f32.mrb[77].mxu1  ;;  %v1701_v15 = vpack.c.bf16 %v1594_v16, %v1593_v4  ;;  %3256 = vmatpush3.bf16.msra.mxu0 %v3484_v43 }
 0x18f   :  { %v1251_v62 = vadd.f32 %v4061_v20, %v1250_v5  ;;  %v3120_v40 = vpop.f32.mrb[78].mxu1  ;;  %3257 = vmatprep.subr.bf16.mxu0 %v3485_v12 }
 0x190   :  { %v1535_v23 = vmul.f32 0.1, %v1259_v1  ;;  %v1262_v56 = vadd.f32 %v3120_v40, %v4061_v20  ;;  %v1253_v17 = vpop.f32.mrb[79].mxu1  ;;  %3193 = vmatprep.mubr.bf16.mxu0 %v1701_v15  ;;  %vm1471_vm12 = vcmp.gt.f32.partialorder %v1259_v1, 0.0  ;;  %v3488_v40 = vld [vmem:[%s4524_s6 + $0x38] sm:$0xff]  }
 0x191   :  { %v1533_v50 = vmul.f32 0.1, %v1251_v62  ;;  %v1254_v38 = vadd.f32 %v4061_v20, %v1253_v17  ;;  %3194 = vmatmul.mubr.bf16.gmra.mrb[8].mxu0 %v1702_v18  ;;  %vm1469_vm13 = vcmp.gt.f32.partialorder %v1251_v62, 0.0 }
 0x192   :  { %vm1472_vm14 = vcmp.gt.f32.partialorder %v1262_v56, 0.0  ;;  %v1536_v43 = vmul.f32 0.1, %v1262_v56  ;;  %3258 = vmatpush3.bf16.msra.mxu0 %v3485_v12  ;;  %v1599_v39 = vsel %vm1471_vm12, %v1259_v1, %v1535_v23 }
 0x193   :  { %vm1470_vm15 = vcmp.gt.f32.partialorder %v1254_v38, 0.0  ;;  %v1534_v27 = vmul.f32 0.1, %v1254_v38  ;;  %3259 = vmatprep.subr.bf16.mxu0 %v3486_v60  ;;  %v1597_v32 = vsel %vm1469_vm13, %v1251_v62, %v1533_v50 }
 0x194   :  { %v1600_v13 = vsel %vm1472_vm14, %v1262_v56, %v1536_v43 }
 0x195   :  { %v3123_v14 = vpop.f32.mrb[80].mxu1  ;;  %v1598_v49 = vsel %vm1470_vm15, %v1254_v38, %v1534_v27  ;;  %v1704_v4 = vpack.c.bf16 %v1600_v13, %v1599_v39 }
 0x196   :  { %v1275_v16 = vadd.f32 %v3123_v14, %v4061_v20  ;;  %v1266_v18 = vpop.f32.mrb[81].mxu1  ;;  %v1703_v5 = vpack.c.bf16 %v1598_v49, %v1597_v32  ;;  %3260 = vmatpush3.bf16.msra.mxu0 %v3486_v60 }
 0x197   :  { %v1267_v12 = vadd.f32 %v4061_v20, %v1266_v18  ;;  %v3124_v15 = vpop.f32.mrb[82].mxu1  ;;  %3261 = vmatprep.subr.bf16.mxu0 %v3487_v9 }
 0x198   :  { %v1539_v17 = vmul.f32 0.1, %v1275_v16  ;;  %v1278_v1 = vadd.f32 %v3124_v15, %v4061_v20  ;;  %v1269_v23 = vpop.f32.mrb[83].mxu1  ;;  %3197 = vmatprep.mubr.bf16.mxu0 %v1703_v5  ;;  %vm1475_vm0 = vcmp.gt.f32.partialorder %v1275_v16, 0.0 }
 0x199   :  { %v1537_v62 = vmul.f32 0.1, %v1267_v12  ;;  %v1270_v56 = vadd.f32 %v4061_v20, %v1269_v23  ;;  %3198 = vmatmul.mubr.bf16.gmra.mrb[12].mxu0 %v1704_v4  ;;  %vm1473_vm1 = vcmp.gt.f32.partialorder %v1267_v12, 0.0 }
 0x19a   :  { %vm1476_vm2 = vcmp.gt.f32.partialorder %v1278_v1, 0.0  ;;  %v1540_v60 = vmul.f32 0.1, %v1278_v1  ;;  %3262 = vmatpush3.bf16.msra.mxu0 %v3487_v9  ;;  %v1603_v38 = vsel %vm1475_vm0, %v1275_v16, %v1539_v17 }
 0x19b   :  { %vm1474_vm3 = vcmp.gt.f32.partialorder %v1270_v56, 0.0  ;;  %v1538_v50 = vmul.f32 0.1, %v1270_v56  ;;  %3263 = vmatprep.subr.bf16.mxu0 %v3488_v40  ;;  %v1601_v39 = vsel %vm1473_vm1, %v1267_v12, %v1537_v62 }
 0x19c   :  { %v1604_v43 = vsel %vm1476_vm2, %v1278_v1, %v1540_v60 }
 0x19d   :  { %v3127_v27 = vpop.f32.mrb[84].mxu1  ;;  %v1602_v13 = vsel %vm1474_vm3, %v1270_v56, %v1538_v50  ;;  %v1706_v14 = vpack.c.bf16 %v1604_v43, %v1603_v38 }
 0x19e   :  { %v1291_v32 = vadd.f32 %v3127_v27, %v4061_v20  ;;  %v1282_v49 = vpop.f32.mrb[85].mxu1  ;;  %v1705_v18 = vpack.c.bf16 %v1602_v13, %v1601_v39  ;;  %3264 = vmatpush3.bf16.msra.mxu0 %v3488_v40 }
 0x19f   :  { %v1283_v4 = vadd.f32 %v4061_v20, %v1282_v49  ;;  %v3128_v5 = vpop.f32.mrb[86].mxu1 }
 0x1a0   :  { %v1543_v15 = vmul.f32 0.1, %v1291_v32  ;;  %v1294_v9 = vadd.f32 %v3128_v5, %v4061_v20  ;;  %v1285_v23 = vpop.f32.mrb[87].mxu1  ;;  %3201 = vmatprep.mubr.bf16.mxu0 %v1705_v18  ;;  %vm1479_vm4 = vcmp.gt.f32.partialorder %v1291_v32, 0.0 }
 0x1a1   :  { %v1541_v16 = vmul.f32 0.1, %v1283_v4  ;;  %v1286_v17 = vadd.f32 %v4061_v20, %v1285_v23  ;;  %3202 = vmatmul.mubr.bf16.gmra.mrb[16].mxu0 %v1706_v14  ;;  %vm1477_vm5 = vcmp.gt.f32.partialorder %v1283_v4, 0.0 }
 0x1a2   :  { %vm1480_vm6 = vcmp.gt.f32.partialorder %v1294_v9, 0.0  ;;  %v1544_v12 = vmul.f32 0.1, %v1294_v9  ;;  %v1607_v62 = vsel %vm1479_vm4, %v1291_v32, %v1543_v15 }
 0x1a3   :  { %vm1478_vm7 = vcmp.gt.f32.partialorder %v1286_v17, 0.0  ;;  %v1542_v1 = vmul.f32 0.1, %v1286_v17  ;;  %v1605_v60 = vsel %vm1477_vm5, %v1283_v4, %v1541_v16 }
 0x1a4   :  { %v1608_v40 = vsel %vm1480_vm6, %v1294_v9, %v1544_v12 }
 0x1a5   :  { %v3131_v56 = vpop.f32.mrb[88].mxu1  ;;  %v1606_v50 = vsel %vm1478_vm7, %v1286_v17, %v1542_v1  ;;  %v1708_v38 = vpack.c.bf16 %v1608_v40, %v1607_v62 }
 0x1a6   :  { %v1307_v43 = vadd.f32 %v3131_v56, %v4061_v20  ;;  %v1298_v27 = vpop.f32.mrb[89].mxu1  ;;  %v1707_v39 = vpack.c.bf16 %v1606_v50, %v1605_v60 }
 0x1a7   :  { %v1299_v13 = vadd.f32 %v4061_v20, %v1298_v27  ;;  %v3132_v49 = vpop.f32.mrb[90].mxu1 }
 0x1a8   :  { %v1547_v18 = vmul.f32 0.1, %v1307_v43  ;;  %v1310_v14 = vadd.f32 %v3132_v49, %v4061_v20  ;;  %v1301_v5 = vpop.f32.mrb[91].mxu1  ;;  %3205 = vmatprep.mubr.bf16.mxu0 %v1707_v39  ;;  %vm1483_vm8 = vcmp.gt.f32.partialorder %v1307_v43, 0.0 }
 0x1a9   :  { %v1545_v23 = vmul.f32 0.1, %v1299_v13  ;;  %v1302_v32 = vadd.f32 %v4061_v20, %v1301_v5  ;;  %3206 = vmatmul.mubr.bf16.gmra.mrb[20].mxu0 %v1708_v38  ;;  %vm1481_vm9 = vcmp.gt.f32.partialorder %v1299_v13, 0.0 }
 0x1aa   :  { %vm1484_vm10 = vcmp.gt.f32.partialorder %v1310_v14, 0.0  ;;  %v1548_v4 = vmul.f32 0.1, %v1310_v14  ;;  %v1611_v9 = vsel %vm1483_vm8, %v1307_v43, %v1547_v18 }
 0x1ab   :  { %vm1482_vm11 = vcmp.gt.f32.partialorder %v1302_v32, 0.0  ;;  %v1546_v15 = vmul.f32 0.1, %v1302_v32  ;;  %v1609_v12 = vsel %vm1481_vm9, %v1299_v13, %v1545_v23 }
 0x1ac   :  { %v1612_v16 = vsel %vm1484_vm10, %v1310_v14, %v1548_v4 }
 0x1ad   :  { %v3135_v17 = vpop.f32.mrb[92].mxu1  ;;  %v1610_v1 = vsel %vm1482_vm11, %v1302_v32, %v1546_v15  ;;  %v1710_v62 = vpack.c.bf16 %v1612_v16, %v1611_v9 }
 0x1ae   :  { %v1323_v40 = vadd.f32 %v3135_v17, %v4061_v20  ;;  %v1314_v56 = vpop.f32.mrb[93].mxu1  ;;  %v1709_v60 = vpack.c.bf16 %v1610_v1, %v1609_v12 }
 0x1af   :  { %v1315_v50 = vadd.f32 %v4061_v20, %v1314_v56  ;;  %v3136_v27 = vpop.f32.mrb[94].mxu1 }
 0x1b0   :  { %v1551_v39 = vmul.f32 0.1, %v1323_v40  ;;  %v1326_v38 = vadd.f32 %v3136_v27, %v4061_v20  ;;  %v1317_v49 = vpop.f32.mrb[95].mxu1  ;;  %3209 = vmatprep.mubr.bf16.mxu0 %v1709_v60  ;;  %vm1487_vm12 = vcmp.gt.f32.partialorder %v1323_v40, 0.0 }
 0x1b1   :  { %v1549_v5 = vmul.f32 0.1, %v1315_v50  ;;  %v1318_v43 = vadd.f32 %v4061_v20, %v1317_v49  ;;  %3210 = vmatmul.mubr.bf16.gmra.mrb[24].mxu0 %v1710_v62  ;;  %vm1485_vm13 = vcmp.gt.f32.partialorder %v1315_v50, 0.0 }
 0x1b2   :  { %vm1488_vm14 = vcmp.gt.f32.partialorder %v1326_v38, 0.0  ;;  %v1552_v13 = vmul.f32 0.1, %v1326_v38  ;;  %v1615_v14 = vsel %vm1487_vm12, %v1323_v40, %v1551_v39 }
 0x1b3   :  { %vm1486_vm15 = vcmp.gt.f32.partialorder %v1318_v43, 0.0  ;;  %v1550_v18 = vmul.f32 0.1, %v1318_v43  ;;  %v1613_v4 = vsel %vm1485_vm13, %v1315_v50, %v1549_v5 }
 0x1b4   :  { %v1616_v23 = vsel %vm1488_vm14, %v1326_v38, %v1552_v13 }
 0x1b5   :  { %v3139_v32 = vpop.f32.mrb[96].mxu1  ;;  %v1614_v15 = vsel %vm1486_vm15, %v1318_v43, %v1550_v18  ;;  %v1712_v9 = vpack.c.bf16 %v1616_v23, %v1615_v14 }
 0x1b6   :  { %v1339_v16 = vadd.f32 %v3139_v32, %v4061_v20  ;;  %v1330_v17 = vpop.f32.mrb[97].mxu1  ;;  %v1711_v12 = vpack.c.bf16 %v1614_v15, %v1613_v4 }
 0x1b7   :  { %v1331_v1 = vadd.f32 %v4061_v20, %v1330_v17  ;;  %v3140_v56 = vpop.f32.mrb[98].mxu1 }
 0x1b8   :  { %v1555_v60 = vmul.f32 0.1, %v1339_v16  ;;  %v1342_v62 = vadd.f32 %v3140_v56, %v4061_v20  ;;  %v1333_v27 = vpop.f32.mrb[99].mxu1  ;;  %3213 = vmatprep.mubr.bf16.mxu0 %v1711_v12  ;;  %vm1491_vm0 = vcmp.gt.f32.partialorder %v1339_v16, 0.0 }
 0x1b9   :  { %v1553_v49 = vmul.f32 0.1, %v1331_v1  ;;  %v1334_v40 = vadd.f32 %v4061_v20, %v1333_v27  ;;  %3214 = vmatmul.mubr.bf16.gmra.mrb[28].mxu0 %v1712_v9  ;;  %vm1489_vm1 = vcmp.gt.f32.partialorder %v1331_v1, 0.0 }
 0x1ba   :  { %vm1492_vm2 = vcmp.gt.f32.partialorder %v1342_v62, 0.0  ;;  %v1556_v50 = vmul.f32 0.1, %v1342_v62  ;;  %v1619_v38 = vsel %vm1491_vm0, %v1339_v16, %v1555_v60 }
 0x1bb   :  { %vm1490_vm3 = vcmp.gt.f32.partialorder %v1334_v40, 0.0  ;;  %v1554_v39 = vmul.f32 0.1, %v1334_v40  ;;  %v1617_v13 = vsel %vm1489_vm1, %v1331_v1, %v1553_v49 }
 0x1bc   :  { %v1620_v5 = vsel %vm1492_vm2, %v1342_v62, %v1556_v50 }
 0x1bd   :  { %v3143_v43 = vpop.f32.mrb[100].mxu1  ;;  %v1618_v18 = vsel %vm1490_vm3, %v1334_v40, %v1554_v39  ;;  %v1714_v14 = vpack.c.bf16 %v1620_v5, %v1619_v38 }
 0x1be   :  { %v1355_v23 = vadd.f32 %v3143_v43, %v4061_v20  ;;  %v1346_v32 = vpop.f32.mrb[101].mxu1  ;;  %v1713_v4 = vpack.c.bf16 %v1618_v18, %v1617_v13 }
 0x1bf   :  { %v1347_v15 = vadd.f32 %v4061_v20, %v1346_v32  ;;  %v3144_v17 = vpop.f32.mrb[102].mxu1 }
 0x1c0   :  { %v1559_v12 = vmul.f32 0.1, %v1355_v23  ;;  %v1358_v9 = vadd.f32 %v3144_v17, %v4061_v20  ;;  %v1349_v56 = vpop.f32.mrb[103].mxu1  ;;  %3217 = vmatprep.mubr.bf16.mxu0 %v1713_v4  ;;  %vm1495_vm4 = vcmp.gt.f32.partialorder %v1355_v23, 0.0 }
 0x1c1   :  { %v1557_v27 = vmul.f32 0.1, %v1347_v15  ;;  %v1350_v16 = vadd.f32 %v4061_v20, %v1349_v56  ;;  %3218 = vmatmul.mubr.bf16.gmra.mrb[32].mxu0 %v1714_v14  ;;  %vm1493_vm5 = vcmp.gt.f32.partialorder %v1347_v15, 0.0 }
 0x1c2   :  { %vm1496_vm6 = vcmp.gt.f32.partialorder %v1358_v9, 0.0  ;;  %v1560_v1 = vmul.f32 0.1, %v1358_v9  ;;  %v1623_v62 = vsel %vm1495_vm4, %v1355_v23, %v1559_v12 }
 0x1c3   :  { %vm1494_vm7 = vcmp.gt.f32.partialorder %v1350_v16, 0.0  ;;  %v1558_v60 = vmul.f32 0.1, %v1350_v16  ;;  %v1621_v50 = vsel %vm1493_vm5, %v1347_v15, %v1557_v27 }
 0x1c4   :  { %v1624_v49 = vsel %vm1496_vm6, %v1358_v9, %v1560_v1 }
 0x1c5   :  { %v3147_v40 = vpop.f32.mrb[104].mxu1  ;;  %v1622_v39 = vsel %vm1494_vm7, %v1350_v16, %v1558_v60  ;;  %v1716_v38 = vpack.c.bf16 %v1624_v49, %v1623_v62 }
 0x1c6   :  { %v1371_v5 = vadd.f32 %v3147_v40, %v4061_v20  ;;  %v1362_v43 = vpop.f32.mrb[105].mxu1  ;;  %v1715_v13 = vpack.c.bf16 %v1622_v39, %v1621_v50 }
 0x1c7   :  { %v1363_v18 = vadd.f32 %v4061_v20, %v1362_v43  ;;  %v3148_v32 = vpop.f32.mrb[106].mxu1 }
 0x1c8   :  { %v1563_v4 = vmul.f32 0.1, %v1371_v5  ;;  %v1374_v14 = vadd.f32 %v3148_v32, %v4061_v20  ;;  %v1365_v17 = vpop.f32.mrb[107].mxu1  ;;  %3221 = vmatprep.mubr.bf16.mxu0 %v1715_v13  ;;  %vm1499_vm8 = vcmp.gt.f32.partialorder %v1371_v5, 0.0 }
 0x1c9   :  { %v1561_v56 = vmul.f32 0.1, %v1363_v18  ;;  %v1366_v23 = vadd.f32 %v4061_v20, %v1365_v17  ;;  %3222 = vmatmul.mubr.bf16.gmra.mrb[36].mxu0 %v1716_v38  ;;  %vm1497_vm9 = vcmp.gt.f32.partialorder %v1363_v18, 0.0 }
 0x1ca   :  { %vm1500_vm10 = vcmp.gt.f32.partialorder %v1374_v14, 0.0  ;;  %v1564_v15 = vmul.f32 0.1, %v1374_v14  ;;  %v1627_v9 = vsel %vm1499_vm8, %v1371_v5, %v1563_v4 }
 0x1cb   :  { %vm1498_vm11 = vcmp.gt.f32.partialorder %v1366_v23, 0.0  ;;  %v1562_v12 = vmul.f32 0.1, %v1366_v23  ;;  %v1625_v1 = vsel %vm1497_vm9, %v1363_v18, %v1561_v56 }
 0x1cc   :  { %v1628_v27 = vsel %vm1500_vm10, %v1374_v14, %v1564_v15 }
 0x1cd   :  { %v3151_v16 = vpop.f32.mrb[108].mxu1  ;;  %v1626_v60 = vsel %vm1498_vm11, %v1366_v23, %v1562_v12  ;;  %v1718_v62 = vpack.c.bf16 %v1628_v27, %v1627_v9 }
 0x1ce   :  { %v1387_v49 = vadd.f32 %v3151_v16, %v4061_v20  ;;  %v1378_v40 = vpop.f32.mrb[109].mxu1  ;;  %v1717_v50 = vpack.c.bf16 %v1626_v60, %v1625_v1 }
 0x1cf   :  { %v1379_v39 = vadd.f32 %v4061_v20, %v1378_v40  ;;  %v3152_v43 = vpop.f32.mrb[110].mxu1 }
 0x1d0   :  { %v1567_v13 = vmul.f32 0.1, %v1387_v49  ;;  %v1390_v38 = vadd.f32 %v3152_v43, %v4061_v20  ;;  %v1381_v32 = vpop.f32.mrb[111].mxu1  ;;  %3225 = vmatprep.mubr.bf16.mxu0 %v1717_v50  ;;  %vm1503_vm12 = vcmp.gt.f32.partialorder %v1387_v49, 0.0 }
 0x1d1   :  { %v1565_v17 = vmul.f32 0.1, %v1379_v39  ;;  %v1382_v5 = vadd.f32 %v4061_v20, %v1381_v32  ;;  %3226 = vmatmul.mubr.bf16.gmra.mrb[40].mxu0 %v1718_v62  ;;  %vm1501_vm13 = vcmp.gt.f32.partialorder %v1379_v39, 0.0 }
 0x1d2   :  { %vm1504_vm14 = vcmp.gt.f32.partialorder %v1390_v38, 0.0  ;;  %v1568_v18 = vmul.f32 0.1, %v1390_v38  ;;  %v1631_v14 = vsel %vm1503_vm12, %v1387_v49, %v1567_v13 }
 0x1d3   :  { %vm1502_vm15 = vcmp.gt.f32.partialorder %v1382_v5, 0.0  ;;  %v1566_v4 = vmul.f32 0.1, %v1382_v5  ;;  %v1629_v15 = vsel %vm1501_vm13, %v1379_v39, %v1565_v17 }
 0x1d4   :  { %v1632_v56 = vsel %vm1504_vm14, %v1390_v38, %v1568_v18 }
 0x1d5   :  { %v3155_v23 = vpop.f32.mrb[112].mxu1  ;;  %v1630_v12 = vsel %vm1502_vm15, %v1382_v5, %v1566_v4  ;;  %v1720_v9 = vpack.c.bf16 %v1632_v56, %v1631_v14 }
 0x1d6   :  { %v1403_v27 = vadd.f32 %v3155_v23, %v4061_v20  ;;  %v1394_v16 = vpop.f32.mrb[113].mxu1  ;;  %v1719_v1 = vpack.c.bf16 %v1630_v12, %v1629_v15 }
 0x1d7   :  { %v1395_v60 = vadd.f32 %v4061_v20, %v1394_v16  ;;  %v3156_v40 = vpop.f32.mrb[114].mxu1 }
 0x1d8   :  { %v1571_v50 = vmul.f32 0.1, %v1403_v27  ;;  %v1406_v62 = vadd.f32 %v3156_v40, %v4061_v20  ;;  %v1397_v43 = vpop.f32.mrb[115].mxu1  ;;  %3229 = vmatprep.mubr.bf16.mxu0 %v1719_v1  ;;  %vm1507_vm0 = vcmp.gt.f32.partialorder %v1403_v27, 0.0 }
 0x1d9   :  { %v1569_v32 = vmul.f32 0.1, %v1395_v60  ;;  %v1398_v49 = vadd.f32 %v4061_v20, %v1397_v43  ;;  %3230 = vmatmul.mubr.bf16.gmra.mrb[44].mxu0 %v1720_v9  ;;  %vm1505_vm1 = vcmp.gt.f32.partialorder %v1395_v60, 0.0 }
 0x1da   :  { %vm1508_vm2 = vcmp.gt.f32.partialorder %v1406_v62, 0.0  ;;  %v1572_v39 = vmul.f32 0.1, %v1406_v62  ;;  %v1635_v38 = vsel %vm1507_vm0, %v1403_v27, %v1571_v50 }
 0x1db   :  { %vm1506_vm3 = vcmp.gt.f32.partialorder %v1398_v49, 0.0  ;;  %v1570_v13 = vmul.f32 0.1, %v1398_v49  ;;  %v1633_v18 = vsel %vm1505_vm1, %v1395_v60, %v1569_v32 }
 0x1dc   :  { %v1636_v17 = vsel %vm1508_vm2, %v1406_v62, %v1572_v39 }
 0x1dd   :  { %v3159_v5 = vpop.f32.mrb[116].mxu1  ;;  %v1634_v4 = vsel %vm1506_vm3, %v1398_v49, %v1570_v13  ;;  %v1722_v14 = vpack.c.bf16 %v1636_v17, %v1635_v38 }
 0x1de   :  { %v1419_v56 = vadd.f32 %v3159_v5, %v4061_v20  ;;  %v1410_v23 = vpop.f32.mrb[117].mxu1  ;;  %v1721_v15 = vpack.c.bf16 %v1634_v4, %v1633_v18 }
 0x1df   :  { %v1411_v12 = vadd.f32 %v4061_v20, %v1410_v23  ;;  %v3160_v16 = vpop.f32.mrb[118].mxu1 }
 0x1e0   :  { %v1575_v1 = vmul.f32 0.1, %v1419_v56  ;;  %v1422_v9 = vadd.f32 %v3160_v16, %v4061_v20  ;;  %v1413_v40 = vpop.f32.mrb[119].mxu1  ;;  %3233 = vmatprep.mubr.bf16.mxu0 %v1721_v15  ;;  %vm1511_vm4 = vcmp.gt.f32.partialorder %v1419_v56, 0.0 }
 0x1e1   :  { %v1573_v43 = vmul.f32 0.1, %v1411_v12  ;;  %v1414_v27 = vadd.f32 %v4061_v20, %v1413_v40  ;;  %3234 = vmatmul.mubr.bf16.gmra.mrb[48].mxu0 %v1722_v14  ;;  %vm1509_vm5 = vcmp.gt.f32.partialorder %v1411_v12, 0.0 }
 0x1e2   :  { %vm1512_vm6 = vcmp.gt.f32.partialorder %v1422_v9, 0.0  ;;  %v1576_v60 = vmul.f32 0.1, %v1422_v9  ;;  %v1639_v62 = vsel %vm1511_vm4, %v1419_v56, %v1575_v1 }
 0x1e3   :  { %vm1510_vm7 = vcmp.gt.f32.partialorder %v1414_v27, 0.0  ;;  %v1574_v50 = vmul.f32 0.1, %v1414_v27  ;;  %v1637_v39 = vsel %vm1509_vm5, %v1411_v12, %v1573_v43 }
 0x1e4   :  { %v1640_v32 = vsel %vm1512_vm6, %v1422_v9, %v1576_v60 }
 0x1e5   :  { %v3163_v49 = vpop.f32.mrb[120].mxu1  ;;  %v1638_v13 = vsel %vm1510_vm7, %v1414_v27, %v1574_v50  ;;  %v1724_v38 = vpack.c.bf16 %v1640_v32, %v1639_v62 }
 0x1e6   :  { %v1435_v17 = vadd.f32 %v3163_v49, %v4061_v20  ;;  %v1426_v5 = vpop.f32.mrb[121].mxu1  ;;  %v1723_v18 = vpack.c.bf16 %v1638_v13, %v1637_v39 }
 0x1e7   :  { %v1427_v4 = vadd.f32 %v4061_v20, %v1426_v5  ;;  %v3164_v23 = vpop.f32.mrb[122].mxu1 }
 0x1e8   :  { %v1579_v15 = vmul.f32 0.1, %v1435_v17  ;;  %v1438_v14 = vadd.f32 %v3164_v23, %v4061_v20  ;;  %v1429_v16 = vpop.f32.mrb[123].mxu1  ;;  %3237 = vmatprep.mubr.bf16.mxu0 %v1723_v18  ;;  %vm1515_vm8 = vcmp.gt.f32.partialorder %v1435_v17, 0.0 }
 0x1e9   :  { %v1577_v40 = vmul.f32 0.1, %v1427_v4  ;;  %v1430_v56 = vadd.f32 %v4061_v20, %v1429_v16  ;;  %3238 = vmatmul.mubr.bf16.gmra.mrb[52].mxu0 %v1724_v38  ;;  %vm1513_vm9 = vcmp.gt.f32.partialorder %v1427_v4, 0.0 }
 0x1ea   :  { %vm1516_vm10 = vcmp.gt.f32.partialorder %v1438_v14, 0.0  ;;  %v1580_v12 = vmul.f32 0.1, %v1438_v14  ;;  %v1643_v9 = vsel %vm1515_vm8, %v1435_v17, %v1579_v15 }
 0x1eb   :  { %vm1514_vm11 = vcmp.gt.f32.partialorder %v1430_v56, 0.0  ;;  %v1578_v1 = vmul.f32 0.1, %v1430_v56  ;;  %v1641_v60 = vsel %vm1513_vm9, %v1427_v4, %v1577_v40 }
 0x1ec   :  { %v1644_v43 = vsel %vm1516_vm10, %v1438_v14, %v1580_v12 }
 0x1ed   :  { %v3167_v27 = vpop.f32.mrb[124].mxu1  ;;  %v1642_v50 = vsel %vm1514_vm11, %v1430_v56, %v1578_v1  ;;  %v1726_v62 = vpack.c.bf16 %v1644_v43, %v1643_v9  ;;  %v4576_v43 = vpack.c.bf16 %v3799_v35, %v3797_v34  ;;  %v4581_v34 = vpack.c.bf16 %v3843_v8, %v3841_v7 }
 0x1ee   :  { %v1451_v32 = vadd.f32 %v3167_v27, %v4061_v20  ;;  %v1442_v49 = vpop.f32.mrb[125].mxu1  ;;  %v1725_v39 = vpack.c.bf16 %v1642_v50, %v1641_v60  ;;  %v4578_v27 = vpack.c.bf16 %v3824_v55, %v3822_v54  ;;  %v4579_v60 = vpack.c.bf16 %v3820_v52, %v3818_v51 }
 0x1ef   :  { %v1443_v13 = vadd.f32 %v4061_v20, %v1442_v49  ;;  %v3168_v5 = vpop.f32.mrb[126].mxu1  ;;  %v4580_v50 = vpack.c.bf16 %v3847_v11, %v3845_v10  ;;  %v4584_v35 = vpack.c.bf16 %v3888_v0, %v3886_v63  ;;  %v4585_v51 = vpack.c.bf16 %v3884_v61, %v3882_v59  ;;  %v4597_v59 = vld [vmem:[#allocation4_spill] sm:$0xff]  ;;  %v4599_v63 = vld [vmem:[#allocation3_spill] sm:$0xff]  ;;  %v4600_v0 = vld [vmem:[#allocation2_spill] sm:$0xff] }
 0x1f0   :  { %v1583_v18 = vmul.f32 0.1, %v1451_v32  ;;  %v1454_v38 = vadd.f32 %v3168_v5, %v4061_v20  ;;  %v1445_v23 = vpop.f32.mrb[127].mxu1  ;;  %3241 = vmatprep.mubr.bf16.mxu0 %v1725_v39  ;;  %vm1519_vm12 = vcmp.gt.f32.partialorder %v1451_v32, 0.0  ;;  %v4586_v52 = vpack.c.bf16 %v3904_v25, %v3902_v24  ;;  %v4603_v24 = vld [vmem:[#allocation8_spill] sm:$0xff]  ;;  %v4623_v49 = vld [vmem:[#allocation19_spill] sm:$0xff] }
 0x1f1   :  { %v1581_v16 = vmul.f32 0.1, %v1443_v13  ;;  %v1446_v17 = vadd.f32 %v4061_v20, %v1445_v23  ;;  %3242 = vmatmul.mubr.bf16.gmra.mrb[56].mxu0 %v1726_v62  ;;  %vm1517_vm13 = vcmp.gt.f32.partialorder %v1443_v13, 0.0  ;;  %v4577_v20 = vpack.c.bf16 %v3793_v31, %v3791_v30  ;;  %v4621_v62 = vld [vmem:[#allocation20_spill] sm:$0xff]  ;;  %v4624_v39 = vld [vmem:[#allocation18_spill] sm:$0xff]  ;;  %v4626_v5 = vld [vmem:[#allocation25_spill] sm:$0xff] }
 0x1f2   :  { %vm1520_vm14 = vcmp.gt.f32.partialorder %v1454_v38, 0.0  ;;  %v1584_v4 = vmul.f32 0.1, %v1454_v38  ;;  %v1647_v14 = vsel %vm1519_vm12, %v1451_v32, %v1583_v18  ;;  %v4582_v30 = vpack.c.bf16 %v3869_v37, %v3867_v36  ;;  %v4596_v37 = vld [vmem:[#allocation5_spill] sm:$0xff]  ;;  %v4627_v18 = vld [vmem:[#allocation24_spill] sm:$0xff]  ;;  %v4629_v23 = vld [vmem:[#allocation23_spill] sm:$0xff] }
 0x1f3   :  { %vm1518_vm15 = vcmp.gt.f32.partialorder %v1446_v17, 0.0  ;;  %v1582_v15 = vmul.f32 0.1, %v1446_v17  ;;  %v1645_v56 = vsel %vm1517_vm13, %v1443_v13, %v1581_v16  ;;  %v4583_v31 = vpack.c.bf16 %v3865_v29, %v3863_v28  ;;  %v4630_v16 = vld [vmem:[#allocation22_spill] sm:$0xff] }
 0x1f4   :  { %v1648_v40 = vsel %vm1520_vm14, %v1454_v38, %v1584_v4  ;;  %v4587_v54 = vpack.c.bf16 %v3900_v22, %v3898_v21  ;;  %v4588_v55 = vpack.c.bf16 %v3920_v3, %v3918_v2  ;;  %v4589_v7 = vpack.c.bf16 %v3916_v58, %v3914_v57  ;;  %v4602_v22 = vld [vmem:[#allocation9_spill] sm:$0xff]  ;;  %v4605_v57 = vld [vmem:[#allocation7_spill] sm:$0xff]  ;;  %v4606_v58 = vld [vmem:[#allocation6_spill] sm:$0xff] }
 0x1f5   :  { %v1646_v12 = vsel %vm1518_vm15, %v1446_v17, %v1582_v15  ;;  %v1728_v1 = vpack.c.bf16 %v1648_v40, %v1647_v14  ;;  %v4590_v8 = vpack.c.bf16 %v3936_v47, %v3934_v46  ;;  %v4591_v10 = vpack.c.bf16 %v3932_v44, %v3930_v42  ;;  %v4608_v2 = vld [vmem:[#allocation13_spill] sm:$0xff]  ;;  %v4609_v3 = vld [vmem:[#allocation12_spill] sm:$0xff]  ;;  %v4611_v44 = vld [vmem:[#allocation11_spill] sm:$0xff] }
 0x1f6   :  { %v1727_v9 = vpack.c.bf16 %v1646_v12, %v1645_v56  ;;  %v4592_v11 = vpack.c.bf16 %v3952_v48, %v3950_v53  ;;  %v4593_v28 = vpack.c.bf16 %v3948_v41, %v3946_v33  ;;  %v4594_v29 = vpack.c.bf16 %v3968_v26, %v3966_v19  ;;  %v4612_v46 = vld [vmem:[#allocation10_spill] sm:$0xff]  ;;  %v4614_v48 = vld [vmem:[#allocation17_spill] sm:$0xff]  ;;  %v4615_v33 = vld [vmem:[#allocation16_spill] sm:$0xff] }
 0x1f7   :  { %v4595_v36 = vpack.c.bf16 %v3964_v6, %v3962_v45  ;;  %v4598_v61 = vpack.c.bf16 %v4596_v37, %v4597_v59  ;;  %v4601_v21 = vpack.c.bf16 %v4599_v63, %v4600_v0  ;;  %v4604_v25 = vpack.c.bf16 %v4602_v22, %v4603_v24  ;;  %v4617_v53 = vld [vmem:[#allocation15_spill] sm:$0xff]  ;;  %v4618_v6 = vld [vmem:[#allocation14_spill] sm:$0xff]  ;;  %v4620_v19 = vld [vmem:[#allocation21_spill] sm:$0xff] }
 0x1f8   :  { %3245 = vmatprep.mubr.bf16.mxu0 %v1727_v9  ;;  %v4607_v26 = vpack.c.bf16 %v4605_v57, %v4606_v58  ;;  %v4610_v42 = vpack.c.bf16 %v4608_v2, %v4609_v3  ;;  %v4613_v47 = vpack.c.bf16 %v4611_v44, %v4612_v46  ;;  %v4616_v41 = vpack.c.bf16 %v4614_v48, %v4615_v33  ;;  %v4260_v4 = vld [vmem:[%s4526_s8] ss:$0 sm:$0xff] }
 0x1f9   :  { %3246 = vmatmul.mubr.bf16.gmra.mrb[60].mxu0 %v1728_v1  ;;  %v4619_v45 = vpack.c.bf16 %v4617_v53, %v4618_v6  ;;  %v4622_v32 = vpack.c.bf16 %v4620_v19, %v4621_v62  ;;  %v4625_v13 = vpack.c.bf16 %v4623_v49, %v4624_v39  ;;  %v4628_v38 = vpack.c.bf16 %v4626_v5, %v4627_v18 }
 0x1fa   :  { %3265 = vmatprep.mubr.bf16.mxu0 %v4576_v43  ;;  %v4631_v17 = vpack.c.bf16 %v4629_v23, %v4630_v16 }
 0x201   :  { %3266 = vmatmul.mubr.bf16.vlgmr.msra.gmra.mrb[0].mxu0 %v4577_v20 }
 0x202   :  { %3269 = vmatprep.mubr.bf16.mxu0 %v4578_v27 }
 0x209   :  { %3270 = vmatmul.mubr.bf16.gmra.mrb[4].mxu0 %v4579_v60 }
 0x20a   :  { %3273 = vmatprep.mubr.bf16.mxu0 %v4580_v50 }
 0x211   :  { %3274 = vmatmul.mubr.bf16.gmra.mrb[8].mxu0 %v4581_v34 }
 0x212   :  { %3277 = vmatprep.mubr.bf16.mxu0 %v4582_v30 }
 0x219   :  { %3278 = vmatmul.mubr.bf16.gmra.mrb[12].mxu0 %v4583_v31 }
 0x21a   :  { %3281 = vmatprep.mubr.bf16.mxu0 %v4584_v35 }
 0x221   :  { %3282 = vmatmul.mubr.bf16.gmra.mrb[16].mxu0 %v4585_v51 }
 0x222   :  { %3285 = vmatprep.mubr.bf16.mxu0 %v4586_v52 }
 0x229   :  { %3286 = vmatmul.mubr.bf16.gmra.mrb[20].mxu0 %v4587_v54 }
 0x22a   :  { %3289 = vmatprep.mubr.bf16.mxu0 %v4588_v55 }
 0x231   :  { %3290 = vmatmul.mubr.bf16.gmra.mrb[24].mxu0 %v4589_v7 }
 0x232   :  { %3293 = vmatprep.mubr.bf16.mxu0 %v4590_v8 }
 0x239   :  { %3294 = vmatmul.mubr.bf16.gmra.mrb[28].mxu0 %v4591_v10 }
 0x23a   :  { %3297 = vmatprep.mubr.bf16.mxu0 %v4592_v11 }
 0x241   :  { %3298 = vmatmul.mubr.bf16.gmra.mrb[32].mxu0 %v4593_v28 }
 0x242   :  { %3301 = vmatprep.mubr.bf16.mxu0 %v4594_v29 }
 0x249   :  { %3302 = vmatmul.mubr.bf16.gmra.mrb[36].mxu0 %v4595_v36 }
 0x24a   :  { %3305 = vmatprep.mubr.bf16.mxu0 %v4598_v61 }
 0x251   :  { %3306 = vmatmul.mubr.bf16.gmra.mrb[40].mxu0 %v4601_v21 }
 0x252   :  { %3309 = vmatprep.mubr.bf16.mxu0 %v4604_v25 }
 0x259   :  { %3310 = vmatmul.mubr.bf16.gmra.mrb[44].mxu0 %v4607_v26 }
 0x25a   :  { %3313 = vmatprep.mubr.bf16.mxu0 %v4610_v42 }
 0x261   :  { %3314 = vmatmul.mubr.bf16.gmra.mrb[48].mxu0 %v4613_v47 }
 0x262   :  { %3317 = vmatprep.mubr.bf16.mxu0 %v4616_v41 }
 0x269   :  { %3318 = vmatmul.mubr.bf16.gmra.mrb[52].mxu0 %v4619_v45 }
 0x26a   :  { %3321 = vmatprep.mubr.bf16.mxu0 %v4622_v32 }
 0x271   :  { %3322 = vmatmul.mubr.bf16.gmra.mrb[56].mxu0 %v4625_v13 }
 0x272   :  { %3325 = vmatprep.mubr.bf16.mxu0 %v4628_v38 }
 0x279   :  { %3326 = vmatmul.mubr.bf16.gmra.mrb[60].mxu0 %v4631_v17 }
 0x2d4   :  { %v3267_v15 = vpop.f32.mrb[0].mxu0 }
 0x2d5   :  { %v2428_v14 = vadd.f32 %v3267_v15, %v4260_v4  ;;  %v2164_v40 = vpop.f32.mrb[1].mxu0 }
 0x2d6   :  { %v2426_v56 = vadd.f32 %v4260_v4, %v2164_v40  ;;  %v3268_v12 = vpop.f32.mrb[2].mxu0 }
 0x2d7   :  { %vm2492_vm0 = vcmp.gt.f32.partialorder %v2428_v14, 0.0  ;;  %v2556_v1 = vmul.f32 0.01, %v2428_v14  ;;  %v2429_v9 = vadd.f32 %v3268_v12, %v4260_v4  ;;  %v2167_v43 = vpop.f32.mrb[3].mxu0 }
 0x2d8   :  { %vm2490_vm1 = vcmp.gt.f32.partialorder %v2426_v56, 0.0  ;;  %v2554_v20 = vmul.f32 0.01, %v2426_v56  ;;  %v2427_v27 = vadd.f32 %v4260_v4, %v2167_v43 }
 0x2d9   :  { %v2620_v60 = vsel %vm2492_vm0, %v2428_v14, %v2556_v1  ;;  %vm2493_vm2 = vcmp.gt.f32.partialorder %v2429_v9, 0.0  ;;  %v2557_v50 = vmul.f32 0.01, %v2429_v9 }
 0x2da   :  { %2684 = vst [vmem:[%s4527_s9 + $0x10] sm:$0xff] %v2620_v60  ;;  %v2618_v34 = vsel %vm2490_vm1, %v2426_v56, %v2554_v20  ;;  %vm2491_vm3 = vcmp.gt.f32.partialorder %v2427_v27, 0.0  ;;  %v2555_v30 = vmul.f32 0.01, %v2427_v27 }
 0x2db   :  { %2682 = vst [vmem:[%s4527_s9] sm:$0xff] %v2618_v34  ;;  %v2621_v31 = vsel %vm2493_vm2, %v2429_v9, %v2557_v50 }
 0x2dc   :  { %2685 = vst [vmem:[%s4527_s9 + $0x18] sm:$0xff] %v2621_v31  ;;  %v2619_v35 = vsel %vm2491_vm3, %v2427_v27, %v2555_v30  ;;  %v3271_v51 = vpop.f32.mrb[4].mxu0 }
 0x2dd   :  { %2683 = vst [vmem:[%s4527_s9 + $0x8] sm:$0xff] %v2619_v35  ;;  %v2432_v52 = vadd.f32 %v3271_v51, %v4260_v4  ;;  %v2180_v54 = vpop.f32.mrb[5].mxu0 }
 0x2de   :  { %v2430_v55 = vadd.f32 %v4260_v4, %v2180_v54  ;;  %v3272_v7 = vpop.f32.mrb[6].mxu0 }
 0x2df   :  { %vm2496_vm4 = vcmp.gt.f32.partialorder %v2432_v52, 0.0  ;;  %v2560_v8 = vmul.f32 0.01, %v2432_v52  ;;  %v2433_v10 = vadd.f32 %v3272_v7, %v4260_v4  ;;  %v2183_v11 = vpop.f32.mrb[7].mxu0 }
 0x2e0   :  { %vm2494_vm5 = vcmp.gt.f32.partialorder %v2430_v55, 0.0  ;;  %v2558_v28 = vmul.f32 0.01, %v2430_v55  ;;  %v2431_v29 = vadd.f32 %v4260_v4, %v2183_v11 }
 0x2e1   :  { %v2624_v36 = vsel %vm2496_vm4, %v2432_v52, %v2560_v8  ;;  %vm2497_vm6 = vcmp.gt.f32.partialorder %v2433_v10, 0.0  ;;  %v2561_v37 = vmul.f32 0.01, %v2433_v10 }
 0x2e2   :  { %2688 = vst [vmem:[%s4527_s9 + $0x30] sm:$0xff] %v2624_v36  ;;  %v2622_v59 = vsel %vm2494_vm5, %v2430_v55, %v2558_v28  ;;  %vm2495_vm7 = vcmp.gt.f32.partialorder %v2431_v29, 0.0  ;;  %v2559_v61 = vmul.f32 0.01, %v2431_v29 }
 0x2e3   :  { %2686 = vst [vmem:[%s4527_s9 + $0x20] sm:$0xff] %v2622_v59  ;;  %v2625_v63 = vsel %vm2497_vm6, %v2433_v10, %v2561_v37 }
 0x2e4   :  { %2689 = vst [vmem:[%s4527_s9 + $0x38] sm:$0xff] %v2625_v63  ;;  %v2623_v0 = vsel %vm2495_vm7, %v2431_v29, %v2559_v61  ;;  %v3275_v21 = vpop.f32.mrb[8].mxu0 }
 0x2e5   :  { %2687 = vst [vmem:[%s4527_s9 + $0x28] sm:$0xff] %v2623_v0  ;;  %v2436_v22 = vadd.f32 %v3275_v21, %v4260_v4  ;;  %v2196_v24 = vpop.f32.mrb[9].mxu0 }
 0x2e6   :  { %v2434_v25 = vadd.f32 %v4260_v4, %v2196_v24  ;;  %v3276_v57 = vpop.f32.mrb[10].mxu0 }
 0x2e7   :  { %vm2500_vm8 = vcmp.gt.f32.partialorder %v2436_v22, 0.0  ;;  %v2564_v58 = vmul.f32 0.01, %v2436_v22  ;;  %v2437_v26 = vadd.f32 %v3276_v57, %v4260_v4  ;;  %v2199_v2 = vpop.f32.mrb[11].mxu0 }
 0x2e8   :  { %vm2498_vm9 = vcmp.gt.f32.partialorder %v2434_v25, 0.0  ;;  %v2562_v3 = vmul.f32 0.01, %v2434_v25  ;;  %v2435_v42 = vadd.f32 %v4260_v4, %v2199_v2 }
 0x2e9   :  { %v2628_v44 = vsel %vm2500_vm8, %v2436_v22, %v2564_v58  ;;  %vm2501_vm10 = vcmp.gt.f32.partialorder %v2437_v26, 0.0  ;;  %v2565_v46 = vmul.f32 0.01, %v2437_v26 }
 0x2ea   :  { %2692 = vst [vmem:[%s4527_s9 + $0x50] sm:$0xff] %v2628_v44  ;;  %v2626_v47 = vsel %vm2498_vm9, %v2434_v25, %v2562_v3  ;;  %vm2499_vm11 = vcmp.gt.f32.partialorder %v2435_v42, 0.0  ;;  %v2563_v48 = vmul.f32 0.01, %v2435_v42 }
 0x2eb   :  { %2690 = vst [vmem:[%s4527_s9 + $0x40] sm:$0xff] %v2626_v47  ;;  %v2629_v33 = vsel %vm2501_vm10, %v2437_v26, %v2565_v46 }
 0x2ec   :  { %2693 = vst [vmem:[%s4527_s9 + $0x58] sm:$0xff] %v2629_v33  ;;  %v2627_v41 = vsel %vm2499_vm11, %v2435_v42, %v2563_v48  ;;  %v3279_v53 = vpop.f32.mrb[12].mxu0 }
 0x2ed   :  { %2691 = vst [vmem:[%s4527_s9 + $0x48] sm:$0xff] %v2627_v41  ;;  %v2440_v6 = vadd.f32 %v3279_v53, %v4260_v4  ;;  %v2212_v45 = vpop.f32.mrb[13].mxu0 }
 0x2ee   :  { %v2438_v19 = vadd.f32 %v4260_v4, %v2212_v45  ;;  %v3280_v62 = vpop.f32.mrb[14].mxu0 }
 0x2ef   :  { %vm2504_vm12 = vcmp.gt.f32.partialorder %v2440_v6, 0.0  ;;  %v2568_v32 = vmul.f32 0.01, %v2440_v6  ;;  %v2441_v49 = vadd.f32 %v3280_v62, %v4260_v4  ;;  %v2215_v39 = vpop.f32.mrb[15].mxu0 }
 0x2f0   :  { %vm2502_vm13 = vcmp.gt.f32.partialorder %v2438_v19, 0.0  ;;  %v2566_v13 = vmul.f32 0.01, %v2438_v19  ;;  %v2439_v5 = vadd.f32 %v4260_v4, %v2215_v39 }
 0x2f1   :  { %v2632_v18 = vsel %vm2504_vm12, %v2440_v6, %v2568_v32  ;;  %vm2505_vm14 = vcmp.gt.f32.partialorder %v2441_v49, 0.0  ;;  %v2569_v38 = vmul.f32 0.01, %v2441_v49 }
 0x2f2   :  { %2696 = vst [vmem:[%s4527_s9 + $0x70] sm:$0xff] %v2632_v18  ;;  %v2630_v23 = vsel %vm2502_vm13, %v2438_v19, %v2566_v13  ;;  %vm2503_vm15 = vcmp.gt.f32.partialorder %v2439_v5, 0.0  ;;  %v2567_v16 = vmul.f32 0.01, %v2439_v5 }
 0x2f3   :  { %2694 = vst [vmem:[%s4527_s9 + $0x60] sm:$0xff] %v2630_v23  ;;  %v2633_v17 = vsel %vm2505_vm14, %v2441_v49, %v2569_v38 }
 0x2f4   :  { %2697 = vst [vmem:[%s4527_s9 + $0x78] sm:$0xff] %v2633_v17  ;;  %v2631_v15 = vsel %vm2503_vm15, %v2439_v5, %v2567_v16  ;;  %v3283_v14 = vpop.f32.mrb[16].mxu0 }
 0x2f5   :  { %2695 = vst [vmem:[%s4527_s9 + $0x68] sm:$0xff] %v2631_v15  ;;  %v2444_v40 = vadd.f32 %v3283_v14, %v4260_v4  ;;  %v2228_v56 = vpop.f32.mrb[17].mxu0 }
 0x2f6   :  { %v2442_v12 = vadd.f32 %v4260_v4, %v2228_v56  ;;  %v3284_v1 = vpop.f32.mrb[18].mxu0 }
 0x2f7   :  { %vm2508_vm0 = vcmp.gt.f32.partialorder %v2444_v40, 0.0  ;;  %v2572_v9 = vmul.f32 0.01, %v2444_v40  ;;  %v2445_v43 = vadd.f32 %v3284_v1, %v4260_v4  ;;  %v2231_v20 = vpop.f32.mrb[19].mxu0 }
 0x2f8   :  { %vm2506_vm1 = vcmp.gt.f32.partialorder %v2442_v12, 0.0  ;;  %v2570_v27 = vmul.f32 0.01, %v2442_v12  ;;  %v2443_v60 = vadd.f32 %v4260_v4, %v2231_v20 }
 0x2f9   :  { %v2636_v50 = vsel %vm2508_vm0, %v2444_v40, %v2572_v9  ;;  %vm2509_vm2 = vcmp.gt.f32.partialorder %v2445_v43, 0.0  ;;  %v2573_v34 = vmul.f32 0.01, %v2445_v43 }
 0x2fa   :  { %2700 = vst [vmem:[%s4527_s9 + $0x90] sm:$0xff] %v2636_v50  ;;  %v2634_v30 = vsel %vm2506_vm1, %v2442_v12, %v2570_v27  ;;  %vm2507_vm3 = vcmp.gt.f32.partialorder %v2443_v60, 0.0  ;;  %v2571_v31 = vmul.f32 0.01, %v2443_v60 }
 0x2fb   :  { %2698 = vst [vmem:[%s4527_s9 + $0x80] sm:$0xff] %v2634_v30  ;;  %v2637_v35 = vsel %vm2509_vm2, %v2445_v43, %v2573_v34 }
 0x2fc   :  { %2701 = vst [vmem:[%s4527_s9 + $0x98] sm:$0xff] %v2637_v35  ;;  %v2635_v51 = vsel %vm2507_vm3, %v2443_v60, %v2571_v31  ;;  %v3287_v52 = vpop.f32.mrb[20].mxu0 }
 0x2fd   :  { %2699 = vst [vmem:[%s4527_s9 + $0x88] sm:$0xff] %v2635_v51  ;;  %v2448_v54 = vadd.f32 %v3287_v52, %v4260_v4  ;;  %v2244_v55 = vpop.f32.mrb[21].mxu0 }
 0x2fe   :  { %v2446_v7 = vadd.f32 %v4260_v4, %v2244_v55  ;;  %v3288_v8 = vpop.f32.mrb[22].mxu0 }
 0x2ff   :  { %vm2512_vm4 = vcmp.gt.f32.partialorder %v2448_v54, 0.0  ;;  %v2576_v10 = vmul.f32 0.01, %v2448_v54  ;;  %v2449_v11 = vadd.f32 %v3288_v8, %v4260_v4  ;;  %v2247_v28 = vpop.f32.mrb[23].mxu0 }
 0x300   :  { %vm2510_vm5 = vcmp.gt.f32.partialorder %v2446_v7, 0.0  ;;  %v2574_v29 = vmul.f32 0.01, %v2446_v7  ;;  %v2447_v36 = vadd.f32 %v4260_v4, %v2247_v28 }
 0x301   :  { %v2640_v37 = vsel %vm2512_vm4, %v2448_v54, %v2576_v10  ;;  %vm2513_vm6 = vcmp.gt.f32.partialorder %v2449_v11, 0.0  ;;  %v2577_v59 = vmul.f32 0.01, %v2449_v11 }
 0x302   :  { %2704 = vst [vmem:[%s4527_s9 + $0xb0] sm:$0xff] %v2640_v37  ;;  %v2638_v61 = vsel %vm2510_vm5, %v2446_v7, %v2574_v29  ;;  %vm2511_vm7 = vcmp.gt.f32.partialorder %v2447_v36, 0.0  ;;  %v2575_v63 = vmul.f32 0.01, %v2447_v36 }
 0x303   :  { %2702 = vst [vmem:[%s4527_s9 + $0xa0] sm:$0xff] %v2638_v61  ;;  %v2641_v0 = vsel %vm2513_vm6, %v2449_v11, %v2577_v59 }
 0x304   :  { %2705 = vst [vmem:[%s4527_s9 + $0xb8] sm:$0xff] %v2641_v0  ;;  %v2639_v21 = vsel %vm2511_vm7, %v2447_v36, %v2575_v63  ;;  %v3291_v22 = vpop.f32.mrb[24].mxu0 }
 0x305   :  { %2703 = vst [vmem:[%s4527_s9 + $0xa8] sm:$0xff] %v2639_v21  ;;  %v2452_v24 = vadd.f32 %v3291_v22, %v4260_v4  ;;  %v2260_v25 = vpop.f32.mrb[25].mxu0 }
 0x306   :  { %v2450_v57 = vadd.f32 %v4260_v4, %v2260_v25  ;;  %v3292_v58 = vpop.f32.mrb[26].mxu0 }
 0x307   :  { %vm2516_vm8 = vcmp.gt.f32.partialorder %v2452_v24, 0.0  ;;  %v2580_v26 = vmul.f32 0.01, %v2452_v24  ;;  %v2453_v2 = vadd.f32 %v3292_v58, %v4260_v4  ;;  %v2263_v3 = vpop.f32.mrb[27].mxu0 }
 0x308   :  { %vm2514_vm9 = vcmp.gt.f32.partialorder %v2450_v57, 0.0  ;;  %v2578_v42 = vmul.f32 0.01, %v2450_v57  ;;  %v2451_v44 = vadd.f32 %v4260_v4, %v2263_v3 }
 0x309   :  { %v2644_v46 = vsel %vm2516_vm8, %v2452_v24, %v2580_v26  ;;  %vm2517_vm10 = vcmp.gt.f32.partialorder %v2453_v2, 0.0  ;;  %v2581_v47 = vmul.f32 0.01, %v2453_v2 }
 0x30a   :  { %2708 = vst [vmem:[%s4527_s9 + $0xd0] sm:$0xff] %v2644_v46  ;;  %v2642_v48 = vsel %vm2514_vm9, %v2450_v57, %v2578_v42  ;;  %vm2515_vm11 = vcmp.gt.f32.partialorder %v2451_v44, 0.0  ;;  %v2579_v33 = vmul.f32 0.01, %v2451_v44 }
 0x30b   :  { %2706 = vst [vmem:[%s4527_s9 + $0xc0] sm:$0xff] %v2642_v48  ;;  %v2645_v41 = vsel %vm2517_vm10, %v2453_v2, %v2581_v47 }
 0x30c   :  { %2709 = vst [vmem:[%s4527_s9 + $0xd8] sm:$0xff] %v2645_v41  ;;  %v2643_v53 = vsel %vm2515_vm11, %v2451_v44, %v2579_v33  ;;  %v3295_v6 = vpop.f32.mrb[28].mxu0 }
 0x30d   :  { %2707 = vst [vmem:[%s4527_s9 + $0xc8] sm:$0xff] %v2643_v53  ;;  %v2456_v45 = vadd.f32 %v3295_v6, %v4260_v4  ;;  %v2276_v19 = vpop.f32.mrb[29].mxu0 }
 0x30e   :  { %v2454_v62 = vadd.f32 %v4260_v4, %v2276_v19  ;;  %v3296_v32 = vpop.f32.mrb[30].mxu0 }
 0x30f   :  { %vm2520_vm12 = vcmp.gt.f32.partialorder %v2456_v45, 0.0  ;;  %v2584_v49 = vmul.f32 0.01, %v2456_v45  ;;  %v2457_v39 = vadd.f32 %v3296_v32, %v4260_v4  ;;  %v2279_v13 = vpop.f32.mrb[31].mxu0 }
 0x310   :  { %vm2518_vm13 = vcmp.gt.f32.partialorder %v2454_v62, 0.0  ;;  %v2582_v5 = vmul.f32 0.01, %v2454_v62  ;;  %v2455_v18 = vadd.f32 %v4260_v4, %v2279_v13 }
 0x311   :  { %v2648_v38 = vsel %vm2520_vm12, %v2456_v45, %v2584_v49  ;;  %vm2521_vm14 = vcmp.gt.f32.partialorder %v2457_v39, 0.0  ;;  %v2585_v23 = vmul.f32 0.01, %v2457_v39 }
 0x312   :  { %2712 = vst [vmem:[%s4527_s9 + $0xf0] sm:$0xff] %v2648_v38  ;;  %v2646_v16 = vsel %vm2518_vm13, %v2454_v62, %v2582_v5  ;;  %vm2519_vm15 = vcmp.gt.f32.partialorder %v2455_v18, 0.0  ;;  %v2583_v17 = vmul.f32 0.01, %v2455_v18 }
 0x313   :  { %2710 = vst [vmem:[%s4527_s9 + $0xe0] sm:$0xff] %v2646_v16  ;;  %v2649_v15 = vsel %vm2521_vm14, %v2457_v39, %v2585_v23 }
 0x314   :  { %2713 = vst [vmem:[%s4527_s9 + $0xf8] sm:$0xff] %v2649_v15  ;;  %v2647_v14 = vsel %vm2519_vm15, %v2455_v18, %v2583_v17  ;;  %v3299_v40 = vpop.f32.mrb[32].mxu0 }
 0x315   :  { %2711 = vst [vmem:[%s4527_s9 + $0xe8] sm:$0xff] %v2647_v14  ;;  %v2460_v56 = vadd.f32 %v3299_v40, %v4260_v4  ;;  %v2292_v12 = vpop.f32.mrb[33].mxu0 }
 0x316   :  { %v2458_v1 = vadd.f32 %v4260_v4, %v2292_v12  ;;  %v3300_v9 = vpop.f32.mrb[34].mxu0 }
 0x317   :  { %vm2524_vm0 = vcmp.gt.f32.partialorder %v2460_v56, 0.0  ;;  %v2588_v43 = vmul.f32 0.01, %v2460_v56  ;;  %v2461_v20 = vadd.f32 %v3300_v9, %v4260_v4  ;;  %v2295_v27 = vpop.f32.mrb[35].mxu0 }
 0x318   :  { %vm2522_vm1 = vcmp.gt.f32.partialorder %v2458_v1, 0.0  ;;  %v2586_v60 = vmul.f32 0.01, %v2458_v1  ;;  %v2459_v50 = vadd.f32 %v4260_v4, %v2295_v27 }
 0x319   :  { %v2652_v34 = vsel %vm2524_vm0, %v2460_v56, %v2588_v43  ;;  %vm2525_vm2 = vcmp.gt.f32.partialorder %v2461_v20, 0.0  ;;  %v2589_v30 = vmul.f32 0.01, %v2461_v20 }
 0x31a   :  { %2716 = vst [vmem:[%s4527_s9 + $0x110] sm:$0xff] %v2652_v34  ;;  %v2650_v31 = vsel %vm2522_vm1, %v2458_v1, %v2586_v60  ;;  %vm2523_vm3 = vcmp.gt.f32.partialorder %v2459_v50, 0.0  ;;  %v2587_v35 = vmul.f32 0.01, %v2459_v50 }
 0x31b   :  { %2714 = vst [vmem:[%s4527_s9 + $0x100] sm:$0xff] %v2650_v31  ;;  %v2653_v51 = vsel %vm2525_vm2, %v2461_v20, %v2589_v30 }
 0x31c   :  { %2717 = vst [vmem:[%s4527_s9 + $0x118] sm:$0xff] %v2653_v51  ;;  %v2651_v52 = vsel %vm2523_vm3, %v2459_v50, %v2587_v35  ;;  %v3303_v54 = vpop.f32.mrb[36].mxu0 }
 0x31d   :  { %2715 = vst [vmem:[%s4527_s9 + $0x108] sm:$0xff] %v2651_v52  ;;  %v2464_v55 = vadd.f32 %v3303_v54, %v4260_v4  ;;  %v2308_v7 = vpop.f32.mrb[37].mxu0 }
 0x31e   :  { %v2462_v8 = vadd.f32 %v4260_v4, %v2308_v7  ;;  %v3304_v10 = vpop.f32.mrb[38].mxu0 }
 0x31f   :  { %vm2528_vm4 = vcmp.gt.f32.partialorder %v2464_v55, 0.0  ;;  %v2592_v11 = vmul.f32 0.01, %v2464_v55  ;;  %v2465_v28 = vadd.f32 %v3304_v10, %v4260_v4  ;;  %v2311_v29 = vpop.f32.mrb[39].mxu0 }
 0x320   :  { %vm2526_vm5 = vcmp.gt.f32.partialorder %v2462_v8, 0.0  ;;  %v2590_v36 = vmul.f32 0.01, %v2462_v8  ;;  %v2463_v37 = vadd.f32 %v4260_v4, %v2311_v29 }
 0x321   :  { %v2656_v59 = vsel %vm2528_vm4, %v2464_v55, %v2592_v11  ;;  %vm2529_vm6 = vcmp.gt.f32.partialorder %v2465_v28, 0.0  ;;  %v2593_v61 = vmul.f32 0.01, %v2465_v28 }
 0x322   :  { %2720 = vst [vmem:[%s4527_s9 + $0x130] sm:$0xff] %v2656_v59  ;;  %v2654_v63 = vsel %vm2526_vm5, %v2462_v8, %v2590_v36  ;;  %vm2527_vm7 = vcmp.gt.f32.partialorder %v2463_v37, 0.0  ;;  %v2591_v0 = vmul.f32 0.01, %v2463_v37 }
 0x323   :  { %2718 = vst [vmem:[%s4527_s9 + $0x120] sm:$0xff] %v2654_v63  ;;  %v2657_v21 = vsel %vm2529_vm6, %v2465_v28, %v2593_v61 }
 0x324   :  { %2721 = vst [vmem:[%s4527_s9 + $0x138] sm:$0xff] %v2657_v21  ;;  %v2655_v22 = vsel %vm2527_vm7, %v2463_v37, %v2591_v0  ;;  %v3307_v24 = vpop.f32.mrb[40].mxu0 }
 0x325   :  { %2719 = vst [vmem:[%s4527_s9 + $0x128] sm:$0xff] %v2655_v22  ;;  %v2468_v25 = vadd.f32 %v3307_v24, %v4260_v4  ;;  %v2324_v57 = vpop.f32.mrb[41].mxu0 }
 0x326   :  { %v2466_v58 = vadd.f32 %v4260_v4, %v2324_v57  ;;  %v3308_v26 = vpop.f32.mrb[42].mxu0 }
 0x327   :  { %vm2532_vm8 = vcmp.gt.f32.partialorder %v2468_v25, 0.0  ;;  %v2596_v2 = vmul.f32 0.01, %v2468_v25  ;;  %v2469_v3 = vadd.f32 %v3308_v26, %v4260_v4  ;;  %v2327_v42 = vpop.f32.mrb[43].mxu0 }
 0x328   :  { %vm2530_vm9 = vcmp.gt.f32.partialorder %v2466_v58, 0.0  ;;  %v2594_v44 = vmul.f32 0.01, %v2466_v58  ;;  %v2467_v46 = vadd.f32 %v4260_v4, %v2327_v42 }
 0x329   :  { %v2660_v47 = vsel %vm2532_vm8, %v2468_v25, %v2596_v2  ;;  %vm2533_vm10 = vcmp.gt.f32.partialorder %v2469_v3, 0.0  ;;  %v2597_v48 = vmul.f32 0.01, %v2469_v3 }
 0x32a   :  { %2724 = vst [vmem:[%s4527_s9 + $0x150] sm:$0xff] %v2660_v47  ;;  %v2658_v33 = vsel %vm2530_vm9, %v2466_v58, %v2594_v44  ;;  %vm2531_vm11 = vcmp.gt.f32.partialorder %v2467_v46, 0.0  ;;  %v2595_v41 = vmul.f32 0.01, %v2467_v46 }
 0x32b   :  { %2722 = vst [vmem:[%s4527_s9 + $0x140] sm:$0xff] %v2658_v33  ;;  %v2661_v53 = vsel %vm2533_vm10, %v2469_v3, %v2597_v48 }
 0x32c   :  { %2725 = vst [vmem:[%s4527_s9 + $0x158] sm:$0xff] %v2661_v53  ;;  %v2659_v6 = vsel %vm2531_vm11, %v2467_v46, %v2595_v41  ;;  %v3311_v45 = vpop.f32.mrb[44].mxu0 }
 0x32d   :  { %2723 = vst [vmem:[%s4527_s9 + $0x148] sm:$0xff] %v2659_v6  ;;  %v2472_v19 = vadd.f32 %v3311_v45, %v4260_v4  ;;  %v2340_v62 = vpop.f32.mrb[45].mxu0 }
 0x32e   :  { %v2470_v32 = vadd.f32 %v4260_v4, %v2340_v62  ;;  %v3312_v49 = vpop.f32.mrb[46].mxu0 }
 0x32f   :  { %vm2536_vm12 = vcmp.gt.f32.partialorder %v2472_v19, 0.0  ;;  %v2600_v39 = vmul.f32 0.01, %v2472_v19  ;;  %v2473_v13 = vadd.f32 %v3312_v49, %v4260_v4  ;;  %v2343_v5 = vpop.f32.mrb[47].mxu0 }
 0x330   :  { %vm2534_vm13 = vcmp.gt.f32.partialorder %v2470_v32, 0.0  ;;  %v2598_v18 = vmul.f32 0.01, %v2470_v32  ;;  %v2471_v38 = vadd.f32 %v4260_v4, %v2343_v5 }
 0x331   :  { %v2664_v23 = vsel %vm2536_vm12, %v2472_v19, %v2600_v39  ;;  %vm2537_vm14 = vcmp.gt.f32.partialorder %v2473_v13, 0.0  ;;  %v2601_v16 = vmul.f32 0.01, %v2473_v13 }
 0x332   :  { %2728 = vst [vmem:[%s4527_s9 + $0x170] sm:$0xff] %v2664_v23  ;;  %v2662_v17 = vsel %vm2534_vm13, %v2470_v32, %v2598_v18  ;;  %vm2535_vm15 = vcmp.gt.f32.partialorder %v2471_v38, 0.0  ;;  %v2599_v15 = vmul.f32 0.01, %v2471_v38 }
 0x333   :  { %2726 = vst [vmem:[%s4527_s9 + $0x160] sm:$0xff] %v2662_v17  ;;  %v2665_v14 = vsel %vm2537_vm14, %v2473_v13, %v2601_v16 }
 0x334   :  { %2729 = vst [vmem:[%s4527_s9 + $0x178] sm:$0xff] %v2665_v14  ;;  %v2663_v40 = vsel %vm2535_vm15, %v2471_v38, %v2599_v15  ;;  %v3315_v56 = vpop.f32.mrb[48].mxu0 }
 0x335   :  { %2727 = vst [vmem:[%s4527_s9 + $0x168] sm:$0xff] %v2663_v40  ;;  %v2476_v12 = vadd.f32 %v3315_v56, %v4260_v4  ;;  %v2356_v1 = vpop.f32.mrb[49].mxu0 }
 0x336   :  { %v2474_v9 = vadd.f32 %v4260_v4, %v2356_v1  ;;  %v3316_v43 = vpop.f32.mrb[50].mxu0 }
 0x337   :  { %vm2540_vm0 = vcmp.gt.f32.partialorder %v2476_v12, 0.0  ;;  %v2604_v20 = vmul.f32 0.01, %v2476_v12  ;;  %v2477_v27 = vadd.f32 %v3316_v43, %v4260_v4  ;;  %v2359_v60 = vpop.f32.mrb[51].mxu0 }
 0x338   :  { %vm2538_vm1 = vcmp.gt.f32.partialorder %v2474_v9, 0.0  ;;  %v2602_v50 = vmul.f32 0.01, %v2474_v9  ;;  %v2475_v34 = vadd.f32 %v4260_v4, %v2359_v60 }
 0x339   :  { %v2668_v30 = vsel %vm2540_vm0, %v2476_v12, %v2604_v20  ;;  %vm2541_vm2 = vcmp.gt.f32.partialorder %v2477_v27, 0.0  ;;  %v2605_v31 = vmul.f32 0.01, %v2477_v27 }
 0x33a   :  { %2732 = vst [vmem:[%s4527_s9 + $0x190] sm:$0xff] %v2668_v30  ;;  %v2666_v35 = vsel %vm2538_vm1, %v2474_v9, %v2602_v50  ;;  %vm2539_vm3 = vcmp.gt.f32.partialorder %v2475_v34, 0.0  ;;  %v2603_v51 = vmul.f32 0.01, %v2475_v34 }
 0x33b   :  { %2730 = vst [vmem:[%s4527_s9 + $0x180] sm:$0xff] %v2666_v35  ;;  %v2669_v52 = vsel %vm2541_vm2, %v2477_v27, %v2605_v31 }
 0x33c   :  { %2733 = vst [vmem:[%s4527_s9 + $0x198] sm:$0xff] %v2669_v52  ;;  %v2667_v54 = vsel %vm2539_vm3, %v2475_v34, %v2603_v51  ;;  %v3319_v55 = vpop.f32.mrb[52].mxu0 }
 0x33d   :  { %2731 = vst [vmem:[%s4527_s9 + $0x188] sm:$0xff] %v2667_v54  ;;  %v2480_v7 = vadd.f32 %v3319_v55, %v4260_v4  ;;  %v2372_v8 = vpop.f32.mrb[53].mxu0 }
 0x33e   :  { %v2478_v10 = vadd.f32 %v4260_v4, %v2372_v8  ;;  %v3320_v11 = vpop.f32.mrb[54].mxu0 }
 0x33f   :  { %vm2544_vm4 = vcmp.gt.f32.partialorder %v2480_v7, 0.0  ;;  %v2608_v28 = vmul.f32 0.01, %v2480_v7  ;;  %v2481_v29 = vadd.f32 %v3320_v11, %v4260_v4  ;;  %v2375_v36 = vpop.f32.mrb[55].mxu0 }
 0x340   :  { %vm2542_vm5 = vcmp.gt.f32.partialorder %v2478_v10, 0.0  ;;  %v2606_v37 = vmul.f32 0.01, %v2478_v10  ;;  %v2479_v59 = vadd.f32 %v4260_v4, %v2375_v36 }
 0x341   :  { %v2672_v61 = vsel %vm2544_vm4, %v2480_v7, %v2608_v28  ;;  %vm2545_vm6 = vcmp.gt.f32.partialorder %v2481_v29, 0.0  ;;  %v2609_v63 = vmul.f32 0.01, %v2481_v29 }
 0x342   :  { %2736 = vst [vmem:[%s4527_s9 + $0x1b0] sm:$0xff] %v2672_v61  ;;  %v2670_v0 = vsel %vm2542_vm5, %v2478_v10, %v2606_v37  ;;  %vm2543_vm7 = vcmp.gt.f32.partialorder %v2479_v59, 0.0  ;;  %v2607_v21 = vmul.f32 0.01, %v2479_v59 }
 0x343   :  { %2734 = vst [vmem:[%s4527_s9 + $0x1a0] sm:$0xff] %v2670_v0  ;;  %v2673_v22 = vsel %vm2545_vm6, %v2481_v29, %v2609_v63 }
 0x344   :  { %2737 = vst [vmem:[%s4527_s9 + $0x1b8] sm:$0xff] %v2673_v22  ;;  %v2671_v24 = vsel %vm2543_vm7, %v2479_v59, %v2607_v21  ;;  %v3323_v25 = vpop.f32.mrb[56].mxu0 }
 0x345   :  { %2735 = vst [vmem:[%s4527_s9 + $0x1a8] sm:$0xff] %v2671_v24  ;;  %v2484_v57 = vadd.f32 %v3323_v25, %v4260_v4  ;;  %v2388_v58 = vpop.f32.mrb[57].mxu0 }
 0x346   :  { %v2482_v26 = vadd.f32 %v4260_v4, %v2388_v58  ;;  %v3324_v2 = vpop.f32.mrb[58].mxu0 }
 0x347   :  { %vm2548_vm8 = vcmp.gt.f32.partialorder %v2484_v57, 0.0  ;;  %v2612_v3 = vmul.f32 0.01, %v2484_v57  ;;  %v2485_v42 = vadd.f32 %v3324_v2, %v4260_v4  ;;  %v2391_v44 = vpop.f32.mrb[59].mxu0 }
 0x348   :  { %vm2546_vm9 = vcmp.gt.f32.partialorder %v2482_v26, 0.0  ;;  %v2610_v46 = vmul.f32 0.01, %v2482_v26  ;;  %v2483_v47 = vadd.f32 %v4260_v4, %v2391_v44 }
 0x349   :  { %v2676_v48 = vsel %vm2548_vm8, %v2484_v57, %v2612_v3  ;;  %vm2549_vm10 = vcmp.gt.f32.partialorder %v2485_v42, 0.0  ;;  %v2613_v33 = vmul.f32 0.01, %v2485_v42 }
 0x34a   :  { %2740 = vst [vmem:[%s4527_s9 + $0x1d0] sm:$0xff] %v2676_v48  ;;  %v2674_v41 = vsel %vm2546_vm9, %v2482_v26, %v2610_v46  ;;  %vm2547_vm11 = vcmp.gt.f32.partialorder %v2483_v47, 0.0  ;;  %v2611_v53 = vmul.f32 0.01, %v2483_v47 }
 0x34b   :  { %2738 = vst [vmem:[%s4527_s9 + $0x1c0] sm:$0xff] %v2674_v41  ;;  %v2677_v6 = vsel %vm2549_vm10, %v2485_v42, %v2613_v33 }
 0x34c   :  { %2741 = vst [vmem:[%s4527_s9 + $0x1d8] sm:$0xff] %v2677_v6  ;;  %v2675_v45 = vsel %vm2547_vm11, %v2483_v47, %v2611_v53  ;;  %v3327_v19 = vpop.f32.mrb[60].mxu0 }
 0x34d   :  { %2739 = vst [vmem:[%s4527_s9 + $0x1c8] sm:$0xff] %v2675_v45  ;;  %v2488_v62 = vadd.f32 %v3327_v19, %v4260_v4  ;;  %v2404_v32 = vpop.f32.mrb[61].mxu0 }
 0x34e   :  { %v2486_v49 = vadd.f32 %v4260_v4, %v2404_v32  ;;  %v3328_v39 = vpop.f32.mrb[62].mxu0 }
 0x34f   :  { %vm2552_vm12 = vcmp.gt.f32.partialorder %v2488_v62, 0.0  ;;  %v2616_v13 = vmul.f32 0.01, %v2488_v62  ;;  %v2489_v5 = vadd.f32 %v3328_v39, %v4260_v4  ;;  %v2407_v18 = vpop.f32.mrb[63].mxu0 }
 0x350   :  { %vm2550_vm13 = vcmp.gt.f32.partialorder %v2486_v49, 0.0  ;;  %v2614_v38 = vmul.f32 0.01, %v2486_v49  ;;  %v2487_v23 = vadd.f32 %v4260_v4, %v2407_v18 }
 0x351   :  { %v2680_v16 = vsel %vm2552_vm12, %v2488_v62, %v2616_v13  ;;  %vm2553_vm14 = vcmp.gt.f32.partialorder %v2489_v5, 0.0  ;;  %v2617_v17 = vmul.f32 0.01, %v2489_v5 }
 0x352   :  { %2744 = vst [vmem:[%s4527_s9 + $0x1f0] sm:$0xff] %v2680_v16  ;;  %v2678_v15 = vsel %vm2550_vm13, %v2486_v49, %v2614_v38  ;;  %vm2551_vm15 = vcmp.gt.f32.partialorder %v2487_v23, 0.0  ;;  %v2615_v14 = vmul.f32 0.01, %v2487_v23 }
 0x353   :  { %2742 = vst [vmem:[%s4527_s9 + $0x1e0] sm:$0xff] %v2678_v15  ;;  %v2681_v40 = vsel %vm2553_vm14, %v2489_v5, %v2617_v17 }
 0x354   :  { %2745 = vst [vmem:[%s4527_s9 + $0x1f8] sm:$0xff] %v2681_v40  ;;  %v2679_v4 = vsel %vm2551_vm15, %v2487_v23, %v2615_v14 }
 0x355   :  { %2743 = vst [vmem:[%s4527_s9 + $0x1e8] sm:$0xff] %v2679_v4 }

// kernel: _csp_forward.2
= control target key start
LH: loop header
LB: loop body
LE: loop exit
PB: predicated region body
PF: predicated region fallthrough
CT: control target
= control target key end

     0   :  { %s4867_s24 = smov 0   ;;  %s6095_s0 = inlined_call_operand.vmem [shape: bf16[2,256,128], index: 0, kind: input, shape index: {}]   ;;  %s6096_s1 = inlined_call_operand.vmem [shape: bf16[128,128], index: 1, kind: input, shape index: {}]   ;;  %s6097_s2 = inlined_call_operand.vmem [shape: f32[1,128], index: 2, kind: input, shape index: {}]   ;;  %s6098_s3 = inlined_call_operand.vmem [shape: bf16[128,128], index: 3, kind: input, shape index: {}]   ;;  %s6099_s4 = inlined_call_operand.vmem [shape: f32[1,128], index: 4, kind: input, shape index: {}]   ;;  %s6100_s5 = inlined_call_operand.vmem [shape: bf16[1152,128], index: 5, kind: input, shape index: {}]   ;;  %s6101_s6 = inlined_call_operand.vmem [shape: f32[1,128], index: 6, kind: input, shape index: {}]   ;;  %s6102_s7 = inlined_call_operand.vmem [shape: bf16[2,256,128], index: 7, kind: output, shape index: {}]  }
   0x1 LB: > { %s3792_s25 = sadd.s32 4294967295, %s4821_s24   ;;  %p3796_p0 = scmp.ge.s32.totalorder %s4821_s24, 1  ;;  %s4821_s24 = sphi %s4867_s24, %s17_s24  }
   0x2   : > { %p237_p1 = scmp.lt.s32.totalorder %s4821_s24, 3 }
   0x4   : > { %p238_p2 = pnand %p3796_p0, %p237_p1 }
   0x6   : > { %241 = sbr.rel (%p238_p2) target bundleno = 1340 (0x53c), region = 48 }
   0xd   : > { %v4693_v0 = vld [vmem:[%s6096_s1] sm:$0xff]   ;;  %p269_p3 = scmp.lt.s32.totalorder %s3792_s25, 1  ;;  %v4694_v1 = vld [vmem:[%s6096_s1 + $0x8] sm:$0xff]   ;;  %v4695_v2 = vld [vmem:[%s6096_s1 + $0x10] sm:$0xff]   ;;  %v6109_v32 = vmov 0  }
   0xe   : > { %4158 = vmatprep.subr.bf16.mxu0 %v4693_v0  ;;  %v4696_v3 = vld [vmem:[%s6096_s1 + $0x18] sm:$0xff]   ;;  %v4697_v5 = vld [vmem:[%s6096_s1 + $0x20] sm:$0xff]   ;;  %v4698_v6 = vld [vmem:[%s6096_s1 + $0x28] sm:$0xff]  }
   0xf   : > { %s6193_s25 = smov (!%p269_p3, %s3792_s25), 1  ;;  %4159 = vmatpush3.bf16.msra.mxu0 %v4693_v0  ;;  %v4699_v7 = vld [vmem:[%s6096_s1 + $0x30] sm:$0xff]   ;;  %v4714_v8 = vld [vmem:[%s6098_s3] sm:$0xff]   ;;  %v4716_v9 = vld [vmem:[%s6098_s3 + $0x8] sm:$0xff]  }
  0x10   : > { %4160 = vmatprep.subr.bf16.mxu0 %v4694_v1  ;;  %s3942_s9 = sshll.u32 %s6193_s25, 7  ;;  %4206 = vmatprep.subr.bf16.mxu1 %v4714_v8  ;;  %v4700_v10 = vld [vmem:[%s6096_s1 + $0x38] sm:$0xff]   ;;  %v4717_v11 = vld [vmem:[%s6098_s3 + $0x10] sm:$0xff]   ;;  %v4721_v15 = vld [vmem:[%s6098_s3 + $0x20] sm:$0xff]  }
  0x11   : > { %s4892_s12 = scalar_lea.vmem %s6095_s0, %s3942_s9  ;;  %4207 = vmatpush3.bf16.msra.mxu1 %v4714_v8  ;;  %v4718_v13 = vld [vmem:[%s6098_s3 + $0x18] sm:$0xff]   ;;  %v4722_v29 = vld [vmem:[%s6098_s3 + $0x28] sm:$0xff]   ;;  %v4723_v30 = vld [vmem:[%s6098_s3 + $0x30] sm:$0xff]   ;;  %s5996_s23 = scalar_lea.vmem %s6102_s7, %s3942_s9 }
  0x12   : > { %v4701_v4 = vld [vmem:[%s4892_s12] sm:$0xff]   ;;  %4208 = vmatprep.subr.bf16.mxu1 %v4716_v9  ;;  %v4702_v12 = vld [vmem:[%s4892_s12 + $0x8] sm:$0xff]   ;;  %v4703_v14 = vld [vmem:[%s4892_s12 + $0x10] sm:$0xff]  }
  0x13   : > { %4161 = vmatpush3.bf16.msra.mxu0 %v4694_v1  ;;  %4174 = vmatprep.mubr.bf16.mxu0 %v4701_v4  ;;  %v4704_v16 = vld [vmem:[%s4892_s12 + $0x18] sm:$0xff]   ;;  %v4705_v17 = vld [vmem:[%s4892_s12 + $0x20] sm:$0xff]   ;;  %v4706_v18 = vld [vmem:[%s4892_s12 + $0x28] sm:$0xff]  }
  0x14   : > { %4162 = vmatprep.subr.bf16.mxu0 %v4695_v2  ;;  %v4707_v19 = vld [vmem:[%s4892_s12 + $0x30] sm:$0xff]   ;;  %v4708_v20 = vld [vmem:[%s4892_s12 + $0x38] sm:$0xff]   ;;  %v4709_v21 = vld [vmem:[%s4892_s12 + $0x40] sm:$0xff]  }
  0x15   : > { %4209 = vmatpush3.bf16.msra.mxu1 %v4716_v9  ;;  %v4710_v22 = vld [vmem:[%s4892_s12 + $0x48] sm:$0xff]   ;;  %v4711_v23 = vld [vmem:[%s4892_s12 + $0x50] sm:$0xff]   ;;  %v4712_v24 = vld [vmem:[%s4892_s12 + $0x58] sm:$0xff]  }
  0x16   : > { %4210 = vmatprep.subr.bf16.mxu1 %v4717_v11  ;;  %v4713_v25 = vld [vmem:[%s4892_s12 + $0x60] sm:$0xff]   ;;  %v4715_v26 = vld [vmem:[%s4892_s12 + $0x68] sm:$0xff]   ;;  %v4719_v27 = vld [vmem:[%s4892_s12 + $0x70] sm:$0xff]  }
  0x17   : > { %4163 = vmatpush3.bf16.msra.mxu0 %v4695_v2  ;;  %v4720_v28 = vld [vmem:[%s4892_s12 + $0x78] sm:$0xff]   ;;  %v4729_v33 = vld [vmem:[%s6100_s5 + $0x100] sm:$0xff]   ;;  %v4731_v34 = vld [vmem:[%s6100_s5 + $0x108] sm:$0xff]  }
  0x18   : > { %4164 = vmatprep.subr.bf16.mxu0 %v4696_v3  ;;  %v4724_v31 = vld [vmem:[%s6098_s3 + $0x38] sm:$0xff]   ;;  %v4733_v35 = vld [vmem:[%s6100_s5 + $0x110] sm:$0xff]   ;;  %v4737_v37 = vld [vmem:[%s6100_s5 + $0x120] sm:$0xff]  }
  0x19   : > { %4211 = vmatpush3.bf16.msra.mxu1 %v4717_v11  ;;  %v4735_v36 = vld [vmem:[%s6100_s5 + $0x118] sm:$0xff]   ;;  %v4739_v38 = vld [vmem:[%s6100_s5 + $0x128] sm:$0xff]   ;;  %v4741_v39 = vld [vmem:[%s6100_s5 + $0x130] sm:$0xff]  }
  0x1a   : > { %4212 = vmatprep.subr.bf16.mxu1 %v4718_v13  ;;  %v4743_v40 = vld [vmem:[%s6100_s5 + $0x138] sm:$0xff]   ;;  %v4745_v41 = vld [vmem:[%s6100_s5 + $0x140] sm:$0xff]   ;;  %v4747_v42 = vld [vmem:[%s6100_s5 + $0x148] sm:$0xff]  }
  0x1b   : > { %4165 = vmatpush3.bf16.msra.mxu0 %v4696_v3  ;;  %v4749_v43 = vld [vmem:[%s6100_s5 + $0x150] sm:$0xff]   ;;  %v4998_v44 = vld [vmem:[%s6097_s2] ss:$0 sm:$0xff] }
  0x1c   : > { %4166 = vmatprep.subr.bf16.mxu0 %v4697_v5  ;;  %v4725_v2 = vld [vmem:[%s6100_s5] sm:$0xff]  }
  0x1d   : > { %4213 = vmatpush3.bf16.msra.mxu1 %v4718_v13 }
  0x1e   : > { %4214 = vmatprep.subr.bf16.mxu1 %v4721_v15 }
  0x1f   : > { %4167 = vmatpush3.bf16.msra.mxu0 %v4697_v5 }
  0x20   : > { %4168 = vmatprep.subr.bf16.mxu0 %v4698_v6 }
  0x21   : > { %4215 = vmatpush3.bf16.msra.mxu1 %v4721_v15 }
  0x22   : > { %4216 = vmatprep.subr.bf16.mxu1 %v4722_v29 }
  0x23   : > { %4169 = vmatpush3.bf16.msra.mxu0 %v4698_v6 }
  0x24   : > { %4170 = vmatprep.subr.bf16.mxu0 %v4699_v7 }
  0x25   : > { %4217 = vmatpush3.bf16.msra.mxu1 %v4722_v29 }
  0x26   : > { %4218 = vmatprep.subr.bf16.mxu1 %v4723_v30 }
  0x27   : > { %4171 = vmatpush3.bf16.msra.mxu0 %v4699_v7 }
  0x28   : > { %4172 = vmatprep.subr.bf16.mxu0 %v4700_v10 }
  0x29   : > { %4219 = vmatpush3.bf16.msra.mxu1 %v4723_v30 }
  0x2a   : > { %4220 = vmatprep.subr.bf16.mxu1 %v4724_v31 }
  0x2b   : > { %4173 = vmatpush3.bf16.msra.mxu0 %v4700_v10 }
  0x2c   : > { %2616 = vmatprep.subr.bf16.mxu0 %v6109_v32 }
  0x2d   : > { %4221 = vmatpush3.bf16.msra.mxu1 %v4724_v31 }
  0x2e   : > { %4175 = vmatmul.mubr.bf16.vlgmr.msra.gmra.mrb[0].mxu0 %v4702_v12  ;;  %2114 = vmatprep.subr.bf16.mxu1 %v6109_v32  ;;  %v4726_v12 = vld [vmem:[%s6100_s5 + $0x8] sm:$0xff]  }
  0x2f   : > { %4178 = vmatprep.mubr.bf16.mxu0 %v4703_v14  ;;  %2617 = vmatpush1.bf16.msra.mxu0 %v4729_v33  ;;  %v4728_v33 = vld [vmem:[%s6100_s5 + $0x18] sm:$0xff]  }
  0x30   : > { %2618 = vmatprep.subr.bf16.mxu0 %v6109_v32 }
  0x33   : > { %2619 = vmatpush1.bf16.msra.mxu0 %v4731_v34 }
  0x34   : > { %2620 = vmatprep.subr.bf16.mxu0 %v6109_v32 }
  0x36   : > { %4179 = vmatmul.mubr.bf16.gmra.mrb[4].mxu0 %v4704_v16 }
  0x37   : > { %4182 = vmatprep.mubr.bf16.mxu0 %v4705_v17  ;;  %2621 = vmatpush1.bf16.msra.mxu0 %v4733_v35 }
  0x38   : > { %2622 = vmatprep.subr.bf16.mxu0 %v6109_v32 }
  0x3b   : > { %2623 = vmatpush1.bf16.msra.mxu0 %v4735_v36 }
  0x3c   : > { %2624 = vmatprep.subr.bf16.mxu0 %v6109_v32 }
  0x3e   : > { %4183 = vmatmul.mubr.bf16.gmra.mrb[8].mxu0 %v4706_v18 }
  0x3f   : > { %4186 = vmatprep.mubr.bf16.mxu0 %v4707_v19  ;;  %2625 = vmatpush1.bf16.msra.mxu0 %v4737_v37 }
  0x40   : > { %2626 = vmatprep.subr.bf16.mxu0 %v6109_v32 }
  0x43   : > { %2627 = vmatpush1.bf16.msra.mxu0 %v4739_v38 }
  0x44   : > { %2628 = vmatprep.subr.bf16.mxu0 %v6109_v32 }
  0x46   : > { %4187 = vmatmul.mubr.bf16.gmra.mrb[12].mxu0 %v4708_v20 }
  0x47   : > { %4190 = vmatprep.mubr.bf16.mxu0 %v4709_v21  ;;  %2629 = vmatpush1.bf16.msra.mxu0 %v4741_v39 }
  0x48   : > { %2630 = vmatprep.subr.bf16.mxu0 %v6109_v32 }
  0x4b   : > { %2631 = vmatpush1.bf16.msra.mxu0 %v4743_v40 }
  0x4c   : > { %2632 = vmatprep.subr.bf16.mxu0 %v6109_v32 }
  0x4e   : > { %4191 = vmatmul.mubr.bf16.gmra.mrb[16].mxu0 %v4710_v22  ;;  %v4727_v22 = vld [vmem:[%s6100_s5 + $0x10] sm:$0xff]  }
  0x4f   : > { %4194 = vmatprep.mubr.bf16.mxu0 %v4711_v23  ;;  %2633 = vmatpush1.bf16.msra.mxu0 %v4745_v41 }
  0x50   : > { %2634 = vmatprep.subr.bf16.mxu0 %v6109_v32 }
  0x53   : > { %2635 = vmatpush1.bf16.msra.mxu0 %v4747_v42 }
  0x54   : > { %2636 = vmatprep.subr.bf16.mxu0 %v6109_v32 }
  0x56   : > { %4195 = vmatmul.mubr.bf16.gmra.mrb[20].mxu0 %v4712_v24 }
  0x57   : > { %4198 = vmatprep.mubr.bf16.mxu0 %v4713_v25  ;;  %2637 = vmatpush1.bf16.msra.mxu0 %v4749_v43  ;;  %v4730_v43 = vld [vmem:[%s6100_s5 + $0x20] sm:$0xff]  }
  0x58   : > { %2638 = vmatprep.subr.bf16.mxu0 %v6109_v32 }
  0x5e   : > { %4199 = vmatmul.mubr.bf16.gmra.mrb[24].mxu0 %v4715_v26 }
  0x5f   : > { %4202 = vmatprep.mubr.bf16.mxu0 %v4719_v27 }
  0x66   : > { %4203 = vmatmul.mubr.bf16.gmra.mrb[28].mxu0 %v4720_v28 }
 0x101   : > { %v4176_v45 = vpop.f32.mrb[0].mxu0 }
 0x102   : > { %v522_v46 = vadd.f32 %v4176_v45, %v4998_v44  ;;  %v513_v47 = vpop.f32.mrb[1].mxu0 }
 0x103   : > { %v514_v48 = vadd.f32 %v4998_v44, %v513_v47  ;;  %v4177_v49 = vpop.f32.mrb[2].mxu0 }
 0x104   : > { %v674_v50 = vmul.f32 0.01, %v522_v46  ;;  %v525_v51 = vadd.f32 %v4177_v49, %v4998_v44  ;;  %v516_v52 = vpop.f32.mrb[3].mxu0  ;;  %vm642_vm0 = vcmp.gt.f32.partialorder %v522_v46, 0.0 }
 0x105   : > { %v672_v53 = vmul.f32 0.01, %v514_v48  ;;  %v517_v54 = vadd.f32 %v4998_v44, %v516_v52  ;;  %vm640_vm1 = vcmp.gt.f32.partialorder %v514_v48, 0.0 }
 0x106   : > { %vm643_vm2 = vcmp.gt.f32.partialorder %v525_v51, 0.0  ;;  %v675_v55 = vmul.f32 0.01, %v525_v51  ;;  %v706_v57 = vsel %vm642_vm0, %v522_v46, %v674_v50 }
 0x107   : > { %vm641_vm3 = vcmp.gt.f32.partialorder %v517_v54, 0.0  ;;  %v673_v56 = vmul.f32 0.01, %v517_v54  ;;  %v704_v59 = vsel %vm640_vm1, %v514_v48, %v672_v53 }
 0x108   : > { %v707_v58 = vsel %vm643_vm2, %v525_v51, %v675_v55 }
 0x109   : > { %v705_v60 = vsel %vm641_vm3, %v517_v54, %v673_v56  ;;  %v5004_v61 = vpack.c.bf16 %v707_v58, %v706_v57  ;;  %v4180_v62 = vpop.f32.mrb[4].mxu0  ;;  %v4732_v54 = vld [vmem:[%s6100_s5 + $0x28] sm:$0xff]  }
 0x10a   : > { %v5006_v63 = vpack.c.bf16 %v705_v60, %v704_v59  ;;  %v538_v0 = vadd.f32 %v4180_v62, %v4998_v44  ;;  %v529_v1 = vpop.f32.mrb[5].mxu0 }
 0x10b   : > { %6148 = vst [vmem:[#allocation4_spill] sm:$0xff] %v5004_v61  ;;  %v530_v3 = vadd.f32 %v4998_v44, %v529_v1  ;;  %v4181_v4 = vpop.f32.mrb[6].mxu0 }
 0x10c   : > { %6149 = vst [vmem:[#allocation5_spill] sm:$0xff] %v5006_v63  ;;  %4222 = vmatprep.mubr.bf16.mxu1 %v5006_v63  ;;  %vm646_vm4 = vcmp.gt.f32.partialorder %v538_v0, 0.0  ;;  %v678_v5 = vmul.f32 0.01, %v538_v0  ;;  %v541_v6 = vadd.f32 %v4181_v4, %v4998_v44  ;;  %v532_v7 = vpop.f32.mrb[7].mxu0 }
 0x10d   : > { %4223 = vmatmul.mubr.bf16.vlgmr.msra.gmra.mrb[0].mxu1 %v5004_v61  ;;  %vm644_vm5 = vcmp.gt.f32.partialorder %v530_v3, 0.0  ;;  %v676_v8 = vmul.f32 0.01, %v530_v3  ;;  %v533_v9 = vadd.f32 %v4998_v44, %v532_v7 }
 0x10e   : > { %vm647_vm6 = vcmp.gt.f32.partialorder %v541_v6, 0.0  ;;  %v679_v10 = vmul.f32 0.01, %v541_v6  ;;  %v710_v11 = vsel %vm646_vm4, %v538_v0, %v678_v5  ;;  %2115 = vmatpush1.bf16.msra.mxu1 %v4725_v2  ;;  %v4734_v2 = vld [vmem:[%s6100_s5 + $0x30] sm:$0xff]  }
 0x10f   : > { %vm645_vm7 = vcmp.gt.f32.partialorder %v533_v9, 0.0  ;;  %v677_v13 = vmul.f32 0.01, %v533_v9  ;;  %v708_v14 = vsel %vm644_vm5, %v530_v3, %v676_v8  ;;  %2116 = vmatprep.subr.bf16.mxu1 %v6109_v32 }
 0x110   : > { %v711_v15 = vsel %vm647_vm6, %v541_v6, %v679_v10 }
 0x111   : > { %v709_v16 = vsel %vm645_vm7, %v533_v9, %v677_v13  ;;  %v5021_v17 = vpack.c.bf16 %v711_v15, %v710_v11  ;;  %v4184_v18 = vpop.f32.mrb[8].mxu0 }
 0x112   : > { %v5023_v19 = vpack.c.bf16 %v709_v16, %v708_v14  ;;  %v554_v20 = vadd.f32 %v4184_v18, %v4998_v44  ;;  %v545_v21 = vpop.f32.mrb[9].mxu0  ;;  %2117 = vmatpush1.bf16.msra.mxu1 %v4726_v12  ;;  %v4736_v12 = vld [vmem:[%s6100_s5 + $0x38] sm:$0xff]  }
 0x113   : > { %6150 = vst [vmem:[#allocation6_spill] sm:$0xff] %v5021_v17  ;;  %v546_v23 = vadd.f32 %v4998_v44, %v545_v21  ;;  %v4185_v24 = vpop.f32.mrb[10].mxu0  ;;  %2118 = vmatprep.subr.bf16.mxu1 %v6109_v32 }
 0x114   : > { %6151 = vst [vmem:[#allocation7_spill] sm:$0xff] %v5023_v19  ;;  %4226 = vmatprep.mubr.bf16.mxu1 %v5023_v19  ;;  %vm650_vm8 = vcmp.gt.f32.partialorder %v554_v20, 0.0  ;;  %v682_v25 = vmul.f32 0.01, %v554_v20  ;;  %v557_v26 = vadd.f32 %v4185_v24, %v4998_v44  ;;  %v548_v27 = vpop.f32.mrb[11].mxu0  ;;  %v4738_v24 = vld [vmem:[%s6100_s5 + $0x40] sm:$0xff]  }
 0x115   : > { %4227 = vmatmul.mubr.bf16.gmra.mrb[4].mxu1 %v5021_v17  ;;  %vm648_vm9 = vcmp.gt.f32.partialorder %v546_v23, 0.0  ;;  %v680_v28 = vmul.f32 0.01, %v546_v23  ;;  %v549_v29 = vadd.f32 %v4998_v44, %v548_v27 }
 0x116   : > { %vm651_vm10 = vcmp.gt.f32.partialorder %v557_v26, 0.0  ;;  %v683_v30 = vmul.f32 0.01, %v557_v26  ;;  %v714_v31 = vsel %vm650_vm8, %v554_v20, %v682_v25  ;;  %2119 = vmatpush1.bf16.msra.mxu1 %v4727_v22 }
 0x117   : > { %vm649_vm11 = vcmp.gt.f32.partialorder %v549_v29, 0.0  ;;  %v681_v34 = vmul.f32 0.01, %v549_v29  ;;  %v712_v35 = vsel %vm648_vm9, %v546_v23, %v680_v28  ;;  %2120 = vmatprep.subr.bf16.mxu1 %v6109_v32 }
 0x118   : > { %v715_v36 = vsel %vm651_vm10, %v557_v26, %v683_v30 }
 0x119   : > { %v713_v37 = vsel %vm649_vm11, %v549_v29, %v681_v34  ;;  %v5039_v38 = vpack.c.bf16 %v715_v36, %v714_v31  ;;  %v4188_v39 = vpop.f32.mrb[12].mxu0 }
 0x11a   : > { %v5041_v40 = vpack.c.bf16 %v713_v37, %v712_v35  ;;  %v570_v41 = vadd.f32 %v4188_v39, %v4998_v44  ;;  %v561_v42 = vpop.f32.mrb[13].mxu0  ;;  %2121 = vmatpush1.bf16.msra.mxu1 %v4728_v33  ;;  %v4740_v35 = vld [vmem:[%s6100_s5 + $0x48] sm:$0xff]  }
 0x11b   : > { %6152 = vst [vmem:[#allocation8_spill] sm:$0xff] %v5039_v38  ;;  %v562_v45 = vadd.f32 %v4998_v44, %v561_v42  ;;  %v4189_v46 = vpop.f32.mrb[14].mxu0  ;;  %2122 = vmatprep.subr.bf16.mxu1 %v6109_v32 }
 0x11c   : > { %6153 = vst [vmem:[#allocation9_spill] sm:$0xff] %v5041_v40  ;;  %4230 = vmatprep.mubr.bf16.mxu1 %v5041_v40  ;;  %vm654_vm12 = vcmp.gt.f32.partialorder %v570_v41, 0.0  ;;  %v686_v47 = vmul.f32 0.01, %v570_v41  ;;  %v573_v48 = vadd.f32 %v4189_v46, %v4998_v44  ;;  %v564_v49 = vpop.f32.mrb[15].mxu0 }
 0x11d   : > { %4231 = vmatmul.mubr.bf16.gmra.mrb[8].mxu1 %v5039_v38  ;;  %vm652_vm13 = vcmp.gt.f32.partialorder %v562_v45, 0.0  ;;  %v684_v50 = vmul.f32 0.01, %v562_v45  ;;  %v565_v51 = vadd.f32 %v4998_v44, %v564_v49 }
 0x11e   : > { %vm655_vm14 = vcmp.gt.f32.partialorder %v573_v48, 0.0  ;;  %v687_v52 = vmul.f32 0.01, %v573_v48  ;;  %v718_v53 = vsel %vm654_vm12, %v570_v41, %v686_v47  ;;  %2123 = vmatpush1.bf16.msra.mxu1 %v4730_v43 }
 0x11f   : > { %vm653_vm15 = vcmp.gt.f32.partialorder %v565_v51, 0.0  ;;  %v685_v55 = vmul.f32 0.01, %v565_v51  ;;  %v716_v56 = vsel %vm652_vm13, %v562_v45, %v684_v50  ;;  %2124 = vmatprep.subr.bf16.mxu1 %v6109_v32 }
 0x120   : > { %v719_v57 = vsel %vm655_vm14, %v573_v48, %v687_v52  ;;  %v4742_v48 = vld [vmem:[%s6100_s5 + $0x50] sm:$0xff]  }
 0x121   : > { %v717_v58 = vsel %vm653_vm15, %v565_v51, %v685_v55  ;;  %v5057_v59 = vpack.c.bf16 %v719_v57, %v718_v53  ;;  %v4192_v60 = vpop.f32.mrb[16].mxu0 }
 0x122   : > { %v5059_v62 = vpack.c.bf16 %v717_v58, %v716_v56  ;;  %v586_v0 = vadd.f32 %v4192_v60, %v4998_v44  ;;  %v577_v1 = vpop.f32.mrb[17].mxu0  ;;  %2125 = vmatpush1.bf16.msra.mxu1 %v4732_v54  ;;  %v4744_v58 = vld [vmem:[%s6100_s5 + $0x58] sm:$0xff]  }
 0x123   : > { %6154 = vst [vmem:[#allocation10_spill] sm:$0xff] %v5057_v59  ;;  %v578_v3 = vadd.f32 %v4998_v44, %v577_v1  ;;  %v4193_v4 = vpop.f32.mrb[18].mxu0  ;;  %2126 = vmatprep.subr.bf16.mxu1 %v6109_v32 }
 0x124   : > { %6155 = vst [vmem:[#allocation11_spill] sm:$0xff] %v5059_v62  ;;  %4234 = vmatprep.mubr.bf16.mxu1 %v5059_v62  ;;  %vm658_vm0 = vcmp.gt.f32.partialorder %v586_v0, 0.0  ;;  %v690_v5 = vmul.f32 0.01, %v586_v0  ;;  %v589_v6 = vadd.f32 %v4193_v4, %v4998_v44  ;;  %v580_v7 = vpop.f32.mrb[19].mxu0 }
 0x125   : > { %4235 = vmatmul.mubr.bf16.gmra.mrb[12].mxu1 %v5057_v59  ;;  %vm656_vm1 = vcmp.gt.f32.partialorder %v578_v3, 0.0  ;;  %v688_v8 = vmul.f32 0.01, %v578_v3  ;;  %v581_v9 = vadd.f32 %v4998_v44, %v580_v7 }
 0x126   : > { %vm659_vm2 = vcmp.gt.f32.partialorder %v589_v6, 0.0  ;;  %v691_v10 = vmul.f32 0.01, %v589_v6  ;;  %v722_v11 = vsel %vm658_vm0, %v586_v0, %v690_v5  ;;  %2127 = vmatpush1.bf16.msra.mxu1 %v4734_v2 }
 0x127   : > { %vm657_vm3 = vcmp.gt.f32.partialorder %v581_v9, 0.0  ;;  %v689_v13 = vmul.f32 0.01, %v581_v9  ;;  %v720_v14 = vsel %vm656_vm1, %v578_v3, %v688_v8  ;;  %2128 = vmatprep.subr.bf16.mxu1 %v6109_v32  ;;  %v4746_v8 = vld [vmem:[%s6100_s5 + $0x60] sm:$0xff]  }
 0x128   : > { %v723_v15 = vsel %vm659_vm2, %v589_v6, %v691_v10 }
 0x129   : > { %v721_v16 = vsel %vm657_vm3, %v581_v9, %v689_v13  ;;  %v5075_v18 = vpack.c.bf16 %v723_v15, %v722_v11  ;;  %v4196_v20 = vpop.f32.mrb[20].mxu0 }
 0x12a   : > { %v5077_v21 = vpack.c.bf16 %v721_v16, %v720_v14  ;;  %v602_v22 = vadd.f32 %v4196_v20, %v4998_v44  ;;  %v593_v23 = vpop.f32.mrb[21].mxu0  ;;  %2129 = vmatpush1.bf16.msra.mxu1 %v4736_v12  ;;  %v4748_v20 = vld [vmem:[%s6100_s5 + $0x68] sm:$0xff]  }
 0x12b   : > { %6156 = vst [vmem:[#allocation12_spill] sm:$0xff] %v5075_v18  ;;  %v594_v25 = vadd.f32 %v4998_v44, %v593_v23  ;;  %v4197_v26 = vpop.f32.mrb[22].mxu0  ;;  %2130 = vmatprep.subr.bf16.mxu1 %v6109_v32 }
 0x12c   : > { %6157 = vst [vmem:[#allocation13_spill] sm:$0xff] %v5077_v21  ;;  %4238 = vmatprep.mubr.bf16.mxu1 %v5077_v21  ;;  %vm662_vm4 = vcmp.gt.f32.partialorder %v602_v22, 0.0  ;;  %v694_v27 = vmul.f32 0.01, %v602_v22  ;;  %v605_v28 = vadd.f32 %v4197_v26, %v4998_v44  ;;  %v596_v29 = vpop.f32.mrb[23].mxu0 }
 0x12d   : > { %4239 = vmatmul.mubr.bf16.gmra.mrb[16].mxu1 %v5075_v18  ;;  %vm660_vm5 = vcmp.gt.f32.partialorder %v594_v25, 0.0  ;;  %v692_v30 = vmul.f32 0.01, %v594_v25  ;;  %v597_v31 = vadd.f32 %v4998_v44, %v596_v29  ;;  %v4824_v29 = vmov 0.0  }
 0x12e   : > { %vm663_vm6 = vcmp.gt.f32.partialorder %v605_v28, 0.0  ;;  %v695_v33 = vmul.f32 0.01, %v605_v28  ;;  %v726_v34 = vsel %vm662_vm4, %v602_v22, %v694_v27  ;;  %2131 = vmatpush1.bf16.msra.mxu1 %v4738_v24  ;;  %1112 = vst [vmem:[#allocation3] sm:$0xff] %v4824_v29  ;;  %1113 = vst [vmem:[#allocation3 + $0x8] sm:$0xff] %v4824_v29 }
 0x12f   : > { %vm661_vm7 = vcmp.gt.f32.partialorder %v597_v31, 0.0  ;;  %v693_v36 = vmul.f32 0.01, %v597_v31  ;;  %v724_v37 = vsel %vm660_vm5, %v594_v25, %v692_v30  ;;  %2132 = vmatprep.subr.bf16.mxu1 %v6109_v32  ;;  %1114 = vst [vmem:[#allocation3 + $0x10] sm:$0xff] %v4824_v29  ;;  %1115 = vst [vmem:[#allocation3 + $0x18] sm:$0xff] %v4824_v29  ;;  %v4752_v30 = vld [vmem:[%s6100_s5 + $0x78] sm:$0xff]  }
 0x130   : > { %v727_v39 = vsel %vm663_vm6, %v605_v28, %v695_v33  ;;  %1116 = vst [vmem:[#allocation3 + $0x20] sm:$0xff] %v4824_v29  ;;  %1119 = vst [vmem:[#allocation3 + $0x38] sm:$0xff] %v4824_v29 }
 0x131   : > { %v725_v41 = vsel %vm661_vm7, %v597_v31, %v693_v36  ;;  %v5093_v42 = vpack.c.bf16 %v727_v39, %v726_v34  ;;  %v4200_v43 = vpop.f32.mrb[24].mxu0  ;;  %1120 = vst [vmem:[#allocation3 + $0x40] sm:$0xff] %v4824_v29  ;;  %1123 = vst [vmem:[#allocation3 + $0x58] sm:$0xff] %v4824_v29  ;;  %v4751_v31 = vld [vmem:[%s6100_s5 + $0x158] sm:$0xff]   ;;  %v6103_v36 = vmov 0.0|0.0   ;;  %v4754_v39 = vld [vmem:[%s6100_s5 + $0x168] sm:$0xff]  }
 0x132   : > { %v5095_v45 = vpack.c.bf16 %v725_v41, %v724_v37  ;;  %v618_v46 = vadd.f32 %v4200_v43, %v4998_v44  ;;  %v609_v47 = vpop.f32.mrb[25].mxu0  ;;  %2133 = vmatpush1.bf16.msra.mxu1 %v4740_v35  ;;  %1124 = vst [vmem:[#allocation3 + $0x60] sm:$0xff] %v4824_v29  ;;  %1127 = vst [vmem:[#allocation3 + $0x78] sm:$0xff] %v4824_v29  ;;  %2639 = vmatpush1.bf16.msra.mxu0 %v4751_v31  ;;  %v4753_v37 = vld [vmem:[%s6100_s5 + $0x160] sm:$0xff]  }
 0x133   : > { %6158 = vst [vmem:[#allocation14_spill] sm:$0xff] %v5093_v42  ;;  %v610_v49 = vadd.f32 %v4998_v44, %v609_v47  ;;  %v4201_v50 = vpop.f32.mrb[26].mxu0  ;;  %2134 = vmatprep.subr.bf16.mxu1 %v6109_v32  ;;  %1128 = vst [vmem:[#allocation3 + $0x80] sm:$0xff] %v4824_v29  ;;  %2640 = vmatprep.subr.bf16.mxu0 %v6109_v32  ;;  %v4755_v47 = vld [vmem:[%s6100_s5 + $0x170] sm:$0xff]  }
 0x134   : > { %6159 = vst [vmem:[#allocation15_spill] sm:$0xff] %v5095_v45  ;;  %4242 = vmatprep.mubr.bf16.mxu1 %v5095_v45  ;;  %vm666_vm8 = vcmp.gt.f32.partialorder %v618_v46, 0.0  ;;  %v698_v51 = vmul.f32 0.01, %v618_v46  ;;  %v621_v52 = vadd.f32 %v4201_v50, %v4998_v44  ;;  %v612_v53 = vpop.f32.mrb[27].mxu0  ;;  %1131 = vst [vmem:[#allocation3 + $0x98] sm:$0xff] %v4824_v29 }
 0x135   : > { %4243 = vmatmul.mubr.bf16.gmra.mrb[20].mxu1 %v5093_v42  ;;  %vm664_vm9 = vcmp.gt.f32.partialorder %v610_v49, 0.0  ;;  %v696_v54 = vmul.f32 0.01, %v610_v49  ;;  %v613_v55 = vadd.f32 %v4998_v44, %v612_v53  ;;  %1132 = vst [vmem:[#allocation3 + $0xa0] sm:$0xff] %v4824_v29  ;;  %1135 = vst [vmem:[#allocation3 + $0xb8] sm:$0xff] %v4824_v29  ;;  %v1216_v33 = vld [vmem:[#allocation3 + $0x7] sm:$0xff] }
 0x136   : > { %vm667_vm10 = vcmp.gt.f32.partialorder %v621_v52, 0.0  ;;  %v699_v56 = vmul.f32 0.01, %v621_v52  ;;  %v730_v57 = vsel %vm666_vm8, %v618_v46, %v698_v51  ;;  %2135 = vmatpush1.bf16.msra.mxu1 %v4742_v48  ;;  %1136 = vst [vmem:[#allocation3 + $0xc0] sm:$0xff] %v4824_v29  ;;  %1139 = vst [vmem:[#allocation3 + $0xd8] sm:$0xff] %v4824_v29  ;;  %v1217_v34 = vld [vmem:[#allocation3 + $0xf] sm:$0xff]  ;;  %2641 = vmatpush1.bf16.msra.mxu0 %v4753_v37 }
 0x137   : > { %vm665_vm11 = vcmp.gt.f32.partialorder %v613_v55, 0.0  ;;  %v697_v60 = vmul.f32 0.01, %v613_v55  ;;  %v728_v0 = vsel %vm664_vm9, %v610_v49, %v696_v54  ;;  %2136 = vmatprep.subr.bf16.mxu1 %v6109_v32  ;;  %1140 = vst [vmem:[#allocation3 + $0xe0] sm:$0xff] %v4824_v29  ;;  %1143 = vst [vmem:[#allocation3 + $0xf8] sm:$0xff] %v4824_v29  ;;  %v1426_v35 = vpack.c.bf16 %v1217_v34, %v1216_v33  ;;  %v1218_v41 = vld [vmem:[#allocation3 + $0x17] sm:$0xff] }
 0x138   : > { %v731_v1 = vsel %vm667_vm10, %v621_v52, %v699_v56  ;;  %1144 = vst [vmem:[#allocation3 + $0x100] sm:$0xff] %v4824_v29  ;;  %1147 = vst [vmem:[#allocation3 + $0x118] sm:$0xff] %v4824_v29  ;;  %2642 = vmatprep.subr.bf16.mxu0 %v6109_v32  ;;  %v1219_v43 = vld [vmem:[#allocation3 + $0x1f] sm:$0xff]  ;;  %v4761_v50 = vld [vmem:[%s6100_s5 + $0x88] sm:$0xff]  }
 0x139   : > { %v729_v2 = vsel %vm665_vm11, %v613_v55, %v697_v60  ;;  %v5111_v3 = vpack.c.bf16 %v731_v1, %v730_v57  ;;  %v4204_v4 = vpop.f32.mrb[28].mxu0  ;;  %1148 = vst [vmem:[#allocation3 + $0x120] sm:$0xff] %v4824_v29  ;;  %1151 = vst [vmem:[#allocation3 + $0x138] sm:$0xff] %v4824_v29  ;;  %v1435_v46 = vpack.c.bf16 %v1219_v43, %v1218_v41  ;;  %v4756_v48 = vld [vmem:[%s6100_s5 + $0x178] sm:$0xff]   ;;  %v4758_v49 = vld [vmem:[%s6100_s5 + $0x80] sm:$0xff]  }
 0x13a   : > { %v5113_v5 = vpack.c.bf16 %v729_v2, %v728_v0  ;;  %v634_v6 = vadd.f32 %v4204_v4, %v4998_v44  ;;  %v625_v7 = vpop.f32.mrb[29].mxu0  ;;  %2137 = vmatpush1.bf16.msra.mxu1 %v4744_v58  ;;  %1152 = vst [vmem:[#allocation3 + $0x140] sm:$0xff] %v4824_v29  ;;  %1155 = vst [vmem:[#allocation3 + $0x158] sm:$0xff] %v4824_v29  ;;  %2643 = vmatpush1.bf16.msra.mxu0 %v4754_v39  ;;  %v4764_v51 = vld [vmem:[%s6100_s5 + $0x90] sm:$0xff]   ;;  %v4767_v52 = vld [vmem:[%s6100_s5 + $0x98] sm:$0xff]  }
 0x13b   : > { %6160 = vst [vmem:[#allocation16_spill] sm:$0xff] %v5111_v3  ;;  %v626_v9 = vadd.f32 %v4998_v44, %v625_v7  ;;  %v4205_v10 = vpop.f32.mrb[30].mxu0  ;;  %2138 = vmatprep.subr.bf16.mxu1 %v6109_v32  ;;  %1156 = vst [vmem:[#allocation3 + $0x160] sm:$0xff] %v4824_v29  ;;  %2644 = vmatprep.subr.bf16.mxu0 %v6109_v32  ;;  %v4770_v53 = vld [vmem:[%s6100_s5 + $0xa0] sm:$0xff]   ;;  %v4773_v54 = vld [vmem:[%s6100_s5 + $0xa8] sm:$0xff]  }
 0x13c   : > { %6161 = vst [vmem:[#allocation17_spill] sm:$0xff] %v5113_v5  ;;  %4246 = vmatprep.mubr.bf16.mxu1 %v5113_v5  ;;  %vm670_vm12 = vcmp.gt.f32.partialorder %v634_v6, 0.0  ;;  %v702_v11 = vmul.f32 0.01, %v634_v6  ;;  %v637_v12 = vadd.f32 %v4205_v10, %v4998_v44  ;;  %v628_v13 = vpop.f32.mrb[31].mxu0  ;;  %1159 = vst [vmem:[#allocation3 + $0x178] sm:$0xff] %v4824_v29 }
 0x13d   : > { %4247 = vmatmul.mubr.bf16.gmra.mrb[24].mxu1 %v5111_v3  ;;  %vm668_vm13 = vcmp.gt.f32.partialorder %v626_v9, 0.0  ;;  %v700_v14 = vmul.f32 0.01, %v626_v9  ;;  %v629_v15 = vadd.f32 %v4998_v44, %v628_v13  ;;  %v4750_v44 = vld [vmem:[%s6100_s5 + $0x70] sm:$0xff]   ;;  %1160 = vst [vmem:[#allocation3 + $0x180] sm:$0xff] %v4824_v29  ;;  %1163 = vst [vmem:[#allocation3 + $0x198] sm:$0xff] %v4824_v29 }
 0x13e   : > { %vm671_vm14 = vcmp.gt.f32.partialorder %v637_v12, 0.0  ;;  %v703_v16 = vmul.f32 0.01, %v637_v12  ;;  %2139 = vmatpush1.bf16.msra.mxu1 %v4746_v8  ;;  %v734_v22 = vsel %vm670_vm12, %v634_v6, %v702_v11  ;;  %1164 = vst [vmem:[#allocation3 + $0x1a0] sm:$0xff] %v4824_v29  ;;  %1167 = vst [vmem:[#allocation3 + $0x1b8] sm:$0xff] %v4824_v29  ;;  %2645 = vmatpush1.bf16.msra.mxu0 %v4755_v47  ;;  %v4776_v55 = vld [vmem:[%s6100_s5 + $0xb0] sm:$0xff]  }
 0x13f   : > { %vm669_vm15 = vcmp.gt.f32.partialorder %v629_v15, 0.0  ;;  %v701_v23 = vmul.f32 0.01, %v629_v15  ;;  %2140 = vmatprep.subr.bf16.mxu1 %v6109_v32  ;;  %v732_v24 = vsel %vm668_vm13, %v626_v9, %v700_v14  ;;  %1168 = vst [vmem:[#allocation3 + $0x1c0] sm:$0xff] %v4824_v29  ;;  %1171 = vst [vmem:[#allocation3 + $0x1d8] sm:$0xff] %v4824_v29  ;;  %2646 = vmatprep.subr.bf16.mxu0 %v6109_v32  ;;  %v4779_v11 = vld [vmem:[%s6100_s5 + $0xb8] sm:$0xff]  }
 0x140   : > { %v735_v25 = vsel %vm671_vm14, %v637_v12, %v703_v16  ;;  %1172 = vst [vmem:[#allocation3 + $0x1e0] sm:$0xff] %v4824_v29  ;;  %1175 = vst [vmem:[#allocation3 + $0x1f8] sm:$0xff] %v4824_v29  ;;  %v5237_v56 = vld [vmem:[%s6099_s4] ss:$0 sm:$0xff]  ;;  %v6164_v3 = vmov 0.0|0.0  }
 0x141   : > { %v733_v26 = vsel %vm669_vm15, %v629_v15, %v701_v23  ;;  %v5129_v27 = vpack.c.bf16 %v735_v25, %v734_v22  ;;  %1176 = vst [vmem:[#allocation3 + $0x200] sm:$0xff] %v4824_v29  ;;  %1179 = vst [vmem:[#allocation3 + $0x218] sm:$0xff] %v4824_v29  ;;  %v1346_v47 = vld [vmem:[#allocation3 + $0x39] sm:$0xff] }
 0x142   : > { %2141 = vmatpush1.bf16.msra.mxu1 %v4748_v20  ;;  %v5131_v28 = vpack.c.bf16 %v733_v26, %v732_v24  ;;  %1180 = vst [vmem:[#allocation3 + $0x220] sm:$0xff] %v4824_v29  ;;  %1181 = vst [vmem:[#allocation3 + $0x228] sm:$0xff] %v4824_v29  ;;  %2647 = vmatpush1.bf16.msra.mxu0 %v4756_v48  ;;  %v1374_v45 = vld [vmem:[#allocation3 + $0x119] sm:$0xff] }
 0x143   : > { %6162 = vst [vmem:[#allocation18_spill] sm:$0xff] %v5129_v27  ;;  %2142 = vmatprep.subr.bf16.mxu1 %v6109_v32  ;;  %1182 = vst [vmem:[#allocation3 + $0x230] sm:$0xff] %v4824_v29  ;;  %2867 = vmatprep.subr.bf16.mxu0 %v6109_v32  ;;  %v1259_v62 = vld [vmem:[#allocation3 + $0x15f] sm:$0xff] }
 0x144   : > { %6163 = vst [vmem:[#allocation19_spill] sm:$0xff] %v5131_v28  ;;  %4250 = vmatprep.mubr.bf16.mxu1 %v5131_v28  ;;  %1183 = vst [vmem:[#allocation3 + $0x238] sm:$0xff] %v4824_v29 }
 0x145   : > { %4251 = vmatmul.mubr.bf16.gmra.mrb[28].mxu1 %v5129_v27 }
 0x146   : > { %2143 = vmatpush1.bf16.msra.mxu1 %v4750_v44  ;;  %2146 = vmatprep.mubr.bf16.mxu1 %v6103_v36 }
 0x147   : > { %2144 = vmatprep.subr.bf16.mxu1 %v6109_v32 }
 0x14a   : > { %2145 = vmatpush1.bf16.msra.mxu1 %v4752_v30 }
 0x14b   : > { %2365 = vmatprep.subr.bf16.mxu1 %v6109_v32 }
 0x14d   : > { %2147 = vmatmul.mubr.bf16.vlgmr.msra.gmra.mrb[32].mxu1 %v1426_v35 }
 0x14e   : > { %2154 = vmatprep.mubr.bf16.mxu1 %v6103_v36  ;;  %2366 = vmatpush1.bf16.msra.mxu1 %v4758_v49 }
 0x14f   : > { %2367 = vmatprep.subr.bf16.mxu1 %v6109_v32 }
 0x152   : > { %2368 = vmatpush1.bf16.msra.mxu1 %v4761_v50 }
 0x153   : > { %2369 = vmatprep.subr.bf16.mxu1 %v6109_v32 }
 0x155   : > { %2155 = vmatmul.mubr.bf16.gmra.mrb[36].mxu1 %v1435_v46 }
 0x156   : > { %2370 = vmatpush1.bf16.msra.mxu1 %v4764_v51 }
 0x157   : > { %2371 = vmatprep.subr.bf16.mxu1 %v6109_v32 }
 0x15a   : > { %2372 = vmatpush1.bf16.msra.mxu1 %v4767_v52 }
 0x15b   : > { %2373 = vmatprep.subr.bf16.mxu1 %v6109_v32 }
 0x15e   : > { %2374 = vmatpush1.bf16.msra.mxu1 %v4770_v53 }
 0x15f   : > { %2375 = vmatprep.subr.bf16.mxu1 %v6109_v32 }
 0x162   : > { %2376 = vmatpush1.bf16.msra.mxu1 %v4773_v54 }
 0x163   : > { %2377 = vmatprep.subr.bf16.mxu1 %v6109_v32 }
 0x166   : > { %2378 = vmatpush1.bf16.msra.mxu1 %v4776_v55 }
 0x167   : > { %2379 = vmatprep.subr.bf16.mxu1 %v6109_v32 }
 0x16a   : > { %2380 = vmatpush1.bf16.msra.mxu1 %v4779_v11 }
 0x16b   : > { %2381 = vmatprep.subr.bf16.mxu1 %v6109_v32 }
 0x1e0   : > { %v4224_v57 = vpop.f32.mrb[0].mxu1 }
 0x1e1   : > { %v898_v58 = vadd.f32 %v4224_v57, %v5237_v56  ;;  %v889_v60 = vpop.f32.mrb[1].mxu1 }
 0x1e2   : > { %v890_v0 = vadd.f32 %v5237_v56, %v889_v60  ;;  %v4225_v1 = vpop.f32.mrb[2].mxu1 }
 0x1e3   : > { %vm1018_vm0 = vcmp.gt.f32.partialorder %v898_v58, 0.0  ;;  %v1050_v2 = vmul.f32 0.01, %v898_v58  ;;  %v901_v4 = vadd.f32 %v4225_v1, %v5237_v56  ;;  %v892_v6 = vpop.f32.mrb[3].mxu1 }
 0x1e4   : > { %vm1016_vm1 = vcmp.gt.f32.partialorder %v890_v0, 0.0  ;;  %v1048_v7 = vmul.f32 0.01, %v890_v0  ;;  %v893_v8 = vadd.f32 %v5237_v56, %v892_v6 }
 0x1e5   : > { %v1082_v9 = vsel %vm1018_vm0, %v898_v58, %v1050_v2  ;;  %vm1019_vm2 = vcmp.gt.f32.partialorder %v901_v4, 0.0  ;;  %v1051_v10 = vmul.f32 0.01, %v901_v4  ;;  %v4757_v58 = vld [vmem:[%s6100_s5 + $0x180] sm:$0xff]  }
 0x1e6   : > { %1186 = vst [vmem:[#allocation3 + $0x48] sm:$0xff] %v1082_v9  ;;  %v1080_v12 = vsel %vm1016_vm1, %v890_v0, %v1048_v7  ;;  %vm1017_vm3 = vcmp.gt.f32.partialorder %v893_v8, 0.0  ;;  %v1049_v13 = vmul.f32 0.01, %v893_v8 }
 0x1e7   : > { %1184 = vst [vmem:[#allocation3 + $0x28] sm:$0xff] %v1080_v12  ;;  %v1083_v14 = vsel %vm1019_vm2, %v901_v4, %v1051_v10 }
 0x1e8   : > { %1187 = vst [vmem:[#allocation3 + $0x50] sm:$0xff] %v1083_v14  ;;  %v1081_v15 = vsel %vm1017_vm3, %v893_v8, %v1049_v13  ;;  %v4228_v16 = vpop.f32.mrb[4].mxu1  ;;  %v5246_v20 = vpack.c.bf16 %v1083_v14, %v1082_v9 }
 0x1e9   : > { %1185 = vst [vmem:[#allocation3 + $0x30] sm:$0xff] %v1081_v15  ;;  %v914_v22 = vadd.f32 %v4228_v16, %v5237_v56  ;;  %v905_v23 = vpop.f32.mrb[5].mxu1  ;;  %v1430_v24 = vpack.c.bf16 %v1081_v15, %v1080_v12  ;;  %v4759_v12 = vld [vmem:[%s6100_s5 + $0x188] sm:$0xff]   ;;  %v4782_v15 = vld [vmem:[%s6100_s5 + $0xc0] sm:$0xff]  }
 0x1ea   : > { %v906_v25 = vadd.f32 %v5237_v56, %v905_v23  ;;  %v4229_v26 = vpop.f32.mrb[6].mxu1  ;;  %2382 = vmatpush1.bf16.msra.mxu1 %v4782_v15  ;;  %v4763_v15 = vld [vmem:[%s6100_s5 + $0x1a0] sm:$0xff]  }
 0x1eb   : > { %vm1022_vm4 = vcmp.gt.f32.partialorder %v914_v22, 0.0  ;;  %v1054_v44 = vmul.f32 0.01, %v914_v22  ;;  %v917_v30 = vadd.f32 %v4229_v26, %v5237_v56  ;;  %v908_v31 = vpop.f32.mrb[7].mxu1  ;;  %2160 = vmatprep.mubr.bf16.mxu1 %v1430_v24  ;;  %2383 = vmatprep.subr.bf16.mxu1 %v6109_v32 }
 0x1ec   : > { %vm1020_vm5 = vcmp.gt.f32.partialorder %v906_v25, 0.0  ;;  %v1052_v33 = vmul.f32 0.01, %v906_v25  ;;  %v909_v34 = vadd.f32 %v5237_v56, %v908_v31 }
 0x1ed   : > { %v1086_v35 = vsel %vm1022_vm4, %v914_v22, %v1054_v44  ;;  %vm1023_vm6 = vcmp.gt.f32.partialorder %v917_v30, 0.0  ;;  %v1055_v37 = vmul.f32 0.01, %v917_v30  ;;  %v1347_v48 = vld [vmem:[#allocation3 + $0x41] sm:$0xff] }
 0x1ee   : > { %1190 = vst [vmem:[#allocation3 + $0x88] sm:$0xff] %v1086_v35  ;;  %v1084_v39 = vsel %vm1020_vm5, %v906_v25, %v1052_v33  ;;  %vm1021_vm7 = vcmp.gt.f32.partialorder %v909_v34, 0.0  ;;  %v1053_v41 = vmul.f32 0.01, %v909_v34  ;;  %v1220_v46 = vld [vmem:[#allocation3 + $0x27] sm:$0xff]  ;;  %v5268_v6 = vpack.c.bf16 %v1347_v48, %v1346_v47  ;;  %v1223_v22 = vld [vmem:[#allocation3 + $0x3f] sm:$0xff] }
 0x1ef   : > { %1188 = vst [vmem:[#allocation3 + $0x68] sm:$0xff] %v1084_v39  ;;  %v1087_v43 = vsel %vm1023_vm6, %v917_v30, %v1055_v37  ;;  %v1348_v26 = vld [vmem:[#allocation3 + $0x49] sm:$0xff]  ;;  %v1349_v44 = vld [vmem:[#allocation3 + $0x51] sm:$0xff] }
 0x1f0   : > { %1191 = vst [vmem:[#allocation3 + $0x90] sm:$0xff] %v1087_v43  ;;  %v1085_v49 = vsel %vm1021_vm7, %v909_v34, %v1053_v41  ;;  %v1344_v50 = vld [vmem:[#allocation3 + $0x29] sm:$0xff]  ;;  %v1345_v51 = vld [vmem:[#allocation3 + $0x31] sm:$0xff]  ;;  %v4232_v53 = vpop.f32.mrb[8].mxu1  ;;  %v5253_v54 = vpack.c.bf16 %v1087_v43, %v1086_v35  ;;  %v5295_v47 = vpack.c.bf16 %v1349_v44, %v1348_v26 }
 0x1f1   : > { %v1221_v52 = vld [vmem:[#allocation3 + $0x2f] sm:$0xff]  ;;  %1189 = vst [vmem:[#allocation3 + $0x70] sm:$0xff] %v1085_v49  ;;  %v5255_v55 = vpack.c.bf16 %v1345_v51, %v1344_v50  ;;  %v5262_v60 = vpack.c.bf16 %v1085_v49, %v1084_v39  ;;  %v930_v0 = vadd.f32 %v4232_v53, %v5237_v56  ;;  %v921_v1 = vpop.f32.mrb[9].mxu1  ;;  %v1222_v16 = vld [vmem:[#allocation3 + $0x37] sm:$0xff] }
 0x1f2   : > { %v5257_v57 = vpack.c.bf16 %v1221_v52, %v1220_v46  ;;  %v922_v2 = vadd.f32 %v5237_v56, %v921_v1  ;;  %v4233_v4 = vpop.f32.mrb[10].mxu1  ;;  %v5284_v34 = vpack.c.bf16 %v1223_v22, %v1222_v16  ;;  %v4760_v35 = vld [vmem:[%s6100_s5 + $0x190] sm:$0xff]   ;;  %v4762_v53 = vld [vmem:[%s6100_s5 + $0x198] sm:$0xff]  }
 0x1f3   : > { %2648 = vmatprep.mubr.bf16.mxu0 %v5255_v55  ;;  %vm1026_vm8 = vcmp.gt.f32.partialorder %v930_v0, 0.0  ;;  %v1058_v7 = vmul.f32 0.01, %v930_v0  ;;  %v933_v8 = vadd.f32 %v4233_v4, %v5237_v56  ;;  %v924_v9 = vpop.f32.mrb[11].mxu1  ;;  %v1225_v1 = vld [vmem:[#allocation3 + $0x4f] sm:$0xff] }
 0x1f4   : > { %2161 = vmatmul.mubr.bf16.gmra.mrb[40].mxu1 %v5257_v57  ;;  %2649 = vmatmul.mubr.bf16.vlgmr.msra.gmra.mrb[32].mxu0 %v1430_v24  ;;  %vm1024_vm9 = vcmp.gt.f32.partialorder %v922_v2, 0.0  ;;  %v1056_v10 = vmul.f32 0.01, %v922_v2  ;;  %v925_v11 = vadd.f32 %v5237_v56, %v924_v9  ;;  %v1350_v9 = vld [vmem:[#allocation3 + $0x59] sm:$0xff] }
 0x1f5   : > { %2168 = vmatprep.mubr.bf16.mxu1 %v6103_v36  ;;  %2868 = vmatpush1.bf16.msra.mxu0 %v4757_v58  ;;  %v1090_v13 = vsel %vm1026_vm8, %v930_v0, %v1058_v7  ;;  %vm1027_vm10 = vcmp.gt.f32.partialorder %v933_v8, 0.0  ;;  %v1059_v14 = vmul.f32 0.01, %v933_v8 }
 0x1f6   : > { %2656 = vmatprep.mubr.bf16.mxu0 %v5268_v6  ;;  %2869 = vmatprep.subr.bf16.mxu0 %v6109_v32  ;;  %1194 = vst [vmem:[#allocation3 + $0xc8] sm:$0xff] %v1090_v13  ;;  %v1088_v23 = vsel %vm1024_vm9, %v922_v2, %v1056_v10  ;;  %vm1025_vm11 = vcmp.gt.f32.partialorder %v925_v11, 0.0  ;;  %v1057_v24 = vmul.f32 0.01, %v925_v11  ;;  %v1351_v10 = vld [vmem:[#allocation3 + $0x61] sm:$0xff] }
 0x1f7   : > { %1192 = vst [vmem:[#allocation3 + $0xa8] sm:$0xff] %v1088_v23  ;;  %v1091_v25 = vsel %vm1027_vm10, %v933_v8, %v1059_v14  ;;  %v1224_v8 = vld [vmem:[#allocation3 + $0x47] sm:$0xff]  ;;  %v5319_v26 = vpack.c.bf16 %v1351_v10, %v1350_v9 }
 0x1f8   : > { %1195 = vst [vmem:[#allocation3 + $0xd0] sm:$0xff] %v1091_v25  ;;  %v1089_v30 = vsel %vm1025_vm11, %v925_v11, %v1057_v24  ;;  %v4236_v31 = vpop.f32.mrb[12].mxu1  ;;  %v5281_v33 = vpack.c.bf16 %v1091_v25, %v1090_v13  ;;  %v5308_v14 = vpack.c.bf16 %v1225_v1, %v1224_v8  ;;  %v4766_v8 = vld [vmem:[%s6100_s5 + $0x1b0] sm:$0xff]  }
 0x1f9   : > { %2870 = vmatpush1.bf16.msra.mxu0 %v4759_v12  ;;  %1193 = vst [vmem:[#allocation3 + $0xb0] sm:$0xff] %v1089_v30  ;;  %v5289_v37 = vpack.c.bf16 %v1089_v30, %v1088_v23  ;;  %v946_v39 = vadd.f32 %v4236_v31, %v5237_v56  ;;  %v937_v41 = vpop.f32.mrb[13].mxu1 }
 0x1fa   : > { %2871 = vmatprep.subr.bf16.mxu0 %v6109_v32  ;;  %v938_v43 = vadd.f32 %v5237_v56, %v937_v41  ;;  %v4237_v46 = vpop.f32.mrb[14].mxu1  ;;  %v4783_v41 = vld [vmem:[%s6100_s5 + $0xc8] sm:$0xff]  }
 0x1fb   : > { %vm1030_vm12 = vcmp.gt.f32.partialorder %v946_v39, 0.0  ;;  %v1062_v48 = vmul.f32 0.01, %v946_v39  ;;  %v949_v49 = vadd.f32 %v4237_v46, %v5237_v56  ;;  %v940_v50 = vpop.f32.mrb[15].mxu1  ;;  %2384 = vmatpush1.bf16.msra.mxu1 %v4783_v41  ;;  %v1228_v41 = vld [vmem:[#allocation3 + $0x67] sm:$0xff] }
 0x1fc   : > { %2169 = vmatmul.mubr.bf16.gmra.mrb[44].mxu1 %v5284_v34  ;;  %2657 = vmatmul.mubr.bf16.gmra.mrb[36].mxu0 %v6103_v36  ;;  %vm1028_vm13 = vcmp.gt.f32.partialorder %v938_v43, 0.0  ;;  %v1060_v51 = vmul.f32 0.01, %v938_v43  ;;  %v941_v52 = vadd.f32 %v5237_v56, %v940_v50  ;;  %v1227_v50 = vld [vmem:[#allocation3 + $0x5f] sm:$0xff] }
 0x1fd   : > { %2174 = vmatprep.mubr.bf16.mxu1 %v5246_v20  ;;  %2662 = vmatprep.mubr.bf16.mxu0 %v5295_v47  ;;  %v1094_v58 = vsel %vm1030_vm12, %v946_v39, %v1062_v48  ;;  %vm1031_vm14 = vcmp.gt.f32.partialorder %v949_v49, 0.0  ;;  %v1063_v0 = vmul.f32 0.01, %v949_v49 }
 0x1fe   : > { %2872 = vmatpush1.bf16.msra.mxu0 %v4760_v35  ;;  %1198 = vst [vmem:[#allocation3 + $0x108] sm:$0xff] %v1094_v58  ;;  %v1092_v2 = vsel %vm1028_vm13, %v938_v43, %v1060_v51  ;;  %vm1029_vm15 = vcmp.gt.f32.partialorder %v941_v52, 0.0  ;;  %v1061_v4 = vmul.f32 0.01, %v941_v52  ;;  %v4765_v43 = vld [vmem:[%s6100_s5 + $0x1a8] sm:$0xff]   ;;  %2385 = vmatprep.subr.bf16.mxu1 %v6109_v32 }
 0x1ff   : > { %2873 = vmatprep.subr.bf16.mxu0 %v6109_v32  ;;  %1196 = vst [vmem:[#allocation3 + $0xe8] sm:$0xff] %v1092_v2  ;;  %v1095_v7 = vsel %vm1031_vm14, %v949_v49, %v1063_v0  ;;  %v1226_v49 = vld [vmem:[#allocation3 + $0x57] sm:$0xff] }
 0x200   : > { %1199 = vst [vmem:[#allocation3 + $0x110] sm:$0xff] %v1095_v7  ;;  %v1093_v11 = vsel %vm1029_vm15, %v941_v52, %v1061_v4  ;;  %v4240_v12 = vpop.f32.mrb[16].mxu1  ;;  %v5306_v13 = vpack.c.bf16 %v1095_v7, %v1094_v58  ;;  %v1352_v58 = vld [vmem:[#allocation3 + $0x69] sm:$0xff]  ;;  %v1353_v0 = vld [vmem:[#allocation3 + $0x71] sm:$0xff]  ;;  %v5336_v7 = vpack.c.bf16 %v1227_v50, %v1226_v49  ;;  %v1354_v50 = vld [vmem:[#allocation3 + $0x79] sm:$0xff] }
 0x201   : > { %1197 = vst [vmem:[#allocation3 + $0xf0] sm:$0xff] %v1093_v11  ;;  %v5313_v16 = vpack.c.bf16 %v1093_v11, %v1092_v2  ;;  %v962_v22 = vadd.f32 %v4240_v12, %v5237_v56  ;;  %v953_v23 = vpop.f32.mrb[17].mxu1 }
 0x202   : > { %2874 = vmatpush1.bf16.msra.mxu0 %v4762_v53  ;;  %v954_v24 = vadd.f32 %v5237_v56, %v953_v23  ;;  %v4241_v25 = vpop.f32.mrb[18].mxu1 }
 0x203   : > { %2875 = vmatprep.subr.bf16.mxu0 %v6109_v32  ;;  %vm1034_vm0 = vcmp.gt.f32.partialorder %v962_v22, 0.0  ;;  %v1066_v44 = vmul.f32 0.01, %v962_v22  ;;  %v965_v30 = vadd.f32 %v4241_v25, %v5237_v56  ;;  %v956_v31 = vpop.f32.mrb[19].mxu1 }
 0x204   : > { %2175 = vmatmul.mubr.bf16.gmra.mrb[48].mxu1 %v5308_v14  ;;  %2663 = vmatmul.mubr.bf16.gmra.mrb[40].mxu0 %v5246_v20  ;;  %vm1032_vm1 = vcmp.gt.f32.partialorder %v954_v24, 0.0  ;;  %v1064_v35 = vmul.f32 0.01, %v954_v24  ;;  %v957_v39 = vadd.f32 %v5237_v56, %v956_v31  ;;  %v4768_v31 = vld [vmem:[%s6100_s5 + $0x1b8] sm:$0xff]  }
 0x205   : > { %2182 = vmatprep.mubr.bf16.mxu1 %v6103_v36  ;;  %2670 = vmatprep.mubr.bf16.mxu0 %v5319_v26  ;;  %v1098_v46 = vsel %vm1034_vm0, %v962_v22, %v1066_v44  ;;  %vm1035_vm2 = vcmp.gt.f32.partialorder %v965_v30, 0.0  ;;  %v1067_v48 = vmul.f32 0.01, %v965_v30  ;;  %v5347_v22 = vpack.c.bf16 %v1353_v0, %v1352_v58  ;;  %v4769_v58 = vld [vmem:[%s6100_s5 + $0x1c0] sm:$0xff]  }
 0x206   : > { %2876 = vmatpush1.bf16.msra.mxu0 %v4763_v15  ;;  %1202 = vst [vmem:[#allocation3 + $0x148] sm:$0xff] %v1098_v46  ;;  %v1096_v51 = vsel %vm1032_vm1, %v954_v24, %v1064_v35  ;;  %vm1033_vm3 = vcmp.gt.f32.partialorder %v957_v39, 0.0  ;;  %v1065_v52 = vmul.f32 0.01, %v957_v39  ;;  %vm4826_vm0 = vmmov 0  }
 0x207   : > { %2877 = vmatprep.subr.bf16.mxu0 %v6109_v32  ;;  %1200 = vst [vmem:[#allocation3 + $0x128] sm:$0xff] %v1096_v51  ;;  %v1099_v53 = vsel %vm1035_vm2, %v965_v30, %v1067_v48 }
 0x208   : > { %1203 = vst [vmem:[#allocation3 + $0x150] sm:$0xff] %v1099_v53  ;;  %v1097_v1 = vsel %vm1033_vm3, %v957_v39, %v1065_v52  ;;  %v5334_v2 = vpack.c.bf16 %v1099_v53, %v1098_v46  ;;  %v4244_v4 = vpop.f32.mrb[20].mxu1 }
 0x209   : > { %1201 = vst [vmem:[#allocation3 + $0x130] sm:$0xff] %v1097_v1  ;;  %v5341_v9 = vpack.c.bf16 %v1097_v1, %v1096_v51  ;;  %v978_v10 = vadd.f32 %v4244_v4, %v5237_v56  ;;  %v969_v11 = vpop.f32.mrb[21].mxu1  ;;  %v1355_v51 = vld [vmem:[#allocation3 + $0x81] sm:$0xff]  ;;  %v4785_v4 = vld [vmem:[%s6100_s5 + $0xd0] sm:$0xff]  }
 0x20a   : > { %2878 = vmatpush1.bf16.msra.mxu0 %v4765_v43  ;;  %v970_v12 = vadd.f32 %v5237_v56, %v969_v11  ;;  %v4245_v15 = vpop.f32.mrb[22].mxu1  ;;  %v1229_v43 = vld [vmem:[#allocation3 + $0x6f] sm:$0xff]  ;;  %v5367_v1 = vpack.c.bf16 %v1355_v51, %v1354_v50  ;;  %v1231_v11 = vld [vmem:[#allocation3 + $0x7f] sm:$0xff]  ;;  %2386 = vmatpush1.bf16.msra.mxu1 %v4785_v4 }
 0x20b   : > { %2879 = vmatprep.subr.bf16.mxu0 %v6109_v32  ;;  %vm1038_vm4 = vcmp.gt.f32.partialorder %v978_v10, 0.0  ;;  %v1070_v23 = vmul.f32 0.01, %v978_v10  ;;  %v981_v24 = vadd.f32 %v4245_v15, %v5237_v56  ;;  %v972_v25 = vpop.f32.mrb[23].mxu1  ;;  %v5358_v53 = vpack.c.bf16 %v1229_v43, %v1228_v41  ;;  %2387 = vmatprep.subr.bf16.mxu1 %v6109_v32  ;;  %v1356_v15 = vld [vmem:[#allocation3 + $0x89] sm:$0xff]  ;;  %v1359_v50 = vld [vmem:[#allocation3 + $0xa1] sm:$0xff] }
 0x20c   : > { %2183 = vmatmul.mubr.bf16.gmra.mrb[52].mxu1 %v5336_v7  ;;  %2671 = vmatmul.mubr.bf16.gmra.mrb[44].mxu0 %v6103_v36  ;;  %vm1036_vm5 = vcmp.gt.f32.partialorder %v970_v12, 0.0  ;;  %v1068_v44 = vmul.f32 0.01, %v970_v12  ;;  %v973_v30 = vadd.f32 %v5237_v56, %v972_v25  ;;  %v4772_v25 = vld [vmem:[%s6100_s5 + $0x1d0] sm:$0xff]  }
 0x20d   : > { %2188 = vmatprep.mubr.bf16.mxu1 %v5262_v60  ;;  %2676 = vmatprep.mubr.bf16.mxu0 %v5347_v22  ;;  %v1102_v35 = vsel %vm1038_vm4, %v978_v10, %v1070_v23  ;;  %vm1039_vm6 = vcmp.gt.f32.partialorder %v981_v24, 0.0  ;;  %v1071_v39 = vmul.f32 0.01, %v981_v24  ;;  %v1230_v10 = vld [vmem:[#allocation3 + $0x77] sm:$0xff] }
 0x20e   : > { %2880 = vmatpush1.bf16.msra.mxu0 %v4766_v8  ;;  %1206 = vst [vmem:[#allocation3 + $0x188] sm:$0xff] %v1102_v35  ;;  %v1100_v46 = vsel %vm1036_vm5, %v970_v12, %v1068_v44  ;;  %vm1037_vm7 = vcmp.gt.f32.partialorder %v973_v30, 0.0  ;;  %v1069_v48 = vmul.f32 0.01, %v973_v30  ;;  %v4771_v8 = vld [vmem:[%s6100_s5 + $0x1c8] sm:$0xff]   ;;  %v1357_v23 = vld [vmem:[#allocation3 + $0x91] sm:$0xff] }
 0x20f   : > { %2881 = vmatprep.subr.bf16.mxu0 %v6109_v32  ;;  %1204 = vst [vmem:[#allocation3 + $0x168] sm:$0xff] %v1100_v46  ;;  %v1103_v49 = vsel %vm1039_vm6, %v981_v24, %v1071_v39  ;;  %v5382_v24 = vpack.c.bf16 %v1231_v11, %v1230_v10  ;;  %v5389_v44 = vpack.c.bf16 %v1357_v23, %v1356_v15  ;;  %v1233_v39 = vld [vmem:[#allocation3 + $0x8f] sm:$0xff]  ;;  %v1375_v18 = vld [vmem:[#allocation3 + $0x121] sm:$0xff] }
 0x210   : > { %1207 = vst [vmem:[#allocation3 + $0x190] sm:$0xff] %v1103_v49  ;;  %v1101_v52 = vsel %vm1037_vm7, %v973_v30, %v1069_v48  ;;  %v5379_v12 = vpack.c.bf16 %v1103_v49, %v1102_v35  ;;  %v4774_v30 = vld [vmem:[%s6100_s5 + $0x1d8] sm:$0xff]   ;;  %v1232_v35 = vld [vmem:[#allocation3 + $0x87] sm:$0xff] }
 0x211   : > { %1205 = vst [vmem:[#allocation3 + $0x170] sm:$0xff] %v1101_v52  ;;  %v5363_v0 = vpack.c.bf16 %v1101_v52, %v1100_v46  ;;  %v1358_v49 = vld [vmem:[#allocation3 + $0x99] sm:$0xff]  ;;  %v5401_v4 = vpack.c.bf16 %v1233_v39, %v1232_v35 }
 0x212   : > { %2882 = vmatpush1.bf16.msra.mxu0 %v4768_v31  ;;  %v4248_v31 = vpop.f32.mrb[24].mxu1  ;;  %v4786_v39 = vld [vmem:[%s6100_s5 + $0xd8] sm:$0xff]  }
 0x213   : > { %2883 = vmatprep.subr.bf16.mxu0 %v6109_v32  ;;  %v994_v41 = vadd.f32 %v4248_v31, %v5237_v56  ;;  %v985_v43 = vpop.f32.mrb[25].mxu1  ;;  %2388 = vmatpush1.bf16.msra.mxu1 %v4786_v39  ;;  %v1363_v39 = vld [vmem:[#allocation3 + $0xc1] sm:$0xff] }
 0x214   : > { %2189 = vmatmul.mubr.bf16.gmra.mrb[56].mxu1 %v5358_v53  ;;  %2677 = vmatmul.mubr.bf16.gmra.mrb[48].mxu0 %v5262_v60  ;;  %v986_v46 = vadd.f32 %v5237_v56, %v985_v43  ;;  %v4249_v48 = vpop.f32.mrb[26].mxu1 }
 0x215   : > { %2196 = vmatprep.mubr.bf16.mxu1 %v6103_v36  ;;  %2684 = vmatprep.mubr.bf16.mxu0 %v5367_v1  ;;  %vm1042_vm8 = vcmp.gt.f32.partialorder %v994_v41, 0.0  ;;  %v1074_v51 = vmul.f32 0.01, %v994_v41  ;;  %v997_v52 = vadd.f32 %v4249_v48, %v5237_v56  ;;  %v1235_v48 = vld [vmem:[#allocation3 + $0x9f] sm:$0xff] }
 0x216   : > { %2884 = vmatpush1.bf16.msra.mxu0 %v4769_v58  ;;  %v988_v58 = vpop.f32.mrb[27].mxu1  ;;  %vm1040_vm9 = vcmp.gt.f32.partialorder %v986_v46, 0.0  ;;  %v1072_v10 = vmul.f32 0.01, %v986_v46  ;;  %2389 = vmatprep.subr.bf16.mxu1 %v6109_v32 }
 0x217   : > { %2885 = vmatprep.subr.bf16.mxu0 %v6109_v32  ;;  %v989_v11 = vadd.f32 %v5237_v56, %v988_v58  ;;  %v5408_v15 = vsel %vm1042_vm8, %v994_v41, %v1074_v51  ;;  %vm1043_vm10 = vcmp.gt.f32.partialorder %v997_v52, 0.0  ;;  %v1075_v23 = vmul.f32 0.01, %v997_v52  ;;  %v4777_v41 = vld [vmem:[%s6100_s5 + $0x1e8] sm:$0xff]  }
 0x218   : > { %1210 = vst [vmem:[#allocation3 + $0x1c8] sm:$0xff] %v5408_v15 }
 0x219   : > { %vm1041_vm11 = vcmp.gt.f32.partialorder %v989_v11, 0.0  ;;  %v1073_v31 = vmul.f32 0.01, %v989_v11  ;;  %v1107_v35 = vsel %vm1043_vm10, %v997_v52, %v1075_v23  ;;  %v4778_v52 = vld [vmem:[%s6100_s5 + $0x1f0] sm:$0xff]  }
 0x21a   : > { %2886 = vmatpush1.bf16.msra.mxu0 %v4771_v8  ;;  %v4775_v8 = vld [vmem:[%s6100_s5 + $0x1e0] sm:$0xff]   ;;  %1211 = vst [vmem:[#allocation3 + $0x1d0] sm:$0xff] %v1107_v35  ;;  %v1237_v23 = vld [vmem:[#allocation3 + $0xaf] sm:$0xff] }
 0x21b   : > { %2887 = vmatprep.subr.bf16.mxu0 %v6109_v32  ;;  %v1105_v43 = vsel %vm1041_vm11, %v989_v11, %v1073_v31  ;;  %v1236_v11 = vld [vmem:[#allocation3 + $0xa7] sm:$0xff]  ;;  %v1362_v31 = vld [vmem:[#allocation3 + $0xb9] sm:$0xff] }
 0x21c   : > { %2197 = vmatmul.mubr.bf16.gmra.mrb[60].mxu1 %v5382_v24  ;;  %2685 = vmatmul.mubr.bf16.gmra.mrb[52].mxu0 %v6103_v36  ;;  %1209 = vst [vmem:[#allocation3 + $0x1b0] sm:$0xff] %v1105_v43 }
 0x21d   : > { %2202 = vmatprep.mubr.bf16.mxu1 %v5253_v54  ;;  %2690 = vmatprep.mubr.bf16.mxu0 %v5389_v44 }
 0x21e   : > { %2888 = vmatpush1.bf16.msra.mxu0 %v4772_v25  ;;  %v5411_v25 = vpack.c.bf16 %v1359_v50, %v1358_v49  ;;  %v1360_v49 = vld [vmem:[#allocation3 + $0xa9] sm:$0xff]  ;;  %v1361_v50 = vld [vmem:[#allocation3 + $0xb1] sm:$0xff] }
 0x21f   : > { %2889 = vmatprep.subr.bf16.mxu0 %v6109_v32  ;;  %v5432_v58 = vpack.c.bf16 %v1361_v50, %v1360_v49  ;;  %v1239_v50 = vld [vmem:[#allocation3 + $0xbf] sm:$0xff] }
 0x222   : > { %2890 = vmatpush1.bf16.msra.mxu0 %v4774_v30  ;;  %v1104_v30 = vsel %vm1040_vm9, %v986_v46, %v1072_v10  ;;  %v1234_v46 = vld [vmem:[#allocation3 + $0x97] sm:$0xff] }
 0x223   : > { %2891 = vmatprep.subr.bf16.mxu0 %v6109_v32  ;;  %1208 = vst [vmem:[#allocation3 + $0x1a8] sm:$0xff] %v1104_v30  ;;  %v5425_v51 = vpack.c.bf16 %v1235_v48, %v1234_v46  ;;  %v5440_v10 = vpack.c.bf16 %v1105_v43, %v1104_v30  ;;  %v5447_v46 = vpack.c.bf16 %v1363_v39, %v1362_v31  ;;  %v4788_v30 = vld [vmem:[%s6100_s5 + $0xe0] sm:$0xff]   ;;  %v4252_v43 = vpop.f32.mrb[28].mxu1  ;;  %v1364_v39 = vld [vmem:[#allocation3 + $0xc9] sm:$0xff] }
 0x224   : > { %2203 = vmatmul.mubr.bf16.gmra.mrb[64].mxu1 %v5401_v4  ;;  %2691 = vmatmul.mubr.bf16.gmra.mrb[56].mxu0 %v5253_v54  ;;  %v1010_v48 = vadd.f32 %v4252_v43, %v5237_v56  ;;  %v1001_v49 = vpop.f32.mrb[29].mxu1  ;;  %v5460_v31 = vpack.c.bf16 %v1107_v35, %v5408_v15 }
 0x225   : > { %2210 = vmatprep.mubr.bf16.mxu1 %v6103_v36  ;;  %2698 = vmatprep.mubr.bf16.mxu0 %v5411_v25 }
 0x226   : > { %2892 = vmatpush1.bf16.msra.mxu0 %v4775_v8  ;;  %v4780_v8 = vld [vmem:[%s6100_s5 + $0x1f8] sm:$0xff]   ;;  %2390 = vmatpush1.bf16.msra.mxu1 %v4788_v30  ;;  %vm1046_vm12 = vcmp.gt.f32.partialorder %v1010_v48, 0.0 }
 0x227   : > { %2893 = vmatprep.subr.bf16.mxu0 %v6109_v32  ;;  %2391 = vmatprep.subr.bf16.mxu1 %v6109_v32 }
 0x22a   : > { %2894 = vmatpush1.bf16.msra.mxu0 %v4777_v41  ;;  %v5443_v41 = vpack.c.bf16 %v1237_v23, %v1236_v11  ;;  %v1078_v11 = vmul.f32 0.01, %v1010_v48 }
 0x22b   : > { %2895 = vmatprep.subr.bf16.mxu0 %v6109_v32 }
 0x22c   : > { %2211 = vmatmul.mubr.bf16.gmra.mrb[68].mxu1 %v5425_v51  ;;  %2699 = vmatmul.mubr.bf16.gmra.mrb[60].mxu0 %v6103_v36  ;;  %v1110_v27 = vsel %vm1046_vm12, %v1010_v48, %v1078_v11 }
 0x22d   : > { %2216 = vmatprep.mubr.bf16.mxu1 %v5289_v37  ;;  %2704 = vmatprep.mubr.bf16.mxu0 %v5432_v58  ;;  %1214 = vst [vmem:[#allocation3 + $0x208] sm:$0xff] %v1110_v27 }
 0x22e   : > { %2896 = vmatpush1.bf16.msra.mxu0 %v4778_v52  ;;  %v1002_v52 = vadd.f32 %v5237_v56, %v1001_v49 }
 0x22f   : > { %2897 = vmatprep.subr.bf16.mxu0 %v6109_v32 }
 0x230   : > { %vm1044_vm13 = vcmp.gt.f32.partialorder %v1002_v52, 0.0  ;;  %v1076_v30 = vmul.f32 0.01, %v1002_v52 }
 0x232   : > { %2898 = vmatpush1.bf16.msra.mxu0 %v4780_v8  ;;  %v4253_v8 = vpop.f32.mrb[30].mxu1  ;;  %v1108_v49 = vsel %vm1044_vm13, %v1002_v52, %v1076_v30  ;;  %v1367_v30 = vld [vmem:[#allocation3 + $0xe1] sm:$0xff] }
 0x233   : > { %4254 = vmatprep.subr.bf16.mxu0 %v4824_v29  ;;  %v1238_v29 = vld [vmem:[#allocation3 + $0xb7] sm:$0xff]  ;;  %v1013_v23 = vadd.f32 %v4253_v8, %v5237_v56  ;;  %1212 = vst [vmem:[#allocation3 + $0x1e8] sm:$0xff] %v1108_v49  ;;  %v1004_v15 = vpop.f32.mrb[31].mxu1 }
 0x234   : > { %2217 = vmatmul.mubr.bf16.gmra.mrb[72].mxu1 %v5443_v41  ;;  %2705 = vmatmul.mubr.bf16.gmra.mrb[64].mxu0 %v5289_v37  ;;  %v5462_v43 = vpack.c.bf16 %v1239_v50, %v1238_v29  ;;  %v1005_v35 = vadd.f32 %v5237_v56, %v1004_v15  ;;  %v2156_v48 = vpop.f32.mrb[36].mxu1  ;;  %v1240_v29 = vld [vmem:[#allocation3 + $0xc7] sm:$0xff]  ;;  %v1241_v50 = vld [vmem:[#allocation3 + $0xcf] sm:$0xff] }
 0x235   : > { %2224 = vmatprep.mubr.bf16.mxu1 %v6103_v36  ;;  %2712 = vmatprep.mubr.bf16.mxu0 %v5447_v46  ;;  %v1365_v36 = vld [vmem:[#allocation3 + $0xd1] sm:$0xff]  ;;  %vm1047_vm14 = vcmp.gt.f32.partialorder %v1013_v23, 0.0  ;;  %v1079_v28 = vmul.f32 0.01, %v1013_v23  ;;  %v2157_v52 = vpop.f32.mrb[37].mxu1  ;;  %v4789_v56 = vld [vmem:[%s6100_s5 + $0xe8] sm:$0xff]  }
 0x236   : > { %v5465_v32 = vpack.c.bf16 %v1365_v36, %v1364_v39  ;;  %vm1045_vm15 = vcmp.gt.f32.partialorder %v1005_v35, 0.0  ;;  %v1077_v11 = vmul.f32 0.01, %v1005_v35  ;;  %v2158_v36 = vpop.f32.mrb[38].mxu1  ;;  %v1366_v39 = vld [vmem:[#allocation3 + $0xd9] sm:$0xff]  ;;  %2392 = vmatpush1.bf16.msra.mxu1 %v4789_v56  ;;  %v1368_v52 = vld [vmem:[#allocation3 + $0xe9] sm:$0xff] }
 0x237   : > { %v1111_v8 = vsel %vm1047_vm14, %v1013_v23, %v1079_v28  ;;  %v2159_v28 = vpop.f32.mrb[39].mxu1  ;;  %v5471_v23 = vpack.c.bf16 %v1241_v50, %v1240_v29  ;;  %v5474_v42 = vpack.c.bf16 %v1367_v30, %v1366_v39  ;;  %v1243_v29 = vld [vmem:[#allocation3 + $0xdf] sm:$0xff]  ;;  %v6166_v50 = vmov 0  }
 0x238   : > { %1215 = vst [vmem:[#allocation3 + $0x210] sm:$0xff] %v1111_v8  ;;  %v1109_v5 = vsel %vm1045_vm15, %v1005_v35, %v1077_v11  ;;  %v5484_v48 = vpack.c.bf16 %v1111_v8, %v1110_v27  ;;  %v1242_v35 = vld [vmem:[#allocation3 + $0xd7] sm:$0xff]  ;;  %2393 = vmatprep.subr.bf16.mxu1 %v6166_v50  ;;  %v1245_v27 = vld [vmem:[#allocation3 + $0xef] sm:$0xff]  ;;  %v1371_v8 = vld [vmem:[#allocation3 + $0x101] sm:$0xff] }
 0x239   : > { %1213 = vst [vmem:[#allocation3 + $0x1f0] sm:$0xff] %v1109_v5  ;;  %v5482_v15 = vpack.c.bf16 %v1109_v5, %v1108_v49  ;;  %v1369_v11 = vld [vmem:[#allocation3 + $0xf1] sm:$0xff]  ;;  %v5487_v36 = vpack.c.bf16 %v1243_v29, %v1242_v35  ;;  %v1244_v5 = vld [vmem:[#allocation3 + $0xe7] sm:$0xff]  ;;  %v1370_v49 = vld [vmem:[#allocation3 + $0xf9] sm:$0xff] }
 0x23a   : > { %6165 = vst [vmem:[#allocation20_spill] sm:$0xff] %v5484_v48  ;;  %v5490_v39 = vpack.c.bf16 %v1369_v11, %v1368_v52  ;;  %v5495_v30 = vpack.c.bf16 %v1245_v27, %v1244_v5  ;;  %v4791_v28 = vld [vmem:[%s6100_s5 + $0xf0] sm:$0xff]   ;;  %v5501_v56 = vpack.c.bf16 %v1371_v8, %v1370_v49  ;;  %v4792_v35 = vld [vmem:[%s6100_s5 + $0xf8] sm:$0xff]   ;;  %v1248_v8 = vld [vmem:[#allocation3 + $0x107] sm:$0xff] }
 0x23b   : > { %2394 = vmatpush1.bf16.msra.mxu1 %v4791_v28  ;;  %v1246_v29 = vld [vmem:[#allocation3 + $0xf7] sm:$0xff]  ;;  %v1247_v52 = vld [vmem:[#allocation3 + $0xff] sm:$0xff]  ;;  %v1372_v11 = vld [vmem:[#allocation3 + $0x109] sm:$0xff] }
 0x23c   : > { %2225 = vmatmul.mubr.bf16.gmra.mrb[76].mxu1 %v5462_v43  ;;  %2713 = vmatmul.mubr.bf16.gmra.mrb[68].mxu0 %v6164_v3  ;;  %6167 = vst [vmem:[#allocation21_spill] sm:$0xff] %v5501_v56  ;;  %v1373_v5 = vld [vmem:[#allocation3 + $0x111] sm:$0xff]  ;;  %v5510_v27 = vpack.c.bf16 %v1247_v52, %v1246_v29  ;;  %v1251_v52 = vld [vmem:[#allocation3 + $0x11f] sm:$0xff] }
 0x23d   : > { %2230 = vmatprep.mubr.bf16.mxu1 %v5281_v33  ;;  %2718 = vmatprep.mubr.bf16.mxu0 %v5465_v32  ;;  %v5514_v49 = vpack.c.bf16 %v1373_v5, %v1372_v11  ;;  %v1249_v28 = vld [vmem:[#allocation3 + $0x10f] sm:$0xff]  ;;  %v1250_v29 = vld [vmem:[#allocation3 + $0x117] sm:$0xff] }
 0x23e   : > { %2395 = vmatprep.subr.bf16.mxu1 %v6166_v50  ;;  %v5519_v21 = vpack.c.bf16 %v1249_v28, %v1248_v8  ;;  %v5527_v11 = vpack.c.bf16 %v1251_v52, %v1250_v29  ;;  %v4781_v8 = vld [vmem:[%s6100_s5 + $0x200] sm:$0xff]   ;;  %v1254_v28 = vld [vmem:[#allocation3 + $0x137] sm:$0xff] }
 0x23f   : > { %2396 = vmatpush1.bf16.msra.mxu1 %v4792_v35  ;;  %6168 = vst [vmem:[#allocation22_spill] sm:$0xff] %v5514_v49  ;;  %v5522_v35 = vpack.c.bf16 %v1375_v18, %v1374_v45  ;;  %v1252_v18 = vld [vmem:[#allocation3 + $0x127] sm:$0xff]  ;;  %v1253_v45 = vld [vmem:[#allocation3 + $0x12f] sm:$0xff]  ;;  %v1255_v29 = vld [vmem:[#allocation3 + $0x13f] sm:$0xff] }
 0x240   : > { %4394 = vmatprep.subr.bf16.mxu1 %v6166_v50  ;;  %v5533_v5 = vpack.c.bf16 %v1253_v45, %v1252_v18  ;;  %v5545_v52 = vld [vmem:[#allocation3] sm:$0xff]  ;;  %v5548_v18 = vpack.c.bf16 %v1255_v29, %v1254_v28  ;;  %v4787_v45 = vld [vmem:[%s6100_s5 + $0x210] sm:$0xff]  }
 0x241   : > { %6169 = vst [vmem:[#allocation23_spill] sm:$0xff] %v5522_v35  ;;  %6170 = vst [vmem:[#allocation24_spill] sm:$0xff] %v5545_v52  ;;  %v1257_v28 = vld [vmem:[#allocation3 + $0x14f] sm:$0xff]  ;;  %v5564_v29 = vpack.c.bf16 %v5545_v52, %v5545_v52 }
 0x242   : > { %v1277_v61 = vld [vmem:[#allocation3 + $0x1ef] sm:$0xff] }
 0x244   : > { %2231 = vmatmul.mubr.bf16.gmra.mrb[80].mxu1 %v5471_v23  ;;  %2719 = vmatmul.mubr.bf16.gmra.mrb[72].mxu0 %v5281_v33 }
 0x245   : > { %2238 = vmatprep.mubr.bf16.mxu1 %v6164_v3  ;;  %2726 = vmatprep.mubr.bf16.mxu0 %v5474_v42 }
 0x24c   : > { %2239 = vmatmul.mubr.bf16.gmra.mrb[84].mxu1 %v5487_v36  ;;  %2727 = vmatmul.mubr.bf16.gmra.mrb[76].mxu0 %v6164_v3 }
 0x24d   : > { %2244 = vmatprep.mubr.bf16.mxu1 %v5313_v16  ;;  %2732 = vmatprep.mubr.bf16.mxu0 %v5490_v39 }
 0x254   : > { %2245 = vmatmul.mubr.bf16.gmra.mrb[88].mxu1 %v5495_v30  ;;  %2733 = vmatmul.mubr.bf16.gmra.mrb[80].mxu0 %v5313_v16 }
 0x255   : > { %2252 = vmatprep.mubr.bf16.mxu1 %v6164_v3  ;;  %2740 = vmatprep.mubr.bf16.mxu0 %v5501_v56 }
 0x25c   : > { %2253 = vmatmul.mubr.bf16.gmra.mrb[92].mxu1 %v5510_v27  ;;  %2741 = vmatmul.mubr.bf16.gmra.mrb[84].mxu0 %v6164_v3 }
 0x25d   : > { %2258 = vmatprep.mubr.bf16.mxu1 %v5306_v13  ;;  %2746 = vmatprep.mubr.bf16.mxu0 %v5514_v49 }
 0x264   : > { %2259 = vmatmul.mubr.bf16.gmra.mrb[96].mxu1 %v5519_v21  ;;  %2747 = vmatmul.mubr.bf16.gmra.mrb[88].mxu0 %v5306_v13 }
 0x265   : > { %2266 = vmatprep.mubr.bf16.mxu1 %v6164_v3  ;;  %2754 = vmatprep.mubr.bf16.mxu0 %v5522_v35 }
 0x26c   : > { %2267 = vmatmul.mubr.bf16.gmra.mrb[100].mxu1 %v5527_v11  ;;  %2755 = vmatmul.mubr.bf16.gmra.mrb[92].mxu0 %v6164_v3 }
 0x26d   : > { %2272 = vmatprep.mubr.bf16.mxu1 %v5341_v9  ;;  %2899 = vmatprep.mubr.bf16.mxu0 %v5246_v20  ;;  %v4784_v20 = vld [vmem:[%s6100_s5 + $0x208] sm:$0xff]  }
 0x274   : > { %2273 = vmatmul.mubr.bf16.gmra.mrb[104].mxu1 %v5533_v5  ;;  %2900 = vmatmul.mubr.bf16.vlgmr.msra.gmra.mrb[32].mxu0 %v5308_v14 }
 0x275   : > { %2280 = vmatprep.mubr.bf16.mxu1 %v6164_v3  ;;  %4255 = vmatpush3.bf16.msra.mxu0 %v4781_v8  ;;  %v4790_v8 = vld [vmem:[%s6100_s5 + $0x218] sm:$0xff]  }
 0x276   : > { %2907 = vmatprep.mubr.bf16.mxu0 %v6164_v3  ;;  %4256 = vmatprep.subr.bf16.mxu0 %v5545_v52 }
 0x279   : > { %4257 = vmatpush3.bf16.msra.mxu0 %v4784_v20  ;;  %v1256_v20 = vld [vmem:[#allocation3 + $0x147] sm:$0xff] }
 0x27a   : > { %4258 = vmatprep.subr.bf16.mxu0 %v5545_v52  ;;  %v5566_v59 = vpack.c.bf16 %v1257_v28, %v1256_v20  ;;  %v1260_v20 = vld [vmem:[#allocation3 + $0x167] sm:$0xff]  ;;  %v1261_v28 = vld [vmem:[#allocation3 + $0x16f] sm:$0xff] }
 0x27b   : > { %v5583_v38 = vpack.c.bf16 %v1261_v28, %v1260_v20  ;;  %v1264_v20 = vld [vmem:[#allocation3 + $0x187] sm:$0xff]  ;;  %v1265_v28 = vld [vmem:[#allocation3 + $0x18f] sm:$0xff] }
 0x27c   : > { %2281 = vmatmul.mubr.bf16.gmra.mrb[108].mxu1 %v5548_v18  ;;  %2908 = vmatmul.mubr.bf16.gmra.mrb[96].mxu0 %v5336_v7 }
 0x27d   : > { %2286 = vmatprep.mubr.bf16.mxu1 %v5334_v2  ;;  %2913 = vmatprep.mubr.bf16.mxu0 %v5262_v60  ;;  %v4793_v60 = vld [vmem:[%s6100_s5 + $0x220] sm:$0xff]  }
 0x27e   : > { %4259 = vmatpush3.bf16.msra.mxu0 %v4787_v45  ;;  %v1258_v45 = vld [vmem:[#allocation3 + $0x157] sm:$0xff] }
 0x27f   : > { %4260 = vmatprep.subr.bf16.mxu0 %v5545_v52 }
 0x282   : > { %4261 = vmatpush3.bf16.msra.mxu0 %v4790_v8  ;;  %v5577_v8 = vpack.c.bf16 %v1259_v62, %v1258_v45  ;;  %v1262_v62 = vld [vmem:[#allocation3 + $0x177] sm:$0xff]  ;;  %v1263_v45 = vld [vmem:[#allocation3 + $0x17f] sm:$0xff] }
 0x283   : > { %4262 = vmatprep.subr.bf16.mxu0 %v5545_v52 }
 0x284   : > { %2287 = vmatmul.mubr.bf16.gmra.mrb[112].mxu1 %v5566_v59  ;;  %2914 = vmatmul.mubr.bf16.gmra.mrb[40].mxu0 %v5358_v53 }
 0x285   : > { %2294 = vmatprep.mubr.bf16.mxu1 %v5564_v29  ;;  %2921 = vmatprep.mubr.bf16.mxu0 %v6164_v3 }
 0x286   : > { %4263 = vmatpush3.bf16.msra.mxu0 %v4793_v60  ;;  %v4794_v60 = vld [vmem:[%s6100_s5 + $0x228] sm:$0xff]  }
 0x287   : > { %4264 = vmatprep.subr.bf16.mxu0 %v5545_v52 }
 0x28a   : > { %4265 = vmatpush3.bf16.msra.mxu0 %v4794_v60  ;;  %v5599_v60 = vpack.c.bf16 %v1265_v28, %v1264_v20  ;;  %v1269_v20 = vld [vmem:[#allocation3 + $0x1af] sm:$0xff] }
 0x28b   : > { %4266 = vmatprep.subr.bf16.mxu0 %v5545_v52  ;;  %v4795_v28 = vld [vmem:[%s6100_s5 + $0x230] sm:$0xff]  }
 0x28c   : > { %2295 = vmatmul.mubr.bf16.gmra.mrb[116].mxu1 %v5577_v8  ;;  %2922 = vmatmul.mubr.bf16.gmra.mrb[100].mxu0 %v5382_v24 }
 0x28d   : > { %2300 = vmatprep.mubr.bf16.mxu1 %v5363_v0  ;;  %2927 = vmatprep.mubr.bf16.mxu0 %v5253_v54  ;;  %v5593_v54 = vpack.c.bf16 %v1263_v45, %v1262_v62  ;;  %v1266_v62 = vld [vmem:[#allocation3 + $0x197] sm:$0xff]  ;;  %v1267_v45 = vld [vmem:[#allocation3 + $0x19f] sm:$0xff] }
 0x28e   : > { %v5605_v40 = vpack.c.bf16 %v1267_v45, %v1266_v62  ;;  %4267 = vmatpush3.bf16.msra.mxu0 %v4795_v28  ;;  %v1270_v62 = vld [vmem:[#allocation3 + $0x1b7] sm:$0xff]  ;;  %v1271_v45 = vld [vmem:[#allocation3 + $0x1bf] sm:$0xff] }
 0x28f   : > { %4268 = vmatprep.subr.bf16.mxu0 %v5545_v52 }
 0x294   : > { %2301 = vmatmul.mubr.bf16.gmra.mrb[120].mxu1 %v5583_v38  ;;  %2928 = vmatmul.mubr.bf16.gmra.mrb[48].mxu0 %v5401_v4 }
 0x295   : > { %2308 = vmatprep.mubr.bf16.mxu1 %v5564_v29  ;;  %2935 = vmatprep.mubr.bf16.mxu0 %v6164_v3 }
 0x29c   : > { %2309 = vmatmul.mubr.bf16.gmra.mrb[124].mxu1 %v5593_v54  ;;  %2936 = vmatmul.mubr.bf16.gmra.mrb[104].mxu0 %v5425_v51 }
 0x29d   : > { %2314 = vmatprep.mubr.bf16.mxu1 %v5379_v12  ;;  %2941 = vmatprep.mubr.bf16.mxu0 %v5289_v37  ;;  %v1268_v37 = vld [vmem:[#allocation3 + $0x1a7] sm:$0xff] }
 0x29e   : > { %v5614_v17 = vpack.c.bf16 %v1269_v20, %v1268_v37  ;;  %v1272_v37 = vld [vmem:[#allocation3 + $0x1c7] sm:$0xff]  ;;  %v1273_v20 = vld [vmem:[#allocation3 + $0x1cf] sm:$0xff] }
 0x29f   : > { %v5627_v28 = vpack.c.bf16 %v1273_v20, %v1272_v37  ;;  %v1276_v20 = vld [vmem:[#allocation3 + $0x1e7] sm:$0xff] }
 0x2a0   : > { %v5642_v56 = vpack.c.bf16 %v1277_v61, %v1276_v20  ;;  %v4798_v61 = vld [vmem:[%s6100_s5 + $0x100] sm:$0xff]  }
 0x2a4   : > { %2315 = vmatmul.mubr.bf16.gmra.mrb[128].mxu1 %v5599_v60  ;;  %2942 = vmatmul.mubr.bf16.gmra.mrb[56].mxu0 %v5443_v41 }
 0x2a5   : > { %2322 = vmatprep.mubr.bf16.mxu1 %v5564_v29  ;;  %2949 = vmatprep.mubr.bf16.mxu0 %v6164_v3 }
 0x2ac   : > { %2323 = vmatmul.mubr.bf16.gmra.mrb[132].mxu1 %v5605_v40  ;;  %2950 = vmatmul.mubr.bf16.gmra.mrb[108].mxu0 %v5462_v43 }
 0x2ad   : > { %2328 = vmatprep.mubr.bf16.mxu1 %v5440_v10  ;;  %2955 = vmatprep.mubr.bf16.mxu0 %v5281_v33  ;;  %v5621_v33 = vpack.c.bf16 %v1271_v45, %v1270_v62  ;;  %v1274_v62 = vld [vmem:[#allocation3 + $0x1d7] sm:$0xff]  ;;  %v1275_v45 = vld [vmem:[#allocation3 + $0x1df] sm:$0xff] }
 0x2ae   : > { %v5633_v19 = vpack.c.bf16 %v1275_v45, %v1274_v62 }
 0x2b4   : > { %2329 = vmatmul.mubr.bf16.gmra.mrb[136].mxu1 %v5614_v17  ;;  %2956 = vmatmul.mubr.bf16.gmra.mrb[64].mxu0 %v5471_v23 }
 0x2b5   : > { %2336 = vmatprep.mubr.bf16.mxu1 %v5564_v29  ;;  %2963 = vmatprep.mubr.bf16.mxu0 %v6164_v3 }
 0x2bc   : > { %2337 = vmatmul.mubr.bf16.gmra.mrb[140].mxu1 %v5621_v33  ;;  %2964 = vmatmul.mubr.bf16.gmra.mrb[112].mxu0 %v5487_v36 }
 0x2bd   : > { %2342 = vmatprep.mubr.bf16.mxu1 %v5460_v31  ;;  %2969 = vmatprep.mubr.bf16.mxu0 %v5313_v16  ;;  %v4796_v16 = vld [vmem:[%s6100_s5 + $0x238] sm:$0xff]  }
 0x2be   : > { %4269 = vmatpush3.bf16.msra.mxu0 %v4796_v16 }
 0x2c4   : > { %2343 = vmatmul.mubr.bf16.gmra.mrb[144].mxu1 %v5627_v28  ;;  %2970 = vmatmul.mubr.bf16.gmra.mrb[72].mxu0 %v5495_v30 }
 0x2c5   : > { %2350 = vmatprep.mubr.bf16.mxu1 %v5564_v29  ;;  %2977 = vmatprep.mubr.bf16.mxu0 %v6164_v3 }
 0x2cc   : > { %2351 = vmatmul.mubr.bf16.gmra.mrb[148].mxu1 %v5633_v19  ;;  %2978 = vmatmul.mubr.bf16.gmra.mrb[116].mxu0 %v5510_v27 }
 0x2cd   : > { %2356 = vmatprep.mubr.bf16.mxu1 %v5482_v15  ;;  %2983 = vmatprep.mubr.bf16.mxu0 %v5306_v13  ;;  %v1340_v13 = vld [vmem:[#allocation3 + $0x9] sm:$0xff] }
 0x2cf   : > { %v2170_v37 = vpop.f32.mrb[44].mxu1  ;;  %v2658_v63 = vpop.f32.mrb[36].mxu0 }
 0x2d0   : > { %v2171_v52 = vpop.f32.mrb[45].mxu1  ;;  %v2659_v62 = vpop.f32.mrb[37].mxu0  ;;  %v1341_v37 = vld [vmem:[#allocation3 + $0x11] sm:$0xff] }
 0x2d1   : > { %v2172_v45 = vpop.f32.mrb[46].mxu1  ;;  %v2660_v35 = vpop.f32.mrb[38].mxu0  ;;  %v1428_v63 = vpack.c.bf16 %v1341_v37, %v1340_v13 }
 0x2d2   : > { %v2173_v49 = vpop.f32.mrb[47].mxu1  ;;  %v2661_v48 = vpop.f32.mrb[39].mxu0 }
 0x2d3   : > { %v1342_v49 = vld [vmem:[#allocation3 + $0x19] sm:$0xff] }
 0x2d4   : > { %2357 = vmatmul.mubr.bf16.gmra.mrb[152].mxu1 %v5642_v56  ;;  %2984 = vmatmul.mubr.bf16.gmra.mrb[80].mxu0 %v5519_v21 }
 0x2d5   : > { %2397 = vmatprep.mubr.bf16.mxu1 %v5257_v57  ;;  %2991 = vmatprep.mubr.bf16.mxu0 %v6164_v3  ;;  %v1343_v57 = vld [vmem:[#allocation3 + $0x21] sm:$0xff] }
 0x2d6   : > { %v1437_v13 = vpack.c.bf16 %v1343_v57, %v1342_v49 }
 0x2dc   : > { %2398 = vmatmul.mubr.bf16.vlgmr.msra.gmra.mrb[32].mxu1 %v1428_v63  ;;  %2992 = vmatmul.mubr.bf16.gmra.mrb[120].mxu0 %v5527_v11  ;;  %v4800_v63 = vld [vmem:[%s6100_s5 + $0x110] sm:$0xff]  }
 0x2dd   : > { %2405 = vmatprep.mubr.bf16.mxu1 %v5284_v34  ;;  %2997 = vmatprep.mubr.bf16.mxu0 %v5341_v9  ;;  %v4799_v34 = vld [vmem:[%s6100_s5 + $0x108] sm:$0xff]  }
 0x2de   : > { %4410 = vmatpush1.bf16.msra.mxu1 %v4798_v61  ;;  %v4801_v61 = vld [vmem:[%s6100_s5 + $0x118] sm:$0xff]  }
 0x2df   : > { %v2184_v48 = vpop.f32.mrb[52].mxu1  ;;  %4395 = vmatprep.subr.bf16.mxu1 %v6166_v50  ;;  %v2672_v35 = vpop.f32.mrb[44].mxu0 }
 0x2e0   : > { %v2185_v52 = vpop.f32.mrb[53].mxu1  ;;  %v2673_v16 = vpop.f32.mrb[45].mxu0 }
 0x2e1   : > { %v2186_v20 = vpop.f32.mrb[54].mxu1  ;;  %v2674_v62 = vpop.f32.mrb[46].mxu0 }
 0x2e2   : > { %v2187_v45 = vpop.f32.mrb[55].mxu1  ;;  %4411 = vmatpush1.bf16.msra.mxu1 %v4799_v34  ;;  %v2675_v37 = vpop.f32.mrb[47].mxu0  ;;  %v4804_v62 = vld [vmem:[%s6100_s5 + $0x130] sm:$0xff]  }
 0x2e3   : > { %4396 = vmatprep.subr.bf16.mxu1 %v6166_v50  ;;  %v4805_v45 = vld [vmem:[%s6100_s5 + $0x138] sm:$0xff]  }
 0x2e4   : > { %2406 = vmatmul.mubr.bf16.gmra.mrb[156].mxu1 %v1437_v13  ;;  %2998 = vmatmul.mubr.bf16.gmra.mrb[88].mxu0 %v5533_v5 }
 0x2e5   : > { %2411 = vmatprep.mubr.bf16.mxu1 %v5308_v14  ;;  %3005 = vmatprep.mubr.bf16.mxu0 %v6164_v3  ;;  %v4802_v14 = vld [vmem:[%s6100_s5 + $0x120] sm:$0xff]  }
 0x2e6   : > { %4412 = vmatpush1.bf16.msra.mxu1 %v4800_v63 }
 0x2e7   : > { %4397 = vmatprep.subr.bf16.mxu1 %v6166_v50 }
 0x2ea   : > { %4413 = vmatpush1.bf16.msra.mxu1 %v4801_v61 }
 0x2eb   : > { %4398 = vmatprep.subr.bf16.mxu1 %v6166_v50 }
 0x2ec   : > { %2412 = vmatmul.mubr.bf16.gmra.mrb[40].mxu1 %v5255_v55  ;;  %3006 = vmatmul.mubr.bf16.gmra.mrb[124].mxu0 %v5548_v18 }
 0x2ed   : > { %2419 = vmatprep.mubr.bf16.mxu1 %v5336_v7  ;;  %3011 = vmatprep.mubr.bf16.mxu0 %v5334_v2  ;;  %v4803_v7 = vld [vmem:[%s6100_s5 + $0x128] sm:$0xff]  }
 0x2ee   : > { %4414 = vmatpush1.bf16.msra.mxu1 %v4802_v14 }
 0x2ef   : > { %v2198_v48 = vpop.f32.mrb[60].mxu1  ;;  %4399 = vmatprep.subr.bf16.mxu1 %v6166_v50  ;;  %v2686_v49 = vpop.f32.mrb[52].mxu0 }
 0x2f0   : > { %v2199_v57 = vpop.f32.mrb[61].mxu1  ;;  %v2687_v35 = vpop.f32.mrb[53].mxu0  ;;  %v4808_v49 = vld [vmem:[%s6100_s5 + $0x150] sm:$0xff]  }
 0x2f1   : > { %v2200_v52 = vpop.f32.mrb[62].mxu1  ;;  %v2688_v16 = vpop.f32.mrb[54].mxu0  ;;  %v4809_v57 = vld [vmem:[%s6100_s5 + $0x158] sm:$0xff]  }
 0x2f2   : > { %v2201_v55 = vpop.f32.mrb[63].mxu1  ;;  %4415 = vmatpush1.bf16.msra.mxu1 %v4803_v7  ;;  %v2689_v20 = vpop.f32.mrb[55].mxu0 }
 0x2f3   : > { %4400 = vmatprep.subr.bf16.mxu1 %v6166_v50 }
 0x2f4   : > { %2420 = vmatmul.mubr.bf16.gmra.mrb[160].mxu1 %v5268_v6  ;;  %3012 = vmatmul.mubr.bf16.gmra.mrb[128].mxu0 %v5566_v59  ;;  %v4806_v6 = vld [vmem:[%s6100_s5 + $0x140] sm:$0xff]  }
 0x2f5   : > { %2425 = vmatprep.mubr.bf16.mxu1 %v5358_v53  ;;  %3019 = vmatprep.mubr.bf16.mxu0 %v5564_v29 }
 0x2f6   : > { %4416 = vmatpush1.bf16.msra.mxu1 %v4804_v62 }
 0x2f7   : > { %4401 = vmatprep.subr.bf16.mxu1 %v6166_v50 }
 0x2fa   : > { %4417 = vmatpush1.bf16.msra.mxu1 %v4805_v45 }
 0x2fb   : > { %4402 = vmatprep.subr.bf16.mxu1 %v6166_v50 }
 0x2fc   : > { %2426 = vmatmul.mubr.bf16.gmra.mrb[48].mxu1 %v5295_v47  ;;  %3020 = vmatmul.mubr.bf16.gmra.mrb[132].mxu0 %v5577_v8 }
 0x2fd   : > { %2433 = vmatprep.mubr.bf16.mxu1 %v5382_v24  ;;  %3025 = vmatprep.mubr.bf16.mxu0 %v5363_v0  ;;  %v4807_v24 = vld [vmem:[%s6100_s5 + $0x148] sm:$0xff]  }
 0x2fe   : > { %4418 = vmatpush1.bf16.msra.mxu1 %v4806_v6  ;;  %v4812_v6 = vld [vmem:[%s6100_s5 + $0x170] sm:$0xff]  }
 0x2ff   : > { %v2212_v53 = vpop.f32.mrb[68].mxu1  ;;  %4403 = vmatprep.subr.bf16.mxu1 %v6166_v50  ;;  %v2700_v13 = vpop.f32.mrb[60].mxu0 }
 0x300   : > { %v2213_v34 = vpop.f32.mrb[69].mxu1  ;;  %v2701_v37 = vpop.f32.mrb[61].mxu0  ;;  %v4813_v53 = vld [vmem:[%s6100_s5 + $0x178] sm:$0xff]  }
 0x301   : > { %v2214_v63 = vpop.f32.mrb[70].mxu1  ;;  %v2702_v61 = vpop.f32.mrb[62].mxu0 }
 0x302   : > { %v2215_v14 = vpop.f32.mrb[71].mxu1  ;;  %4419 = vmatpush1.bf16.msra.mxu1 %v4807_v24  ;;  %v2703_v48 = vpop.f32.mrb[63].mxu0 }
 0x303   : > { %4404 = vmatprep.subr.bf16.mxu1 %v6166_v50 }
 0x304   : > { %2434 = vmatmul.mubr.bf16.gmra.mrb[164].mxu1 %v5319_v26  ;;  %3026 = vmatmul.mubr.bf16.gmra.mrb[136].mxu0 %v5583_v38 }
 0x305   : > { %2439 = vmatprep.mubr.bf16.mxu1 %v5401_v4  ;;  %3033 = vmatprep.mubr.bf16.mxu0 %v5564_v29  ;;  %v4810_v4 = vld [vmem:[%s6100_s5 + $0x160] sm:$0xff]  }
 0x306   : > { %4420 = vmatpush1.bf16.msra.mxu1 %v4808_v49 }
 0x307   : > { %4405 = vmatprep.subr.bf16.mxu1 %v6166_v50 }
 0x30a   : > { %4421 = vmatpush1.bf16.msra.mxu1 %v4809_v57 }
 0x30b   : > { %4406 = vmatprep.subr.bf16.mxu1 %v6166_v50 }
 0x30c   : > { %2440 = vmatmul.mubr.bf16.gmra.mrb[56].mxu1 %v5347_v22  ;;  %3034 = vmatmul.mubr.bf16.gmra.mrb[140].mxu0 %v5593_v54 }
 0x30d   : > { %2447 = vmatprep.mubr.bf16.mxu1 %v5425_v51  ;;  %3039 = vmatprep.mubr.bf16.mxu0 %v5379_v12  ;;  %v4811_v51 = vld [vmem:[%s6100_s5 + $0x168] sm:$0xff]  }
 0x30e   : > { %4422 = vmatpush1.bf16.msra.mxu1 %v4810_v4 }
 0x30f   : > { %v2226_v35 = vpop.f32.mrb[76].mxu1  ;;  %4407 = vmatprep.subr.bf16.mxu1 %v6166_v50  ;;  %v2714_v52 = vpop.f32.mrb[68].mxu0 }
 0x310   : > { %v2227_v16 = vpop.f32.mrb[77].mxu1  ;;  %v2715_v55 = vpop.f32.mrb[69].mxu0 }
 0x311   : > { %v2228_v7 = vpop.f32.mrb[78].mxu1  ;;  %v2716_v20 = vpop.f32.mrb[70].mxu0 }
 0x312   : > { %v2229_v62 = vpop.f32.mrb[79].mxu1  ;;  %4423 = vmatpush1.bf16.msra.mxu1 %v4811_v51  ;;  %v2717_v45 = vpop.f32.mrb[71].mxu0 }
 0x313   : > { %4408 = vmatprep.subr.bf16.mxu1 %v6166_v50 }
 0x314   : > { %2448 = vmatmul.mubr.bf16.gmra.mrb[168].mxu1 %v5367_v1  ;;  %3040 = vmatmul.mubr.bf16.gmra.mrb[144].mxu0 %v5599_v60 }
 0x315   : > { %2453 = vmatprep.mubr.bf16.mxu1 %v5443_v41  ;;  %3047 = vmatprep.mubr.bf16.mxu0 %v5564_v29 }
 0x316   : > { %4424 = vmatpush1.bf16.msra.mxu1 %v4812_v6  ;;  %v6171_v6 = vld [vmem:[#allocation20_spill] sm:$0xff] }
 0x317   : > { %4409 = vmatprep.subr.bf16.mxu1 %v6166_v50 }
 0x31a   : > { %4425 = vmatpush1.bf16.msra.mxu1 %v4813_v53 }
 0x31c   : > { %2454 = vmatmul.mubr.bf16.gmra.mrb[64].mxu1 %v5389_v44  ;;  %3048 = vmatmul.mubr.bf16.gmra.mrb[148].mxu0 %v5605_v40 }
 0x31d   : > { %2461 = vmatprep.mubr.bf16.mxu1 %v5462_v43  ;;  %3053 = vmatprep.mubr.bf16.mxu0 %v5440_v10 }
 0x31f   : > { %v2240_v41 = vpop.f32.mrb[84].mxu1  ;;  %v2728_v13 = vpop.f32.mrb[76].mxu0 }
 0x320   : > { %v2241_v34 = vpop.f32.mrb[85].mxu1  ;;  %v2729_v37 = vpop.f32.mrb[77].mxu0 }
 0x321   : > { %v2242_v63 = vpop.f32.mrb[86].mxu1  ;;  %v2730_v61 = vpop.f32.mrb[78].mxu0  ;;  %v1404_v34 = vld [vmem:[#allocation3 + $0x207] sm:$0xff]  ;;  %v1405_v37 = vld [vmem:[#allocation3 + $0x20f] sm:$0xff] }
 0x322   : > { %v2243_v50 = vpop.f32.mrb[87].mxu1  ;;  %v2731_v14 = vpop.f32.mrb[79].mxu0 }
 0x324   : > { %2462 = vmatmul.mubr.bf16.gmra.mrb[172].mxu1 %v5411_v25  ;;  %3054 = vmatmul.mubr.bf16.gmra.mrb[152].mxu0 %v5614_v17 }
 0x325   : > { %2467 = vmatprep.mubr.bf16.mxu1 %v5471_v23  ;;  %3061 = vmatprep.mubr.bf16.mxu0 %v5564_v29 }
 0x32c   : > { %2468 = vmatmul.mubr.bf16.gmra.mrb[72].mxu1 %v5432_v58  ;;  %3062 = vmatmul.mubr.bf16.gmra.mrb[156].mxu0 %v5621_v33 }
 0x32d   : > { %2475 = vmatprep.mubr.bf16.mxu1 %v5487_v36  ;;  %3067 = vmatprep.mubr.bf16.mxu0 %v5460_v31 }
 0x32f   : > { %v2254_v43 = vpop.f32.mrb[92].mxu1  ;;  %v2742_v24 = vpop.f32.mrb[84].mxu0 }
 0x330   : > { %v2255_v48 = vpop.f32.mrb[93].mxu1  ;;  %v2743_v49 = vpop.f32.mrb[85].mxu0  ;;  %v5771_v43 = vpack.c.bf16 %v1405_v37, %v1404_v34  ;;  %v6172_v24 = vld [vmem:[#allocation21_spill] sm:$0xff] }
 0x331   : > { %v2256_v57 = vpop.f32.mrb[94].mxu1  ;;  %v2744_v4 = vpop.f32.mrb[86].mxu0  ;;  %v1415_v48 = vld [vmem:[#allocation3 + $0x21f] sm:$0xff] }
 0x332   : > { %v2257_v35 = vpop.f32.mrb[95].mxu1  ;;  %v2745_v52 = vpop.f32.mrb[87].mxu0  ;;  %v6173_v57 = vld [vmem:[#allocation22_spill] sm:$0xff]  ;;  %v1416_v4 = vld [vmem:[#allocation3 + $0x227] sm:$0xff] }
 0x333   : > { %v1417_v35 = vld [vmem:[#allocation3 + $0x22f] sm:$0xff] }
 0x334   : > { %2476 = vmatmul.mubr.bf16.gmra.mrb[176].mxu1 %v5447_v46  ;;  %3068 = vmatmul.mubr.bf16.gmra.mrb[160].mxu0 %v5627_v28 }
 0x335   : > { %2481 = vmatprep.mubr.bf16.mxu1 %v5495_v30  ;;  %3075 = vmatprep.mubr.bf16.mxu0 %v5564_v29  ;;  %v1402_v30 = vld [vmem:[#allocation3 + $0x1f7] sm:$0xff] }
 0x33c   : > { %2482 = vmatmul.mubr.bf16.gmra.mrb[80].mxu1 %v5465_v32  ;;  %3076 = vmatmul.mubr.bf16.gmra.mrb[164].mxu0 %v5633_v19 }
 0x33d   : > { %2489 = vmatprep.mubr.bf16.mxu1 %v5510_v27  ;;  %3081 = vmatprep.mubr.bf16.mxu0 %v5482_v15  ;;  %v1403_v27 = vld [vmem:[#allocation3 + $0x1ff] sm:$0xff] }
 0x33e   : > { %v5765_v45 = vpack.c.bf16 %v1403_v27, %v1402_v30  ;;  %v1376_v30 = vld [vmem:[#allocation3 + $0x129] sm:$0xff]  ;;  %v1377_v27 = vld [vmem:[#allocation3 + $0x131] sm:$0xff] }
 0x33f   : > { %v2268_v23 = vpop.f32.mrb[100].mxu1  ;;  %v2756_v36 = vpop.f32.mrb[92].mxu0 }
 0x340   : > { %v2269_v16 = vpop.f32.mrb[101].mxu1  ;;  %v2757_v55 = vpop.f32.mrb[93].mxu0 }
 0x341   : > { %v2270_v7 = vpop.f32.mrb[102].mxu1  ;;  %v2758_v20 = vpop.f32.mrb[94].mxu0 }
 0x342   : > { %v2271_v62 = vpop.f32.mrb[103].mxu1  ;;  %v2759_v51 = vpop.f32.mrb[95].mxu0 }
 0x343   : > { %v6174_v51 = vld [vmem:[#allocation23_spill] sm:$0xff] }
 0x344   : > { %2490 = vmatmul.mubr.bf16.gmra.mrb[180].mxu1 %v5474_v42  ;;  %3082 = vmatmul.mubr.bf16.gmra.mrb[168].mxu0 %v5642_v56 }
 0x345   : > { %2495 = vmatprep.mubr.bf16.mxu1 %v5519_v21  ;;  %3089 = vmatprep.mubr.bf16.mxu0 %v5564_v29 }
 0x34c   : > { %2496 = vmatmul.mubr.bf16.gmra.mrb[88].mxu1 %v5490_v39  ;;  %3090 = vmatmul.mubr.bf16.gmra.mrb[172].mxu0 %v5765_v45 }
 0x34d   : > { %2503 = vmatprep.mubr.bf16.mxu1 %v5527_v11  ;;  %3095 = vmatprep.mubr.bf16.mxu0 %v6171_v6  ;;  %v1414_v11 = vld [vmem:[#allocation3 + $0x217] sm:$0xff] }
 0x34e   : > { %v1525_v49 = vpack.c.bf16 %v1415_v48, %v1414_v11 }
 0x34f   : > { %v2282_v53 = vpop.f32.mrb[108].mxu1  ;;  %v2909_v41 = vpop.f32.mrb[96].mxu0 }
 0x350   : > { %v2283_v13 = vpop.f32.mrb[109].mxu1  ;;  %v2910_v21 = vpop.f32.mrb[97].mxu0  ;;  %v5784_v53 = vpack.c.bf16 %v1377_v27, %v1376_v30 }
 0x351   : > { %v2284_v63 = vpop.f32.mrb[110].mxu1  ;;  %v2911_v61 = vpop.f32.mrb[98].mxu0  ;;  %v1378_v13 = vld [vmem:[#allocation3 + $0x139] sm:$0xff] }
 0x352   : > { %v2285_v50 = vpop.f32.mrb[111].mxu1  ;;  %v2912_v14 = vpop.f32.mrb[99].mxu0 }
 0x354   : > { %2504 = vmatmul.mubr.bf16.gmra.mrb[184].mxu1 %v6172_v24  ;;  %3096 = vmatmul.mubr.bf16.gmra.mrb[176].mxu0 %v5771_v43 }
 0x355   : > { %2509 = vmatprep.mubr.bf16.mxu1 %v5533_v5  ;;  %3103 = vmatprep.mubr.bf16.mxu0 %v5564_v29  ;;  %v1528_v5 = vpack.c.bf16 %v1417_v35, %v1416_v4  ;;  %v1383_v4 = vld [vmem:[#allocation3 + $0x161] sm:$0xff] }
 0x35c   : > { %2510 = vmatmul.mubr.bf16.gmra.mrb[96].mxu1 %v6173_v57  ;;  %3104 = vmatmul.mubr.bf16.gmra.mrb[180].mxu0 %v1525_v49 }
 0x35d   : > { %2517 = vmatprep.mubr.bf16.mxu1 %v5548_v18  ;;  %3109 = vmatprep.mubr.bf16.mxu0 %v5564_v29  ;;  %v6175_v18 = vld [vmem:[#allocation24_spill] sm:$0xff] }
 0x35f   : > { %v2296_v52 = vpop.f32.mrb[116].mxu1  ;;  %v2923_v23 = vpop.f32.mrb[100].mxu0 }
 0x360   : > { %v2297_v36 = vpop.f32.mrb[117].mxu1  ;;  %v2924_v16 = vpop.f32.mrb[101].mxu0 }
 0x361   : > { %v2298_v55 = vpop.f32.mrb[118].mxu1  ;;  %v2925_v7 = vpop.f32.mrb[102].mxu0 }
 0x362   : > { %v2299_v20 = vpop.f32.mrb[119].mxu1  ;;  %v2926_v62 = vpop.f32.mrb[103].mxu0 }
 0x363   : > { %v1387_v62 = vld [vmem:[#allocation3 + $0x181] sm:$0xff] }
 0x364   : > { %2518 = vmatmul.mubr.bf16.gmra.mrb[188].mxu1 %v6174_v51  ;;  %3110 = vmatmul.mubr.bf16.gmra.mrb[184].mxu0 %v1528_v5 }
 0x365   : > { %2523 = vmatprep.mubr.bf16.mxu1 %v5566_v59  ;;  %4270 = vmatprep.mubr.msk.bf16.mxu0 %vm4826_vm0, %v6175_v18  ;;  %v1379_v59 = vld [vmem:[#allocation3 + $0x141] sm:$0xff] }
 0x366   : > { %v5791_v14 = vpack.c.bf16 %v1379_v59, %v1378_v13 }
 0x36c   : > { %2524 = vmatmul.mubr.bf16.gmra.mrb[104].mxu1 %v5784_v53  ;;  %4271 = vmatmul.mubr.bf16.vlgmr.msra.gmra.mrb[32].mxu0 %v5295_v47  ;;  %v1380_v47 = vld [vmem:[#allocation3 + $0x149] sm:$0xff] }
 0x36d   : > { %2531 = vmatprep.mubr.bf16.mxu1 %v5577_v8  ;;  %4274 = vmatprep.mubr.msk.bf16.mxu0 %vm4826_vm0, %v6175_v18  ;;  %v1381_v8 = vld [vmem:[#allocation3 + $0x151] sm:$0xff] }
 0x36e   : > { %v5798_v48 = vpack.c.bf16 %v1381_v8, %v1380_v47 }
 0x36f   : > { %v2310_v41 = vpop.f32.mrb[124].mxu1  ;;  %v2937_v34 = vpop.f32.mrb[104].mxu0 }
 0x370   : > { %v2311_v37 = vpop.f32.mrb[125].mxu1  ;;  %v2938_v21 = vpop.f32.mrb[105].mxu0 }
 0x371   : > { %v2312_v63 = vpop.f32.mrb[126].mxu1  ;;  %v2939_v61 = vpop.f32.mrb[106].mxu0 }
 0x372   : > { %v2313_v50 = vpop.f32.mrb[127].mxu1  ;;  %v2940_v11 = vpop.f32.mrb[107].mxu0  ;;  %v1391_v61 = vld [vmem:[#allocation3 + $0x1a1] sm:$0xff] }
 0x374   : > { %2532 = vmatmul.mubr.bf16.gmra.mrb[192].mxu1 %v5791_v14  ;;  %4275 = vmatmul.mubr.bf16.gmra.mrb[188].mxu0 %v5319_v26  ;;  %v1382_v26 = vld [vmem:[#allocation3 + $0x159] sm:$0xff] }
 0x375   : > { %2537 = vmatprep.mubr.bf16.mxu1 %v5583_v38  ;;  %4278 = vmatprep.mubr.msk.bf16.mxu0 %vm4826_vm0, %v6175_v18  ;;  %v5805_v55 = vpack.c.bf16 %v1383_v4, %v1382_v26 }
 0x37c   : > { %2538 = vmatmul.mubr.bf16.gmra.mrb[112].mxu1 %v5798_v48  ;;  %4279 = vmatmul.mubr.bf16.gmra.mrb[40].mxu0 %v5347_v22  ;;  %v1384_v22 = vld [vmem:[#allocation3 + $0x169] sm:$0xff] }
 0x37d   : > { %2545 = vmatprep.mubr.bf16.mxu1 %v5593_v54  ;;  %4282 = vmatprep.mubr.msk.bf16.mxu0 %vm4826_vm0, %v6175_v18  ;;  %v1385_v54 = vld [vmem:[#allocation3 + $0x171] sm:$0xff] }
 0x37e   : > { %v5812_v7 = vpack.c.bf16 %v1385_v54, %v1384_v22 }
 0x37f   : > { %v2324_v49 = vpop.f32.mrb[132].mxu1  ;;  %v2951_v38 = vpop.f32.mrb[108].mxu0 }
 0x380   : > { %v2325_v35 = vpop.f32.mrb[133].mxu1  ;;  %v2952_v52 = vpop.f32.mrb[109].mxu0 }
 0x381   : > { %v2326_v23 = vpop.f32.mrb[134].mxu1  ;;  %v2953_v36 = vpop.f32.mrb[110].mxu0 }
 0x382   : > { %v2327_v16 = vpop.f32.mrb[135].mxu1  ;;  %v2954_v5 = vpop.f32.mrb[111].mxu0 }
 0x384   : > { %2546 = vmatmul.mubr.bf16.gmra.mrb[196].mxu1 %v5805_v55  ;;  %4283 = vmatmul.mubr.bf16.gmra.mrb[192].mxu0 %v5367_v1  ;;  %v1386_v1 = vld [vmem:[#allocation3 + $0x179] sm:$0xff] }
 0x385   : > { %2551 = vmatprep.mubr.bf16.mxu1 %v5599_v60  ;;  %4286 = vmatprep.mubr.msk.bf16.mxu0 %vm4826_vm0, %v6175_v18  ;;  %v5819_v34 = vpack.c.bf16 %v1387_v62, %v1386_v1  ;;  %v1397_v1 = vld [vmem:[#allocation3 + $0x1d1] sm:$0xff] }
 0x38c   : > { %2552 = vmatmul.mubr.bf16.gmra.mrb[120].mxu1 %v5812_v7  ;;  %4287 = vmatmul.mubr.bf16.gmra.mrb[48].mxu0 %v5389_v44  ;;  %v1389_v44 = vld [vmem:[#allocation3 + $0x191] sm:$0xff] }
 0x38d   : > { %2559 = vmatprep.mubr.bf16.mxu1 %v5605_v40  ;;  %4290 = vmatprep.mubr.msk.bf16.mxu0 %vm4826_vm0, %v6175_v18  ;;  %v1388_v40 = vld [vmem:[#allocation3 + $0x189] sm:$0xff] }
 0x38e   : > { %v5826_v21 = vpack.c.bf16 %v1389_v44, %v1388_v40 }
 0x38f   : > { %v2338_v20 = vpop.f32.mrb[140].mxu1  ;;  %v2965_v60 = vpop.f32.mrb[112].mxu0 }
 0x390   : > { %v2339_v30 = vpop.f32.mrb[141].mxu1  ;;  %v2966_v27 = vpop.f32.mrb[113].mxu0 }
 0x391   : > { %v2340_v41 = vpop.f32.mrb[142].mxu1  ;;  %v2967_v13 = vpop.f32.mrb[114].mxu0 }
 0x392   : > { %v2341_v59 = vpop.f32.mrb[143].mxu1  ;;  %v2968_v37 = vpop.f32.mrb[115].mxu0  ;;  %v1399_v41 = vld [vmem:[#allocation3 + $0x1e1] sm:$0xff] }
 0x394   : > { %2560 = vmatmul.mubr.bf16.gmra.mrb[200].mxu1 %v5819_v34  ;;  %4291 = vmatmul.mubr.bf16.gmra.mrb[196].mxu0 %v5411_v25  ;;  %v1390_v25 = vld [vmem:[#allocation3 + $0x199] sm:$0xff] }
 0x395   : > { %2565 = vmatprep.mubr.bf16.mxu1 %v5614_v17  ;;  %4294 = vmatprep.mubr.msk.bf16.mxu0 %vm4826_vm0, %v6175_v18  ;;  %v5833_v26 = vpack.c.bf16 %v1391_v61, %v1390_v25 }
 0x39c   : > { %2566 = vmatmul.mubr.bf16.gmra.mrb[128].mxu1 %v5826_v21  ;;  %4295 = vmatmul.mubr.bf16.gmra.mrb[56].mxu0 %v5432_v58  ;;  %v1392_v58 = vld [vmem:[#allocation3 + $0x1a9] sm:$0xff] }
 0x39d   : > { %2573 = vmatprep.mubr.bf16.mxu1 %v5621_v33  ;;  %4298 = vmatprep.mubr.msk.bf16.mxu0 %vm4826_vm0, %v6175_v18  ;;  %v1393_v33 = vld [vmem:[#allocation3 + $0x1b1] sm:$0xff] }
 0x39e   : > { %v5840_v38 = vpack.c.bf16 %v1393_v33, %v1392_v58 }
 0x39f   : > { %v2352_v63 = vpop.f32.mrb[148].mxu1  ;;  %v2979_v17 = vpop.f32.mrb[116].mxu0 }
 0x3a0   : > { %v2353_v50 = vpop.f32.mrb[149].mxu1  ;;  %v2980_v11 = vpop.f32.mrb[117].mxu0  ;;  %v1401_v17 = vld [vmem:[#allocation3 + $0x1f1] sm:$0xff] }
 0x3a1   : > { %v2354_v47 = vpop.f32.mrb[150].mxu1  ;;  %v2981_v8 = vpop.f32.mrb[118].mxu0 }
 0x3a2   : > { %v2355_v49 = vpop.f32.mrb[151].mxu1  ;;  %v2982_v4 = vpop.f32.mrb[119].mxu0 }
 0x3a4   : > { %2574 = vmatmul.mubr.bf16.gmra.mrb[204].mxu1 %v5833_v26  ;;  %4299 = vmatmul.mubr.bf16.gmra.mrb[200].mxu0 %v5447_v46  ;;  %v1394_v46 = vld [vmem:[#allocation3 + $0x1b9] sm:$0xff] }
 0x3a5   : > { %2579 = vmatprep.mubr.bf16.mxu1 %v5627_v28  ;;  %4302 = vmatprep.mubr.msk.bf16.mxu0 %vm4826_vm0, %v6175_v18  ;;  %v1395_v28 = vld [vmem:[#allocation3 + $0x1c1] sm:$0xff] }
 0x3a6   : > { %v5851_v54 = vpack.c.bf16 %v1395_v28, %v1394_v46 }
 0x3ac   : > { %2580 = vmatmul.mubr.bf16.gmra.mrb[136].mxu1 %v5840_v38  ;;  %4303 = vmatmul.mubr.bf16.gmra.mrb[64].mxu0 %v5465_v32 }
 0x3ad   : > { %2587 = vmatprep.mubr.bf16.mxu1 %v5633_v19  ;;  %4306 = vmatprep.mubr.msk.bf16.mxu0 %vm4826_vm0, %v6175_v18  ;;  %v1396_v19 = vld [vmem:[#allocation3 + $0x1c9] sm:$0xff] }
 0x3ae   : > { %v5858_v27 = vpack.c.bf16 %v1397_v1, %v1396_v19 }
 0x3af   : > { %v5847_v35 = vpop.f32.mrb[32].mxu1  ;;  %v2993_v52 = vpop.f32.mrb[120].mxu0 }
 0x3b0   : > { %v2401_v23 = vpop.f32.mrb[33].mxu1  ;;  %v2994_v36 = vpop.f32.mrb[121].mxu0 }
 0x3b1   : > { %v5849_v16 = vpop.f32.mrb[34].mxu1  ;;  %v2995_v5 = vpop.f32.mrb[122].mxu0 }
 0x3b2   : > { %v2404_v22 = vpop.f32.mrb[35].mxu1  ;;  %v2996_v20 = vpop.f32.mrb[123].mxu0 }
 0x3b4   : > { %2588 = vmatmul.mubr.bf16.gmra.mrb[208].mxu1 %v5851_v54  ;;  %4307 = vmatmul.mubr.bf16.gmra.mrb[204].mxu0 %v5474_v42 }
 0x3b5   : > { %2593 = vmatprep.mubr.bf16.mxu1 %v5642_v56  ;;  %4310 = vmatprep.mubr.msk.bf16.mxu0 %vm4826_vm0, %v6175_v18  ;;  %v1398_v56 = vld [vmem:[#allocation3 + $0x1d9] sm:$0xff] }
 0x3b6   : > { %v5869_v25 = vpack.c.bf16 %v1399_v41, %v1398_v56 }
 0x3b7   : > { %v2407_v32 = vpop.f32.mrb[156].mxu1 }
 0x3b8   : > { %v2408_v62 = vpop.f32.mrb[157].mxu1 }
 0x3b9   : > { %v2409_v60 = vpop.f32.mrb[158].mxu1 }
 0x3ba   : > { %v2410_v30 = vpop.f32.mrb[159].mxu1 }
 0x3bc   : > { %2594 = vmatmul.mubr.bf16.gmra.mrb[144].mxu1 %v5858_v27  ;;  %4311 = vmatmul.mubr.bf16.gmra.mrb[72].mxu0 %v5490_v39 }
 0x3bd   : > { %2601 = vmatprep.mubr.bf16.mxu1 %v5765_v45  ;;  %4314 = vmatprep.mubr.msk.bf16.mxu0 %vm4826_vm0, %v6175_v18  ;;  %v1400_v45 = vld [vmem:[#allocation3 + $0x1e9] sm:$0xff] }
 0x3be   : > { %v5876_v8 = vpack.c.bf16 %v1401_v17, %v1400_v45 }
 0x3bf   : > { %v5865_v42 = vpop.f32.mrb[40].mxu1  ;;  %v3007_v13 = vpop.f32.mrb[124].mxu0 }
 0x3c0   : > { %v2415_v59 = vpop.f32.mrb[41].mxu1  ;;  %v3008_v37 = vpop.f32.mrb[125].mxu0 }
 0x3c1   : > { %v5867_v40 = vpop.f32.mrb[42].mxu1  ;;  %v3009_v44 = vpop.f32.mrb[126].mxu0 }
 0x3c2   : > { %v2418_v63 = vpop.f32.mrb[43].mxu1  ;;  %v3010_v61 = vpop.f32.mrb[127].mxu0 }
 0x3c4   : > { %2602 = vmatmul.mubr.bf16.gmra.mrb[212].mxu1 %v5869_v25  ;;  %4315 = vmatmul.mubr.bf16.gmra.mrb[208].mxu0 %v6172_v24 }
 0x3c5   : > { %2607 = vmatprep.mubr.bf16.mxu1 %v5771_v43  ;;  %4318 = vmatprep.mubr.msk.bf16.mxu0 %vm4826_vm0, %v6175_v18 }
 0x3c7   : > { %v2421_v39 = vpop.f32.mrb[160].mxu1 }
 0x3c8   : > { %v2422_v50 = vpop.f32.mrb[161].mxu1 }
 0x3c9   : > { %v2423_v11 = vpop.f32.mrb[162].mxu1 }
 0x3ca   : > { %v2424_v47 = vpop.f32.mrb[163].mxu1 }
 0x3cc   : > { %2608 = vmatmul.mubr.bf16.gmra.mrb[152].mxu1 %v5876_v8  ;;  %4319 = vmatmul.mubr.bf16.gmra.mrb[80].mxu0 %v6173_v57 }
 0x3cd   : > { %2760 = vmatprep.mubr.bf16.mxu1 %v5784_v53  ;;  %4322 = vmatprep.mubr.msk.bf16.mxu0 %vm4826_vm0, %v6175_v18 }
 0x3cf   : > { %v5883_v43 = vpop.f32.mrb[48].mxu1  ;;  %v3021_v24 = vpop.f32.mrb[132].mxu0 }
 0x3d0   : > { %v2429_v49 = vpop.f32.mrb[49].mxu1  ;;  %v3022_v4 = vpop.f32.mrb[133].mxu0 }
 0x3d1   : > { %v5885_v58 = vpop.f32.mrb[50].mxu1  ;;  %v3023_v33 = vpop.f32.mrb[134].mxu0 }
 0x3d2   : > { %v2432_v46 = vpop.f32.mrb[51].mxu1  ;;  %v3024_v28 = vpop.f32.mrb[135].mxu0 }
 0x3d4   : > { %2761 = vmatmul.mubr.bf16.vlgmr.msra.gmra.mrb[96].mxu1 %v5341_v9  ;;  %4323 = vmatmul.mubr.bf16.gmra.mrb[212].mxu0 %v6174_v51 }
 0x3d5   : > { %2768 = vmatprep.mubr.bf16.mxu1 %v5791_v14  ;;  %4326 = vmatprep.mubr.msk.bf16.mxu0 %vm4826_vm0, %v6175_v18 }
 0x3d7   : > { %v2435_v57 = vpop.f32.mrb[164].mxu1 }
 0x3d8   : > { %v2436_v52 = vpop.f32.mrb[165].mxu1 }
 0x3d9   : > { %v2437_v23 = vpop.f32.mrb[166].mxu1 }
 0x3da   : > { %v2438_v36 = vpop.f32.mrb[167].mxu1 }
 0x3dc   : > { %2769 = vmatmul.mubr.bf16.gmra.mrb[216].mxu1 %v6164_v3  ;;  %4327 = vmatmul.mubr.bf16.gmra.mrb[88].mxu0 %v5784_v53 }
 0x3dd   : > { %2774 = vmatprep.mubr.bf16.mxu1 %v5798_v48  ;;  %4330 = vmatprep.mubr.msk.bf16.mxu0 %vm4826_vm0, %v6175_v18 }
 0x3df   : > { %v5897_v9 = vpop.f32.mrb[56].mxu1  ;;  %v3035_v51 = vpop.f32.mrb[140].mxu0 }
 0x3e0   : > { %v2443_v5 = vpop.f32.mrb[57].mxu1  ;;  %v3036_v22 = vpop.f32.mrb[141].mxu0 }
 0x3e1   : > { %v5899_v20 = vpop.f32.mrb[58].mxu1  ;;  %v3037_v32 = vpop.f32.mrb[142].mxu0 }
 0x3e2   : > { %v2446_v19 = vpop.f32.mrb[59].mxu1  ;;  %v3038_v1 = vpop.f32.mrb[143].mxu0 }
 0x3e4   : > { %2775 = vmatmul.mubr.bf16.gmra.mrb[104].mxu1 %v5334_v2  ;;  %4331 = vmatmul.mubr.bf16.gmra.mrb[216].mxu0 %v5791_v14 }
 0x3e5   : > { %2782 = vmatprep.mubr.bf16.mxu1 %v5805_v55  ;;  %4334 = vmatprep.mubr.msk.bf16.mxu0 %vm4826_vm0, %v6175_v18 }
 0x3e7   : > { %v2449_v3 = vpop.f32.mrb[168].mxu1 }
 0x3e8   : > { %v2450_v53 = vpop.f32.mrb[169].mxu1 }
 0x3e9   : > { %v2451_v62 = vpop.f32.mrb[170].mxu1 }
 0x3ea   : > { %v2452_v60 = vpop.f32.mrb[171].mxu1 }
 0x3ec   : > { %2783 = vmatmul.mubr.bf16.gmra.mrb[220].mxu1 %v5564_v29  ;;  %4335 = vmatmul.mubr.bf16.gmra.mrb[128].mxu0 %v5798_v48 }
 0x3ed   : > { %2788 = vmatprep.mubr.bf16.mxu1 %v5812_v7  ;;  %4338 = vmatprep.mubr.msk.bf16.mxu0 %vm4826_vm0, %v6175_v18 }
 0x3ef   : > { %v5911_v2 = vpop.f32.mrb[64].mxu1  ;;  %v3049_v14 = vpop.f32.mrb[148].mxu0 }
 0x3f0   : > { %v2457_v30 = vpop.f32.mrb[65].mxu1  ;;  %v3050_v56 = vpop.f32.mrb[149].mxu0 }
 0x3f1   : > { %v5913_v41 = vpop.f32.mrb[66].mxu1  ;;  %v3051_v13 = vpop.f32.mrb[150].mxu0  ;;  %v1411_v30 = vld [vmem:[#allocation3 + $0x201] sm:$0xff] }
 0x3f2   : > { %v2460_v59 = vpop.f32.mrb[67].mxu1  ;;  %v3052_v37 = vpop.f32.mrb[151].mxu0 }
 0x3f4   : > { %2789 = vmatmul.mubr.bf16.gmra.mrb[112].mxu1 %v5363_v0  ;;  %4339 = vmatmul.mubr.bf16.gmra.mrb[220].mxu0 %v5805_v55 }
 0x3f5   : > { %2796 = vmatprep.mubr.bf16.mxu1 %v5819_v34  ;;  %4342 = vmatprep.mubr.msk.bf16.mxu0 %vm4826_vm0, %v6175_v18 }
 0x3f7   : > { %v2463_v48 = vpop.f32.mrb[172].mxu1 }
 0x3f8   : > { %v2464_v44 = vpop.f32.mrb[173].mxu1 }
 0x3f9   : > { %v2465_v63 = vpop.f32.mrb[174].mxu1  ;;  %v1412_v44 = vld [vmem:[#allocation3 + $0x209] sm:$0xff] }
 0x3fa   : > { %v2466_v61 = vpop.f32.mrb[175].mxu1  ;;  %v1413_v63 = vld [vmem:[#allocation3 + $0x211] sm:$0xff] }
 0x3fc   : > { %2797 = vmatmul.mubr.bf16.gmra.mrb[224].mxu1 %v5564_v29  ;;  %4343 = vmatmul.mubr.bf16.gmra.mrb[136].mxu0 %v5812_v7  ;;  %v5932_v7 = vld [vmem:[#allocation3] sm:$0xff] }
 0x3fd   : > { %2802 = vmatprep.mubr.bf16.mxu1 %v5826_v21  ;;  %4346 = vmatprep.mubr.msk.bf16.mxu0 %vm4826_vm0, %v6175_v18 }
 0x3ff   : > { %v5925_v0 = vpop.f32.mrb[72].mxu1  ;;  %v3063_v55 = vpop.f32.mrb[156].mxu0 }
 0x400   : > { %v2471_v39 = vpop.f32.mrb[73].mxu1  ;;  %v3064_v45 = vpop.f32.mrb[157].mxu0 }
 0x401   : > { %v5927_v17 = vpop.f32.mrb[74].mxu1  ;;  %v3065_v50 = vpop.f32.mrb[158].mxu0  ;;  %v1524_v39 = vpack.c.bf16 %v1413_v63, %v1412_v44  ;;  %v5976_v45 = vld [vmem:[%s6101_s6] ss:$0 sm:$0xff] }
 0x402   : > { %v2474_v11 = vpop.f32.mrb[75].mxu1  ;;  %v3066_v47 = vpop.f32.mrb[159].mxu0  ;;  %v6176_v50 = vld [vmem:[#allocation5_spill] sm:$0xff] }
 0x403   : > { %v3466_v11 = vunpack.c.l.bf16 %v6176_v50  ;;  %v4428_v47 = vadd.f32 %v5976_v45, %v5849_v16 }
 0x404   : > { %2803 = vmatmul.mubr.bf16.gmra.mrb[120].mxu1 %v5379_v12  ;;  %4347 = vmatmul.mubr.bf16.gmra.mrb[224].mxu0 %v5819_v34 }
 0x405   : > { %2810 = vmatprep.mubr.bf16.mxu1 %v5833_v26  ;;  %4350 = vmatprep.mubr.msk.bf16.mxu0 %vm4826_vm0, %v5932_v7 }
 0x407   : > { %v2477_v18 = vpop.f32.mrb[176].mxu1 }
 0x408   : > { %v2478_v24 = vpop.f32.mrb[177].mxu1 }
 0x409   : > { %v2479_v49 = vpop.f32.mrb[178].mxu1 }
 0x40a   : > { %v2480_v4 = vpop.f32.mrb[179].mxu1 }
 0x40c   : > { %2811 = vmatmul.mubr.bf16.gmra.mrb[228].mxu1 %v5564_v29  ;;  %4351 = vmatmul.mubr.bf16.gmra.mrb[144].mxu0 %v5826_v21 }
 0x40d   : > { %2816 = vmatprep.mubr.bf16.mxu1 %v5840_v38  ;;  %4354 = vmatprep.mubr.msk.bf16.mxu0 %vm4826_vm0, %v5932_v7 }
 0x40f   : > { %v5941_v12 = vpop.f32.mrb[80].mxu1  ;;  %v3077_v34 = vpop.f32.mrb[164].mxu0 }
 0x410   : > { %v2485_v33 = vpop.f32.mrb[81].mxu1  ;;  %v3078_v46 = vpop.f32.mrb[165].mxu0 }
 0x411   : > { %v5943_v28 = vpop.f32.mrb[82].mxu1  ;;  %v3079_v57 = vpop.f32.mrb[166].mxu0  ;;  %v3468_v33 = vmul.f32 2.0, %v3466_v11 }
 0x412   : > { %v2488_v52 = vpop.f32.mrb[83].mxu1  ;;  %v3080_v23 = vpop.f32.mrb[167].mxu0 }
 0x414   : > { %2817 = vmatmul.mubr.bf16.gmra.mrb[128].mxu1 %v5440_v10  ;;  %4355 = vmatmul.mubr.bf16.gmra.mrb[228].mxu0 %v5833_v26 }
 0x415   : > { %2824 = vmatprep.mubr.bf16.mxu1 %v5851_v54  ;;  %4358 = vmatprep.mubr.msk.bf16.mxu0 %vm4826_vm0, %v5932_v7 }
 0x417   : > { %v2491_v21 = vpop.f32.mrb[180].mxu1 }
 0x418   : > { %v2492_v36 = vpop.f32.mrb[181].mxu1 }
 0x419   : > { %v2493_v51 = vpop.f32.mrb[182].mxu1 }
 0x41a   : > { %v2494_v5 = vpop.f32.mrb[183].mxu1 }
 0x41c   : > { %2825 = vmatmul.mubr.bf16.gmra.mrb[232].mxu1 %v5564_v29  ;;  %4359 = vmatmul.mubr.bf16.gmra.mrb[152].mxu0 %v5840_v38 }
 0x41d   : > { %2830 = vmatprep.mubr.bf16.mxu1 %v5858_v27  ;;  %4362 = vmatprep.mubr.msk.bf16.mxu0 %vm4826_vm0, %v5932_v7 }
 0x41f   : > { %v5955_v10 = vpop.f32.mrb[88].mxu1  ;;  %v3091_v26 = vpop.f32.mrb[172].mxu0 }
 0x420   : > { %v2499_v22 = vpop.f32.mrb[89].mxu1  ;;  %v3092_v32 = vpop.f32.mrb[173].mxu0 }
 0x421   : > { %v5957_v19 = vpop.f32.mrb[90].mxu1  ;;  %v3093_v1 = vpop.f32.mrb[174].mxu0 }
 0x422   : > { %v2502_v3 = vpop.f32.mrb[91].mxu1  ;;  %v3094_v53 = vpop.f32.mrb[175].mxu0 }
 0x423   : > { %v1422_v3 = vld [vmem:[#allocation3 + $0x219] sm:$0xff]  ;;  %v1423_v53 = vld [vmem:[#allocation3 + $0x221] sm:$0xff] }
 0x424   : > { %2831 = vmatmul.mubr.bf16.gmra.mrb[136].mxu1 %v5460_v31  ;;  %4363 = vmatmul.mubr.bf16.gmra.mrb[232].mxu0 %v5851_v54  ;;  %v1410_v54 = vld [vmem:[#allocation3 + $0x1f9] sm:$0xff] }
 0x425   : > { %2838 = vmatprep.mubr.bf16.mxu1 %v5869_v25  ;;  %4366 = vmatprep.mubr.msk.bf16.mxu0 %vm4826_vm0, %v5932_v7  ;;  %v1521_v37 = vpack.c.bf16 %v1411_v30, %v1410_v54 }
 0x427   : > { %v2505_v38 = vpop.f32.mrb[184].mxu1 }
 0x428   : > { %v2506_v62 = vpop.f32.mrb[185].mxu1  ;;  %v4430_v38 = vadd.f32 %v5976_v45, %v5865_v42 }
 0x429   : > { %v2507_v60 = vpop.f32.mrb[186].mxu1 }
 0x42a   : > { %v2508_v14 = vpop.f32.mrb[187].mxu1  ;;  %v6177_v60 = vld [vmem:[#allocation4_spill] sm:$0xff] }
 0x42b   : > { %v3473_v14 = vunpack.c.l.bf16 %v6177_v60 }
 0x42c   : > { %2839 = vmatmul.mubr.bf16.gmra.mrb[236].mxu1 %v5564_v29  ;;  %4367 = vmatmul.mubr.bf16.gmra.mrb[160].mxu0 %v5858_v27 }
 0x42d   : > { %2844 = vmatprep.mubr.bf16.mxu1 %v5876_v8  ;;  %4370 = vmatprep.mubr.msk.bf16.mxu0 %vm4826_vm0, %v5932_v7  ;;  %v3475_v44 = vmul.f32 2.0, %v3473_v14 }
 0x42f   : > { %v3105_v31 = vpop.f32.mrb[180].mxu0 }
 0x430   : > { %v3106_v56 = vpop.f32.mrb[181].mxu0  ;;  %v4432_v31 = vadd.f32 %v5976_v45, %v5867_v40  ;;  %v1424_v40 = vld [vmem:[#allocation3 + $0x229] sm:$0xff] }
 0x431   : > { %v3107_v13 = vpop.f32.mrb[182].mxu0  ;;  %v1527_v56 = vpack.c.bf16 %v1423_v53, %v1422_v3 }
 0x432   : > { %v3108_v59 = vpop.f32.mrb[183].mxu0 }
 0x433   : > { %v3474_v59 = vunpack.c.h.bf16 %v6177_v60 }
 0x434   : > { %2845 = vmatmul.mubr.bf16.gmra.mrb[144].mxu1 %v5482_v15  ;;  %4371 = vmatmul.mubr.bf16.gmra.mrb[236].mxu0 %v5869_v25  ;;  %v4426_v15 = vadd.f32 %v5976_v45, %v5847_v35 }
 0x435   : > { %2852 = vmatprep.mubr.bf16.mxu1 %v1521_v37  ;;  %4374 = vmatprep.mubr.msk.bf16.mxu0 %vm4826_vm0, %v5932_v7 }
 0x437   : > { %v2519_v27 = vpop.f32.mrb[188].mxu1 }
 0x438   : > { %v2520_v48 = vpop.f32.mrb[189].mxu1 }
 0x439   : > { %v2521_v61 = vpop.f32.mrb[190].mxu1 }
 0x43a   : > { %v2522_v55 = vpop.f32.mrb[191].mxu1 }
 0x43b   : > { %v3476_v55 = vmul.f32 2.0, %v3474_v59  ;;  %v6179_v59 = vld [vmem:[#allocation6_spill] sm:$0xff] }
 0x43c   : > { %2853 = vmatmul.mubr.bf16.gmra.mrb[240].mxu1 %v5564_v29  ;;  %4375 = vmatmul.mubr.bf16.gmra.mrb[168].mxu0 %v5876_v8  ;;  %v3467_v29 = vunpack.c.h.bf16 %v6176_v50 }
 0x43d   : > { %2858 = vmatprep.mubr.bf16.mxu1 %v1524_v39  ;;  %4378 = vmatprep.mubr.msk.bf16.mxu0 %vm4826_vm0, %v5932_v7 }
 0x43e   : > { %v3469_v52 = vmul.f32 2.0, %v3467_v29 }
 0x43f   : > { %v3152_v25 = vpop.f32.mrb[32].mxu0 }
 0x440   : > { %v4427_v18 = vadd.f32 %v4426_v15, %v3152_v25  ;;  %v4272_v24 = vpop.f32.mrb[33].mxu0 }
 0x441   : > { %v3155_v49 = vpop.f32.mrb[34].mxu0 }
 0x442   : > { %vm3369_vm1 = vcmp.gt.f32.partialorder %v4427_v18, 0.0  ;;  %v3401_v8 = vmul.f32 0.01, %v4427_v18  ;;  %v4429_v4 = vadd.f32 %v4428_v47, %v3155_v49  ;;  %v4273_v34 = vpop.f32.mrb[35].mxu0 }
 0x444   : > { %2859 = vmatmul.mubr.bf16.gmra.mrb[152].mxu1 %v6171_v6  ;;  %v3433_v35 = vsel %vm3369_vm1, %v4427_v18, %v3401_v8  ;;  %vm3370_vm2 = vcmp.gt.f32.partialorder %v4429_v4, 0.0  ;;  %v3402_v46 = vmul.f32 0.01, %v4429_v4  ;;  %4379 = vmatmul.mubr.bf16.gmra.mrb[240].mxu0 %v1521_v37 }
 0x445   : > { %v3470_v57 = vadd.f32 %v3468_v33, %v3433_v35  ;;  %4382 = vmatprep.mubr.msk.bf16.mxu0 %vm4826_vm0, %v5932_v7  ;;  %v4434_v33 = vadd.f32 %v5976_v45, %v5883_v43  ;;  %v6178_v35 = vld [vmem:[#allocation7_spill] sm:$0xff] }
 0x446   : > { %v3434_v16 = vsel %vm3370_vm2, %v4429_v4, %v3402_v46  ;;  %v3480_v46 = vunpack.c.l.bf16 %v6178_v35 }
 0x447   : > { %v2533_v23 = vpop.f32.mrb[192].mxu1  ;;  %v3471_v21 = vadd.f32 %v3469_v52, %v3434_v16  ;;  %v3160_v36 = vpop.f32.mrb[188].mxu0 }
 0x448   : > { %v2534_v51 = vpop.f32.mrb[193].mxu1  ;;  %v4276_v6 = vpop.f32.mrb[189].mxu0 }
 0x449   : > { %v2535_v5 = vpop.f32.mrb[194].mxu1  ;;  %v3979_v26 = vpack.c.bf16 %v3471_v21, %v3470_v57  ;;  %v3162_v22 = vpop.f32.mrb[190].mxu0  ;;  %v4436_v57 = vadd.f32 %v5976_v45, %v5885_v58  ;;  %v3481_v21 = vunpack.c.h.bf16 %v6178_v35 }
 0x44a   : > { %v2536_v32 = vpop.f32.mrb[195].mxu1  ;;  %v4277_v1 = vpop.f32.mrb[191].mxu0  ;;  %v3482_v5 = vmul.f32 2.0, %v3480_v46  ;;  %v6180_v46 = vld [vmem:[#allocation9_spill] sm:$0xff] }
 0x44b   : > { %3980 = vst [vmem:[%s5996_s23] sm:$0xff] %v3979_v26   ;;  %v3483_v32 = vmul.f32 2.0, %v3481_v21 }
 0x44c   : > { %4383 = vmatmul.mubr.bf16.gmra.mrb[176].mxu0 %v1524_v39  ;;  %v1425_v39 = vld [vmem:[#allocation3 + $0x231] sm:$0xff] }
 0x44d   : > { %4386 = vmatprep.mubr.msk.bf16.mxu0 %vm4826_vm0, %v5932_v7  ;;  %v1530_v49 = vpack.c.bf16 %v1425_v39, %v1424_v40 }
 0x44f   : > { %v3166_v62 = vpop.f32.mrb[40].mxu0 }
 0x450   : > { %v4431_v54 = vadd.f32 %v4430_v38, %v3166_v62  ;;  %v4280_v30 = vpop.f32.mrb[41].mxu0 }
 0x451   : > { %v3169_v13 = vpop.f32.mrb[42].mxu0 }
 0x452   : > { %vm3371_vm3 = vcmp.gt.f32.partialorder %v4431_v54, 0.0  ;;  %v3403_v37 = vmul.f32 0.01, %v4431_v54  ;;  %v4433_v27 = vadd.f32 %v4432_v31, %v3169_v13  ;;  %v4281_v48 = vpop.f32.mrb[43].mxu0 }
 0x454   : > { %v3435_v63 = vsel %vm3371_vm3, %v4431_v54, %v3403_v37  ;;  %vm3372_vm4 = vcmp.gt.f32.partialorder %v4433_v27, 0.0  ;;  %v3404_v42 = vmul.f32 0.01, %v4433_v27  ;;  %4387 = vmatmul.mubr.bf16.gmra.mrb[244].mxu0 %v1527_v56  ;;  %v4438_v56 = vadd.f32 %v5976_v45, %v5897_v9 }
 0x455   : > { %v3477_v61 = vadd.f32 %v3475_v44, %v3435_v63  ;;  %4390 = vmatprep.mubr.msk.bf16.mxu0 %vm4826_vm0, %v5932_v7  ;;  %v3487_v37 = vunpack.c.l.bf16 %v6179_v59 }
 0x456   : > { %v3436_v15 = vsel %vm3372_vm4, %v4433_v27, %v3404_v42  ;;  %v4440_v27 = vadd.f32 %v5976_v45, %v5899_v20  ;;  %v3488_v42 = vunpack.c.h.bf16 %v6179_v59 }
 0x457   : > { %v2547_v25 = vpop.f32.mrb[196].mxu1  ;;  %v3478_v50 = vadd.f32 %v3476_v55, %v3436_v15  ;;  %v3174_v11 = vpop.f32.mrb[192].mxu0  ;;  %v3489_v39 = vmul.f32 2.0, %v3487_v37  ;;  %v4448_v37 = vadd.f32 %v5976_v45, %v5927_v17 }
 0x458   : > { %v2548_v47 = vpop.f32.mrb[197].mxu1  ;;  %v4284_v18 = vpop.f32.mrb[193].mxu0 }
 0x459   : > { %v2549_v24 = vpop.f32.mrb[198].mxu1  ;;  %v3984_v29 = vpack.c.bf16 %v3478_v50, %v3477_v61  ;;  %v3176_v8 = vpop.f32.mrb[194].mxu0  ;;  %v3490_v50 = vmul.f32 2.0, %v3488_v42 }
 0x45a   : > { %v2550_v4 = vpop.f32.mrb[199].mxu1  ;;  %v4285_v34 = vpop.f32.mrb[195].mxu0 }
 0x45b   : > { %4056 = vst [vmem:[%s5996_s23 + $0x8] sm:$0xff] %v3984_v29  }
 0x45c   : > { %4391 = vmatmul.mubr.bf16.gmra.mrb[184].mxu0 %v1530_v49 }
 0x45f   : > { %v3180_v7 = vpop.f32.mrb[48].mxu0 }
 0x460   : > { %v4435_v52 = vadd.f32 %v4434_v33, %v3180_v7  ;;  %v4288_v16 = vpop.f32.mrb[49].mxu0  ;;  %v4442_v7 = vadd.f32 %v5976_v45, %v5911_v2 }
 0x461   : > { %v3183_v23 = vpop.f32.mrb[50].mxu0 }
 0x462   : > { %vm3373_vm5 = vcmp.gt.f32.partialorder %v4435_v52, 0.0  ;;  %v3405_v36 = vmul.f32 0.01, %v4435_v52  ;;  %v4437_v51 = vadd.f32 %v4436_v57, %v3183_v23  ;;  %v4289_v6 = vpop.f32.mrb[51].mxu0  ;;  %v3494_v57 = vunpack.c.l.bf16 %v6180_v46 }
 0x464   : > { %v3437_v26 = vsel %vm3373_vm5, %v4435_v52, %v3405_v36  ;;  %vm3374_vm6 = vcmp.gt.f32.partialorder %v4437_v51, 0.0  ;;  %v3406_v43 = vmul.f32 0.01, %v4437_v51  ;;  %v4444_v52 = vadd.f32 %v5976_v45, %v5913_v41 }
 0x465   : > { %v3484_v22 = vadd.f32 %v3482_v5, %v3437_v26  ;;  %v3495_v36 = vunpack.c.h.bf16 %v6180_v46  ;;  %v3496_v26 = vmul.f32 2.0, %v3494_v57 }
 0x466   : > { %v3438_v1 = vsel %vm3374_vm6, %v4437_v51, %v3406_v43 }
 0x467   : > { %v2561_v3 = vpop.f32.mrb[200].mxu1  ;;  %v3485_v53 = vadd.f32 %v3483_v32, %v3438_v1  ;;  %v3188_v58 = vpop.f32.mrb[196].mxu0  ;;  %v3497_v32 = vmul.f32 2.0, %v3495_v36 }
 0x468   : > { %v2562_v38 = vpop.f32.mrb[201].mxu1  ;;  %v4292_v62 = vpop.f32.mrb[197].mxu0 }
 0x469   : > { %v2563_v60 = vpop.f32.mrb[202].mxu1  ;;  %v3989_v14 = vpack.c.bf16 %v3485_v53, %v3484_v22  ;;  %v3190_v31 = vpop.f32.mrb[198].mxu0 }
 0x46a   : > { %v2564_v54 = vpop.f32.mrb[203].mxu1  ;;  %v4293_v30 = vpop.f32.mrb[199].mxu0 }
 0x46b   : > { %4057 = vst [vmem:[%s5996_s23 + $0x10] sm:$0xff] %v3989_v14   ;;  %v4446_v30 = vadd.f32 %v5976_v45, %v5925_v0 }
 0x46f   : > { %v3194_v13 = vpop.f32.mrb[56].mxu0 }
 0x470   : > { %v4439_v48 = vadd.f32 %v4438_v56, %v3194_v13  ;;  %v4296_v44 = vpop.f32.mrb[57].mxu0  ;;  %v6181_v13 = vld [vmem:[#allocation8_spill] sm:$0xff] }
 0x471   : > { %v3197_v63 = vpop.f32.mrb[58].mxu0  ;;  %v3501_v59 = vunpack.c.l.bf16 %v6181_v13 }
 0x472   : > { %vm3375_vm7 = vcmp.gt.f32.partialorder %v4439_v48, 0.0  ;;  %v3407_v61 = vmul.f32 0.01, %v4439_v48  ;;  %v4441_v55 = vadd.f32 %v4440_v27, %v3197_v63  ;;  %v4297_v40 = vpop.f32.mrb[59].mxu0  ;;  %v3502_v63 = vunpack.c.h.bf16 %v6181_v13 }
 0x473   : > { %v3503_v40 = vmul.f32 2.0, %v3501_v59 }
 0x474   : > { %v3439_v15 = vsel %vm3375_vm7, %v4439_v48, %v3407_v61  ;;  %vm3376_vm8 = vcmp.gt.f32.partialorder %v4441_v55, 0.0  ;;  %v3408_v9 = vmul.f32 0.01, %v4441_v55 }
 0x475   : > { %v3491_v25 = vadd.f32 %v3489_v39, %v3439_v15 }
 0x476   : > { %v3440_v11 = vsel %vm3376_vm8, %v4441_v55, %v3408_v9  ;;  %v3504_v9 = vmul.f32 2.0, %v3502_v63 }
 0x477   : > { %v2575_v47 = vpop.f32.mrb[204].mxu1  ;;  %v3492_v18 = vadd.f32 %v3490_v50, %v3440_v11  ;;  %v3202_v20 = vpop.f32.mrb[200].mxu0 }
 0x478   : > { %v2576_v24 = vpop.f32.mrb[205].mxu1  ;;  %v4300_v49 = vpop.f32.mrb[201].mxu0 }
 0x479   : > { %v2577_v29 = vpop.f32.mrb[206].mxu1  ;;  %v3994_v8 = vpack.c.bf16 %v3492_v18, %v3491_v25  ;;  %v3204_v4 = vpop.f32.mrb[202].mxu0 }
 0x47a   : > { %v2578_v34 = vpop.f32.mrb[207].mxu1  ;;  %v4301_v33 = vpop.f32.mrb[203].mxu0  ;;  %v4450_v4 = vadd.f32 %v5976_v45, %v5941_v12 }
 0x47b   : > { %4058 = vst [vmem:[%s5996_s23 + $0x18] sm:$0xff] %v3994_v8   ;;  %v6182_v33 = vld [vmem:[#allocation11_spill] sm:$0xff] }
 0x47f   : > { %v3208_v35 = vpop.f32.mrb[64].mxu0 }
 0x480   : > { %v4443_v16 = vadd.f32 %v4442_v7, %v3208_v35  ;;  %v4304_v23 = vpop.f32.mrb[65].mxu0  ;;  %v3508_v7 = vunpack.c.l.bf16 %v6182_v33  ;;  %v4452_v35 = vadd.f32 %v5976_v45, %v5943_v28 }
 0x481   : > { %v3211_v21 = vpop.f32.mrb[66].mxu0 }
 0x482   : > { %vm3377_vm9 = vcmp.gt.f32.partialorder %v4443_v16, 0.0  ;;  %v3409_v51 = vmul.f32 0.01, %v4443_v16  ;;  %v4445_v6 = vadd.f32 %v4444_v52, %v3211_v21  ;;  %v4305_v5 = vpop.f32.mrb[67].mxu0 }
 0x484   : > { %v3441_v43 = vsel %vm3377_vm9, %v4443_v16, %v3409_v51  ;;  %vm3378_vm10 = vcmp.gt.f32.partialorder %v4445_v6, 0.0  ;;  %v3410_v2 = vmul.f32 0.01, %v4445_v6  ;;  %v3509_v16 = vunpack.c.h.bf16 %v6182_v33 }
 0x485   : > { %v3498_v22 = vadd.f32 %v3496_v26, %v3441_v43  ;;  %v3510_v51 = vmul.f32 2.0, %v3508_v7 }
 0x486   : > { %v3442_v1 = vsel %vm3378_vm10, %v4445_v6, %v3410_v2  ;;  %v3511_v26 = vmul.f32 2.0, %v3509_v16 }
 0x487   : > { %v2589_v3 = vpop.f32.mrb[208].mxu1  ;;  %v3499_v53 = vadd.f32 %v3497_v32, %v3442_v1  ;;  %v3216_v41 = vpop.f32.mrb[204].mxu0 }
 0x488   : > { %v2590_v58 = vpop.f32.mrb[209].mxu1  ;;  %v4308_v38 = vpop.f32.mrb[205].mxu0 }
 0x489   : > { %v2591_v62 = vpop.f32.mrb[210].mxu1  ;;  %v3999_v60 = vpack.c.bf16 %v3499_v53, %v3498_v22  ;;  %v3218_v14 = vpop.f32.mrb[206].mxu0 }
 0x48a   : > { %v2592_v31 = vpop.f32.mrb[211].mxu1  ;;  %v4309_v54 = vpop.f32.mrb[207].mxu0  ;;  %v4454_v62 = vadd.f32 %v5976_v45, %v5955_v10 }
 0x48b   : > { %4059 = vst [vmem:[%s5996_s23 + $0x20] sm:$0xff] %v3999_v60   ;;  %v6183_v31 = vld [vmem:[#allocation10_spill] sm:$0xff] }
 0x48c   : > { %v3515_v54 = vunpack.c.l.bf16 %v6183_v31 }
 0x48e   : > { %v3517_v10 = vmul.f32 2.0, %v3515_v54  ;;  %v6185_v54 = vld [vmem:[#allocation12_spill] sm:$0xff] }
 0x48f   : > { %v3222_v56 = vpop.f32.mrb[72].mxu0 }
 0x490   : > { %v4447_v27 = vadd.f32 %v4446_v30, %v3222_v56  ;;  %v4312_v48 = vpop.f32.mrb[73].mxu0  ;;  %v4456_v56 = vadd.f32 %v5976_v45, %v5957_v19 }
 0x491   : > { %v3225_v44 = vpop.f32.mrb[74].mxu0  ;;  %v3516_v48 = vunpack.c.h.bf16 %v6183_v31 }
 0x492   : > { %vm3379_vm11 = vcmp.gt.f32.partialorder %v4447_v27, 0.0  ;;  %v3411_v42 = vmul.f32 0.01, %v4447_v27  ;;  %v4449_v61 = vadd.f32 %v4448_v37, %v3225_v44  ;;  %v4313_v55 = vpop.f32.mrb[75].mxu0 }
 0x494   : > { %v3443_v39 = vsel %vm3379_vm11, %v4447_v27, %v3411_v42  ;;  %vm3380_vm12 = vcmp.gt.f32.partialorder %v4449_v61, 0.0  ;;  %v3412_v0 = vmul.f32 0.01, %v4449_v61 }
 0x495   : > { %v3505_v15 = vadd.f32 %v3503_v40, %v3443_v39 }
 0x496   : > { %v3444_v25 = vsel %vm3380_vm12, %v4449_v61, %v3412_v0  ;;  %v3518_v0 = vmul.f32 2.0, %v3516_v48 }
 0x497   : > { %v2603_v50 = vpop.f32.mrb[212].mxu1  ;;  %v3506_v11 = vadd.f32 %v3504_v9, %v3444_v25  ;;  %v3230_v17 = vpop.f32.mrb[208].mxu0 }
 0x498   : > { %v2604_v47 = vpop.f32.mrb[213].mxu1  ;;  %v4316_v18 = vpop.f32.mrb[209].mxu0 }
 0x499   : > { %v2605_v20 = vpop.f32.mrb[214].mxu1  ;;  %v4004_v24 = vpack.c.bf16 %v3506_v11, %v3505_v15  ;;  %v3232_v49 = vpop.f32.mrb[210].mxu0 }
 0x49a   : > { %v2606_v29 = vpop.f32.mrb[215].mxu1  ;;  %v4317_v8 = vpop.f32.mrb[211].mxu0 }
 0x49b   : > { %4060 = vst [vmem:[%s5996_s23 + $0x28] sm:$0xff] %v4004_v24  }
 0x49f   : > { %v3236_v34 = vpop.f32.mrb[80].mxu0 }
 0x4a0   : > { %v4451_v46 = vadd.f32 %v4450_v4, %v3236_v34  ;;  %v4320_v57 = vpop.f32.mrb[81].mxu0  ;;  %v6184_v4 = vld [vmem:[#allocation13_spill] sm:$0xff] }
 0x4a1   : > { %v3239_v52 = vpop.f32.mrb[82].mxu0  ;;  %v3522_v34 = vunpack.c.l.bf16 %v6184_v4  ;;  %v3523_v16 = vunpack.c.h.bf16 %v6184_v4 }
 0x4a2   : > { %vm3381_vm13 = vcmp.gt.f32.partialorder %v4451_v46, 0.0  ;;  %v3413_v23 = vmul.f32 0.01, %v4451_v46  ;;  %v4453_v21 = vadd.f32 %v4452_v35, %v3239_v52  ;;  %v4321_v36 = vpop.f32.mrb[83].mxu0 }
 0x4a4   : > { %v3445_v6 = vsel %vm3381_vm13, %v4451_v46, %v3413_v23  ;;  %vm3382_vm14 = vcmp.gt.f32.partialorder %v4453_v21, 0.0  ;;  %v3414_v12 = vmul.f32 0.01, %v4453_v21 }
 0x4a5   : > { %v3512_v5 = vadd.f32 %v3510_v51, %v3445_v6  ;;  %v3524_v6 = vmul.f32 2.0, %v3522_v34  ;;  %v6186_v34 = vld [vmem:[#allocation15_spill] sm:$0xff] }
 0x4a6   : > { %v3446_v43 = vsel %vm3382_vm14, %v4453_v21, %v3414_v12 }
 0x4a7   : > { %v2762_v2 = vpop.f32.mrb[96].mxu1  ;;  %v3513_v22 = vadd.f32 %v3511_v26, %v3446_v43  ;;  %v3244_v28 = vpop.f32.mrb[212].mxu0  ;;  %v3525_v43 = vmul.f32 2.0, %v3523_v16 }
 0x4a8   : > { %v2764_v32 = vpop.f32.mrb[97].mxu1  ;;  %v4324_v1 = vpop.f32.mrb[213].mxu0  ;;  %v4458_v49 = vadd.f32 %v5976_v45, %v2762_v2 }
 0x4a9   : > { %v2765_v3 = vpop.f32.mrb[98].mxu1  ;;  %v4009_v53 = vpack.c.bf16 %v3513_v22, %v3512_v5  ;;  %v3246_v41 = vpop.f32.mrb[214].mxu0 }
 0x4aa   : > { %v2767_v58 = vpop.f32.mrb[99].mxu1  ;;  %v4325_v38 = vpop.f32.mrb[215].mxu0  ;;  %v4460_v7 = vadd.f32 %v5976_v45, %v2765_v3 }
 0x4ab   : > { %4061 = vst [vmem:[%s5996_s23 + $0x30] sm:$0xff] %v4009_v53  }
 0x4af   : > { %v2770_v60 = vpop.f32.mrb[216].mxu1  ;;  %v3250_v14 = vpop.f32.mrb[88].mxu0 }
 0x4b0   : > { %v2771_v30 = vpop.f32.mrb[217].mxu1  ;;  %v4455_v13 = vadd.f32 %v4454_v62, %v3250_v14  ;;  %v4328_v59 = vpop.f32.mrb[89].mxu0 }
 0x4b1   : > { %v2772_v37 = vpop.f32.mrb[218].mxu1  ;;  %v3253_v27 = vpop.f32.mrb[90].mxu0  ;;  %v3529_v30 = vunpack.c.l.bf16 %v6185_v54 }
 0x4b2   : > { %v2773_v44 = vpop.f32.mrb[219].mxu1  ;;  %vm3383_vm15 = vcmp.gt.f32.partialorder %v4455_v13, 0.0  ;;  %v3415_v63 = vmul.f32 0.01, %v4455_v13  ;;  %v4457_v42 = vadd.f32 %v4456_v56, %v3253_v27  ;;  %v4329_v61 = vpop.f32.mrb[91].mxu0 }
 0x4b3   : > { %v3530_v44 = vunpack.c.h.bf16 %v6185_v54 }
 0x4b4   : > { %v3447_v55 = vsel %vm3383_vm15, %v4455_v13, %v3415_v63  ;;  %vm3384_vm0 = vcmp.gt.f32.partialorder %v4457_v42, 0.0  ;;  %v3416_v40 = vmul.f32 0.01, %v4457_v42 }
 0x4b5   : > { %v3519_v39 = vadd.f32 %v3517_v10, %v3447_v55  ;;  %v3531_v55 = vmul.f32 2.0, %v3529_v30  ;;  %v6187_v30 = vld [vmem:[#allocation14_spill] sm:$0xff] }
 0x4b6   : > { %v3448_v15 = vsel %vm3384_vm0, %v4457_v42, %v3416_v40 }
 0x4b7   : > { %v2776_v19 = vpop.f32.mrb[104].mxu1  ;;  %v3520_v9 = vadd.f32 %v3518_v0, %v3448_v15  ;;  %v3258_v25 = vpop.f32.mrb[216].mxu0  ;;  %v3532_v15 = vmul.f32 2.0, %v3530_v44 }
 0x4b8   : > { %v2778_v50 = vpop.f32.mrb[105].mxu1  ;;  %v4332_v11 = vpop.f32.mrb[217].mxu0  ;;  %v4462_v60 = vadd.f32 %v5976_v45, %v2776_v19 }
 0x4b9   : > { %v2779_v17 = vpop.f32.mrb[106].mxu1  ;;  %v4014_v47 = vpack.c.bf16 %v3520_v9, %v3519_v39  ;;  %v3260_v18 = vpop.f32.mrb[218].mxu0 }
 0x4ba   : > { %v2781_v20 = vpop.f32.mrb[107].mxu1  ;;  %v4333_v24 = vpop.f32.mrb[219].mxu0  ;;  %v4464_v13 = vadd.f32 %v5976_v45, %v2779_v17 }
 0x4bb   : > { %4062 = vst [vmem:[%s5996_s23 + $0x38] sm:$0xff] %v4014_v47  }
 0x4bf   : > { %v2784_v29 = vpop.f32.mrb[220].mxu1  ;;  %v3264_v8 = vpop.f32.mrb[128].mxu0 }
 0x4c0   : > { %v2785_v33 = vpop.f32.mrb[221].mxu1  ;;  %v4459_v35 = vadd.f32 %v4458_v49, %v3264_v8  ;;  %v4336_v46 = vpop.f32.mrb[129].mxu0 }
 0x4c1   : > { %v2786_v57 = vpop.f32.mrb[222].mxu1  ;;  %v3267_v52 = vpop.f32.mrb[130].mxu0  ;;  %v3536_v33 = vunpack.c.l.bf16 %v6186_v34 }
 0x4c2   : > { %v2787_v23 = vpop.f32.mrb[223].mxu1  ;;  %vm3385_vm1 = vcmp.gt.f32.partialorder %v4459_v35, 0.0  ;;  %v3417_v21 = vmul.f32 0.01, %v4459_v35  ;;  %v4461_v36 = vadd.f32 %v4460_v7, %v3267_v52  ;;  %v4337_v51 = vpop.f32.mrb[131].mxu0 }
 0x4c3   : > { %v3537_v23 = vunpack.c.h.bf16 %v6186_v34 }
 0x4c4   : > { %v3449_v12 = vsel %vm3385_vm1, %v4459_v35, %v3417_v21  ;;  %vm3386_vm2 = vcmp.gt.f32.partialorder %v4461_v36, 0.0  ;;  %v3418_v5 = vmul.f32 0.01, %v4461_v36 }
 0x4c5   : > { %v3526_v26 = vadd.f32 %v3524_v6, %v3449_v12  ;;  %v3538_v12 = vmul.f32 2.0, %v3536_v33  ;;  %v6188_v33 = vld [vmem:[#allocation17_spill] sm:$0xff] }
 0x4c6   : > { %v3450_v2 = vsel %vm3386_vm2, %v4461_v36, %v3418_v5 }
 0x4c7   : > { %v2790_v22 = vpop.f32.mrb[112].mxu1  ;;  %v3527_v28 = vadd.f32 %v3525_v43, %v3450_v2  ;;  %v3272_v32 = vpop.f32.mrb[220].mxu0  ;;  %v3539_v2 = vmul.f32 2.0, %v3537_v23 }
 0x4c8   : > { %v2792_v1 = vpop.f32.mrb[113].mxu1  ;;  %v4340_v3 = vpop.f32.mrb[221].mxu0  ;;  %v4466_v29 = vadd.f32 %v5976_v45, %v2790_v22 }
 0x4c9   : > { %v2793_v53 = vpop.f32.mrb[114].mxu1  ;;  %v4019_v41 = vpack.c.bf16 %v3527_v28, %v3526_v26  ;;  %v3274_v58 = vpop.f32.mrb[222].mxu0 }
 0x4ca   : > { %v2795_v38 = vpop.f32.mrb[115].mxu1  ;;  %v4341_v62 = vpop.f32.mrb[223].mxu0  ;;  %v4468_v35 = vadd.f32 %v5976_v45, %v2793_v53 }
 0x4cb   : > { %4063 = vst [vmem:[%s5996_s23 + $0x40] sm:$0xff] %v4019_v41  }
 0x4cf   : > { %v2798_v14 = vpop.f32.mrb[224].mxu1  ;;  %v3278_v31 = vpop.f32.mrb[136].mxu0 }
 0x4d0   : > { %v2799_v56 = vpop.f32.mrb[225].mxu1  ;;  %v4463_v59 = vadd.f32 %v4462_v60, %v3278_v31  ;;  %v4344_v37 = vpop.f32.mrb[137].mxu0 }
 0x4d1   : > { %v2800_v27 = vpop.f32.mrb[226].mxu1  ;;  %v3281_v48 = vpop.f32.mrb[138].mxu0  ;;  %v3543_v56 = vunpack.c.l.bf16 %v6187_v30 }
 0x4d2   : > { %v2801_v63 = vpop.f32.mrb[227].mxu1  ;;  %vm3387_vm3 = vcmp.gt.f32.partialorder %v4463_v59, 0.0  ;;  %v3419_v42 = vmul.f32 0.01, %v4463_v59  ;;  %v4465_v61 = vadd.f32 %v4464_v13, %v3281_v48  ;;  %v4345_v10 = vpop.f32.mrb[139].mxu0 }
 0x4d3   : > { %v3544_v63 = vunpack.c.h.bf16 %v6187_v30 }
 0x4d4   : > { %v3451_v40 = vsel %vm3387_vm3, %v4463_v59, %v3419_v42  ;;  %vm3388_vm4 = vcmp.gt.f32.partialorder %v4465_v61, 0.0  ;;  %v3420_v39 = vmul.f32 0.01, %v4465_v61 }
 0x4d5   : > { %v3533_v0 = vadd.f32 %v3531_v55, %v3451_v40  ;;  %v3545_v40 = vmul.f32 2.0, %v3543_v56  ;;  %v6189_v56 = vld [vmem:[#allocation16_spill] sm:$0xff] }
 0x4d6   : > { %v3452_v19 = vsel %vm3388_vm4, %v4465_v61, %v3420_v39 }
 0x4d7   : > { %v2804_v9 = vpop.f32.mrb[120].mxu1  ;;  %v3534_v25 = vadd.f32 %v3532_v15, %v3452_v19  ;;  %v3286_v50 = vpop.f32.mrb[224].mxu0  ;;  %v3546_v19 = vmul.f32 2.0, %v3544_v63 }
 0x4d8   : > { %v2806_v11 = vpop.f32.mrb[121].mxu1  ;;  %v4348_v17 = vpop.f32.mrb[225].mxu0  ;;  %v4470_v14 = vadd.f32 %v5976_v45, %v2804_v9 }
 0x4d9   : > { %v2807_v47 = vpop.f32.mrb[122].mxu1  ;;  %v4024_v18 = vpack.c.bf16 %v3534_v25, %v3533_v0  ;;  %v3288_v20 = vpop.f32.mrb[226].mxu0 }
 0x4da   : > { %v2809_v24 = vpop.f32.mrb[123].mxu1  ;;  %v4349_v49 = vpop.f32.mrb[227].mxu0  ;;  %v4472_v59 = vadd.f32 %v5976_v45, %v2807_v47 }
 0x4db   : > { %4064 = vst [vmem:[%s5996_s23 + $0x48] sm:$0xff] %v4024_v18  }
 0x4df   : > { %v2812_v8 = vpop.f32.mrb[228].mxu1  ;;  %v3292_v4 = vpop.f32.mrb[144].mxu0 }
 0x4e0   : > { %v2813_v7 = vpop.f32.mrb[229].mxu1  ;;  %v4467_v46 = vadd.f32 %v4466_v29, %v3292_v4  ;;  %v4352_v57 = vpop.f32.mrb[145].mxu0 }
 0x4e1   : > { %v2814_v52 = vpop.f32.mrb[230].mxu1  ;;  %v3295_v16 = vpop.f32.mrb[146].mxu0  ;;  %v3550_v7 = vunpack.c.l.bf16 %v6188_v33 }
 0x4e2   : > { %v2815_v21 = vpop.f32.mrb[231].mxu1  ;;  %vm3389_vm5 = vcmp.gt.f32.partialorder %v4467_v46, 0.0  ;;  %v3421_v36 = vmul.f32 0.01, %v4467_v46  ;;  %v4469_v51 = vadd.f32 %v4468_v35, %v3295_v16  ;;  %v4353_v6 = vpop.f32.mrb[147].mxu0 }
 0x4e3   : > { %v3551_v21 = vunpack.c.h.bf16 %v6188_v33  ;;  %v6190_v33 = vld [vmem:[#allocation19_spill] sm:$0xff] }
 0x4e4   : > { %v3453_v5 = vsel %vm3389_vm5, %v4467_v46, %v3421_v36  ;;  %vm3390_vm6 = vcmp.gt.f32.partialorder %v4469_v51, 0.0  ;;  %v3422_v26 = vmul.f32 0.01, %v4469_v51 }
 0x4e5   : > { %v3540_v43 = vadd.f32 %v3538_v12, %v3453_v5  ;;  %v3552_v5 = vmul.f32 2.0, %v3550_v7  ;;  %v3564_v7 = vunpack.c.l.bf16 %v6190_v33 }
 0x4e6   : > { %v3454_v22 = vsel %vm3390_vm6, %v4469_v51, %v3422_v26 }
 0x4e7   : > { %v2818_v28 = vpop.f32.mrb[128].mxu1  ;;  %v3541_v32 = vadd.f32 %v3539_v2, %v3454_v22  ;;  %v3300_v1 = vpop.f32.mrb[228].mxu0  ;;  %v3553_v22 = vmul.f32 2.0, %v3551_v21 }
 0x4e8   : > { %v2820_v3 = vpop.f32.mrb[129].mxu1  ;;  %v4356_v53 = vpop.f32.mrb[229].mxu0  ;;  %v4474_v8 = vadd.f32 %v5976_v45, %v2818_v28 }
 0x4e9   : > { %v2821_v41 = vpop.f32.mrb[130].mxu1  ;;  %v4029_v58 = vpack.c.bf16 %v3541_v32, %v3540_v43  ;;  %v3302_v38 = vpop.f32.mrb[230].mxu0 }
 0x4ea   : > { %v2823_v62 = vpop.f32.mrb[131].mxu1  ;;  %v4357_v60 = vpop.f32.mrb[231].mxu0  ;;  %v4476_v46 = vadd.f32 %v5976_v45, %v2821_v41 }
 0x4eb   : > { %4065 = vst [vmem:[%s5996_s23 + $0x50] sm:$0xff] %v4029_v58  }
 0x4ef   : > { %v2826_v31 = vpop.f32.mrb[232].mxu1  ;;  %v3306_v54 = vpop.f32.mrb[152].mxu0 }
 0x4f0   : > { %v2827_v13 = vpop.f32.mrb[233].mxu1  ;;  %v4471_v37 = vadd.f32 %v4470_v14, %v3306_v54  ;;  %v4360_v27 = vpop.f32.mrb[153].mxu0 }
 0x4f1   : > { %v2828_v48 = vpop.f32.mrb[234].mxu1  ;;  %v3309_v44 = vpop.f32.mrb[154].mxu0  ;;  %v3557_v13 = vunpack.c.l.bf16 %v6189_v56 }
 0x4f2   : > { %v2829_v42 = vpop.f32.mrb[235].mxu1  ;;  %vm3391_vm7 = vcmp.gt.f32.partialorder %v4471_v37, 0.0  ;;  %v3423_v61 = vmul.f32 0.01, %v4471_v37  ;;  %v4473_v10 = vadd.f32 %v4472_v59, %v3309_v44  ;;  %v4361_v55 = vpop.f32.mrb[155].mxu0 }
 0x4f3   : > { %v3558_v42 = vunpack.c.h.bf16 %v6189_v56 }
 0x4f4   : > { %v3455_v39 = vsel %vm3391_vm7, %v4471_v37, %v3423_v61  ;;  %vm3392_vm8 = vcmp.gt.f32.partialorder %v4473_v10, 0.0  ;;  %v3424_v0 = vmul.f32 0.01, %v4473_v10 }
 0x4f5   : > { %v3547_v15 = vadd.f32 %v3545_v40, %v3455_v39  ;;  %v3559_v39 = vmul.f32 2.0, %v3557_v13 }
 0x4f6   : > { %v3456_v9 = vsel %vm3392_vm8, %v4473_v10, %v3424_v0 }
 0x4f7   : > { %v2832_v25 = vpop.f32.mrb[136].mxu1  ;;  %v3548_v50 = vadd.f32 %v3546_v19, %v3456_v9  ;;  %v3314_v11 = vpop.f32.mrb[232].mxu0  ;;  %v3560_v9 = vmul.f32 2.0, %v3558_v42 }
 0x4f8   : > { %v2834_v17 = vpop.f32.mrb[137].mxu1  ;;  %v4364_v47 = vpop.f32.mrb[233].mxu0  ;;  %v4478_v31 = vadd.f32 %v5976_v45, %v2832_v25 }
 0x4f9   : > { %v2835_v18 = vpop.f32.mrb[138].mxu1  ;;  %v4034_v20 = vpack.c.bf16 %v3548_v50, %v3547_v15  ;;  %v3316_v24 = vpop.f32.mrb[234].mxu0 }
 0x4fa   : > { %v2837_v49 = vpop.f32.mrb[139].mxu1  ;;  %v4365_v29 = vpop.f32.mrb[235].mxu0  ;;  %v4480_v37 = vadd.f32 %v5976_v45, %v2835_v18 }
 0x4fb   : > { %4066 = vst [vmem:[%s5996_s23 + $0x58] sm:$0xff] %v4034_v20  }
 0x4ff   : > { %v2840_v4 = vpop.f32.mrb[236].mxu1  ;;  %v3320_v34 = vpop.f32.mrb[160].mxu0 }
 0x500   : > { %v2841_v35 = vpop.f32.mrb[237].mxu1  ;;  %v4475_v57 = vadd.f32 %v4474_v8, %v3320_v34  ;;  %v4368_v52 = vpop.f32.mrb[161].mxu0 }
 0x501   : > { %v2842_v16 = vpop.f32.mrb[238].mxu1  ;;  %v3323_v23 = vpop.f32.mrb[162].mxu0 }
 0x502   : > { %v2843_v36 = vpop.f32.mrb[239].mxu1  ;;  %vm3393_vm9 = vcmp.gt.f32.partialorder %v4475_v57, 0.0  ;;  %v3425_v51 = vmul.f32 0.01, %v4475_v57  ;;  %v4477_v6 = vadd.f32 %v4476_v46, %v3323_v23  ;;  %v4369_v12 = vpop.f32.mrb[163].mxu0  ;;  %v3565_v16 = vunpack.c.h.bf16 %v6190_v33 }
 0x504   : > { %v3457_v26 = vsel %vm3393_vm9, %v4475_v57, %v3425_v51  ;;  %vm3394_vm10 = vcmp.gt.f32.partialorder %v4477_v6, 0.0  ;;  %v3426_v43 = vmul.f32 0.01, %v4477_v6  ;;  %v3566_v51 = vmul.f32 2.0, %v3564_v7 }
 0x505   : > { %v3554_v2 = vadd.f32 %v3552_v5, %v3457_v26  ;;  %v3567_v26 = vmul.f32 2.0, %v3565_v16 }
 0x506   : > { %v3458_v28 = vsel %vm3394_vm10, %v4477_v6, %v3426_v43 }
 0x507   : > { %v2846_v32 = vpop.f32.mrb[144].mxu1  ;;  %v3555_v1 = vadd.f32 %v3553_v22, %v3458_v28  ;;  %v3328_v3 = vpop.f32.mrb[236].mxu0 }
 0x508   : > { %v2848_v53 = vpop.f32.mrb[145].mxu1  ;;  %v4372_v41 = vpop.f32.mrb[237].mxu0  ;;  %v4482_v4 = vadd.f32 %v5976_v45, %v2846_v32 }
 0x509   : > { %v2849_v58 = vpop.f32.mrb[146].mxu1  ;;  %v4039_v38 = vpack.c.bf16 %v3555_v1, %v3554_v2  ;;  %v3330_v62 = vpop.f32.mrb[238].mxu0 }
 0x50a   : > { %v2851_v60 = vpop.f32.mrb[147].mxu1  ;;  %v4373_v14 = vpop.f32.mrb[239].mxu0  ;;  %v4484_v35 = vadd.f32 %v5976_v45, %v2849_v58  ;;  %v6191_v58 = vld [vmem:[#allocation18_spill] sm:$0xff] }
 0x50b   : > { %4067 = vst [vmem:[%s5996_s23 + $0x60] sm:$0xff] %v4039_v38   ;;  %v3571_v38 = vunpack.c.l.bf16 %v6191_v58 }
 0x50f   : > { %v2854_v54 = vpop.f32.mrb[240].mxu1  ;;  %v3334_v30 = vpop.f32.mrb[168].mxu0 }
 0x510   : > { %v2855_v59 = vpop.f32.mrb[241].mxu1  ;;  %v4479_v27 = vadd.f32 %v4478_v31, %v3334_v30  ;;  %v4376_v48 = vpop.f32.mrb[169].mxu0  ;;  %v3572_v54 = vunpack.c.h.bf16 %v6191_v58 }
 0x511   : > { %v2856_v44 = vpop.f32.mrb[242].mxu1  ;;  %v3337_v63 = vpop.f32.mrb[170].mxu0  ;;  %v3573_v59 = vmul.f32 2.0, %v3571_v38 }
 0x512   : > { %v2857_v61 = vpop.f32.mrb[243].mxu1  ;;  %vm3395_vm11 = vcmp.gt.f32.partialorder %v4479_v27, 0.0  ;;  %v3427_v10 = vmul.f32 0.01, %v4479_v27  ;;  %v4481_v55 = vadd.f32 %v4480_v37, %v3337_v63  ;;  %v4377_v40 = vpop.f32.mrb[171].mxu0  ;;  %v3574_v44 = vmul.f32 2.0, %v3572_v54 }
 0x514   : > { %v3459_v0 = vsel %vm3395_vm11, %v4479_v27, %v3427_v10  ;;  %vm3396_vm12 = vcmp.gt.f32.partialorder %v4481_v55, 0.0  ;;  %v3428_v15 = vmul.f32 0.01, %v4481_v55 }
 0x515   : > { %v3561_v19 = vadd.f32 %v3559_v39, %v3459_v0 }
 0x516   : > { %v3460_v25 = vsel %vm3396_vm12, %v4481_v55, %v3428_v15 }
 0x517   : > { %v2860_v50 = vpop.f32.mrb[152].mxu1  ;;  %v3562_v11 = vadd.f32 %v3560_v9, %v3460_v25  ;;  %v3342_v17 = vpop.f32.mrb[240].mxu0 }
 0x518   : > { %v2862_v47 = vpop.f32.mrb[153].mxu1  ;;  %v4380_v18 = vpop.f32.mrb[241].mxu0  ;;  %v4486_v53 = vadd.f32 %v5976_v45, %v2860_v50 }
 0x519   : > { %v2863_v20 = vpop.f32.mrb[154].mxu1  ;;  %v4044_v24 = vpack.c.bf16 %v3562_v11, %v3561_v19  ;;  %v3344_v49 = vpop.f32.mrb[242].mxu0 }
 0x51a   : > { %v2865_v29 = vpop.f32.mrb[155].mxu1  ;;  %v4381_v8 = vpop.f32.mrb[243].mxu0  ;;  %v4488_v62 = vadd.f32 %v5976_v45, %v2863_v20 }
 0x51b   : > { %4068 = vst [vmem:[%s5996_s23 + $0x68] sm:$0xff] %v4044_v24  }
 0x51f   : > { %v3348_v34 = vpop.f32.mrb[176].mxu0 }
 0x520   : > { %v4483_v46 = vadd.f32 %v4482_v4, %v3348_v34  ;;  %v4384_v57 = vpop.f32.mrb[177].mxu0 }
 0x521   : > { %v3351_v52 = vpop.f32.mrb[178].mxu0 }
 0x522   : > { %vm3397_vm13 = vcmp.gt.f32.partialorder %v4483_v46, 0.0  ;;  %v3429_v23 = vmul.f32 0.01, %v4483_v46  ;;  %v4485_v21 = vadd.f32 %v4484_v35, %v3351_v52  ;;  %v4385_v36 = vpop.f32.mrb[179].mxu0 }
 0x524   : > { %v3461_v6 = vsel %vm3397_vm13, %v4483_v46, %v3429_v23  ;;  %vm3398_vm14 = vcmp.gt.f32.partialorder %v4485_v21, 0.0  ;;  %v3430_v12 = vmul.f32 0.01, %v4485_v21 }
 0x525   : > { %v3568_v5 = vadd.f32 %v3566_v51, %v3461_v6 }
 0x526   : > { %v3462_v43 = vsel %vm3398_vm14, %v4485_v21, %v3430_v12 }
 0x527   : > { %v3569_v2 = vadd.f32 %v3567_v26, %v3462_v43  ;;  %v3356_v22 = vpop.f32.mrb[244].mxu0 }
 0x528   : > { %v4388_v28 = vpop.f32.mrb[245].mxu0 }
 0x529   : > { %v4049_v32 = vpack.c.bf16 %v3569_v2, %v3568_v5  ;;  %v3358_v1 = vpop.f32.mrb[246].mxu0 }
 0x52a   : > { %v4389_v3 = vpop.f32.mrb[247].mxu0 }
 0x52b   : > { %4069 = vst [vmem:[%s5996_s23 + $0x70] sm:$0xff] %v4049_v32  }
 0x52f   : > { %v3362_v41 = vpop.f32.mrb[184].mxu0 }
 0x530   : > { %v4487_v60 = vadd.f32 %v4486_v53, %v3362_v41  ;;  %v4392_v14 = vpop.f32.mrb[185].mxu0 }
 0x531   : > { %v3365_v31 = vpop.f32.mrb[186].mxu0 }
 0x532   : > { %vm3399_vm15 = vcmp.gt.f32.partialorder %v4487_v60, 0.0  ;;  %v3431_v30 = vmul.f32 0.01, %v4487_v60  ;;  %v4489_v56 = vadd.f32 %v4488_v62, %v3365_v31  ;;  %v4393_v13 = vpop.f32.mrb[187].mxu0 }
 0x534   : > { %v3463_v37 = vsel %vm3399_vm15, %v4487_v60, %v3431_v30  ;;  %vm3400_vm0 = vcmp.gt.f32.partialorder %v4489_v56, 0.0  ;;  %v3432_v27 = vmul.f32 0.01, %v4489_v56 }
 0x535   : > { %v3575_v48 = vadd.f32 %v3573_v59, %v3463_v37 }
 0x536   : > { %v3464_v63 = vsel %vm3400_vm0, %v4489_v56, %v3432_v27 }
 0x537   : > { %v3576_v42 = vadd.f32 %v3574_v44, %v3464_v63 }
 0x539   : > { %v4054_v61 = vpack.c.bf16 %v3576_v42, %v3575_v48 }
 0x53b   : > { %4070 = vst [vmem:[%s5996_s23 + $0x78] sm:$0xff] %v4054_v61  }
 0x53c PF: > { %s17_s24 = sadd.s32 1, %s4821_s24  }
 0x53d   : > { %p14_p4 = scmp.ge.s32.totalorder %s17_s24, 4  }
 0x53f   :  { %16 = sbr.rel (!%p14_p4) target bundleno = 1 (0x1), region = 78 }

</bundles_post_ra>
